<compile_context>
chip_gen: v7x
topology: tpu7x:2x2x1
jax: 0.10.0
libtpu: 0.0.40
codegen_flags: <defaults>
</compile_context>

<pallas_src>
import numpy as np
import jax
import jax.numpy as jnp
from jax import lax
from jax.experimental import pallas as pl
from jax.experimental.pallas import tpu as pltpu

B_J0 = 0.01     # b_j0
TAU_M = 20.0    # tau_m
BETA = 1.8      # adaptation strength (isAdapt=1)
DT = 1.0


# ---------------------------------------------------------------------------
# mask construction (init-time glue, straight port of create_general_mask)
# ---------------------------------------------------------------------------
def create_general_mask(dim, c_min, c_max, min_dc, max_dc, phase_shift_max, T):
    mask = []
    dc_steps = np.linspace(min_dc, max_dc, num=dim)
    cycles = np.linspace(c_min, c_max, num=dim)
    phase_shifts = np.linspace(0, int(phase_shift_max * c_max), num=dim)
    for cycle, dc, phase_shift in zip(cycles, dc_steps, phase_shifts):
        cycle = int(np.round(cycle))
        on_length = int(np.round(dc * cycle))
        off_length = cycle - on_length
        pattern = [1] * on_length + [0] * off_length
        phase_shift = int(np.round(phase_shift))
        pattern = pattern[-phase_shift:] + pattern[:-phase_shift]
        full_pattern = pattern * (T // cycle) + pattern[: T % cycle]
        mask.append(full_pattern)
    return np.asarray(mask, dtype=np.float32)  # (dim, T)


# ---------------------------------------------------------------------------
# deterministic parameter init (mirrors torch shapes: Linear weight = (out, in))
# ---------------------------------------------------------------------------
def xavier_uniform(key, out_f, in_f):
    limit = float(np.sqrt(6.0 / (in_f + out_f)))
    return jax.random.uniform(key, (out_f, in_f), jnp.float32, -limit, limit)


def orthogonal(key, out_f, in_f):
    a = jax.random.normal(key, (out_f, in_f), jnp.float32)
    q, r = jnp.linalg.qr(a)
    q = q * jnp.sign(jnp.diag(r))
    return q.astype(jnp.float32)


# ---------------------------------------------------------------------------
# Pallas kernel (one grid step == T_CHUNK RNN time steps)
# ---------------------------------------------------------------------------
def _make_kernel(N, H1, H2, H3, tau_a, t_chunk):
    alpha = float(np.exp(-DT / TAU_M))
    ro = float(np.exp(-DT / float(tau_a)))
    one_minus_ro = 1.0 - ro
    total_neurons = float(N * (H1 + H2 + H3))

    def kernel(feed1_ref, m1_ref, m2_ref, m3_ref,
               wh1, wi2, wh2, bias2, wi3, wh3, bias3,
               hs_ref, hm_ref, ht_ref,
               fmem1, fspk1, fb1,
               fmem2, fspk2, fb2,
               fmem3, fspk3, fb3,
               fr_ref,
               mem1, spk1, b1, mem2, spk2, b2, mem3, spk3, b3):
        c = pl.program_id(0)

        @pl.when(c == 0)
        def _init():
            mem1[...] = jnp.zeros_like(mem1)
            spk1[...] = jnp.zeros_like(spk1)
            mem2[...] = jnp.zeros_like(mem2)
            spk2[...] = jnp.zeros_like(spk2)
            mem3[...] = jnp.zeros_like(mem3)
            spk3[...] = jnp.zeros_like(spk3)
            b1[...] = jnp.full_like(b1, B_J0)
            b2[...] = jnp.full_like(b2, B_J0)
            b3[...] = jnp.full_like(b3, B_J0)

        def lif_update(h_scaled, mem_ref, spk_ref, b_ref, mask):
            # mem_update_adp_skip semantics; (1-alpha) already folded into h_scaled.
            mem = mem_ref[...]
            spike = spk_ref[...]
            b_new = ro * b_ref[...] + one_minus_ro * spike
            theta = B_J0 + BETA * b_new
            mem_new = mem * alpha + h_scaled - theta * spike * DT
            mem_new = jnp.where(mask == 0.0, mem, mem_new)          # skip: keep pre_mem
            spike_new = (mem_new - theta > 0.0).astype(jnp.float32) * mask
            mem_ref[...] = mem_new
            spk_ref[...] = spike_new
            b_ref[...] = b_new
            return mem_new, spike_new, theta

        def step(i, carry):
            mask1 = m1_ref[i]          # (1, H1) -> broadcasts over batch
            mask2 = m2_ref[i]
            mask3 = m3_ref[i]

            # layer 1: x-dependent part precomputed outside the kernel
            h1 = feed1_ref[i] + jnp.dot(spk1[...], wh1[...],
                                        preferred_element_type=jnp.float32)
            _, s1n, _ = lif_update(h1, mem1, spk1, b1, mask1)

            # layer 2
            h2 = (jnp.dot(s1n, wi2[...], preferred_element_type=jnp.float32)
                  + jnp.dot(spk2[...], wh2[...], preferred_element_type=jnp.float32)
                  + bias2[...])
            _, s2n, _ = lif_update(h2, mem2, spk2, b2, mask2)

            # layer 3
            h3 = (jnp.dot(s2n, wi3[...], preferred_element_type=jnp.float32)
                  + jnp.dot(spk3[...], wh3[...], preferred_element_type=jnp.float32)
                  + bias3[...])
            m3n, s3n, th3 = lif_update(h3, mem3, spk3, b3, mask3)

            # per-step history stored into the chunk's VMEM block
            hs_ref[i] = s3n
            hm_ref[i] = m3n
            ht_ref[i] = th3
            return carry

        lax.fori_loop(0, t_chunk, step, 0, unroll=True)

        @pl.when(c == pl.num_programs(0) - 1)
        def _finalize():
            fmem1[...] = mem1[...]
            fspk1[...] = spk1[...]
            fb1[...] = b1[...]
            fmem2[...] = mem2[...]
            fspk2[...] = spk2[...]
            fb2[...] = b2[...]
            fmem3[...] = mem3[...]
            fspk3[...] = spk3[...]
            fb3[...] = b3[...]
            # fire rate from FINAL-step spikes (matches the PyTorch reference);
            # spikes are 0/1 so sum == nonzero count
            nz = jnp.sum(spk1[...]) + jnp.sum(spk2[...]) + jnp.sum(spk3[...])
            fr_ref[...] = jnp.broadcast_to(nz / total_neurons, (1, 1))

    return kernel


# ---------------------------------------------------------------------------
# Wrapper
# ---------------------------------------------------------------------------
def _pick_chunk(seq_len, target=32):
    for c in range(min(target, seq_len), 0, -1):
        if seq_len % c == 0:
            return c
    return 1


def gen_skip_srnn_alif_fix_forward(x, params, masks, tau_a=600.0, t_chunk=None):
    """x: (N, seq, in_size) float32 (matches torch forward).  Returns
    (output, final_state, fire_rate, hidden_spike, hidden_mem, hidden_theta)."""
    N, seq_len, in_size = x.shape
    H1 = params["i2h_1_w"].shape[0]
    H2 = params["i2h_2_w"].shape[0]
    H3 = params["i2h_3_w"].shape[0]
    n_out = params["h2o_3_w"].shape[0]

    if t_chunk is None:
        t_chunk = _pick_chunk(seq_len)
    assert seq_len % t_chunk == 0
    num_chunks = seq_len // t_chunk

    alpha = float(np.exp(-DT / TAU_M))
    one_m_alpha = 1.0 - alpha
    f32 = jnp.float32

    def wt(name):  # torch (out, in) -> (in, out)
        return jnp.asarray(params[name + "_w"]).T.astype(f32)

    def bs(name):
        return jnp.asarray(params[name + "_b"]).reshape(1, -1).astype(f32)

    # --- hoisted layer-1 input feed: one big GEMM over all timesteps ---------
    x_t = jnp.transpose(x, (1, 0, 2)).astype(f32)                      # (seq, N, in)
    feed1 = one_m_alpha * (jnp.dot(x_t, wt("i2h_1")) + bs("i2h_1") + bs("h2h_1"))

    # masks: (dim, T) -> time-major (seq, 1, H)
    m1 = jnp.asarray(masks[0][:, :seq_len].T).reshape(seq_len, 1, H1).astype(f32)
    m2 = jnp.asarray(masks[1][:, :seq_len].T).reshape(seq_len, 1, H2).astype(f32)
    m3 = jnp.asarray(masks[2][:, :seq_len].T).reshape(seq_len, 1, H3).astype(f32)

    # --- constants folded into weights (x (1-alpha)), merged biases ----------
    wh1 = one_m_alpha * wt("h2h_1")
    wi2 = one_m_alpha * wt("i2h_2")
    wh2 = one_m_alpha * wt("h2h_2")
    bias2 = one_m_alpha * (bs("i2h_2") + bs("h2h_2"))
    wi3 = one_m_alpha * wt("i2h_3")
    wh3 = one_m_alpha * wt("h2h_3")
    bias3 = one_m_alpha * (bs("i2h_3") + bs("h2h_3"))
    weight_args = [wh1, wi2, wh2, bias2, wi3, wh3, bias3]

    def full_spec(shape):
        return pl.BlockSpec(shape, lambda c: (0,) * len(shape))

    in_specs = [
        pl.BlockSpec((t_chunk, N, H1), lambda c: (c, 0, 0)),   # feed1 chunk
        pl.BlockSpec((t_chunk, 1, H1), lambda c: (c, 0, 0)),   # mask1 chunk
        pl.BlockSpec((t_chunk, 1, H2), lambda c: (c, 0, 0)),   # mask2 chunk
        pl.BlockSpec((t_chunk, 1, H3), lambda c: (c, 0, 0)),   # mask3 chunk
    ] + [full_spec(w.shape) for w in weight_args]

    out_specs = [
        pl.BlockSpec((t_chunk, N, H3), lambda c: (c, 0, 0)),   # hidden spikes
        pl.BlockSpec((t_chunk, N, H3), lambda c: (c, 0, 0)),   # hidden mems
        pl.BlockSpec((t_chunk, N, H3), lambda c: (c, 0, 0)),   # hidden thetas
        full_spec((N, H1)), full_spec((N, H1)), full_spec((N, H1)),   # mem1/spk1/b1
        full_spec((N, H2)), full_spec((N, H2)), full_spec((N, H2)),
        full_spec((N, H3)), full_spec((N, H3)), full_spec((N, H3)),
        full_spec((1, 1)),                                              # fire rate
    ]

    out_shape = (
        jax.ShapeDtypeStruct((seq_len, N, H3), f32),
        jax.ShapeDtypeStruct((seq_len, N, H3), f32),
        jax.ShapeDtypeStruct((seq_len, N, H3), f32),
        jax.ShapeDtypeStruct((N, H1), f32), jax.ShapeDtypeStruct((N, H1), f32),
        jax.ShapeDtypeStruct((N, H1), f32),
        jax.ShapeDtypeStruct((N, H2), f32), jax.ShapeDtypeStruct((N, H2), f32),
        jax.ShapeDtypeStruct((N, H2), f32),
        jax.ShapeDtypeStruct((N, H3), f32), jax.ShapeDtypeStruct((N, H3), f32),
        jax.ShapeDtypeStruct((N, H3), f32),
        jax.ShapeDtypeStruct((1, 1), f32),
    )

    scratch_shapes = [
        pltpu.VMEM((N, H1), f32), pltpu.VMEM((N, H1), f32), pltpu.VMEM((N, H1), f32),
        pltpu.VMEM((N, H2), f32), pltpu.VMEM((N, H2), f32), pltpu.VMEM((N, H2), f32),
        pltpu.VMEM((N, H3), f32), pltpu.VMEM((N, H3), f32), pltpu.VMEM((N, H3), f32),
    ]

    kernel = _make_kernel(N, H1, H2, H3, tau_a, t_chunk)

    results = pl.pallas_call(
        kernel,
        out_shape=out_shape,
        grid_spec=pltpu.PrefetchScalarGridSpec(
            num_scalar_prefetch=0,
            grid=(num_chunks,),
            in_specs=in_specs,
            out_specs=out_specs,
            scratch_shapes=scratch_shapes,
        ),
        compiler_params=pltpu.CompilerParams(
            dimension_semantics=("arbitrary",),   # recurrence over time is sequential
        ),
    )(feed1, m1, m2, m3, *weight_args)

    (hs, hm, ht,
     fmem1, fspk1, fb1, fmem2, fspk2, fb2, fmem3, fspk3, fb3, fr) = results

    # permute back to batch-major (matches torch .permute(1, 0, 2))
    hidden_spike = jnp.transpose(hs, (1, 0, 2))
    hidden_mem = jnp.transpose(hm, (1, 0, 2))
    hidden_theta = jnp.transpose(ht, (1, 0, 2))

    # hoisted readout: one big GEMM over the full sequence
    output = jnp.dot(hidden_mem, wt("h2o_3")) + bs("h2o_3")   # (N, seq, n_out)

    final_state = {
        "mem_list": [fmem1, fmem2, fmem3],
        "spike_list": [fspk1, fspk2, fspk3],
        "b_list": [fb1, fb2, fb3],
    }
    fire_rate = fr[0, 0]
    return output, final_state, fire_rate, hidden_spike, hidden_mem, hidden_theta


# ---------------------------------------------------------------------------
# Main
# ---------------------------------------------------------------------------
if __name__ == "__main__":
    # small synthetic config (stand-ins for args.*)
    N, seq_len, in_size, n_out = 2, 16, 16, 2
    cfg_fc = [32, 32, 32]
    tau_a = 600.0
    cycle_min = [4, 4, 4]
    cycle_max = [8, 8, 8]
    duty_cycle_min = [0.1, 0.1, 0.1]
    duty_cycle_max = [0.9, 0.9, 0.9]
    phase_max = [0.5, 0.5, 0.5]

    masks = [
        create_general_mask(cfg_fc[i], cycle_min[i], cycle_max[i],
                            duty_cycle_min[i], duty_cycle_max[i],
                            phase_max[i], seq_len)
        for i in range(3)
    ]

    keys = jax.random.split(jax.random.PRNGKey(0), 9)
    params = {
        "i2h_1_w": xavier_uniform(keys[0], cfg_fc[0], in_size),
        "i2h_1_b": jnp.zeros((cfg_fc[0],), jnp.float32),
        "h2h_1_w": orthogonal(keys[1], cfg_fc[0], cfg_fc[0]),
        "h2h_1_b": jnp.zeros((cfg_fc[0],), jnp.float32),
        "i2h_2_w": xavier_uniform(keys[2], cfg_fc[1], cfg_fc[0]),
        "i2h_2_b": jnp.zeros((cfg_fc[1],), jnp.float32),
        "h2h_2_w": orthogonal(keys[3], cfg_fc[1], cfg_fc[1]),
        "h2h_2_b": jnp.zeros((cfg_fc[1],), jnp.float32),
        "i2h_3_w": xavier_uniform(keys[4], cfg_fc[2], cfg_fc[1]),
        "i2h_3_b": jnp.zeros((cfg_fc[2],), jnp.float32),
        "h2h_3_w": orthogonal(keys[5], cfg_fc[2], cfg_fc[2]),
        "h2h_3_b": jnp.zeros((cfg_fc[2],), jnp.float32),
        "h2o_3_w": xavier_uniform(keys[6], n_out, cfg_fc[2]),
        # torch default Linear bias init (uniform(-1/sqrt(fan_in), 1/sqrt(fan_in)))
        "h2o_3_b": jax.random.uniform(keys[7], (n_out,), jnp.float32,
                                      -1.0 / np.sqrt(cfg_fc[2]),
                                      1.0 / np.sqrt(cfg_fc[2])),
    }

    x = jax.random.normal(keys[8], (N, seq_len, in_size), jnp.float32)

    # t_chunk=8 -> grid of 2 chunks, exercising the chunked recurrent pipeline
    (output, final_state, fire_rate,
     hidden_spike, hidden_mem, hidden_theta) = gen_skip_srnn_alif_fix_forward(
        x, params, masks, tau_a=tau_a, t_chunk=8)

    jax.block_until_ready(output)
    jax.block_until_ready(fire_rate)
    jax.block_until_ready(final_state["mem_list"][2])
    print("KERNEL_OK")
</pallas_src>

<mosaic_0001>
module attributes {stable_mosaic.version = 11 : i64} {
  func.func @kernel(%arg0: i32, %arg1: memref<8x2x32xf32, #tpu.memory_space<vmem>>, %arg2: memref<8x1x32xf32, #tpu.memory_space<vmem>>, %arg3: memref<8x1x32xf32, #tpu.memory_space<vmem>>, %arg4: memref<8x1x32xf32, #tpu.memory_space<vmem>>, %arg5: memref<32x32xf32, #tpu.memory_space<vmem>>, %arg6: memref<32x32xf32, #tpu.memory_space<vmem>>, %arg7: memref<32x32xf32, #tpu.memory_space<vmem>>, %arg8: memref<1x32xf32, #tpu.memory_space<vmem>>, %arg9: memref<32x32xf32, #tpu.memory_space<vmem>>, %arg10: memref<32x32xf32, #tpu.memory_space<vmem>>, %arg11: memref<1x32xf32, #tpu.memory_space<vmem>>, %arg12: memref<8x2x32xf32, #tpu.memory_space<vmem>>, %arg13: memref<8x2x32xf32, #tpu.memory_space<vmem>>, %arg14: memref<8x2x32xf32, #tpu.memory_space<vmem>>, %arg15: memref<2x32xf32, #tpu.memory_space<vmem>>, %arg16: memref<2x32xf32, #tpu.memory_space<vmem>>, %arg17: memref<2x32xf32, #tpu.memory_space<vmem>>, %arg18: memref<2x32xf32, #tpu.memory_space<vmem>>, %arg19: memref<2x32xf32, #tpu.memory_space<vmem>>, %arg20: memref<2x32xf32, #tpu.memory_space<vmem>>, %arg21: memref<2x32xf32, #tpu.memory_space<vmem>>, %arg22: memref<2x32xf32, #tpu.memory_space<vmem>>, %arg23: memref<2x32xf32, #tpu.memory_space<vmem>>, %arg24: memref<1x1xf32, #tpu.memory_space<vmem>>, %arg25: memref<2x32xf32, #tpu.memory_space<vmem>>, %arg26: memref<2x32xf32, #tpu.memory_space<vmem>>, %arg27: memref<2x32xf32, #tpu.memory_space<vmem>>, %arg28: memref<2x32xf32, #tpu.memory_space<vmem>>, %arg29: memref<2x32xf32, #tpu.memory_space<vmem>>, %arg30: memref<2x32xf32, #tpu.memory_space<vmem>>, %arg31: memref<2x32xf32, #tpu.memory_space<vmem>>, %arg32: memref<2x32xf32, #tpu.memory_space<vmem>>, %arg33: memref<2x32xf32, #tpu.memory_space<vmem>>) attributes {dimension_semantics = [#tpu.dimension_semantics<arbitrary>], iteration_bounds = array<i64: 2>, scalar_prefetch = 0 : i64, scratch_operands = 9 : i64, tpu.core_type = #tpu.core_type<tc>, window_params = [{transform_indices = @transform_0, window_bounds = array<i64: 8, 2, 32>}, {transform_indices = @transform_1, window_bounds = array<i64: 8, 1, 32>}, {transform_indices = @transform_2, window_bounds = array<i64: 8, 1, 32>}, {transform_indices = @transform_3, window_bounds = array<i64: 8, 1, 32>}, {pipeline_mode = #tpu.pipeline_mode<synchronous>, transform_indices = @transform_4, window_bounds = array<i64: 32, 32>}, {pipeline_mode = #tpu.pipeline_mode<synchronous>, transform_indices = @transform_5, window_bounds = array<i64: 32, 32>}, {pipeline_mode = #tpu.pipeline_mode<synchronous>, transform_indices = @transform_6, window_bounds = array<i64: 32, 32>}, {pipeline_mode = #tpu.pipeline_mode<synchronous>, transform_indices = @transform_7, window_bounds = array<i64: 1, 32>}, {pipeline_mode = #tpu.pipeline_mode<synchronous>, transform_indices = @transform_8, window_bounds = array<i64: 32, 32>}, {pipeline_mode = #tpu.pipeline_mode<synchronous>, transform_indices = @transform_9, window_bounds = array<i64: 32, 32>}, {pipeline_mode = #tpu.pipeline_mode<synchronous>, transform_indices = @transform_10, window_bounds = array<i64: 1, 32>}, {transform_indices = @transform_11, window_bounds = array<i64: 8, 2, 32>}, {transform_indices = @transform_12, window_bounds = array<i64: 8, 2, 32>}, {transform_indices = @transform_13, window_bounds = array<i64: 8, 2, 32>}, {pipeline_mode = #tpu.pipeline_mode<synchronous>, transform_indices = @transform_14, window_bounds = array<i64: 2, 32>}, {pipeline_mode = #tpu.pipeline_mode<synchronous>, transform_indices = @transform_15, window_bounds = array<i64: 2, 32>}, {pipeline_mode = #tpu.pipeline_mode<synchronous>, transform_indices = @transform_16, window_bounds = array<i64: 2, 32>}, {pipeline_mode = #tpu.pipeline_mode<synchronous>, transform_indices = @transform_17, window_bounds = array<i64: 2, 32>}, {pipeline_mode = #tpu.pipeline_mode<synchronous>, transform_indices = @transform_18, window_bounds = array<i64: 2, 32>}, {pipeline_mode = #tpu.pipeline_mode<synchronous>, transform_indices = @transform_19, window_bounds = array<i64: 2, 32>}, {pipeline_mode = #tpu.pipeline_mode<synchronous>, transform_indices = @transform_20, window_bounds = array<i64: 2, 32>}, {pipeline_mode = #tpu.pipeline_mode<synchronous>, transform_indices = @transform_21, window_bounds = array<i64: 2, 32>}, {pipeline_mode = #tpu.pipeline_mode<synchronous>, transform_indices = @transform_22, window_bounds = array<i64: 2, 32>}, {pipeline_mode = #tpu.pipeline_mode<synchronous>, transform_indices = @transform_23, window_bounds = array<i64: 1, 1>}]} {
    %c0_i32 = arith.constant 0 : i32
    %0 = arith.cmpi eq, %arg0, %c0_i32 : i32
    %1 = arith.extui %0 : i1 to i32
    %c0_i32_0 = arith.constant 0 : i32
    %2 = arith.cmpi ne, %1, %c0_i32_0 : i32
    scf.if %2 {
      %cst_794 = arith.constant 0.000000e+00 : f32
      %1190 = vector.broadcast %cst_794 : f32 to vector<2x32xf32>
      %c0_795 = arith.constant 0 : index
      %c0_796 = arith.constant 0 : index
      %1191 = vector.load %arg25[%c0_795, %c0_796] : memref<2x32xf32, #tpu.memory_space<vmem>>, vector<2x32xf32>
      tpu.vector_store %arg25[%c0_795, %c0_796], %1190 {strides = array<i32>} : memref<2x32xf32, #tpu.memory_space<vmem>>, vector<2x32xf32>,
      %cst_797 = arith.constant 0.000000e+00 : f32
      %1192 = vector.broadcast %cst_797 : f32 to vector<2x32xf32>
      %c0_798 = arith.constant 0 : index
      %c0_799 = arith.constant 0 : index
      %1193 = vector.load %arg26[%c0_798, %c0_799] : memref<2x32xf32, #tpu.memory_space<vmem>>, vector<2x32xf32>
      tpu.vector_store %arg26[%c0_798, %c0_799], %1192 {strides = array<i32>} : memref<2x32xf32, #tpu.memory_space<vmem>>, vector<2x32xf32>,
      %cst_800 = arith.constant 0.000000e+00 : f32
      %1194 = vector.broadcast %cst_800 : f32 to vector<2x32xf32>
      %c0_801 = arith.constant 0 : index
      %c0_802 = arith.constant 0 : index
      %1195 = vector.load %arg28[%c0_801, %c0_802] : memref<2x32xf32, #tpu.memory_space<vmem>>, vector<2x32xf32>
      tpu.vector_store %arg28[%c0_801, %c0_802], %1194 {strides = array<i32>} : memref<2x32xf32, #tpu.memory_space<vmem>>, vector<2x32xf32>,
      %cst_803 = arith.constant 0.000000e+00 : f32
      %1196 = vector.broadcast %cst_803 : f32 to vector<2x32xf32>
      %c0_804 = arith.constant 0 : index
      %c0_805 = arith.constant 0 : index
      %1197 = vector.load %arg29[%c0_804, %c0_805] : memref<2x32xf32, #tpu.memory_space<vmem>>, vector<2x32xf32>
      tpu.vector_store %arg29[%c0_804, %c0_805], %1196 {strides = array<i32>} : memref<2x32xf32, #tpu.memory_space<vmem>>, vector<2x32xf32>,
      %cst_806 = arith.constant 0.000000e+00 : f32
      %1198 = vector.broadcast %cst_806 : f32 to vector<2x32xf32>
      %c0_807 = arith.constant 0 : index
      %c0_808 = arith.constant 0 : index
      %1199 = vector.load %arg31[%c0_807, %c0_808] : memref<2x32xf32, #tpu.memory_space<vmem>>, vector<2x32xf32>
      tpu.vector_store %arg31[%c0_807, %c0_808], %1198 {strides = array<i32>} : memref<2x32xf32, #tpu.memory_space<vmem>>, vector<2x32xf32>,
      %cst_809 = arith.constant 0.000000e+00 : f32
      %1200 = vector.broadcast %cst_809 : f32 to vector<2x32xf32>
      %c0_810 = arith.constant 0 : index
      %c0_811 = arith.constant 0 : index
      %1201 = vector.load %arg32[%c0_810, %c0_811] : memref<2x32xf32, #tpu.memory_space<vmem>>, vector<2x32xf32>
      tpu.vector_store %arg32[%c0_810, %c0_811], %1200 {strides = array<i32>} : memref<2x32xf32, #tpu.memory_space<vmem>>, vector<2x32xf32>,
      %cst_812 = arith.constant 0.00999999977 : f32
      %1202 = vector.broadcast %cst_812 : f32 to vector<2x32xf32>
      %c0_813 = arith.constant 0 : index
      %c0_814 = arith.constant 0 : index
      %1203 = vector.load %arg27[%c0_813, %c0_814] : memref<2x32xf32, #tpu.memory_space<vmem>>, vector<2x32xf32>
      tpu.vector_store %arg27[%c0_813, %c0_814], %1202 {strides = array<i32>} : memref<2x32xf32, #tpu.memory_space<vmem>>, vector<2x32xf32>,
      %cst_815 = arith.constant 0.00999999977 : f32
      %1204 = vector.broadcast %cst_815 : f32 to vector<2x32xf32>
      %c0_816 = arith.constant 0 : index
      %c0_817 = arith.constant 0 : index
      %1205 = vector.load %arg30[%c0_816, %c0_817] : memref<2x32xf32, #tpu.memory_space<vmem>>, vector<2x32xf32>
      tpu.vector_store %arg30[%c0_816, %c0_817], %1204 {strides = array<i32>} : memref<2x32xf32, #tpu.memory_space<vmem>>, vector<2x32xf32>,
      %cst_818 = arith.constant 0.00999999977 : f32
      %1206 = vector.broadcast %cst_818 : f32 to vector<2x32xf32>
      %c0_819 = arith.constant 0 : index
      %c0_820 = arith.constant 0 : index
      %1207 = vector.load %arg33[%c0_819, %c0_820] : memref<2x32xf32, #tpu.memory_space<vmem>>, vector<2x32xf32>
      tpu.vector_store %arg33[%c0_819, %c0_820], %1206 {strides = array<i32>} : memref<2x32xf32, #tpu.memory_space<vmem>>, vector<2x32xf32>,
    } else {
    }
    %c0_i32_1 = arith.constant 0 : i32
    %3 = arith.index_cast %c0_i32_1 : i32 to index
    %c0 = arith.constant 0 : index
    %c0_2 = arith.constant 0 : index
    %4 = vector.load %arg2[%3, %c0, %c0_2] : memref<8x1x32xf32, #tpu.memory_space<vmem>>, vector<1x1x32xf32>
    %5 = vector.shape_cast %4 : vector<1x1x32xf32> to vector<1x32xf32>
    %6 = arith.index_cast %c0_i32_1 : i32 to index
    %c0_3 = arith.constant 0 : index
    %c0_4 = arith.constant 0 : index
    %7 = vector.load %arg3[%6, %c0_3, %c0_4] : memref<8x1x32xf32, #tpu.memory_space<vmem>>, vector<1x1x32xf32>
    %8 = vector.shape_cast %7 : vector<1x1x32xf32> to vector<1x32xf32>
    %9 = arith.index_cast %c0_i32_1 : i32 to index
    %c0_5 = arith.constant 0 : index
    %c0_6 = arith.constant 0 : index
    %10 = vector.load %arg4[%9, %c0_5, %c0_6] : memref<8x1x32xf32, #tpu.memory_space<vmem>>, vector<1x1x32xf32>
    %11 = vector.shape_cast %10 : vector<1x1x32xf32> to vector<1x32xf32>
    %12 = arith.index_cast %c0_i32_1 : i32 to index
    %c0_7 = arith.constant 0 : index
    %c0_8 = arith.constant 0 : index
    %13 = vector.load %arg1[%12, %c0_7, %c0_8] : memref<8x2x32xf32, #tpu.memory_space<vmem>>, vector<1x2x32xf32>
    %14 = vector.shape_cast %13 : vector<1x2x32xf32> to vector<2x32xf32>
    %c0_9 = arith.constant 0 : index
    %c0_10 = arith.constant 0 : index
    %15 = vector.load %arg26[%c0_9, %c0_10] : memref<2x32xf32, #tpu.memory_space<vmem>>, vector<2x32xf32>
    %c0_11 = arith.constant 0 : index
    %c0_12 = arith.constant 0 : index
    %16 = vector.load %arg5[%c0_11, %c0_12] : memref<32x32xf32, #tpu.memory_space<vmem>>, vector<32x32xf32>
    %cst = arith.constant dense<0.000000e+00> : vector<2x32xf32>
    %17 = tpu.matmul %15, %16, %cst {dimension_numbers = #tpu.dot_dimension_numbers<[1], [0], [0], [1], [0, 0, 1, 1], [], []>} : vector<2x32xf32>, vector<32x32xf32>, vector<2x32xf32> -> vector<2x32xf32>
    %18 = arith.addf %14, %17 : vector<2x32xf32>
    %c0_13 = arith.constant 0 : index
    %c0_14 = arith.constant 0 : index
    %19 = vector.load %arg25[%c0_13, %c0_14] : memref<2x32xf32, #tpu.memory_space<vmem>>, vector<2x32xf32>
    %c0_15 = arith.constant 0 : index
    %c0_16 = arith.constant 0 : index
    %20 = vector.load %arg26[%c0_15, %c0_16] : memref<2x32xf32, #tpu.memory_space<vmem>>, vector<2x32xf32>
    %c0_17 = arith.constant 0 : index
    %c0_18 = arith.constant 0 : index
    %21 = vector.load %arg27[%c0_17, %c0_18] : memref<2x32xf32, #tpu.memory_space<vmem>>, vector<2x32xf32>
    %cst_19 = arith.constant 0.998334705 : f32
    %22 = vector.broadcast %cst_19 : f32 to vector<2x32xf32>
    %23 = arith.mulf %22, %21 : vector<2x32xf32>
    %cst_20 = arith.constant 0.00166527857 : f32
    %24 = vector.broadcast %cst_20 : f32 to vector<2x32xf32>
    %25 = arith.mulf %24, %20 : vector<2x32xf32>
    %26 = arith.addf %23, %25 : vector<2x32xf32>
    %cst_21 = arith.constant 1.800000e+00 : f32
    %27 = vector.broadcast %cst_21 : f32 to vector<2x32xf32>
    %28 = arith.mulf %27, %26 : vector<2x32xf32>
    %cst_22 = arith.constant 0.00999999977 : f32
    %29 = vector.broadcast %cst_22 : f32 to vector<2x32xf32>
    %30 = arith.addf %29, %28 : vector<2x32xf32>
    %cst_23 = arith.constant 0.951229453 : f32
    %31 = vector.broadcast %cst_23 : f32 to vector<2x32xf32>
    %32 = arith.mulf %19, %31 : vector<2x32xf32>
    %33 = arith.addf %32, %18 : vector<2x32xf32>
    %34 = arith.mulf %30, %20 : vector<2x32xf32>
    %cst_24 = arith.constant 1.000000e+00 : f32
    %35 = vector.broadcast %cst_24 : f32 to vector<2x32xf32>
    %36 = arith.mulf %34, %35 : vector<2x32xf32>
    %37 = arith.subf %33, %36 : vector<2x32xf32>
    %cst_25 = arith.constant 0.000000e+00 : f32
    %38 = vector.broadcast %cst_25 : f32 to vector<1x32xf32>
    %39 = arith.cmpf oeq, %5, %38 : vector<1x32xf32>
    %40 = vector.shape_cast %39 : vector<1x32xi1> to vector<1x32xi1>
    %41 = vector.broadcast %40 : vector<1x32xi1> to vector<2x32xi1>
    %42 = arith.select %41, %19, %37 : vector<2x32xi1>, vector<2x32xf32>
    %43 = arith.subf %42, %30 : vector<2x32xf32>
    %cst_26 = arith.constant 0.000000e+00 : f32
    %44 = vector.broadcast %cst_26 : f32 to vector<2x32xf32>
    %45 = arith.cmpf ogt, %43, %44 : vector<2x32xf32>
    %46 = arith.extui %45 : vector<2x32xi1> to vector<2x32xi32>
    %47 = arith.sitofp %46 : vector<2x32xi32> to vector<2x32xf32>
    %48 = vector.broadcast %5 : vector<1x32xf32> to vector<2x32xf32>
    %49 = arith.mulf %47, %48 : vector<2x32xf32>
    %c0_27 = arith.constant 0 : index
    %c0_28 = arith.constant 0 : index
    %50 = vector.load %arg25[%c0_27, %c0_28] : memref<2x32xf32, #tpu.memory_space<vmem>>, vector<2x32xf32>
    tpu.vector_store %arg25[%c0_27, %c0_28], %42 {strides = array<i32>} : memref<2x32xf32, #tpu.memory_space<vmem>>, vector<2x32xf32>,
    %c0_29 = arith.constant 0 : index
    %c0_30 = arith.constant 0 : index
    %51 = vector.load %arg26[%c0_29, %c0_30] : memref<2x32xf32, #tpu.memory_space<vmem>>, vector<2x32xf32>
    tpu.vector_store %arg26[%c0_29, %c0_30], %49 {strides = array<i32>} : memref<2x32xf32, #tpu.memory_space<vmem>>, vector<2x32xf32>,
    %c0_31 = arith.constant 0 : index
    %c0_32 = arith.constant 0 : index
    %52 = vector.load %arg27[%c0_31, %c0_32] : memref<2x32xf32, #tpu.memory_space<vmem>>, vector<2x32xf32>
    tpu.vector_store %arg27[%c0_31, %c0_32], %26 {strides = array<i32>} : memref<2x32xf32, #tpu.memory_space<vmem>>, vector<2x32xf32>,
    %c0_33 = arith.constant 0 : index
    %c0_34 = arith.constant 0 : index
    %53 = vector.load %arg6[%c0_33, %c0_34] : memref<32x32xf32, #tpu.memory_space<vmem>>, vector<32x32xf32>
    %cst_35 = arith.constant dense<0.000000e+00> : vector<2x32xf32>
    %54 = tpu.matmul %49, %53, %cst_35 {dimension_numbers = #tpu.dot_dimension_numbers<[1], [0], [0], [1], [0, 0, 1, 1], [], []>} : vector<2x32xf32>, vector<32x32xf32>, vector<2x32xf32> -> vector<2x32xf32>
    %c0_36 = arith.constant 0 : index
    %c0_37 = arith.constant 0 : index
    %55 = vector.load %arg29[%c0_36, %c0_37] : memref<2x32xf32, #tpu.memory_space<vmem>>, vector<2x32xf32>
    %c0_38 = arith.constant 0 : index
    %c0_39 = arith.constant 0 : index
    %56 = vector.load %arg7[%c0_38, %c0_39] : memref<32x32xf32, #tpu.memory_space<vmem>>, vector<32x32xf32>
    %cst_40 = arith.constant dense<0.000000e+00> : vector<2x32xf32>
    %57 = tpu.matmul %55, %56, %cst_40 {dimension_numbers = #tpu.dot_dimension_numbers<[1], [0], [0], [1], [0, 0, 1, 1], [], []>} : vector<2x32xf32>, vector<32x32xf32>, vector<2x32xf32> -> vector<2x32xf32>
    %58 = arith.addf %54, %57 : vector<2x32xf32>
    %c0_41 = arith.constant 0 : index
    %c0_42 = arith.constant 0 : index
    %59 = vector.load %arg8[%c0_41, %c0_42] : memref<1x32xf32, #tpu.memory_space<vmem>>, vector<1x32xf32>
    %60 = vector.broadcast %59 : vector<1x32xf32> to vector<2x32xf32>
    %61 = arith.addf %58, %60 : vector<2x32xf32>
    %c0_43 = arith.constant 0 : index
    %c0_44 = arith.constant 0 : index
    %62 = vector.load %arg28[%c0_43, %c0_44] : memref<2x32xf32, #tpu.memory_space<vmem>>, vector<2x32xf32>
    %c0_45 = arith.constant 0 : index
    %c0_46 = arith.constant 0 : index
    %63 = vector.load %arg29[%c0_45, %c0_46] : memref<2x32xf32, #tpu.memory_space<vmem>>, vector<2x32xf32>
    %c0_47 = arith.constant 0 : index
    %c0_48 = arith.constant 0 : index
    %64 = vector.load %arg30[%c0_47, %c0_48] : memref<2x32xf32, #tpu.memory_space<vmem>>, vector<2x32xf32>
    %cst_49 = arith.constant 0.998334705 : f32
    %65 = vector.broadcast %cst_49 : f32 to vector<2x32xf32>
    %66 = arith.mulf %65, %64 : vector<2x32xf32>
    %cst_50 = arith.constant 0.00166527857 : f32
    %67 = vector.broadcast %cst_50 : f32 to vector<2x32xf32>
    %68 = arith.mulf %67, %63 : vector<2x32xf32>
    %69 = arith.addf %66, %68 : vector<2x32xf32>
    %cst_51 = arith.constant 1.800000e+00 : f32
    %70 = vector.broadcast %cst_51 : f32 to vector<2x32xf32>
    %71 = arith.mulf %70, %69 : vector<2x32xf32>
    %cst_52 = arith.constant 0.00999999977 : f32
    %72 = vector.broadcast %cst_52 : f32 to vector<2x32xf32>
    %73 = arith.addf %72, %71 : vector<2x32xf32>
    %cst_53 = arith.constant 0.951229453 : f32
    %74 = vector.broadcast %cst_53 : f32 to vector<2x32xf32>
    %75 = arith.mulf %62, %74 : vector<2x32xf32>
    %76 = arith.addf %75, %61 : vector<2x32xf32>
    %77 = arith.mulf %73, %63 : vector<2x32xf32>
    %cst_54 = arith.constant 1.000000e+00 : f32
    %78 = vector.broadcast %cst_54 : f32 to vector<2x32xf32>
    %79 = arith.mulf %77, %78 : vector<2x32xf32>
    %80 = arith.subf %76, %79 : vector<2x32xf32>
    %cst_55 = arith.constant 0.000000e+00 : f32
    %81 = vector.broadcast %cst_55 : f32 to vector<1x32xf32>
    %82 = arith.cmpf oeq, %8, %81 : vector<1x32xf32>
    %83 = vector.shape_cast %82 : vector<1x32xi1> to vector<1x32xi1>
    %84 = vector.broadcast %83 : vector<1x32xi1> to vector<2x32xi1>
    %85 = arith.select %84, %62, %80 : vector<2x32xi1>, vector<2x32xf32>
    %86 = arith.subf %85, %73 : vector<2x32xf32>
    %cst_56 = arith.constant 0.000000e+00 : f32
    %87 = vector.broadcast %cst_56 : f32 to vector<2x32xf32>
    %88 = arith.cmpf ogt, %86, %87 : vector<2x32xf32>
    %89 = arith.extui %88 : vector<2x32xi1> to vector<2x32xi32>
    %90 = arith.sitofp %89 : vector<2x32xi32> to vector<2x32xf32>
    %91 = vector.broadcast %8 : vector<1x32xf32> to vector<2x32xf32>
    %92 = arith.mulf %90, %91 : vector<2x32xf32>
    %c0_57 = arith.constant 0 : index
    %c0_58 = arith.constant 0 : index
    %93 = vector.load %arg28[%c0_57, %c0_58] : memref<2x32xf32, #tpu.memory_space<vmem>>, vector<2x32xf32>
    tpu.vector_store %arg28[%c0_57, %c0_58], %85 {strides = array<i32>} : memref<2x32xf32, #tpu.memory_space<vmem>>, vector<2x32xf32>,
    %c0_59 = arith.constant 0 : index
    %c0_60 = arith.constant 0 : index
    %94 = vector.load %arg29[%c0_59, %c0_60] : memref<2x32xf32, #tpu.memory_space<vmem>>, vector<2x32xf32>
    tpu.vector_store %arg29[%c0_59, %c0_60], %92 {strides = array<i32>} : memref<2x32xf32, #tpu.memory_space<vmem>>, vector<2x32xf32>,
    %c0_61 = arith.constant 0 : index
    %c0_62 = arith.constant 0 : index
    %95 = vector.load %arg30[%c0_61, %c0_62] : memref<2x32xf32, #tpu.memory_space<vmem>>, vector<2x32xf32>
    tpu.vector_store %arg30[%c0_61, %c0_62], %69 {strides = array<i32>} : memref<2x32xf32, #tpu.memory_space<vmem>>, vector<2x32xf32>,
    %c0_63 = arith.constant 0 : index
    %c0_64 = arith.constant 0 : index
    %96 = vector.load %arg9[%c0_63, %c0_64] : memref<32x32xf32, #tpu.memory_space<vmem>>, vector<32x32xf32>
    %cst_65 = arith.constant dense<0.000000e+00> : vector<2x32xf32>
    %97 = tpu.matmul %92, %96, %cst_65 {dimension_numbers = #tpu.dot_dimension_numbers<[1], [0], [0], [1], [0, 0, 1, 1], [], []>} : vector<2x32xf32>, vector<32x32xf32>, vector<2x32xf32> -> vector<2x32xf32>
    %c0_66 = arith.constant 0 : index
    %c0_67 = arith.constant 0 : index
    %98 = vector.load %arg32[%c0_66, %c0_67] : memref<2x32xf32, #tpu.memory_space<vmem>>, vector<2x32xf32>
    %c0_68 = arith.constant 0 : index
    %c0_69 = arith.constant 0 : index
    %99 = vector.load %arg10[%c0_68, %c0_69] : memref<32x32xf32, #tpu.memory_space<vmem>>, vector<32x32xf32>
    %cst_70 = arith.constant dense<0.000000e+00> : vector<2x32xf32>
    %100 = tpu.matmul %98, %99, %cst_70 {dimension_numbers = #tpu.dot_dimension_numbers<[1], [0], [0], [1], [0, 0, 1, 1], [], []>} : vector<2x32xf32>, vector<32x32xf32>, vector<2x32xf32> -> vector<2x32xf32>
    %101 = arith.addf %97, %100 : vector<2x32xf32>
    %c0_71 = arith.constant 0 : index
    %c0_72 = arith.constant 0 : index
    %102 = vector.load %arg11[%c0_71, %c0_72] : memref<1x32xf32, #tpu.memory_space<vmem>>, vector<1x32xf32>
    %103 = vector.broadcast %102 : vector<1x32xf32> to vector<2x32xf32>
    %104 = arith.addf %101, %103 : vector<2x32xf32>
    %c0_73 = arith.constant 0 : index
    %c0_74 = arith.constant 0 : index
    %105 = vector.load %arg31[%c0_73, %c0_74] : memref<2x32xf32, #tpu.memory_space<vmem>>, vector<2x32xf32>
    %c0_75 = arith.constant 0 : index
    %c0_76 = arith.constant 0 : index
    %106 = vector.load %arg32[%c0_75, %c0_76] : memref<2x32xf32, #tpu.memory_space<vmem>>, vector<2x32xf32>
    %c0_77 = arith.constant 0 : index
    %c0_78 = arith.constant 0 : index
    %107 = vector.load %arg33[%c0_77, %c0_78] : memref<2x32xf32, #tpu.memory_space<vmem>>, vector<2x32xf32>
    %cst_79 = arith.constant 0.998334705 : f32
    %108 = vector.broadcast %cst_79 : f32 to vector<2x32xf32>
    %109 = arith.mulf %108, %107 : vector<2x32xf32>
    %cst_80 = arith.constant 0.00166527857 : f32
    %110 = vector.broadcast %cst_80 : f32 to vector<2x32xf32>
    %111 = arith.mulf %110, %106 : vector<2x32xf32>
    %112 = arith.addf %109, %111 : vector<2x32xf32>
    %cst_81 = arith.constant 1.800000e+00 : f32
    %113 = vector.broadcast %cst_81 : f32 to vector<2x32xf32>
    %114 = arith.mulf %113, %112 : vector<2x32xf32>
    %cst_82 = arith.constant 0.00999999977 : f32
    %115 = vector.broadcast %cst_82 : f32 to vector<2x32xf32>
    %116 = arith.addf %115, %114 : vector<2x32xf32>
    %cst_83 = arith.constant 0.951229453 : f32
    %117 = vector.broadcast %cst_83 : f32 to vector<2x32xf32>
    %118 = arith.mulf %105, %117 : vector<2x32xf32>
    %119 = arith.addf %118, %104 : vector<2x32xf32>
    %120 = arith.mulf %116, %106 : vector<2x32xf32>
    %cst_84 = arith.constant 1.000000e+00 : f32
    %121 = vector.broadcast %cst_84 : f32 to vector<2x32xf32>
    %122 = arith.mulf %120, %121 : vector<2x32xf32>
    %123 = arith.subf %119, %122 : vector<2x32xf32>
    %cst_85 = arith.constant 0.000000e+00 : f32
    %124 = vector.broadcast %cst_85 : f32 to vector<1x32xf32>
    %125 = arith.cmpf oeq, %11, %124 : vector<1x32xf32>
    %126 = vector.shape_cast %125 : vector<1x32xi1> to vector<1x32xi1>
    %127 = vector.broadcast %126 : vector<1x32xi1> to vector<2x32xi1>
    %128 = arith.select %127, %105, %123 : vector<2x32xi1>, vector<2x32xf32>
    %129 = arith.subf %128, %116 : vector<2x32xf32>
    %cst_86 = arith.constant 0.000000e+00 : f32
    %130 = vector.broadcast %cst_86 : f32 to vector<2x32xf32>
    %131 = arith.cmpf ogt, %129, %130 : vector<2x32xf32>
    %132 = arith.extui %131 : vector<2x32xi1> to vector<2x32xi32>
    %133 = arith.sitofp %132 : vector<2x32xi32> to vector<2x32xf32>
    %134 = vector.broadcast %11 : vector<1x32xf32> to vector<2x32xf32>
    %135 = arith.mulf %133, %134 : vector<2x32xf32>
    %c0_87 = arith.constant 0 : index
    %c0_88 = arith.constant 0 : index
    %136 = vector.load %arg31[%c0_87, %c0_88] : memref<2x32xf32, #tpu.memory_space<vmem>>, vector<2x32xf32>
    tpu.vector_store %arg31[%c0_87, %c0_88], %128 {strides = array<i32>} : memref<2x32xf32, #tpu.memory_space<vmem>>, vector<2x32xf32>,
    %c0_89 = arith.constant 0 : index
    %c0_90 = arith.constant 0 : index
    %137 = vector.load %arg32[%c0_89, %c0_90] : memref<2x32xf32, #tpu.memory_space<vmem>>, vector<2x32xf32>
    tpu.vector_store %arg32[%c0_89, %c0_90], %135 {strides = array<i32>} : memref<2x32xf32, #tpu.memory_space<vmem>>, vector<2x32xf32>,
    %c0_91 = arith.constant 0 : index
    %c0_92 = arith.constant 0 : index
    %138 = vector.load %arg33[%c0_91, %c0_92] : memref<2x32xf32, #tpu.memory_space<vmem>>, vector<2x32xf32>
    tpu.vector_store %arg33[%c0_91, %c0_92], %112 {strides = array<i32>} : memref<2x32xf32, #tpu.memory_space<vmem>>, vector<2x32xf32>,
    %139 = arith.index_cast %c0_i32_1 : i32 to index
    %c0_93 = arith.constant 0 : index
    %c0_94 = arith.constant 0 : index
    %140 = vector.load %arg12[%139, %c0_93, %c0_94] : memref<8x2x32xf32, #tpu.memory_space<vmem>>, vector<1x2x32xf32>
    %141 = vector.shape_cast %140 : vector<1x2x32xf32> to vector<2x32xf32>
    %142 = vector.shape_cast %135 : vector<2x32xf32> to vector<1x2x32xf32>
    tpu.vector_store %arg12[%139, %c0_93, %c0_94], %142 {strides = array<i32>} : memref<8x2x32xf32, #tpu.memory_space<vmem>>, vector<1x2x32xf32>,
    %143 = arith.index_cast %c0_i32_1 : i32 to index
    %c0_95 = arith.constant 0 : index
    %c0_96 = arith.constant 0 : index
    %144 = vector.load %arg13[%143, %c0_95, %c0_96] : memref<8x2x32xf32, #tpu.memory_space<vmem>>, vector<1x2x32xf32>
    %145 = vector.shape_cast %144 : vector<1x2x32xf32> to vector<2x32xf32>
    %146 = vector.shape_cast %128 : vector<2x32xf32> to vector<1x2x32xf32>
    tpu.vector_store %arg13[%143, %c0_95, %c0_96], %146 {strides = array<i32>} : memref<8x2x32xf32, #tpu.memory_space<vmem>>, vector<1x2x32xf32>,
    %147 = arith.index_cast %c0_i32_1 : i32 to index
    %c0_97 = arith.constant 0 : index
    %c0_98 = arith.constant 0 : index
    %148 = vector.load %arg14[%147, %c0_97, %c0_98] : memref<8x2x32xf32, #tpu.memory_space<vmem>>, vector<1x2x32xf32>
    %149 = vector.shape_cast %148 : vector<1x2x32xf32> to vector<2x32xf32>
    %150 = vector.shape_cast %116 : vector<2x32xf32> to vector<1x2x32xf32>
    tpu.vector_store %arg14[%147, %c0_97, %c0_98], %150 {strides = array<i32>} : memref<8x2x32xf32, #tpu.memory_space<vmem>>, vector<1x2x32xf32>,
    %c1_i32 = arith.constant 1 : i32
    %151 = arith.index_cast %c1_i32 : i32 to index
    %c0_99 = arith.constant 0 : index
    %c0_100 = arith.constant 0 : index
    %152 = vector.load %arg2[%151, %c0_99, %c0_100] : memref<8x1x32xf32, #tpu.memory_space<vmem>>, vector<1x1x32xf32>
    %153 = vector.shape_cast %152 : vector<1x1x32xf32> to vector<1x32xf32>
    %154 = arith.index_cast %c1_i32 : i32 to index
    %c0_101 = arith.constant 0 : index
    %c0_102 = arith.constant 0 : index
    %155 = vector.load %arg3[%154, %c0_101, %c0_102] : memref<8x1x32xf32, #tpu.memory_space<vmem>>, vector<1x1x32xf32>
    %156 = vector.shape_cast %155 : vector<1x1x32xf32> to vector<1x32xf32>
    %157 = arith.index_cast %c1_i32 : i32 to index
    %c0_103 = arith.constant 0 : index
    %c0_104 = arith.constant 0 : index
    %158 = vector.load %arg4[%157, %c0_103, %c0_104] : memref<8x1x32xf32, #tpu.memory_space<vmem>>, vector<1x1x32xf32>
    %159 = vector.shape_cast %158 : vector<1x1x32xf32> to vector<1x32xf32>
    %160 = arith.index_cast %c1_i32 : i32 to index
    %c0_105 = arith.constant 0 : index
    %c0_106 = arith.constant 0 : index
    %161 = vector.load %arg1[%160, %c0_105, %c0_106] : memref<8x2x32xf32, #tpu.memory_space<vmem>>, vector<1x2x32xf32>
    %162 = vector.shape_cast %161 : vector<1x2x32xf32> to vector<2x32xf32>
    %c0_107 = arith.constant 0 : index
    %c0_108 = arith.constant 0 : index
    %163 = vector.load %arg26[%c0_107, %c0_108] : memref<2x32xf32, #tpu.memory_space<vmem>>, vector<2x32xf32>
    %c0_109 = arith.constant 0 : index
    %c0_110 = arith.constant 0 : index
    %164 = vector.load %arg5[%c0_109, %c0_110] : memref<32x32xf32, #tpu.memory_space<vmem>>, vector<32x32xf32>
    %cst_111 = arith.constant dense<0.000000e+00> : vector<2x32xf32>
    %165 = tpu.matmul %163, %164, %cst_111 {dimension_numbers = #tpu.dot_dimension_numbers<[1], [0], [0], [1], [0, 0, 1, 1], [], []>} : vector<2x32xf32>, vector<32x32xf32>, vector<2x32xf32> -> vector<2x32xf32>
    %166 = arith.addf %162, %165 : vector<2x32xf32>
    %c0_112 = arith.constant 0 : index
    %c0_113 = arith.constant 0 : index
    %167 = vector.load %arg25[%c0_112, %c0_113] : memref<2x32xf32, #tpu.memory_space<vmem>>, vector<2x32xf32>
    %c0_114 = arith.constant 0 : index
    %c0_115 = arith.constant 0 : index
    %168 = vector.load %arg26[%c0_114, %c0_115] : memref<2x32xf32, #tpu.memory_space<vmem>>, vector<2x32xf32>
    %c0_116 = arith.constant 0 : index
    %c0_117 = arith.constant 0 : index
    %169 = vector.load %arg27[%c0_116, %c0_117] : memref<2x32xf32, #tpu.memory_space<vmem>>, vector<2x32xf32>
    %cst_118 = arith.constant 0.998334705 : f32
    %170 = vector.broadcast %cst_118 : f32 to vector<2x32xf32>
    %171 = arith.mulf %170, %169 : vector<2x32xf32>
    %cst_119 = arith.constant 0.00166527857 : f32
    %172 = vector.broadcast %cst_119 : f32 to vector<2x32xf32>
    %173 = arith.mulf %172, %168 : vector<2x32xf32>
    %174 = arith.addf %171, %173 : vector<2x32xf32>
    %cst_120 = arith.constant 1.800000e+00 : f32
    %175 = vector.broadcast %cst_120 : f32 to vector<2x32xf32>
    %176 = arith.mulf %175, %174 : vector<2x32xf32>
    %cst_121 = arith.constant 0.00999999977 : f32
    %177 = vector.broadcast %cst_121 : f32 to vector<2x32xf32>
    %178 = arith.addf %177, %176 : vector<2x32xf32>
    %cst_122 = arith.constant 0.951229453 : f32
    %179 = vector.broadcast %cst_122 : f32 to vector<2x32xf32>
    %180 = arith.mulf %167, %179 : vector<2x32xf32>
    %181 = arith.addf %180, %166 : vector<2x32xf32>
    %182 = arith.mulf %178, %168 : vector<2x32xf32>
    %cst_123 = arith.constant 1.000000e+00 : f32
    %183 = vector.broadcast %cst_123 : f32 to vector<2x32xf32>
    %184 = arith.mulf %182, %183 : vector<2x32xf32>
    %185 = arith.subf %181, %184 : vector<2x32xf32>
    %cst_124 = arith.constant 0.000000e+00 : f32
    %186 = vector.broadcast %cst_124 : f32 to vector<1x32xf32>
    %187 = arith.cmpf oeq, %153, %186 : vector<1x32xf32>
    %188 = vector.shape_cast %187 : vector<1x32xi1> to vector<1x32xi1>
    %189 = vector.broadcast %188 : vector<1x32xi1> to vector<2x32xi1>
    %190 = arith.select %189, %167, %185 : vector<2x32xi1>, vector<2x32xf32>
    %191 = arith.subf %190, %178 : vector<2x32xf32>
    %cst_125 = arith.constant 0.000000e+00 : f32
    %192 = vector.broadcast %cst_125 : f32 to vector<2x32xf32>
    %193 = arith.cmpf ogt, %191, %192 : vector<2x32xf32>
    %194 = arith.extui %193 : vector<2x32xi1> to vector<2x32xi32>
    %195 = arith.sitofp %194 : vector<2x32xi32> to vector<2x32xf32>
    %196 = vector.broadcast %153 : vector<1x32xf32> to vector<2x32xf32>
    %197 = arith.mulf %195, %196 : vector<2x32xf32>
    %c0_126 = arith.constant 0 : index
    %c0_127 = arith.constant 0 : index
    %198 = vector.load %arg25[%c0_126, %c0_127] : memref<2x32xf32, #tpu.memory_space<vmem>>, vector<2x32xf32>
    tpu.vector_store %arg25[%c0_126, %c0_127], %190 {strides = array<i32>} : memref<2x32xf32, #tpu.memory_space<vmem>>, vector<2x32xf32>,
    %c0_128 = arith.constant 0 : index
    %c0_129 = arith.constant 0 : index
    %199 = vector.load %arg26[%c0_128, %c0_129] : memref<2x32xf32, #tpu.memory_space<vmem>>, vector<2x32xf32>
    tpu.vector_store %arg26[%c0_128, %c0_129], %197 {strides = array<i32>} : memref<2x32xf32, #tpu.memory_space<vmem>>, vector<2x32xf32>,
    %c0_130 = arith.constant 0 : index
    %c0_131 = arith.constant 0 : index
    %200 = vector.load %arg27[%c0_130, %c0_131] : memref<2x32xf32, #tpu.memory_space<vmem>>, vector<2x32xf32>
    tpu.vector_store %arg27[%c0_130, %c0_131], %174 {strides = array<i32>} : memref<2x32xf32, #tpu.memory_space<vmem>>, vector<2x32xf32>,
    %c0_132 = arith.constant 0 : index
    %c0_133 = arith.constant 0 : index
    %201 = vector.load %arg6[%c0_132, %c0_133] : memref<32x32xf32, #tpu.memory_space<vmem>>, vector<32x32xf32>
    %cst_134 = arith.constant dense<0.000000e+00> : vector<2x32xf32>
    %202 = tpu.matmul %197, %201, %cst_134 {dimension_numbers = #tpu.dot_dimension_numbers<[1], [0], [0], [1], [0, 0, 1, 1], [], []>} : vector<2x32xf32>, vector<32x32xf32>, vector<2x32xf32> -> vector<2x32xf32>
    %c0_135 = arith.constant 0 : index
    %c0_136 = arith.constant 0 : index
    %203 = vector.load %arg29[%c0_135, %c0_136] : memref<2x32xf32, #tpu.memory_space<vmem>>, vector<2x32xf32>
    %c0_137 = arith.constant 0 : index
    %c0_138 = arith.constant 0 : index
    %204 = vector.load %arg7[%c0_137, %c0_138] : memref<32x32xf32, #tpu.memory_space<vmem>>, vector<32x32xf32>
    %cst_139 = arith.constant dense<0.000000e+00> : vector<2x32xf32>
    %205 = tpu.matmul %203, %204, %cst_139 {dimension_numbers = #tpu.dot_dimension_numbers<[1], [0], [0], [1], [0, 0, 1, 1], [], []>} : vector<2x32xf32>, vector<32x32xf32>, vector<2x32xf32> -> vector<2x32xf32>
    %206 = arith.addf %202, %205 : vector<2x32xf32>
    %c0_140 = arith.constant 0 : index
    %c0_141 = arith.constant 0 : index
    %207 = vector.load %arg8[%c0_140, %c0_141] : memref<1x32xf32, #tpu.memory_space<vmem>>, vector<1x32xf32>
    %208 = vector.broadcast %207 : vector<1x32xf32> to vector<2x32xf32>
    %209 = arith.addf %206, %208 : vector<2x32xf32>
    %c0_142 = arith.constant 0 : index
    %c0_143 = arith.constant 0 : index
    %210 = vector.load %arg28[%c0_142, %c0_143] : memref<2x32xf32, #tpu.memory_space<vmem>>, vector<2x32xf32>
    %c0_144 = arith.constant 0 : index
    %c0_145 = arith.constant 0 : index
    %211 = vector.load %arg29[%c0_144, %c0_145] : memref<2x32xf32, #tpu.memory_space<vmem>>, vector<2x32xf32>
    %c0_146 = arith.constant 0 : index
    %c0_147 = arith.constant 0 : index
    %212 = vector.load %arg30[%c0_146, %c0_147] : memref<2x32xf32, #tpu.memory_space<vmem>>, vector<2x32xf32>
    %cst_148 = arith.constant 0.998334705 : f32
    %213 = vector.broadcast %cst_148 : f32 to vector<2x32xf32>
    %214 = arith.mulf %213, %212 : vector<2x32xf32>
    %cst_149 = arith.constant 0.00166527857 : f32
    %215 = vector.broadcast %cst_149 : f32 to vector<2x32xf32>
    %216 = arith.mulf %215, %211 : vector<2x32xf32>
    %217 = arith.addf %214, %216 : vector<2x32xf32>
    %cst_150 = arith.constant 1.800000e+00 : f32
    %218 = vector.broadcast %cst_150 : f32 to vector<2x32xf32>
    %219 = arith.mulf %218, %217 : vector<2x32xf32>
    %cst_151 = arith.constant 0.00999999977 : f32
    %220 = vector.broadcast %cst_151 : f32 to vector<2x32xf32>
    %221 = arith.addf %220, %219 : vector<2x32xf32>
    %cst_152 = arith.constant 0.951229453 : f32
    %222 = vector.broadcast %cst_152 : f32 to vector<2x32xf32>
    %223 = arith.mulf %210, %222 : vector<2x32xf32>
    %224 = arith.addf %223, %209 : vector<2x32xf32>
    %225 = arith.mulf %221, %211 : vector<2x32xf32>
    %cst_153 = arith.constant 1.000000e+00 : f32
    %226 = vector.broadcast %cst_153 : f32 to vector<2x32xf32>
    %227 = arith.mulf %225, %226 : vector<2x32xf32>
    %228 = arith.subf %224, %227 : vector<2x32xf32>
    %cst_154 = arith.constant 0.000000e+00 : f32
    %229 = vector.broadcast %cst_154 : f32 to vector<1x32xf32>
    %230 = arith.cmpf oeq, %156, %229 : vector<1x32xf32>
    %231 = vector.shape_cast %230 : vector<1x32xi1> to vector<1x32xi1>
    %232 = vector.broadcast %231 : vector<1x32xi1> to vector<2x32xi1>
    %233 = arith.select %232, %210, %228 : vector<2x32xi1>, vector<2x32xf32>
    %234 = arith.subf %233, %221 : vector<2x32xf32>
    %cst_155 = arith.constant 0.000000e+00 : f32
    %235 = vector.broadcast %cst_155 : f32 to vector<2x32xf32>
    %236 = arith.cmpf ogt, %234, %235 : vector<2x32xf32>
    %237 = arith.extui %236 : vector<2x32xi1> to vector<2x32xi32>
    %238 = arith.sitofp %237 : vector<2x32xi32> to vector<2x32xf32>
    %239 = vector.broadcast %156 : vector<1x32xf32> to vector<2x32xf32>
    %240 = arith.mulf %238, %239 : vector<2x32xf32>
    %c0_156 = arith.constant 0 : index
    %c0_157 = arith.constant 0 : index
    %241 = vector.load %arg28[%c0_156, %c0_157] : memref<2x32xf32, #tpu.memory_space<vmem>>, vector<2x32xf32>
    tpu.vector_store %arg28[%c0_156, %c0_157], %233 {strides = array<i32>} : memref<2x32xf32, #tpu.memory_space<vmem>>, vector<2x32xf32>,
    %c0_158 = arith.constant 0 : index
    %c0_159 = arith.constant 0 : index
    %242 = vector.load %arg29[%c0_158, %c0_159] : memref<2x32xf32, #tpu.memory_space<vmem>>, vector<2x32xf32>
    tpu.vector_store %arg29[%c0_158, %c0_159], %240 {strides = array<i32>} : memref<2x32xf32, #tpu.memory_space<vmem>>, vector<2x32xf32>,
    %c0_160 = arith.constant 0 : index
    %c0_161 = arith.constant 0 : index
    %243 = vector.load %arg30[%c0_160, %c0_161] : memref<2x32xf32, #tpu.memory_space<vmem>>, vector<2x32xf32>
    tpu.vector_store %arg30[%c0_160, %c0_161], %217 {strides = array<i32>} : memref<2x32xf32, #tpu.memory_space<vmem>>, vector<2x32xf32>,
    %c0_162 = arith.constant 0 : index
    %c0_163 = arith.constant 0 : index
    %244 = vector.load %arg9[%c0_162, %c0_163] : memref<32x32xf32, #tpu.memory_space<vmem>>, vector<32x32xf32>
    %cst_164 = arith.constant dense<0.000000e+00> : vector<2x32xf32>
    %245 = tpu.matmul %240, %244, %cst_164 {dimension_numbers = #tpu.dot_dimension_numbers<[1], [0], [0], [1], [0, 0, 1, 1], [], []>} : vector<2x32xf32>, vector<32x32xf32>, vector<2x32xf32> -> vector<2x32xf32>
    %c0_165 = arith.constant 0 : index
    %c0_166 = arith.constant 0 : index
    %246 = vector.load %arg32[%c0_165, %c0_166] : memref<2x32xf32, #tpu.memory_space<vmem>>, vector<2x32xf32>
    %c0_167 = arith.constant 0 : index
    %c0_168 = arith.constant 0 : index
    %247 = vector.load %arg10[%c0_167, %c0_168] : memref<32x32xf32, #tpu.memory_space<vmem>>, vector<32x32xf32>
    %cst_169 = arith.constant dense<0.000000e+00> : vector<2x32xf32>
    %248 = tpu.matmul %246, %247, %cst_169 {dimension_numbers = #tpu.dot_dimension_numbers<[1], [0], [0], [1], [0, 0, 1, 1], [], []>} : vector<2x32xf32>, vector<32x32xf32>, vector<2x32xf32> -> vector<2x32xf32>
    %249 = arith.addf %245, %248 : vector<2x32xf32>
    %c0_170 = arith.constant 0 : index
    %c0_171 = arith.constant 0 : index
    %250 = vector.load %arg11[%c0_170, %c0_171] : memref<1x32xf32, #tpu.memory_space<vmem>>, vector<1x32xf32>
    %251 = vector.broadcast %250 : vector<1x32xf32> to vector<2x32xf32>
    %252 = arith.addf %249, %251 : vector<2x32xf32>
    %c0_172 = arith.constant 0 : index
    %c0_173 = arith.constant 0 : index
    %253 = vector.load %arg31[%c0_172, %c0_173] : memref<2x32xf32, #tpu.memory_space<vmem>>, vector<2x32xf32>
    %c0_174 = arith.constant 0 : index
    %c0_175 = arith.constant 0 : index
    %254 = vector.load %arg32[%c0_174, %c0_175] : memref<2x32xf32, #tpu.memory_space<vmem>>, vector<2x32xf32>
    %c0_176 = arith.constant 0 : index
    %c0_177 = arith.constant 0 : index
    %255 = vector.load %arg33[%c0_176, %c0_177] : memref<2x32xf32, #tpu.memory_space<vmem>>, vector<2x32xf32>
    %cst_178 = arith.constant 0.998334705 : f32
    %256 = vector.broadcast %cst_178 : f32 to vector<2x32xf32>
    %257 = arith.mulf %256, %255 : vector<2x32xf32>
    %cst_179 = arith.constant 0.00166527857 : f32
    %258 = vector.broadcast %cst_179 : f32 to vector<2x32xf32>
    %259 = arith.mulf %258, %254 : vector<2x32xf32>
    %260 = arith.addf %257, %259 : vector<2x32xf32>
    %cst_180 = arith.constant 1.800000e+00 : f32
    %261 = vector.broadcast %cst_180 : f32 to vector<2x32xf32>
    %262 = arith.mulf %261, %260 : vector<2x32xf32>
    %cst_181 = arith.constant 0.00999999977 : f32
    %263 = vector.broadcast %cst_181 : f32 to vector<2x32xf32>
    %264 = arith.addf %263, %262 : vector<2x32xf32>
    %cst_182 = arith.constant 0.951229453 : f32
    %265 = vector.broadcast %cst_182 : f32 to vector<2x32xf32>
    %266 = arith.mulf %253, %265 : vector<2x32xf32>
    %267 = arith.addf %266, %252 : vector<2x32xf32>
    %268 = arith.mulf %264, %254 : vector<2x32xf32>
    %cst_183 = arith.constant 1.000000e+00 : f32
    %269 = vector.broadcast %cst_183 : f32 to vector<2x32xf32>
    %270 = arith.mulf %268, %269 : vector<2x32xf32>
    %271 = arith.subf %267, %270 : vector<2x32xf32>
    %cst_184 = arith.constant 0.000000e+00 : f32
    %272 = vector.broadcast %cst_184 : f32 to vector<1x32xf32>
    %273 = arith.cmpf oeq, %159, %272 : vector<1x32xf32>
    %274 = vector.shape_cast %273 : vector<1x32xi1> to vector<1x32xi1>
    %275 = vector.broadcast %274 : vector<1x32xi1> to vector<2x32xi1>
    %276 = arith.select %275, %253, %271 : vector<2x32xi1>, vector<2x32xf32>
    %277 = arith.subf %276, %264 : vector<2x32xf32>
    %cst_185 = arith.constant 0.000000e+00 : f32
    %278 = vector.broadcast %cst_185 : f32 to vector<2x32xf32>
    %279 = arith.cmpf ogt, %277, %278 : vector<2x32xf32>
    %280 = arith.extui %279 : vector<2x32xi1> to vector<2x32xi32>
    %281 = arith.sitofp %280 : vector<2x32xi32> to vector<2x32xf32>
    %282 = vector.broadcast %159 : vector<1x32xf32> to vector<2x32xf32>
    %283 = arith.mulf %281, %282 : vector<2x32xf32>
    %c0_186 = arith.constant 0 : index
    %c0_187 = arith.constant 0 : index
    %284 = vector.load %arg31[%c0_186, %c0_187] : memref<2x32xf32, #tpu.memory_space<vmem>>, vector<2x32xf32>
    tpu.vector_store %arg31[%c0_186, %c0_187], %276 {strides = array<i32>} : memref<2x32xf32, #tpu.memory_space<vmem>>, vector<2x32xf32>,
    %c0_188 = arith.constant 0 : index
    %c0_189 = arith.constant 0 : index
    %285 = vector.load %arg32[%c0_188, %c0_189] : memref<2x32xf32, #tpu.memory_space<vmem>>, vector<2x32xf32>
    tpu.vector_store %arg32[%c0_188, %c0_189], %283 {strides = array<i32>} : memref<2x32xf32, #tpu.memory_space<vmem>>, vector<2x32xf32>,
    %c0_190 = arith.constant 0 : index
    %c0_191 = arith.constant 0 : index
    %286 = vector.load %arg33[%c0_190, %c0_191] : memref<2x32xf32, #tpu.memory_space<vmem>>, vector<2x32xf32>
    tpu.vector_store %arg33[%c0_190, %c0_191], %260 {strides = array<i32>} : memref<2x32xf32, #tpu.memory_space<vmem>>, vector<2x32xf32>,
    %287 = arith.index_cast %c1_i32 : i32 to index
    %c0_192 = arith.constant 0 : index
    %c0_193 = arith.constant 0 : index
    %288 = vector.load %arg12[%287, %c0_192, %c0_193] : memref<8x2x32xf32, #tpu.memory_space<vmem>>, vector<1x2x32xf32>
    %289 = vector.shape_cast %288 : vector<1x2x32xf32> to vector<2x32xf32>
    %290 = vector.shape_cast %283 : vector<2x32xf32> to vector<1x2x32xf32>
    tpu.vector_store %arg12[%287, %c0_192, %c0_193], %290 {strides = array<i32>} : memref<8x2x32xf32, #tpu.memory_space<vmem>>, vector<1x2x32xf32>,
    %291 = arith.index_cast %c1_i32 : i32 to index
    %c0_194 = arith.constant 0 : index
    %c0_195 = arith.constant 0 : index
    %292 = vector.load %arg13[%291, %c0_194, %c0_195] : memref<8x2x32xf32, #tpu.memory_space<vmem>>, vector<1x2x32xf32>
    %293 = vector.shape_cast %292 : vector<1x2x32xf32> to vector<2x32xf32>
    %294 = vector.shape_cast %276 : vector<2x32xf32> to vector<1x2x32xf32>
    tpu.vector_store %arg13[%291, %c0_194, %c0_195], %294 {strides = array<i32>} : memref<8x2x32xf32, #tpu.memory_space<vmem>>, vector<1x2x32xf32>,
    %295 = arith.index_cast %c1_i32 : i32 to index
    %c0_196 = arith.constant 0 : index
    %c0_197 = arith.constant 0 : index
    %296 = vector.load %arg14[%295, %c0_196, %c0_197] : memref<8x2x32xf32, #tpu.memory_space<vmem>>, vector<1x2x32xf32>
    %297 = vector.shape_cast %296 : vector<1x2x32xf32> to vector<2x32xf32>
    %298 = vector.shape_cast %264 : vector<2x32xf32> to vector<1x2x32xf32>
    tpu.vector_store %arg14[%295, %c0_196, %c0_197], %298 {strides = array<i32>} : memref<8x2x32xf32, #tpu.memory_space<vmem>>, vector<1x2x32xf32>,
    %c2_i32 = arith.constant 2 : i32
    %299 = arith.index_cast %c2_i32 : i32 to index
    %c0_198 = arith.constant 0 : index
    %c0_199 = arith.constant 0 : index
    %300 = vector.load %arg2[%299, %c0_198, %c0_199] : memref<8x1x32xf32, #tpu.memory_space<vmem>>, vector<1x1x32xf32>
    %301 = vector.shape_cast %300 : vector<1x1x32xf32> to vector<1x32xf32>
    %302 = arith.index_cast %c2_i32 : i32 to index
    %c0_200 = arith.constant 0 : index
    %c0_201 = arith.constant 0 : index
    %303 = vector.load %arg3[%302, %c0_200, %c0_201] : memref<8x1x32xf32, #tpu.memory_space<vmem>>, vector<1x1x32xf32>
    %304 = vector.shape_cast %303 : vector<1x1x32xf32> to vector<1x32xf32>
    %305 = arith.index_cast %c2_i32 : i32 to index
    %c0_202 = arith.constant 0 : index
    %c0_203 = arith.constant 0 : index
    %306 = vector.load %arg4[%305, %c0_202, %c0_203] : memref<8x1x32xf32, #tpu.memory_space<vmem>>, vector<1x1x32xf32>
    %307 = vector.shape_cast %306 : vector<1x1x32xf32> to vector<1x32xf32>
    %308 = arith.index_cast %c2_i32 : i32 to index
    %c0_204 = arith.constant 0 : index
    %c0_205 = arith.constant 0 : index
    %309 = vector.load %arg1[%308, %c0_204, %c0_205] : memref<8x2x32xf32, #tpu.memory_space<vmem>>, vector<1x2x32xf32>
    %310 = vector.shape_cast %309 : vector<1x2x32xf32> to vector<2x32xf32>
    %c0_206 = arith.constant 0 : index
    %c0_207 = arith.constant 0 : index
    %311 = vector.load %arg26[%c0_206, %c0_207] : memref<2x32xf32, #tpu.memory_space<vmem>>, vector<2x32xf32>
    %c0_208 = arith.constant 0 : index
    %c0_209 = arith.constant 0 : index
    %312 = vector.load %arg5[%c0_208, %c0_209] : memref<32x32xf32, #tpu.memory_space<vmem>>, vector<32x32xf32>
    %cst_210 = arith.constant dense<0.000000e+00> : vector<2x32xf32>
    %313 = tpu.matmul %311, %312, %cst_210 {dimension_numbers = #tpu.dot_dimension_numbers<[1], [0], [0], [1], [0, 0, 1, 1], [], []>} : vector<2x32xf32>, vector<32x32xf32>, vector<2x32xf32> -> vector<2x32xf32>
    %314 = arith.addf %310, %313 : vector<2x32xf32>
    %c0_211 = arith.constant 0 : index
    %c0_212 = arith.constant 0 : index
    %315 = vector.load %arg25[%c0_211, %c0_212] : memref<2x32xf32, #tpu.memory_space<vmem>>, vector<2x32xf32>
    %c0_213 = arith.constant 0 : index
    %c0_214 = arith.constant 0 : index
    %316 = vector.load %arg26[%c0_213, %c0_214] : memref<2x32xf32, #tpu.memory_space<vmem>>, vector<2x32xf32>
    %c0_215 = arith.constant 0 : index
    %c0_216 = arith.constant 0 : index
    %317 = vector.load %arg27[%c0_215, %c0_216] : memref<2x32xf32, #tpu.memory_space<vmem>>, vector<2x32xf32>
    %cst_217 = arith.constant 0.998334705 : f32
    %318 = vector.broadcast %cst_217 : f32 to vector<2x32xf32>
    %319 = arith.mulf %318, %317 : vector<2x32xf32>
    %cst_218 = arith.constant 0.00166527857 : f32
    %320 = vector.broadcast %cst_218 : f32 to vector<2x32xf32>
    %321 = arith.mulf %320, %316 : vector<2x32xf32>
    %322 = arith.addf %319, %321 : vector<2x32xf32>
    %cst_219 = arith.constant 1.800000e+00 : f32
    %323 = vector.broadcast %cst_219 : f32 to vector<2x32xf32>
    %324 = arith.mulf %323, %322 : vector<2x32xf32>
    %cst_220 = arith.constant 0.00999999977 : f32
    %325 = vector.broadcast %cst_220 : f32 to vector<2x32xf32>
    %326 = arith.addf %325, %324 : vector<2x32xf32>
    %cst_221 = arith.constant 0.951229453 : f32
    %327 = vector.broadcast %cst_221 : f32 to vector<2x32xf32>
    %328 = arith.mulf %315, %327 : vector<2x32xf32>
    %329 = arith.addf %328, %314 : vector<2x32xf32>
    %330 = arith.mulf %326, %316 : vector<2x32xf32>
    %cst_222 = arith.constant 1.000000e+00 : f32
    %331 = vector.broadcast %cst_222 : f32 to vector<2x32xf32>
    %332 = arith.mulf %330, %331 : vector<2x32xf32>
    %333 = arith.subf %329, %332 : vector<2x32xf32>
    %cst_223 = arith.constant 0.000000e+00 : f32
    %334 = vector.broadcast %cst_223 : f32 to vector<1x32xf32>
    %335 = arith.cmpf oeq, %301, %334 : vector<1x32xf32>
    %336 = vector.shape_cast %335 : vector<1x32xi1> to vector<1x32xi1>
    %337 = vector.broadcast %336 : vector<1x32xi1> to vector<2x32xi1>
    %338 = arith.select %337, %315, %333 : vector<2x32xi1>, vector<2x32xf32>
    %339 = arith.subf %338, %326 : vector<2x32xf32>
    %cst_224 = arith.constant 0.000000e+00 : f32
    %340 = vector.broadcast %cst_224 : f32 to vector<2x32xf32>
    %341 = arith.cmpf ogt, %339, %340 : vector<2x32xf32>
    %342 = arith.extui %341 : vector<2x32xi1> to vector<2x32xi32>
    %343 = arith.sitofp %342 : vector<2x32xi32> to vector<2x32xf32>
    %344 = vector.broadcast %301 : vector<1x32xf32> to vector<2x32xf32>
    %345 = arith.mulf %343, %344 : vector<2x32xf32>
    %c0_225 = arith.constant 0 : index
    %c0_226 = arith.constant 0 : index
    %346 = vector.load %arg25[%c0_225, %c0_226] : memref<2x32xf32, #tpu.memory_space<vmem>>, vector<2x32xf32>
    tpu.vector_store %arg25[%c0_225, %c0_226], %338 {strides = array<i32>} : memref<2x32xf32, #tpu.memory_space<vmem>>, vector<2x32xf32>,
    %c0_227 = arith.constant 0 : index
    %c0_228 = arith.constant 0 : index
    %347 = vector.load %arg26[%c0_227, %c0_228] : memref<2x32xf32, #tpu.memory_space<vmem>>, vector<2x32xf32>
    tpu.vector_store %arg26[%c0_227, %c0_228], %345 {strides = array<i32>} : memref<2x32xf32, #tpu.memory_space<vmem>>, vector<2x32xf32>,
    %c0_229 = arith.constant 0 : index
    %c0_230 = arith.constant 0 : index
    %348 = vector.load %arg27[%c0_229, %c0_230] : memref<2x32xf32, #tpu.memory_space<vmem>>, vector<2x32xf32>
    tpu.vector_store %arg27[%c0_229, %c0_230], %322 {strides = array<i32>} : memref<2x32xf32, #tpu.memory_space<vmem>>, vector<2x32xf32>,
    %c0_231 = arith.constant 0 : index
    %c0_232 = arith.constant 0 : index
    %349 = vector.load %arg6[%c0_231, %c0_232] : memref<32x32xf32, #tpu.memory_space<vmem>>, vector<32x32xf32>
    %cst_233 = arith.constant dense<0.000000e+00> : vector<2x32xf32>
    %350 = tpu.matmul %345, %349, %cst_233 {dimension_numbers = #tpu.dot_dimension_numbers<[1], [0], [0], [1], [0, 0, 1, 1], [], []>} : vector<2x32xf32>, vector<32x32xf32>, vector<2x32xf32> -> vector<2x32xf32>
    %c0_234 = arith.constant 0 : index
    %c0_235 = arith.constant 0 : index
    %351 = vector.load %arg29[%c0_234, %c0_235] : memref<2x32xf32, #tpu.memory_space<vmem>>, vector<2x32xf32>
    %c0_236 = arith.constant 0 : index
    %c0_237 = arith.constant 0 : index
    %352 = vector.load %arg7[%c0_236, %c0_237] : memref<32x32xf32, #tpu.memory_space<vmem>>, vector<32x32xf32>
    %cst_238 = arith.constant dense<0.000000e+00> : vector<2x32xf32>
    %353 = tpu.matmul %351, %352, %cst_238 {dimension_numbers = #tpu.dot_dimension_numbers<[1], [0], [0], [1], [0, 0, 1, 1], [], []>} : vector<2x32xf32>, vector<32x32xf32>, vector<2x32xf32> -> vector<2x32xf32>
    %354 = arith.addf %350, %353 : vector<2x32xf32>
    %c0_239 = arith.constant 0 : index
    %c0_240 = arith.constant 0 : index
    %355 = vector.load %arg8[%c0_239, %c0_240] : memref<1x32xf32, #tpu.memory_space<vmem>>, vector<1x32xf32>
    %356 = vector.broadcast %355 : vector<1x32xf32> to vector<2x32xf32>
    %357 = arith.addf %354, %356 : vector<2x32xf32>
    %c0_241 = arith.constant 0 : index
    %c0_242 = arith.constant 0 : index
    %358 = vector.load %arg28[%c0_241, %c0_242] : memref<2x32xf32, #tpu.memory_space<vmem>>, vector<2x32xf32>
    %c0_243 = arith.constant 0 : index
    %c0_244 = arith.constant 0 : index
    %359 = vector.load %arg29[%c0_243, %c0_244] : memref<2x32xf32, #tpu.memory_space<vmem>>, vector<2x32xf32>
    %c0_245 = arith.constant 0 : index
    %c0_246 = arith.constant 0 : index
    %360 = vector.load %arg30[%c0_245, %c0_246] : memref<2x32xf32, #tpu.memory_space<vmem>>, vector<2x32xf32>
    %cst_247 = arith.constant 0.998334705 : f32
    %361 = vector.broadcast %cst_247 : f32 to vector<2x32xf32>
    %362 = arith.mulf %361, %360 : vector<2x32xf32>
    %cst_248 = arith.constant 0.00166527857 : f32
    %363 = vector.broadcast %cst_248 : f32 to vector<2x32xf32>
    %364 = arith.mulf %363, %359 : vector<2x32xf32>
    %365 = arith.addf %362, %364 : vector<2x32xf32>
    %cst_249 = arith.constant 1.800000e+00 : f32
    %366 = vector.broadcast %cst_249 : f32 to vector<2x32xf32>
    %367 = arith.mulf %366, %365 : vector<2x32xf32>
    %cst_250 = arith.constant 0.00999999977 : f32
    %368 = vector.broadcast %cst_250 : f32 to vector<2x32xf32>
    %369 = arith.addf %368, %367 : vector<2x32xf32>
    %cst_251 = arith.constant 0.951229453 : f32
    %370 = vector.broadcast %cst_251 : f32 to vector<2x32xf32>
    %371 = arith.mulf %358, %370 : vector<2x32xf32>
    %372 = arith.addf %371, %357 : vector<2x32xf32>
    %373 = arith.mulf %369, %359 : vector<2x32xf32>
    %cst_252 = arith.constant 1.000000e+00 : f32
    %374 = vector.broadcast %cst_252 : f32 to vector<2x32xf32>
    %375 = arith.mulf %373, %374 : vector<2x32xf32>
    %376 = arith.subf %372, %375 : vector<2x32xf32>
    %cst_253 = arith.constant 0.000000e+00 : f32
    %377 = vector.broadcast %cst_253 : f32 to vector<1x32xf32>
    %378 = arith.cmpf oeq, %304, %377 : vector<1x32xf32>
    %379 = vector.shape_cast %378 : vector<1x32xi1> to vector<1x32xi1>
    %380 = vector.broadcast %379 : vector<1x32xi1> to vector<2x32xi1>
    %381 = arith.select %380, %358, %376 : vector<2x32xi1>, vector<2x32xf32>
    %382 = arith.subf %381, %369 : vector<2x32xf32>
    %cst_254 = arith.constant 0.000000e+00 : f32
    %383 = vector.broadcast %cst_254 : f32 to vector<2x32xf32>
    %384 = arith.cmpf ogt, %382, %383 : vector<2x32xf32>
    %385 = arith.extui %384 : vector<2x32xi1> to vector<2x32xi32>
    %386 = arith.sitofp %385 : vector<2x32xi32> to vector<2x32xf32>
    %387 = vector.broadcast %304 : vector<1x32xf32> to vector<2x32xf32>
    %388 = arith.mulf %386, %387 : vector<2x32xf32>
    %c0_255 = arith.constant 0 : index
    %c0_256 = arith.constant 0 : index
    %389 = vector.load %arg28[%c0_255, %c0_256] : memref<2x32xf32, #tpu.memory_space<vmem>>, vector<2x32xf32>
    tpu.vector_store %arg28[%c0_255, %c0_256], %381 {strides = array<i32>} : memref<2x32xf32, #tpu.memory_space<vmem>>, vector<2x32xf32>,
    %c0_257 = arith.constant 0 : index
    %c0_258 = arith.constant 0 : index
    %390 = vector.load %arg29[%c0_257, %c0_258] : memref<2x32xf32, #tpu.memory_space<vmem>>, vector<2x32xf32>
    tpu.vector_store %arg29[%c0_257, %c0_258], %388 {strides = array<i32>} : memref<2x32xf32, #tpu.memory_space<vmem>>, vector<2x32xf32>,
    %c0_259 = arith.constant 0 : index
    %c0_260 = arith.constant 0 : index
    %391 = vector.load %arg30[%c0_259, %c0_260] : memref<2x32xf32, #tpu.memory_space<vmem>>, vector<2x32xf32>
    tpu.vector_store %arg30[%c0_259, %c0_260], %365 {strides = array<i32>} : memref<2x32xf32, #tpu.memory_space<vmem>>, vector<2x32xf32>,
    %c0_261 = arith.constant 0 : index
    %c0_262 = arith.constant 0 : index
    %392 = vector.load %arg9[%c0_261, %c0_262] : memref<32x32xf32, #tpu.memory_space<vmem>>, vector<32x32xf32>
    %cst_263 = arith.constant dense<0.000000e+00> : vector<2x32xf32>
    %393 = tpu.matmul %388, %392, %cst_263 {dimension_numbers = #tpu.dot_dimension_numbers<[1], [0], [0], [1], [0, 0, 1, 1], [], []>} : vector<2x32xf32>, vector<32x32xf32>, vector<2x32xf32> -> vector<2x32xf32>
    %c0_264 = arith.constant 0 : index
    %c0_265 = arith.constant 0 : index
    %394 = vector.load %arg32[%c0_264, %c0_265] : memref<2x32xf32, #tpu.memory_space<vmem>>, vector<2x32xf32>
    %c0_266 = arith.constant 0 : index
    %c0_267 = arith.constant 0 : index
    %395 = vector.load %arg10[%c0_266, %c0_267] : memref<32x32xf32, #tpu.memory_space<vmem>>, vector<32x32xf32>
    %cst_268 = arith.constant dense<0.000000e+00> : vector<2x32xf32>
    %396 = tpu.matmul %394, %395, %cst_268 {dimension_numbers = #tpu.dot_dimension_numbers<[1], [0], [0], [1], [0, 0, 1, 1], [], []>} : vector<2x32xf32>, vector<32x32xf32>, vector<2x32xf32> -> vector<2x32xf32>
    %397 = arith.addf %393, %396 : vector<2x32xf32>
    %c0_269 = arith.constant 0 : index
    %c0_270 = arith.constant 0 : index
    %398 = vector.load %arg11[%c0_269, %c0_270] : memref<1x32xf32, #tpu.memory_space<vmem>>, vector<1x32xf32>
    %399 = vector.broadcast %398 : vector<1x32xf32> to vector<2x32xf32>
    %400 = arith.addf %397, %399 : vector<2x32xf32>
    %c0_271 = arith.constant 0 : index
    %c0_272 = arith.constant 0 : index
    %401 = vector.load %arg31[%c0_271, %c0_272] : memref<2x32xf32, #tpu.memory_space<vmem>>, vector<2x32xf32>
    %c0_273 = arith.constant 0 : index
    %c0_274 = arith.constant 0 : index
    %402 = vector.load %arg32[%c0_273, %c0_274] : memref<2x32xf32, #tpu.memory_space<vmem>>, vector<2x32xf32>
    %c0_275 = arith.constant 0 : index
    %c0_276 = arith.constant 0 : index
    %403 = vector.load %arg33[%c0_275, %c0_276] : memref<2x32xf32, #tpu.memory_space<vmem>>, vector<2x32xf32>
    %cst_277 = arith.constant 0.998334705 : f32
    %404 = vector.broadcast %cst_277 : f32 to vector<2x32xf32>
    %405 = arith.mulf %404, %403 : vector<2x32xf32>
    %cst_278 = arith.constant 0.00166527857 : f32
    %406 = vector.broadcast %cst_278 : f32 to vector<2x32xf32>
    %407 = arith.mulf %406, %402 : vector<2x32xf32>
    %408 = arith.addf %405, %407 : vector<2x32xf32>
    %cst_279 = arith.constant 1.800000e+00 : f32
    %409 = vector.broadcast %cst_279 : f32 to vector<2x32xf32>
    %410 = arith.mulf %409, %408 : vector<2x32xf32>
    %cst_280 = arith.constant 0.00999999977 : f32
    %411 = vector.broadcast %cst_280 : f32 to vector<2x32xf32>
    %412 = arith.addf %411, %410 : vector<2x32xf32>
    %cst_281 = arith.constant 0.951229453 : f32
    %413 = vector.broadcast %cst_281 : f32 to vector<2x32xf32>
    %414 = arith.mulf %401, %413 : vector<2x32xf32>
    %415 = arith.addf %414, %400 : vector<2x32xf32>
    %416 = arith.mulf %412, %402 : vector<2x32xf32>
    %cst_282 = arith.constant 1.000000e+00 : f32
    %417 = vector.broadcast %cst_282 : f32 to vector<2x32xf32>
    %418 = arith.mulf %416, %417 : vector<2x32xf32>
    %419 = arith.subf %415, %418 : vector<2x32xf32>
    %cst_283 = arith.constant 0.000000e+00 : f32
    %420 = vector.broadcast %cst_283 : f32 to vector<1x32xf32>
    %421 = arith.cmpf oeq, %307, %420 : vector<1x32xf32>
    %422 = vector.shape_cast %421 : vector<1x32xi1> to vector<1x32xi1>
    %423 = vector.broadcast %422 : vector<1x32xi1> to vector<2x32xi1>
    %424 = arith.select %423, %401, %419 : vector<2x32xi1>, vector<2x32xf32>
    %425 = arith.subf %424, %412 : vector<2x32xf32>
    %cst_284 = arith.constant 0.000000e+00 : f32
    %426 = vector.broadcast %cst_284 : f32 to vector<2x32xf32>
    %427 = arith.cmpf ogt, %425, %426 : vector<2x32xf32>
    %428 = arith.extui %427 : vector<2x32xi1> to vector<2x32xi32>
    %429 = arith.sitofp %428 : vector<2x32xi32> to vector<2x32xf32>
    %430 = vector.broadcast %307 : vector<1x32xf32> to vector<2x32xf32>
    %431 = arith.mulf %429, %430 : vector<2x32xf32>
    %c0_285 = arith.constant 0 : index
    %c0_286 = arith.constant 0 : index
    %432 = vector.load %arg31[%c0_285, %c0_286] : memref<2x32xf32, #tpu.memory_space<vmem>>, vector<2x32xf32>
    tpu.vector_store %arg31[%c0_285, %c0_286], %424 {strides = array<i32>} : memref<2x32xf32, #tpu.memory_space<vmem>>, vector<2x32xf32>,
    %c0_287 = arith.constant 0 : index
    %c0_288 = arith.constant 0 : index
    %433 = vector.load %arg32[%c0_287, %c0_288] : memref<2x32xf32, #tpu.memory_space<vmem>>, vector<2x32xf32>
    tpu.vector_store %arg32[%c0_287, %c0_288], %431 {strides = array<i32>} : memref<2x32xf32, #tpu.memory_space<vmem>>, vector<2x32xf32>,
    %c0_289 = arith.constant 0 : index
    %c0_290 = arith.constant 0 : index
    %434 = vector.load %arg33[%c0_289, %c0_290] : memref<2x32xf32, #tpu.memory_space<vmem>>, vector<2x32xf32>
    tpu.vector_store %arg33[%c0_289, %c0_290], %408 {strides = array<i32>} : memref<2x32xf32, #tpu.memory_space<vmem>>, vector<2x32xf32>,
    %435 = arith.index_cast %c2_i32 : i32 to index
    %c0_291 = arith.constant 0 : index
    %c0_292 = arith.constant 0 : index
    %436 = vector.load %arg12[%435, %c0_291, %c0_292] : memref<8x2x32xf32, #tpu.memory_space<vmem>>, vector<1x2x32xf32>
    %437 = vector.shape_cast %436 : vector<1x2x32xf32> to vector<2x32xf32>
    %438 = vector.shape_cast %431 : vector<2x32xf32> to vector<1x2x32xf32>
    tpu.vector_store %arg12[%435, %c0_291, %c0_292], %438 {strides = array<i32>} : memref<8x2x32xf32, #tpu.memory_space<vmem>>, vector<1x2x32xf32>,
    %439 = arith.index_cast %c2_i32 : i32 to index
    %c0_293 = arith.constant 0 : index
    %c0_294 = arith.constant 0 : index
    %440 = vector.load %arg13[%439, %c0_293, %c0_294] : memref<8x2x32xf32, #tpu.memory_space<vmem>>, vector<1x2x32xf32>
    %441 = vector.shape_cast %440 : vector<1x2x32xf32> to vector<2x32xf32>
    %442 = vector.shape_cast %424 : vector<2x32xf32> to vector<1x2x32xf32>
    tpu.vector_store %arg13[%439, %c0_293, %c0_294], %442 {strides = array<i32>} : memref<8x2x32xf32, #tpu.memory_space<vmem>>, vector<1x2x32xf32>,
    %443 = arith.index_cast %c2_i32 : i32 to index
    %c0_295 = arith.constant 0 : index
    %c0_296 = arith.constant 0 : index
    %444 = vector.load %arg14[%443, %c0_295, %c0_296] : memref<8x2x32xf32, #tpu.memory_space<vmem>>, vector<1x2x32xf32>
    %445 = vector.shape_cast %444 : vector<1x2x32xf32> to vector<2x32xf32>
    %446 = vector.shape_cast %412 : vector<2x32xf32> to vector<1x2x32xf32>
    tpu.vector_store %arg14[%443, %c0_295, %c0_296], %446 {strides = array<i32>} : memref<8x2x32xf32, #tpu.memory_space<vmem>>, vector<1x2x32xf32>,
    %c3_i32 = arith.constant 3 : i32
    %447 = arith.index_cast %c3_i32 : i32 to index
    %c0_297 = arith.constant 0 : index
    %c0_298 = arith.constant 0 : index
    %448 = vector.load %arg2[%447, %c0_297, %c0_298] : memref<8x1x32xf32, #tpu.memory_space<vmem>>, vector<1x1x32xf32>
    %449 = vector.shape_cast %448 : vector<1x1x32xf32> to vector<1x32xf32>
    %450 = arith.index_cast %c3_i32 : i32 to index
    %c0_299 = arith.constant 0 : index
    %c0_300 = arith.constant 0 : index
    %451 = vector.load %arg3[%450, %c0_299, %c0_300] : memref<8x1x32xf32, #tpu.memory_space<vmem>>, vector<1x1x32xf32>
    %452 = vector.shape_cast %451 : vector<1x1x32xf32> to vector<1x32xf32>
    %453 = arith.index_cast %c3_i32 : i32 to index
    %c0_301 = arith.constant 0 : index
    %c0_302 = arith.constant 0 : index
    %454 = vector.load %arg4[%453, %c0_301, %c0_302] : memref<8x1x32xf32, #tpu.memory_space<vmem>>, vector<1x1x32xf32>
    %455 = vector.shape_cast %454 : vector<1x1x32xf32> to vector<1x32xf32>
    %456 = arith.index_cast %c3_i32 : i32 to index
    %c0_303 = arith.constant 0 : index
    %c0_304 = arith.constant 0 : index
    %457 = vector.load %arg1[%456, %c0_303, %c0_304] : memref<8x2x32xf32, #tpu.memory_space<vmem>>, vector<1x2x32xf32>
    %458 = vector.shape_cast %457 : vector<1x2x32xf32> to vector<2x32xf32>
    %c0_305 = arith.constant 0 : index
    %c0_306 = arith.constant 0 : index
    %459 = vector.load %arg26[%c0_305, %c0_306] : memref<2x32xf32, #tpu.memory_space<vmem>>, vector<2x32xf32>
    %c0_307 = arith.constant 0 : index
    %c0_308 = arith.constant 0 : index
    %460 = vector.load %arg5[%c0_307, %c0_308] : memref<32x32xf32, #tpu.memory_space<vmem>>, vector<32x32xf32>
    %cst_309 = arith.constant dense<0.000000e+00> : vector<2x32xf32>
    %461 = tpu.matmul %459, %460, %cst_309 {dimension_numbers = #tpu.dot_dimension_numbers<[1], [0], [0], [1], [0, 0, 1, 1], [], []>} : vector<2x32xf32>, vector<32x32xf32>, vector<2x32xf32> -> vector<2x32xf32>
    %462 = arith.addf %458, %461 : vector<2x32xf32>
    %c0_310 = arith.constant 0 : index
    %c0_311 = arith.constant 0 : index
    %463 = vector.load %arg25[%c0_310, %c0_311] : memref<2x32xf32, #tpu.memory_space<vmem>>, vector<2x32xf32>
    %c0_312 = arith.constant 0 : index
    %c0_313 = arith.constant 0 : index
    %464 = vector.load %arg26[%c0_312, %c0_313] : memref<2x32xf32, #tpu.memory_space<vmem>>, vector<2x32xf32>
    %c0_314 = arith.constant 0 : index
    %c0_315 = arith.constant 0 : index
    %465 = vector.load %arg27[%c0_314, %c0_315] : memref<2x32xf32, #tpu.memory_space<vmem>>, vector<2x32xf32>
    %cst_316 = arith.constant 0.998334705 : f32
    %466 = vector.broadcast %cst_316 : f32 to vector<2x32xf32>
    %467 = arith.mulf %466, %465 : vector<2x32xf32>
    %cst_317 = arith.constant 0.00166527857 : f32
    %468 = vector.broadcast %cst_317 : f32 to vector<2x32xf32>
    %469 = arith.mulf %468, %464 : vector<2x32xf32>
    %470 = arith.addf %467, %469 : vector<2x32xf32>
    %cst_318 = arith.constant 1.800000e+00 : f32
    %471 = vector.broadcast %cst_318 : f32 to vector<2x32xf32>
    %472 = arith.mulf %471, %470 : vector<2x32xf32>
    %cst_319 = arith.constant 0.00999999977 : f32
    %473 = vector.broadcast %cst_319 : f32 to vector<2x32xf32>
    %474 = arith.addf %473, %472 : vector<2x32xf32>
    %cst_320 = arith.constant 0.951229453 : f32
    %475 = vector.broadcast %cst_320 : f32 to vector<2x32xf32>
    %476 = arith.mulf %463, %475 : vector<2x32xf32>
    %477 = arith.addf %476, %462 : vector<2x32xf32>
    %478 = arith.mulf %474, %464 : vector<2x32xf32>
    %cst_321 = arith.constant 1.000000e+00 : f32
    %479 = vector.broadcast %cst_321 : f32 to vector<2x32xf32>
    %480 = arith.mulf %478, %479 : vector<2x32xf32>
    %481 = arith.subf %477, %480 : vector<2x32xf32>
    %cst_322 = arith.constant 0.000000e+00 : f32
    %482 = vector.broadcast %cst_322 : f32 to vector<1x32xf32>
    %483 = arith.cmpf oeq, %449, %482 : vector<1x32xf32>
    %484 = vector.shape_cast %483 : vector<1x32xi1> to vector<1x32xi1>
    %485 = vector.broadcast %484 : vector<1x32xi1> to vector<2x32xi1>
    %486 = arith.select %485, %463, %481 : vector<2x32xi1>, vector<2x32xf32>
    %487 = arith.subf %486, %474 : vector<2x32xf32>
    %cst_323 = arith.constant 0.000000e+00 : f32
    %488 = vector.broadcast %cst_323 : f32 to vector<2x32xf32>
    %489 = arith.cmpf ogt, %487, %488 : vector<2x32xf32>
    %490 = arith.extui %489 : vector<2x32xi1> to vector<2x32xi32>
    %491 = arith.sitofp %490 : vector<2x32xi32> to vector<2x32xf32>
    %492 = vector.broadcast %449 : vector<1x32xf32> to vector<2x32xf32>
    %493 = arith.mulf %491, %492 : vector<2x32xf32>
    %c0_324 = arith.constant 0 : index
    %c0_325 = arith.constant 0 : index
    %494 = vector.load %arg25[%c0_324, %c0_325] : memref<2x32xf32, #tpu.memory_space<vmem>>, vector<2x32xf32>
    tpu.vector_store %arg25[%c0_324, %c0_325], %486 {strides = array<i32>} : memref<2x32xf32, #tpu.memory_space<vmem>>, vector<2x32xf32>,
    %c0_326 = arith.constant 0 : index
    %c0_327 = arith.constant 0 : index
    %495 = vector.load %arg26[%c0_326, %c0_327] : memref<2x32xf32, #tpu.memory_space<vmem>>, vector<2x32xf32>
    tpu.vector_store %arg26[%c0_326, %c0_327], %493 {strides = array<i32>} : memref<2x32xf32, #tpu.memory_space<vmem>>, vector<2x32xf32>,
    %c0_328 = arith.constant 0 : index
    %c0_329 = arith.constant 0 : index
    %496 = vector.load %arg27[%c0_328, %c0_329] : memref<2x32xf32, #tpu.memory_space<vmem>>, vector<2x32xf32>
    tpu.vector_store %arg27[%c0_328, %c0_329], %470 {strides = array<i32>} : memref<2x32xf32, #tpu.memory_space<vmem>>, vector<2x32xf32>,
    %c0_330 = arith.constant 0 : index
    %c0_331 = arith.constant 0 : index
    %497 = vector.load %arg6[%c0_330, %c0_331] : memref<32x32xf32, #tpu.memory_space<vmem>>, vector<32x32xf32>
    %cst_332 = arith.constant dense<0.000000e+00> : vector<2x32xf32>
    %498 = tpu.matmul %493, %497, %cst_332 {dimension_numbers = #tpu.dot_dimension_numbers<[1], [0], [0], [1], [0, 0, 1, 1], [], []>} : vector<2x32xf32>, vector<32x32xf32>, vector<2x32xf32> -> vector<2x32xf32>
    %c0_333 = arith.constant 0 : index
    %c0_334 = arith.constant 0 : index
    %499 = vector.load %arg29[%c0_333, %c0_334] : memref<2x32xf32, #tpu.memory_space<vmem>>, vector<2x32xf32>
    %c0_335 = arith.constant 0 : index
    %c0_336 = arith.constant 0 : index
    %500 = vector.load %arg7[%c0_335, %c0_336] : memref<32x32xf32, #tpu.memory_space<vmem>>, vector<32x32xf32>
    %cst_337 = arith.constant dense<0.000000e+00> : vector<2x32xf32>
    %501 = tpu.matmul %499, %500, %cst_337 {dimension_numbers = #tpu.dot_dimension_numbers<[1], [0], [0], [1], [0, 0, 1, 1], [], []>} : vector<2x32xf32>, vector<32x32xf32>, vector<2x32xf32> -> vector<2x32xf32>
    %502 = arith.addf %498, %501 : vector<2x32xf32>
    %c0_338 = arith.constant 0 : index
    %c0_339 = arith.constant 0 : index
    %503 = vector.load %arg8[%c0_338, %c0_339] : memref<1x32xf32, #tpu.memory_space<vmem>>, vector<1x32xf32>
    %504 = vector.broadcast %503 : vector<1x32xf32> to vector<2x32xf32>
    %505 = arith.addf %502, %504 : vector<2x32xf32>
    %c0_340 = arith.constant 0 : index
    %c0_341 = arith.constant 0 : index
    %506 = vector.load %arg28[%c0_340, %c0_341] : memref<2x32xf32, #tpu.memory_space<vmem>>, vector<2x32xf32>
    %c0_342 = arith.constant 0 : index
    %c0_343 = arith.constant 0 : index
    %507 = vector.load %arg29[%c0_342, %c0_343] : memref<2x32xf32, #tpu.memory_space<vmem>>, vector<2x32xf32>
    %c0_344 = arith.constant 0 : index
    %c0_345 = arith.constant 0 : index
    %508 = vector.load %arg30[%c0_344, %c0_345] : memref<2x32xf32, #tpu.memory_space<vmem>>, vector<2x32xf32>
    %cst_346 = arith.constant 0.998334705 : f32
    %509 = vector.broadcast %cst_346 : f32 to vector<2x32xf32>
    %510 = arith.mulf %509, %508 : vector<2x32xf32>
    %cst_347 = arith.constant 0.00166527857 : f32
    %511 = vector.broadcast %cst_347 : f32 to vector<2x32xf32>
    %512 = arith.mulf %511, %507 : vector<2x32xf32>
    %513 = arith.addf %510, %512 : vector<2x32xf32>
    %cst_348 = arith.constant 1.800000e+00 : f32
    %514 = vector.broadcast %cst_348 : f32 to vector<2x32xf32>
    %515 = arith.mulf %514, %513 : vector<2x32xf32>
    %cst_349 = arith.constant 0.00999999977 : f32
    %516 = vector.broadcast %cst_349 : f32 to vector<2x32xf32>
    %517 = arith.addf %516, %515 : vector<2x32xf32>
    %cst_350 = arith.constant 0.951229453 : f32
    %518 = vector.broadcast %cst_350 : f32 to vector<2x32xf32>
    %519 = arith.mulf %506, %518 : vector<2x32xf32>
    %520 = arith.addf %519, %505 : vector<2x32xf32>
    %521 = arith.mulf %517, %507 : vector<2x32xf32>
    %cst_351 = arith.constant 1.000000e+00 : f32
    %522 = vector.broadcast %cst_351 : f32 to vector<2x32xf32>
    %523 = arith.mulf %521, %522 : vector<2x32xf32>
    %524 = arith.subf %520, %523 : vector<2x32xf32>
    %cst_352 = arith.constant 0.000000e+00 : f32
    %525 = vector.broadcast %cst_352 : f32 to vector<1x32xf32>
    %526 = arith.cmpf oeq, %452, %525 : vector<1x32xf32>
    %527 = vector.shape_cast %526 : vector<1x32xi1> to vector<1x32xi1>
    %528 = vector.broadcast %527 : vector<1x32xi1> to vector<2x32xi1>
    %529 = arith.select %528, %506, %524 : vector<2x32xi1>, vector<2x32xf32>
    %530 = arith.subf %529, %517 : vector<2x32xf32>
    %cst_353 = arith.constant 0.000000e+00 : f32
    %531 = vector.broadcast %cst_353 : f32 to vector<2x32xf32>
    %532 = arith.cmpf ogt, %530, %531 : vector<2x32xf32>
    %533 = arith.extui %532 : vector<2x32xi1> to vector<2x32xi32>
    %534 = arith.sitofp %533 : vector<2x32xi32> to vector<2x32xf32>
    %535 = vector.broadcast %452 : vector<1x32xf32> to vector<2x32xf32>
    %536 = arith.mulf %534, %535 : vector<2x32xf32>
    %c0_354 = arith.constant 0 : index
    %c0_355 = arith.constant 0 : index
    %537 = vector.load %arg28[%c0_354, %c0_355] : memref<2x32xf32, #tpu.memory_space<vmem>>, vector<2x32xf32>
    tpu.vector_store %arg28[%c0_354, %c0_355], %529 {strides = array<i32>} : memref<2x32xf32, #tpu.memory_space<vmem>>, vector<2x32xf32>,
    %c0_356 = arith.constant 0 : index
    %c0_357 = arith.constant 0 : index
    %538 = vector.load %arg29[%c0_356, %c0_357] : memref<2x32xf32, #tpu.memory_space<vmem>>, vector<2x32xf32>
    tpu.vector_store %arg29[%c0_356, %c0_357], %536 {strides = array<i32>} : memref<2x32xf32, #tpu.memory_space<vmem>>, vector<2x32xf32>,
    %c0_358 = arith.constant 0 : index
    %c0_359 = arith.constant 0 : index
    %539 = vector.load %arg30[%c0_358, %c0_359] : memref<2x32xf32, #tpu.memory_space<vmem>>, vector<2x32xf32>
    tpu.vector_store %arg30[%c0_358, %c0_359], %513 {strides = array<i32>} : memref<2x32xf32, #tpu.memory_space<vmem>>, vector<2x32xf32>,
    %c0_360 = arith.constant 0 : index
    %c0_361 = arith.constant 0 : index
    %540 = vector.load %arg9[%c0_360, %c0_361] : memref<32x32xf32, #tpu.memory_space<vmem>>, vector<32x32xf32>
    %cst_362 = arith.constant dense<0.000000e+00> : vector<2x32xf32>
    %541 = tpu.matmul %536, %540, %cst_362 {dimension_numbers = #tpu.dot_dimension_numbers<[1], [0], [0], [1], [0, 0, 1, 1], [], []>} : vector<2x32xf32>, vector<32x32xf32>, vector<2x32xf32> -> vector<2x32xf32>
    %c0_363 = arith.constant 0 : index
    %c0_364 = arith.constant 0 : index
    %542 = vector.load %arg32[%c0_363, %c0_364] : memref<2x32xf32, #tpu.memory_space<vmem>>, vector<2x32xf32>
    %c0_365 = arith.constant 0 : index
    %c0_366 = arith.constant 0 : index
    %543 = vector.load %arg10[%c0_365, %c0_366] : memref<32x32xf32, #tpu.memory_space<vmem>>, vector<32x32xf32>
    %cst_367 = arith.constant dense<0.000000e+00> : vector<2x32xf32>
    %544 = tpu.matmul %542, %543, %cst_367 {dimension_numbers = #tpu.dot_dimension_numbers<[1], [0], [0], [1], [0, 0, 1, 1], [], []>} : vector<2x32xf32>, vector<32x32xf32>, vector<2x32xf32> -> vector<2x32xf32>
    %545 = arith.addf %541, %544 : vector<2x32xf32>
    %c0_368 = arith.constant 0 : index
    %c0_369 = arith.constant 0 : index
    %546 = vector.load %arg11[%c0_368, %c0_369] : memref<1x32xf32, #tpu.memory_space<vmem>>, vector<1x32xf32>
    %547 = vector.broadcast %546 : vector<1x32xf32> to vector<2x32xf32>
    %548 = arith.addf %545, %547 : vector<2x32xf32>
    %c0_370 = arith.constant 0 : index
    %c0_371 = arith.constant 0 : index
    %549 = vector.load %arg31[%c0_370, %c0_371] : memref<2x32xf32, #tpu.memory_space<vmem>>, vector<2x32xf32>
    %c0_372 = arith.constant 0 : index
    %c0_373 = arith.constant 0 : index
    %550 = vector.load %arg32[%c0_372, %c0_373] : memref<2x32xf32, #tpu.memory_space<vmem>>, vector<2x32xf32>
    %c0_374 = arith.constant 0 : index
    %c0_375 = arith.constant 0 : index
    %551 = vector.load %arg33[%c0_374, %c0_375] : memref<2x32xf32, #tpu.memory_space<vmem>>, vector<2x32xf32>
    %cst_376 = arith.constant 0.998334705 : f32
    %552 = vector.broadcast %cst_376 : f32 to vector<2x32xf32>
    %553 = arith.mulf %552, %551 : vector<2x32xf32>
    %cst_377 = arith.constant 0.00166527857 : f32
    %554 = vector.broadcast %cst_377 : f32 to vector<2x32xf32>
    %555 = arith.mulf %554, %550 : vector<2x32xf32>
    %556 = arith.addf %553, %555 : vector<2x32xf32>
    %cst_378 = arith.constant 1.800000e+00 : f32
    %557 = vector.broadcast %cst_378 : f32 to vector<2x32xf32>
    %558 = arith.mulf %557, %556 : vector<2x32xf32>
    %cst_379 = arith.constant 0.00999999977 : f32
    %559 = vector.broadcast %cst_379 : f32 to vector<2x32xf32>
    %560 = arith.addf %559, %558 : vector<2x32xf32>
    %cst_380 = arith.constant 0.951229453 : f32
    %561 = vector.broadcast %cst_380 : f32 to vector<2x32xf32>
    %562 = arith.mulf %549, %561 : vector<2x32xf32>
    %563 = arith.addf %562, %548 : vector<2x32xf32>
    %564 = arith.mulf %560, %550 : vector<2x32xf32>
    %cst_381 = arith.constant 1.000000e+00 : f32
    %565 = vector.broadcast %cst_381 : f32 to vector<2x32xf32>
    %566 = arith.mulf %564, %565 : vector<2x32xf32>
    %567 = arith.subf %563, %566 : vector<2x32xf32>
    %cst_382 = arith.constant 0.000000e+00 : f32
    %568 = vector.broadcast %cst_382 : f32 to vector<1x32xf32>
    %569 = arith.cmpf oeq, %455, %568 : vector<1x32xf32>
    %570 = vector.shape_cast %569 : vector<1x32xi1> to vector<1x32xi1>
    %571 = vector.broadcast %570 : vector<1x32xi1> to vector<2x32xi1>
    %572 = arith.select %571, %549, %567 : vector<2x32xi1>, vector<2x32xf32>
    %573 = arith.subf %572, %560 : vector<2x32xf32>
    %cst_383 = arith.constant 0.000000e+00 : f32
    %574 = vector.broadcast %cst_383 : f32 to vector<2x32xf32>
    %575 = arith.cmpf ogt, %573, %574 : vector<2x32xf32>
    %576 = arith.extui %575 : vector<2x32xi1> to vector<2x32xi32>
    %577 = arith.sitofp %576 : vector<2x32xi32> to vector<2x32xf32>
    %578 = vector.broadcast %455 : vector<1x32xf32> to vector<2x32xf32>
    %579 = arith.mulf %577, %578 : vector<2x32xf32>
    %c0_384 = arith.constant 0 : index
    %c0_385 = arith.constant 0 : index
    %580 = vector.load %arg31[%c0_384, %c0_385] : memref<2x32xf32, #tpu.memory_space<vmem>>, vector<2x32xf32>
    tpu.vector_store %arg31[%c0_384, %c0_385], %572 {strides = array<i32>} : memref<2x32xf32, #tpu.memory_space<vmem>>, vector<2x32xf32>,
    %c0_386 = arith.constant 0 : index
    %c0_387 = arith.constant 0 : index
    %581 = vector.load %arg32[%c0_386, %c0_387] : memref<2x32xf32, #tpu.memory_space<vmem>>, vector<2x32xf32>
    tpu.vector_store %arg32[%c0_386, %c0_387], %579 {strides = array<i32>} : memref<2x32xf32, #tpu.memory_space<vmem>>, vector<2x32xf32>,
    %c0_388 = arith.constant 0 : index
    %c0_389 = arith.constant 0 : index
    %582 = vector.load %arg33[%c0_388, %c0_389] : memref<2x32xf32, #tpu.memory_space<vmem>>, vector<2x32xf32>
    tpu.vector_store %arg33[%c0_388, %c0_389], %556 {strides = array<i32>} : memref<2x32xf32, #tpu.memory_space<vmem>>, vector<2x32xf32>,
    %583 = arith.index_cast %c3_i32 : i32 to index
    %c0_390 = arith.constant 0 : index
    %c0_391 = arith.constant 0 : index
    %584 = vector.load %arg12[%583, %c0_390, %c0_391] : memref<8x2x32xf32, #tpu.memory_space<vmem>>, vector<1x2x32xf32>
    %585 = vector.shape_cast %584 : vector<1x2x32xf32> to vector<2x32xf32>
    %586 = vector.shape_cast %579 : vector<2x32xf32> to vector<1x2x32xf32>
    tpu.vector_store %arg12[%583, %c0_390, %c0_391], %586 {strides = array<i32>} : memref<8x2x32xf32, #tpu.memory_space<vmem>>, vector<1x2x32xf32>,
    %587 = arith.index_cast %c3_i32 : i32 to index
    %c0_392 = arith.constant 0 : index
    %c0_393 = arith.constant 0 : index
    %588 = vector.load %arg13[%587, %c0_392, %c0_393] : memref<8x2x32xf32, #tpu.memory_space<vmem>>, vector<1x2x32xf32>
    %589 = vector.shape_cast %588 : vector<1x2x32xf32> to vector<2x32xf32>
    %590 = vector.shape_cast %572 : vector<2x32xf32> to vector<1x2x32xf32>
    tpu.vector_store %arg13[%587, %c0_392, %c0_393], %590 {strides = array<i32>} : memref<8x2x32xf32, #tpu.memory_space<vmem>>, vector<1x2x32xf32>,
    %591 = arith.index_cast %c3_i32 : i32 to index
    %c0_394 = arith.constant 0 : index
    %c0_395 = arith.constant 0 : index
    %592 = vector.load %arg14[%591, %c0_394, %c0_395] : memref<8x2x32xf32, #tpu.memory_space<vmem>>, vector<1x2x32xf32>
    %593 = vector.shape_cast %592 : vector<1x2x32xf32> to vector<2x32xf32>
    %594 = vector.shape_cast %560 : vector<2x32xf32> to vector<1x2x32xf32>
    tpu.vector_store %arg14[%591, %c0_394, %c0_395], %594 {strides = array<i32>} : memref<8x2x32xf32, #tpu.memory_space<vmem>>, vector<1x2x32xf32>,
    %c4_i32 = arith.constant 4 : i32
    %595 = arith.index_cast %c4_i32 : i32 to index
    %c0_396 = arith.constant 0 : index
    %c0_397 = arith.constant 0 : index
    %596 = vector.load %arg2[%595, %c0_396, %c0_397] : memref<8x1x32xf32, #tpu.memory_space<vmem>>, vector<1x1x32xf32>
    %597 = vector.shape_cast %596 : vector<1x1x32xf32> to vector<1x32xf32>
    %598 = arith.index_cast %c4_i32 : i32 to index
    %c0_398 = arith.constant 0 : index
    %c0_399 = arith.constant 0 : index
    %599 = vector.load %arg3[%598, %c0_398, %c0_399] : memref<8x1x32xf32, #tpu.memory_space<vmem>>, vector<1x1x32xf32>
    %600 = vector.shape_cast %599 : vector<1x1x32xf32> to vector<1x32xf32>
    %601 = arith.index_cast %c4_i32 : i32 to index
    %c0_400 = arith.constant 0 : index
    %c0_401 = arith.constant 0 : index
    %602 = vector.load %arg4[%601, %c0_400, %c0_401] : memref<8x1x32xf32, #tpu.memory_space<vmem>>, vector<1x1x32xf32>
    %603 = vector.shape_cast %602 : vector<1x1x32xf32> to vector<1x32xf32>
    %604 = arith.index_cast %c4_i32 : i32 to index
    %c0_402 = arith.constant 0 : index
    %c0_403 = arith.constant 0 : index
    %605 = vector.load %arg1[%604, %c0_402, %c0_403] : memref<8x2x32xf32, #tpu.memory_space<vmem>>, vector<1x2x32xf32>
    %606 = vector.shape_cast %605 : vector<1x2x32xf32> to vector<2x32xf32>
    %c0_404 = arith.constant 0 : index
    %c0_405 = arith.constant 0 : index
    %607 = vector.load %arg26[%c0_404, %c0_405] : memref<2x32xf32, #tpu.memory_space<vmem>>, vector<2x32xf32>
    %c0_406 = arith.constant 0 : index
    %c0_407 = arith.constant 0 : index
    %608 = vector.load %arg5[%c0_406, %c0_407] : memref<32x32xf32, #tpu.memory_space<vmem>>, vector<32x32xf32>
    %cst_408 = arith.constant dense<0.000000e+00> : vector<2x32xf32>
    %609 = tpu.matmul %607, %608, %cst_408 {dimension_numbers = #tpu.dot_dimension_numbers<[1], [0], [0], [1], [0, 0, 1, 1], [], []>} : vector<2x32xf32>, vector<32x32xf32>, vector<2x32xf32> -> vector<2x32xf32>
    %610 = arith.addf %606, %609 : vector<2x32xf32>
    %c0_409 = arith.constant 0 : index
    %c0_410 = arith.constant 0 : index
    %611 = vector.load %arg25[%c0_409, %c0_410] : memref<2x32xf32, #tpu.memory_space<vmem>>, vector<2x32xf32>
    %c0_411 = arith.constant 0 : index
    %c0_412 = arith.constant 0 : index
    %612 = vector.load %arg26[%c0_411, %c0_412] : memref<2x32xf32, #tpu.memory_space<vmem>>, vector<2x32xf32>
    %c0_413 = arith.constant 0 : index
    %c0_414 = arith.constant 0 : index
    %613 = vector.load %arg27[%c0_413, %c0_414] : memref<2x32xf32, #tpu.memory_space<vmem>>, vector<2x32xf32>
    %cst_415 = arith.constant 0.998334705 : f32
    %614 = vector.broadcast %cst_415 : f32 to vector<2x32xf32>
    %615 = arith.mulf %614, %613 : vector<2x32xf32>
    %cst_416 = arith.constant 0.00166527857 : f32
    %616 = vector.broadcast %cst_416 : f32 to vector<2x32xf32>
    %617 = arith.mulf %616, %612 : vector<2x32xf32>
    %618 = arith.addf %615, %617 : vector<2x32xf32>
    %cst_417 = arith.constant 1.800000e+00 : f32
    %619 = vector.broadcast %cst_417 : f32 to vector<2x32xf32>
    %620 = arith.mulf %619, %618 : vector<2x32xf32>
    %cst_418 = arith.constant 0.00999999977 : f32
    %621 = vector.broadcast %cst_418 : f32 to vector<2x32xf32>
    %622 = arith.addf %621, %620 : vector<2x32xf32>
    %cst_419 = arith.constant 0.951229453 : f32
    %623 = vector.broadcast %cst_419 : f32 to vector<2x32xf32>
    %624 = arith.mulf %611, %623 : vector<2x32xf32>
    %625 = arith.addf %624, %610 : vector<2x32xf32>
    %626 = arith.mulf %622, %612 : vector<2x32xf32>
    %cst_420 = arith.constant 1.000000e+00 : f32
    %627 = vector.broadcast %cst_420 : f32 to vector<2x32xf32>
    %628 = arith.mulf %626, %627 : vector<2x32xf32>
    %629 = arith.subf %625, %628 : vector<2x32xf32>
    %cst_421 = arith.constant 0.000000e+00 : f32
    %630 = vector.broadcast %cst_421 : f32 to vector<1x32xf32>
    %631 = arith.cmpf oeq, %597, %630 : vector<1x32xf32>
    %632 = vector.shape_cast %631 : vector<1x32xi1> to vector<1x32xi1>
    %633 = vector.broadcast %632 : vector<1x32xi1> to vector<2x32xi1>
    %634 = arith.select %633, %611, %629 : vector<2x32xi1>, vector<2x32xf32>
    %635 = arith.subf %634, %622 : vector<2x32xf32>
    %cst_422 = arith.constant 0.000000e+00 : f32
    %636 = vector.broadcast %cst_422 : f32 to vector<2x32xf32>
    %637 = arith.cmpf ogt, %635, %636 : vector<2x32xf32>
    %638 = arith.extui %637 : vector<2x32xi1> to vector<2x32xi32>
    %639 = arith.sitofp %638 : vector<2x32xi32> to vector<2x32xf32>
    %640 = vector.broadcast %597 : vector<1x32xf32> to vector<2x32xf32>
    %641 = arith.mulf %639, %640 : vector<2x32xf32>
    %c0_423 = arith.constant 0 : index
    %c0_424 = arith.constant 0 : index
    %642 = vector.load %arg25[%c0_423, %c0_424] : memref<2x32xf32, #tpu.memory_space<vmem>>, vector<2x32xf32>
    tpu.vector_store %arg25[%c0_423, %c0_424], %634 {strides = array<i32>} : memref<2x32xf32, #tpu.memory_space<vmem>>, vector<2x32xf32>,
    %c0_425 = arith.constant 0 : index
    %c0_426 = arith.constant 0 : index
    %643 = vector.load %arg26[%c0_425, %c0_426] : memref<2x32xf32, #tpu.memory_space<vmem>>, vector<2x32xf32>
    tpu.vector_store %arg26[%c0_425, %c0_426], %641 {strides = array<i32>} : memref<2x32xf32, #tpu.memory_space<vmem>>, vector<2x32xf32>,
    %c0_427 = arith.constant 0 : index
    %c0_428 = arith.constant 0 : index
    %644 = vector.load %arg27[%c0_427, %c0_428] : memref<2x32xf32, #tpu.memory_space<vmem>>, vector<2x32xf32>
    tpu.vector_store %arg27[%c0_427, %c0_428], %618 {strides = array<i32>} : memref<2x32xf32, #tpu.memory_space<vmem>>, vector<2x32xf32>,
    %c0_429 = arith.constant 0 : index
    %c0_430 = arith.constant 0 : index
    %645 = vector.load %arg6[%c0_429, %c0_430] : memref<32x32xf32, #tpu.memory_space<vmem>>, vector<32x32xf32>
    %cst_431 = arith.constant dense<0.000000e+00> : vector<2x32xf32>
    %646 = tpu.matmul %641, %645, %cst_431 {dimension_numbers = #tpu.dot_dimension_numbers<[1], [0], [0], [1], [0, 0, 1, 1], [], []>} : vector<2x32xf32>, vector<32x32xf32>, vector<2x32xf32> -> vector<2x32xf32>
    %c0_432 = arith.constant 0 : index
    %c0_433 = arith.constant 0 : index
    %647 = vector.load %arg29[%c0_432, %c0_433] : memref<2x32xf32, #tpu.memory_space<vmem>>, vector<2x32xf32>
    %c0_434 = arith.constant 0 : index
    %c0_435 = arith.constant 0 : index
    %648 = vector.load %arg7[%c0_434, %c0_435] : memref<32x32xf32, #tpu.memory_space<vmem>>, vector<32x32xf32>
    %cst_436 = arith.constant dense<0.000000e+00> : vector<2x32xf32>
    %649 = tpu.matmul %647, %648, %cst_436 {dimension_numbers = #tpu.dot_dimension_numbers<[1], [0], [0], [1], [0, 0, 1, 1], [], []>} : vector<2x32xf32>, vector<32x32xf32>, vector<2x32xf32> -> vector<2x32xf32>
    %650 = arith.addf %646, %649 : vector<2x32xf32>
    %c0_437 = arith.constant 0 : index
    %c0_438 = arith.constant 0 : index
    %651 = vector.load %arg8[%c0_437, %c0_438] : memref<1x32xf32, #tpu.memory_space<vmem>>, vector<1x32xf32>
    %652 = vector.broadcast %651 : vector<1x32xf32> to vector<2x32xf32>
    %653 = arith.addf %650, %652 : vector<2x32xf32>
    %c0_439 = arith.constant 0 : index
    %c0_440 = arith.constant 0 : index
    %654 = vector.load %arg28[%c0_439, %c0_440] : memref<2x32xf32, #tpu.memory_space<vmem>>, vector<2x32xf32>
    %c0_441 = arith.constant 0 : index
    %c0_442 = arith.constant 0 : index
    %655 = vector.load %arg29[%c0_441, %c0_442] : memref<2x32xf32, #tpu.memory_space<vmem>>, vector<2x32xf32>
    %c0_443 = arith.constant 0 : index
    %c0_444 = arith.constant 0 : index
    %656 = vector.load %arg30[%c0_443, %c0_444] : memref<2x32xf32, #tpu.memory_space<vmem>>, vector<2x32xf32>
    %cst_445 = arith.constant 0.998334705 : f32
    %657 = vector.broadcast %cst_445 : f32 to vector<2x32xf32>
    %658 = arith.mulf %657, %656 : vector<2x32xf32>
    %cst_446 = arith.constant 0.00166527857 : f32
    %659 = vector.broadcast %cst_446 : f32 to vector<2x32xf32>
    %660 = arith.mulf %659, %655 : vector<2x32xf32>
    %661 = arith.addf %658, %660 : vector<2x32xf32>
    %cst_447 = arith.constant 1.800000e+00 : f32
    %662 = vector.broadcast %cst_447 : f32 to vector<2x32xf32>
    %663 = arith.mulf %662, %661 : vector<2x32xf32>
    %cst_448 = arith.constant 0.00999999977 : f32
    %664 = vector.broadcast %cst_448 : f32 to vector<2x32xf32>
    %665 = arith.addf %664, %663 : vector<2x32xf32>
    %cst_449 = arith.constant 0.951229453 : f32
    %666 = vector.broadcast %cst_449 : f32 to vector<2x32xf32>
    %667 = arith.mulf %654, %666 : vector<2x32xf32>
    %668 = arith.addf %667, %653 : vector<2x32xf32>
    %669 = arith.mulf %665, %655 : vector<2x32xf32>
    %cst_450 = arith.constant 1.000000e+00 : f32
    %670 = vector.broadcast %cst_450 : f32 to vector<2x32xf32>
    %671 = arith.mulf %669, %670 : vector<2x32xf32>
    %672 = arith.subf %668, %671 : vector<2x32xf32>
    %cst_451 = arith.constant 0.000000e+00 : f32
    %673 = vector.broadcast %cst_451 : f32 to vector<1x32xf32>
    %674 = arith.cmpf oeq, %600, %673 : vector<1x32xf32>
    %675 = vector.shape_cast %674 : vector<1x32xi1> to vector<1x32xi1>
    %676 = vector.broadcast %675 : vector<1x32xi1> to vector<2x32xi1>
    %677 = arith.select %676, %654, %672 : vector<2x32xi1>, vector<2x32xf32>
    %678 = arith.subf %677, %665 : vector<2x32xf32>
    %cst_452 = arith.constant 0.000000e+00 : f32
    %679 = vector.broadcast %cst_452 : f32 to vector<2x32xf32>
    %680 = arith.cmpf ogt, %678, %679 : vector<2x32xf32>
    %681 = arith.extui %680 : vector<2x32xi1> to vector<2x32xi32>
    %682 = arith.sitofp %681 : vector<2x32xi32> to vector<2x32xf32>
    %683 = vector.broadcast %600 : vector<1x32xf32> to vector<2x32xf32>
    %684 = arith.mulf %682, %683 : vector<2x32xf32>
    %c0_453 = arith.constant 0 : index
    %c0_454 = arith.constant 0 : index
    %685 = vector.load %arg28[%c0_453, %c0_454] : memref<2x32xf32, #tpu.memory_space<vmem>>, vector<2x32xf32>
    tpu.vector_store %arg28[%c0_453, %c0_454], %677 {strides = array<i32>} : memref<2x32xf32, #tpu.memory_space<vmem>>, vector<2x32xf32>,
    %c0_455 = arith.constant 0 : index
    %c0_456 = arith.constant 0 : index
    %686 = vector.load %arg29[%c0_455, %c0_456] : memref<2x32xf32, #tpu.memory_space<vmem>>, vector<2x32xf32>
    tpu.vector_store %arg29[%c0_455, %c0_456], %684 {strides = array<i32>} : memref<2x32xf32, #tpu.memory_space<vmem>>, vector<2x32xf32>,
    %c0_457 = arith.constant 0 : index
    %c0_458 = arith.constant 0 : index
    %687 = vector.load %arg30[%c0_457, %c0_458] : memref<2x32xf32, #tpu.memory_space<vmem>>, vector<2x32xf32>
    tpu.vector_store %arg30[%c0_457, %c0_458], %661 {strides = array<i32>} : memref<2x32xf32, #tpu.memory_space<vmem>>, vector<2x32xf32>,
    %c0_459 = arith.constant 0 : index
    %c0_460 = arith.constant 0 : index
    %688 = vector.load %arg9[%c0_459, %c0_460] : memref<32x32xf32, #tpu.memory_space<vmem>>, vector<32x32xf32>
    %cst_461 = arith.constant dense<0.000000e+00> : vector<2x32xf32>
    %689 = tpu.matmul %684, %688, %cst_461 {dimension_numbers = #tpu.dot_dimension_numbers<[1], [0], [0], [1], [0, 0, 1, 1], [], []>} : vector<2x32xf32>, vector<32x32xf32>, vector<2x32xf32> -> vector<2x32xf32>
    %c0_462 = arith.constant 0 : index
    %c0_463 = arith.constant 0 : index
    %690 = vector.load %arg32[%c0_462, %c0_463] : memref<2x32xf32, #tpu.memory_space<vmem>>, vector<2x32xf32>
    %c0_464 = arith.constant 0 : index
    %c0_465 = arith.constant 0 : index
    %691 = vector.load %arg10[%c0_464, %c0_465] : memref<32x32xf32, #tpu.memory_space<vmem>>, vector<32x32xf32>
    %cst_466 = arith.constant dense<0.000000e+00> : vector<2x32xf32>
    %692 = tpu.matmul %690, %691, %cst_466 {dimension_numbers = #tpu.dot_dimension_numbers<[1], [0], [0], [1], [0, 0, 1, 1], [], []>} : vector<2x32xf32>, vector<32x32xf32>, vector<2x32xf32> -> vector<2x32xf32>
    %693 = arith.addf %689, %692 : vector<2x32xf32>
    %c0_467 = arith.constant 0 : index
    %c0_468 = arith.constant 0 : index
    %694 = vector.load %arg11[%c0_467, %c0_468] : memref<1x32xf32, #tpu.memory_space<vmem>>, vector<1x32xf32>
    %695 = vector.broadcast %694 : vector<1x32xf32> to vector<2x32xf32>
    %696 = arith.addf %693, %695 : vector<2x32xf32>
    %c0_469 = arith.constant 0 : index
    %c0_470 = arith.constant 0 : index
    %697 = vector.load %arg31[%c0_469, %c0_470] : memref<2x32xf32, #tpu.memory_space<vmem>>, vector<2x32xf32>
    %c0_471 = arith.constant 0 : index
    %c0_472 = arith.constant 0 : index
    %698 = vector.load %arg32[%c0_471, %c0_472] : memref<2x32xf32, #tpu.memory_space<vmem>>, vector<2x32xf32>
    %c0_473 = arith.constant 0 : index
    %c0_474 = arith.constant 0 : index
    %699 = vector.load %arg33[%c0_473, %c0_474] : memref<2x32xf32, #tpu.memory_space<vmem>>, vector<2x32xf32>
    %cst_475 = arith.constant 0.998334705 : f32
    %700 = vector.broadcast %cst_475 : f32 to vector<2x32xf32>
    %701 = arith.mulf %700, %699 : vector<2x32xf32>
    %cst_476 = arith.constant 0.00166527857 : f32
    %702 = vector.broadcast %cst_476 : f32 to vector<2x32xf32>
    %703 = arith.mulf %702, %698 : vector<2x32xf32>
    %704 = arith.addf %701, %703 : vector<2x32xf32>
    %cst_477 = arith.constant 1.800000e+00 : f32
    %705 = vector.broadcast %cst_477 : f32 to vector<2x32xf32>
    %706 = arith.mulf %705, %704 : vector<2x32xf32>
    %cst_478 = arith.constant 0.00999999977 : f32
    %707 = vector.broadcast %cst_478 : f32 to vector<2x32xf32>
    %708 = arith.addf %707, %706 : vector<2x32xf32>
    %cst_479 = arith.constant 0.951229453 : f32
    %709 = vector.broadcast %cst_479 : f32 to vector<2x32xf32>
    %710 = arith.mulf %697, %709 : vector<2x32xf32>
    %711 = arith.addf %710, %696 : vector<2x32xf32>
    %712 = arith.mulf %708, %698 : vector<2x32xf32>
    %cst_480 = arith.constant 1.000000e+00 : f32
    %713 = vector.broadcast %cst_480 : f32 to vector<2x32xf32>
    %714 = arith.mulf %712, %713 : vector<2x32xf32>
    %715 = arith.subf %711, %714 : vector<2x32xf32>
    %cst_481 = arith.constant 0.000000e+00 : f32
    %716 = vector.broadcast %cst_481 : f32 to vector<1x32xf32>
    %717 = arith.cmpf oeq, %603, %716 : vector<1x32xf32>
    %718 = vector.shape_cast %717 : vector<1x32xi1> to vector<1x32xi1>
    %719 = vector.broadcast %718 : vector<1x32xi1> to vector<2x32xi1>
    %720 = arith.select %719, %697, %715 : vector<2x32xi1>, vector<2x32xf32>
    %721 = arith.subf %720, %708 : vector<2x32xf32>
    %cst_482 = arith.constant 0.000000e+00 : f32
    %722 = vector.broadcast %cst_482 : f32 to vector<2x32xf32>
    %723 = arith.cmpf ogt, %721, %722 : vector<2x32xf32>
    %724 = arith.extui %723 : vector<2x32xi1> to vector<2x32xi32>
    %725 = arith.sitofp %724 : vector<2x32xi32> to vector<2x32xf32>
    %726 = vector.broadcast %603 : vector<1x32xf32> to vector<2x32xf32>
    %727 = arith.mulf %725, %726 : vector<2x32xf32>
    %c0_483 = arith.constant 0 : index
    %c0_484 = arith.constant 0 : index
    %728 = vector.load %arg31[%c0_483, %c0_484] : memref<2x32xf32, #tpu.memory_space<vmem>>, vector<2x32xf32>
    tpu.vector_store %arg31[%c0_483, %c0_484], %720 {strides = array<i32>} : memref<2x32xf32, #tpu.memory_space<vmem>>, vector<2x32xf32>,
    %c0_485 = arith.constant 0 : index
    %c0_486 = arith.constant 0 : index
    %729 = vector.load %arg32[%c0_485, %c0_486] : memref<2x32xf32, #tpu.memory_space<vmem>>, vector<2x32xf32>
    tpu.vector_store %arg32[%c0_485, %c0_486], %727 {strides = array<i32>} : memref<2x32xf32, #tpu.memory_space<vmem>>, vector<2x32xf32>,
    %c0_487 = arith.constant 0 : index
    %c0_488 = arith.constant 0 : index
    %730 = vector.load %arg33[%c0_487, %c0_488] : memref<2x32xf32, #tpu.memory_space<vmem>>, vector<2x32xf32>
    tpu.vector_store %arg33[%c0_487, %c0_488], %704 {strides = array<i32>} : memref<2x32xf32, #tpu.memory_space<vmem>>, vector<2x32xf32>,
    %731 = arith.index_cast %c4_i32 : i32 to index
    %c0_489 = arith.constant 0 : index
    %c0_490 = arith.constant 0 : index
    %732 = vector.load %arg12[%731, %c0_489, %c0_490] : memref<8x2x32xf32, #tpu.memory_space<vmem>>, vector<1x2x32xf32>
    %733 = vector.shape_cast %732 : vector<1x2x32xf32> to vector<2x32xf32>
    %734 = vector.shape_cast %727 : vector<2x32xf32> to vector<1x2x32xf32>
    tpu.vector_store %arg12[%731, %c0_489, %c0_490], %734 {strides = array<i32>} : memref<8x2x32xf32, #tpu.memory_space<vmem>>, vector<1x2x32xf32>,
    %735 = arith.index_cast %c4_i32 : i32 to index
    %c0_491 = arith.constant 0 : index
    %c0_492 = arith.constant 0 : index
    %736 = vector.load %arg13[%735, %c0_491, %c0_492] : memref<8x2x32xf32, #tpu.memory_space<vmem>>, vector<1x2x32xf32>
    %737 = vector.shape_cast %736 : vector<1x2x32xf32> to vector<2x32xf32>
    %738 = vector.shape_cast %720 : vector<2x32xf32> to vector<1x2x32xf32>
    tpu.vector_store %arg13[%735, %c0_491, %c0_492], %738 {strides = array<i32>} : memref<8x2x32xf32, #tpu.memory_space<vmem>>, vector<1x2x32xf32>,
    %739 = arith.index_cast %c4_i32 : i32 to index
    %c0_493 = arith.constant 0 : index
    %c0_494 = arith.constant 0 : index
    %740 = vector.load %arg14[%739, %c0_493, %c0_494] : memref<8x2x32xf32, #tpu.memory_space<vmem>>, vector<1x2x32xf32>
    %741 = vector.shape_cast %740 : vector<1x2x32xf32> to vector<2x32xf32>
    %742 = vector.shape_cast %708 : vector<2x32xf32> to vector<1x2x32xf32>
    tpu.vector_store %arg14[%739, %c0_493, %c0_494], %742 {strides = array<i32>} : memref<8x2x32xf32, #tpu.memory_space<vmem>>, vector<1x2x32xf32>,
    %c5_i32 = arith.constant 5 : i32
    %743 = arith.index_cast %c5_i32 : i32 to index
    %c0_495 = arith.constant 0 : index
    %c0_496 = arith.constant 0 : index
    %744 = vector.load %arg2[%743, %c0_495, %c0_496] : memref<8x1x32xf32, #tpu.memory_space<vmem>>, vector<1x1x32xf32>
    %745 = vector.shape_cast %744 : vector<1x1x32xf32> to vector<1x32xf32>
    %746 = arith.index_cast %c5_i32 : i32 to index
    %c0_497 = arith.constant 0 : index
    %c0_498 = arith.constant 0 : index
    %747 = vector.load %arg3[%746, %c0_497, %c0_498] : memref<8x1x32xf32, #tpu.memory_space<vmem>>, vector<1x1x32xf32>
    %748 = vector.shape_cast %747 : vector<1x1x32xf32> to vector<1x32xf32>
    %749 = arith.index_cast %c5_i32 : i32 to index
    %c0_499 = arith.constant 0 : index
    %c0_500 = arith.constant 0 : index
    %750 = vector.load %arg4[%749, %c0_499, %c0_500] : memref<8x1x32xf32, #tpu.memory_space<vmem>>, vector<1x1x32xf32>
    %751 = vector.shape_cast %750 : vector<1x1x32xf32> to vector<1x32xf32>
    %752 = arith.index_cast %c5_i32 : i32 to index
    %c0_501 = arith.constant 0 : index
    %c0_502 = arith.constant 0 : index
    %753 = vector.load %arg1[%752, %c0_501, %c0_502] : memref<8x2x32xf32, #tpu.memory_space<vmem>>, vector<1x2x32xf32>
    %754 = vector.shape_cast %753 : vector<1x2x32xf32> to vector<2x32xf32>
    %c0_503 = arith.constant 0 : index
    %c0_504 = arith.constant 0 : index
    %755 = vector.load %arg26[%c0_503, %c0_504] : memref<2x32xf32, #tpu.memory_space<vmem>>, vector<2x32xf32>
    %c0_505 = arith.constant 0 : index
    %c0_506 = arith.constant 0 : index
    %756 = vector.load %arg5[%c0_505, %c0_506] : memref<32x32xf32, #tpu.memory_space<vmem>>, vector<32x32xf32>
    %cst_507 = arith.constant dense<0.000000e+00> : vector<2x32xf32>
    %757 = tpu.matmul %755, %756, %cst_507 {dimension_numbers = #tpu.dot_dimension_numbers<[1], [0], [0], [1], [0, 0, 1, 1], [], []>} : vector<2x32xf32>, vector<32x32xf32>, vector<2x32xf32> -> vector<2x32xf32>
    %758 = arith.addf %754, %757 : vector<2x32xf32>
    %c0_508 = arith.constant 0 : index
    %c0_509 = arith.constant 0 : index
    %759 = vector.load %arg25[%c0_508, %c0_509] : memref<2x32xf32, #tpu.memory_space<vmem>>, vector<2x32xf32>
    %c0_510 = arith.constant 0 : index
    %c0_511 = arith.constant 0 : index
    %760 = vector.load %arg26[%c0_510, %c0_511] : memref<2x32xf32, #tpu.memory_space<vmem>>, vector<2x32xf32>
    %c0_512 = arith.constant 0 : index
    %c0_513 = arith.constant 0 : index
    %761 = vector.load %arg27[%c0_512, %c0_513] : memref<2x32xf32, #tpu.memory_space<vmem>>, vector<2x32xf32>
    %cst_514 = arith.constant 0.998334705 : f32
    %762 = vector.broadcast %cst_514 : f32 to vector<2x32xf32>
    %763 = arith.mulf %762, %761 : vector<2x32xf32>
    %cst_515 = arith.constant 0.00166527857 : f32
    %764 = vector.broadcast %cst_515 : f32 to vector<2x32xf32>
    %765 = arith.mulf %764, %760 : vector<2x32xf32>
    %766 = arith.addf %763, %765 : vector<2x32xf32>
    %cst_516 = arith.constant 1.800000e+00 : f32
    %767 = vector.broadcast %cst_516 : f32 to vector<2x32xf32>
    %768 = arith.mulf %767, %766 : vector<2x32xf32>
    %cst_517 = arith.constant 0.00999999977 : f32
    %769 = vector.broadcast %cst_517 : f32 to vector<2x32xf32>
    %770 = arith.addf %769, %768 : vector<2x32xf32>
    %cst_518 = arith.constant 0.951229453 : f32
    %771 = vector.broadcast %cst_518 : f32 to vector<2x32xf32>
    %772 = arith.mulf %759, %771 : vector<2x32xf32>
    %773 = arith.addf %772, %758 : vector<2x32xf32>
    %774 = arith.mulf %770, %760 : vector<2x32xf32>
    %cst_519 = arith.constant 1.000000e+00 : f32
    %775 = vector.broadcast %cst_519 : f32 to vector<2x32xf32>
    %776 = arith.mulf %774, %775 : vector<2x32xf32>
    %777 = arith.subf %773, %776 : vector<2x32xf32>
    %cst_520 = arith.constant 0.000000e+00 : f32
    %778 = vector.broadcast %cst_520 : f32 to vector<1x32xf32>
    %779 = arith.cmpf oeq, %745, %778 : vector<1x32xf32>
    %780 = vector.shape_cast %779 : vector<1x32xi1> to vector<1x32xi1>
    %781 = vector.broadcast %780 : vector<1x32xi1> to vector<2x32xi1>
    %782 = arith.select %781, %759, %777 : vector<2x32xi1>, vector<2x32xf32>
    %783 = arith.subf %782, %770 : vector<2x32xf32>
    %cst_521 = arith.constant 0.000000e+00 : f32
    %784 = vector.broadcast %cst_521 : f32 to vector<2x32xf32>
    %785 = arith.cmpf ogt, %783, %784 : vector<2x32xf32>
    %786 = arith.extui %785 : vector<2x32xi1> to vector<2x32xi32>
    %787 = arith.sitofp %786 : vector<2x32xi32> to vector<2x32xf32>
    %788 = vector.broadcast %745 : vector<1x32xf32> to vector<2x32xf32>
    %789 = arith.mulf %787, %788 : vector<2x32xf32>
    %c0_522 = arith.constant 0 : index
    %c0_523 = arith.constant 0 : index
    %790 = vector.load %arg25[%c0_522, %c0_523] : memref<2x32xf32, #tpu.memory_space<vmem>>, vector<2x32xf32>
    tpu.vector_store %arg25[%c0_522, %c0_523], %782 {strides = array<i32>} : memref<2x32xf32, #tpu.memory_space<vmem>>, vector<2x32xf32>,
    %c0_524 = arith.constant 0 : index
    %c0_525 = arith.constant 0 : index
    %791 = vector.load %arg26[%c0_524, %c0_525] : memref<2x32xf32, #tpu.memory_space<vmem>>, vector<2x32xf32>
    tpu.vector_store %arg26[%c0_524, %c0_525], %789 {strides = array<i32>} : memref<2x32xf32, #tpu.memory_space<vmem>>, vector<2x32xf32>,
    %c0_526 = arith.constant 0 : index
    %c0_527 = arith.constant 0 : index
    %792 = vector.load %arg27[%c0_526, %c0_527] : memref<2x32xf32, #tpu.memory_space<vmem>>, vector<2x32xf32>
    tpu.vector_store %arg27[%c0_526, %c0_527], %766 {strides = array<i32>} : memref<2x32xf32, #tpu.memory_space<vmem>>, vector<2x32xf32>,
    %c0_528 = arith.constant 0 : index
    %c0_529 = arith.constant 0 : index
    %793 = vector.load %arg6[%c0_528, %c0_529] : memref<32x32xf32, #tpu.memory_space<vmem>>, vector<32x32xf32>
    %cst_530 = arith.constant dense<0.000000e+00> : vector<2x32xf32>
    %794 = tpu.matmul %789, %793, %cst_530 {dimension_numbers = #tpu.dot_dimension_numbers<[1], [0], [0], [1], [0, 0, 1, 1], [], []>} : vector<2x32xf32>, vector<32x32xf32>, vector<2x32xf32> -> vector<2x32xf32>
    %c0_531 = arith.constant 0 : index
    %c0_532 = arith.constant 0 : index
    %795 = vector.load %arg29[%c0_531, %c0_532] : memref<2x32xf32, #tpu.memory_space<vmem>>, vector<2x32xf32>
    %c0_533 = arith.constant 0 : index
    %c0_534 = arith.constant 0 : index
    %796 = vector.load %arg7[%c0_533, %c0_534] : memref<32x32xf32, #tpu.memory_space<vmem>>, vector<32x32xf32>
    %cst_535 = arith.constant dense<0.000000e+00> : vector<2x32xf32>
    %797 = tpu.matmul %795, %796, %cst_535 {dimension_numbers = #tpu.dot_dimension_numbers<[1], [0], [0], [1], [0, 0, 1, 1], [], []>} : vector<2x32xf32>, vector<32x32xf32>, vector<2x32xf32> -> vector<2x32xf32>
    %798 = arith.addf %794, %797 : vector<2x32xf32>
    %c0_536 = arith.constant 0 : index
    %c0_537 = arith.constant 0 : index
    %799 = vector.load %arg8[%c0_536, %c0_537] : memref<1x32xf32, #tpu.memory_space<vmem>>, vector<1x32xf32>
    %800 = vector.broadcast %799 : vector<1x32xf32> to vector<2x32xf32>
    %801 = arith.addf %798, %800 : vector<2x32xf32>
    %c0_538 = arith.constant 0 : index
    %c0_539 = arith.constant 0 : index
    %802 = vector.load %arg28[%c0_538, %c0_539] : memref<2x32xf32, #tpu.memory_space<vmem>>, vector<2x32xf32>
    %c0_540 = arith.constant 0 : index
    %c0_541 = arith.constant 0 : index
    %803 = vector.load %arg29[%c0_540, %c0_541] : memref<2x32xf32, #tpu.memory_space<vmem>>, vector<2x32xf32>
    %c0_542 = arith.constant 0 : index
    %c0_543 = arith.constant 0 : index
    %804 = vector.load %arg30[%c0_542, %c0_543] : memref<2x32xf32, #tpu.memory_space<vmem>>, vector<2x32xf32>
    %cst_544 = arith.constant 0.998334705 : f32
    %805 = vector.broadcast %cst_544 : f32 to vector<2x32xf32>
    %806 = arith.mulf %805, %804 : vector<2x32xf32>
    %cst_545 = arith.constant 0.00166527857 : f32
    %807 = vector.broadcast %cst_545 : f32 to vector<2x32xf32>
    %808 = arith.mulf %807, %803 : vector<2x32xf32>
    %809 = arith.addf %806, %808 : vector<2x32xf32>
    %cst_546 = arith.constant 1.800000e+00 : f32
    %810 = vector.broadcast %cst_546 : f32 to vector<2x32xf32>
    %811 = arith.mulf %810, %809 : vector<2x32xf32>
    %cst_547 = arith.constant 0.00999999977 : f32
    %812 = vector.broadcast %cst_547 : f32 to vector<2x32xf32>
    %813 = arith.addf %812, %811 : vector<2x32xf32>
    %cst_548 = arith.constant 0.951229453 : f32
    %814 = vector.broadcast %cst_548 : f32 to vector<2x32xf32>
    %815 = arith.mulf %802, %814 : vector<2x32xf32>
    %816 = arith.addf %815, %801 : vector<2x32xf32>
    %817 = arith.mulf %813, %803 : vector<2x32xf32>
    %cst_549 = arith.constant 1.000000e+00 : f32
    %818 = vector.broadcast %cst_549 : f32 to vector<2x32xf32>
    %819 = arith.mulf %817, %818 : vector<2x32xf32>
    %820 = arith.subf %816, %819 : vector<2x32xf32>
    %cst_550 = arith.constant 0.000000e+00 : f32
    %821 = vector.broadcast %cst_550 : f32 to vector<1x32xf32>
    %822 = arith.cmpf oeq, %748, %821 : vector<1x32xf32>
    %823 = vector.shape_cast %822 : vector<1x32xi1> to vector<1x32xi1>
    %824 = vector.broadcast %823 : vector<1x32xi1> to vector<2x32xi1>
    %825 = arith.select %824, %802, %820 : vector<2x32xi1>, vector<2x32xf32>
    %826 = arith.subf %825, %813 : vector<2x32xf32>
    %cst_551 = arith.constant 0.000000e+00 : f32
    %827 = vector.broadcast %cst_551 : f32 to vector<2x32xf32>
    %828 = arith.cmpf ogt, %826, %827 : vector<2x32xf32>
    %829 = arith.extui %828 : vector<2x32xi1> to vector<2x32xi32>
    %830 = arith.sitofp %829 : vector<2x32xi32> to vector<2x32xf32>
    %831 = vector.broadcast %748 : vector<1x32xf32> to vector<2x32xf32>
    %832 = arith.mulf %830, %831 : vector<2x32xf32>
    %c0_552 = arith.constant 0 : index
    %c0_553 = arith.constant 0 : index
    %833 = vector.load %arg28[%c0_552, %c0_553] : memref<2x32xf32, #tpu.memory_space<vmem>>, vector<2x32xf32>
    tpu.vector_store %arg28[%c0_552, %c0_553], %825 {strides = array<i32>} : memref<2x32xf32, #tpu.memory_space<vmem>>, vector<2x32xf32>,
    %c0_554 = arith.constant 0 : index
    %c0_555 = arith.constant 0 : index
    %834 = vector.load %arg29[%c0_554, %c0_555] : memref<2x32xf32, #tpu.memory_space<vmem>>, vector<2x32xf32>
    tpu.vector_store %arg29[%c0_554, %c0_555], %832 {strides = array<i32>} : memref<2x32xf32, #tpu.memory_space<vmem>>, vector<2x32xf32>,
    %c0_556 = arith.constant 0 : index
    %c0_557 = arith.constant 0 : index
    %835 = vector.load %arg30[%c0_556, %c0_557] : memref<2x32xf32, #tpu.memory_space<vmem>>, vector<2x32xf32>
    tpu.vector_store %arg30[%c0_556, %c0_557], %809 {strides = array<i32>} : memref<2x32xf32, #tpu.memory_space<vmem>>, vector<2x32xf32>,
    %c0_558 = arith.constant 0 : index
    %c0_559 = arith.constant 0 : index
    %836 = vector.load %arg9[%c0_558, %c0_559] : memref<32x32xf32, #tpu.memory_space<vmem>>, vector<32x32xf32>
    %cst_560 = arith.constant dense<0.000000e+00> : vector<2x32xf32>
    %837 = tpu.matmul %832, %836, %cst_560 {dimension_numbers = #tpu.dot_dimension_numbers<[1], [0], [0], [1], [0, 0, 1, 1], [], []>} : vector<2x32xf32>, vector<32x32xf32>, vector<2x32xf32> -> vector<2x32xf32>
    %c0_561 = arith.constant 0 : index
    %c0_562 = arith.constant 0 : index
    %838 = vector.load %arg32[%c0_561, %c0_562] : memref<2x32xf32, #tpu.memory_space<vmem>>, vector<2x32xf32>
    %c0_563 = arith.constant 0 : index
    %c0_564 = arith.constant 0 : index
    %839 = vector.load %arg10[%c0_563, %c0_564] : memref<32x32xf32, #tpu.memory_space<vmem>>, vector<32x32xf32>
    %cst_565 = arith.constant dense<0.000000e+00> : vector<2x32xf32>
    %840 = tpu.matmul %838, %839, %cst_565 {dimension_numbers = #tpu.dot_dimension_numbers<[1], [0], [0], [1], [0, 0, 1, 1], [], []>} : vector<2x32xf32>, vector<32x32xf32>, vector<2x32xf32> -> vector<2x32xf32>
    %841 = arith.addf %837, %840 : vector<2x32xf32>
    %c0_566 = arith.constant 0 : index
    %c0_567 = arith.constant 0 : index
    %842 = vector.load %arg11[%c0_566, %c0_567] : memref<1x32xf32, #tpu.memory_space<vmem>>, vector<1x32xf32>
    %843 = vector.broadcast %842 : vector<1x32xf32> to vector<2x32xf32>
    %844 = arith.addf %841, %843 : vector<2x32xf32>
    %c0_568 = arith.constant 0 : index
    %c0_569 = arith.constant 0 : index
    %845 = vector.load %arg31[%c0_568, %c0_569] : memref<2x32xf32, #tpu.memory_space<vmem>>, vector<2x32xf32>
    %c0_570 = arith.constant 0 : index
    %c0_571 = arith.constant 0 : index
    %846 = vector.load %arg32[%c0_570, %c0_571] : memref<2x32xf32, #tpu.memory_space<vmem>>, vector<2x32xf32>
    %c0_572 = arith.constant 0 : index
    %c0_573 = arith.constant 0 : index
    %847 = vector.load %arg33[%c0_572, %c0_573] : memref<2x32xf32, #tpu.memory_space<vmem>>, vector<2x32xf32>
    %cst_574 = arith.constant 0.998334705 : f32
    %848 = vector.broadcast %cst_574 : f32 to vector<2x32xf32>
    %849 = arith.mulf %848, %847 : vector<2x32xf32>
    %cst_575 = arith.constant 0.00166527857 : f32
    %850 = vector.broadcast %cst_575 : f32 to vector<2x32xf32>
    %851 = arith.mulf %850, %846 : vector<2x32xf32>
    %852 = arith.addf %849, %851 : vector<2x32xf32>
    %cst_576 = arith.constant 1.800000e+00 : f32
    %853 = vector.broadcast %cst_576 : f32 to vector<2x32xf32>
    %854 = arith.mulf %853, %852 : vector<2x32xf32>
    %cst_577 = arith.constant 0.00999999977 : f32
    %855 = vector.broadcast %cst_577 : f32 to vector<2x32xf32>
    %856 = arith.addf %855, %854 : vector<2x32xf32>
    %cst_578 = arith.constant 0.951229453 : f32
    %857 = vector.broadcast %cst_578 : f32 to vector<2x32xf32>
    %858 = arith.mulf %845, %857 : vector<2x32xf32>
    %859 = arith.addf %858, %844 : vector<2x32xf32>
    %860 = arith.mulf %856, %846 : vector<2x32xf32>
    %cst_579 = arith.constant 1.000000e+00 : f32
    %861 = vector.broadcast %cst_579 : f32 to vector<2x32xf32>
    %862 = arith.mulf %860, %861 : vector<2x32xf32>
    %863 = arith.subf %859, %862 : vector<2x32xf32>
    %cst_580 = arith.constant 0.000000e+00 : f32
    %864 = vector.broadcast %cst_580 : f32 to vector<1x32xf32>
    %865 = arith.cmpf oeq, %751, %864 : vector<1x32xf32>
    %866 = vector.shape_cast %865 : vector<1x32xi1> to vector<1x32xi1>
    %867 = vector.broadcast %866 : vector<1x32xi1> to vector<2x32xi1>
    %868 = arith.select %867, %845, %863 : vector<2x32xi1>, vector<2x32xf32>
    %869 = arith.subf %868, %856 : vector<2x32xf32>
    %cst_581 = arith.constant 0.000000e+00 : f32
    %870 = vector.broadcast %cst_581 : f32 to vector<2x32xf32>
    %871 = arith.cmpf ogt, %869, %870 : vector<2x32xf32>
    %872 = arith.extui %871 : vector<2x32xi1> to vector<2x32xi32>
    %873 = arith.sitofp %872 : vector<2x32xi32> to vector<2x32xf32>
    %874 = vector.broadcast %751 : vector<1x32xf32> to vector<2x32xf32>
    %875 = arith.mulf %873, %874 : vector<2x32xf32>
    %c0_582 = arith.constant 0 : index
    %c0_583 = arith.constant 0 : index
    %876 = vector.load %arg31[%c0_582, %c0_583] : memref<2x32xf32, #tpu.memory_space<vmem>>, vector<2x32xf32>
    tpu.vector_store %arg31[%c0_582, %c0_583], %868 {strides = array<i32>} : memref<2x32xf32, #tpu.memory_space<vmem>>, vector<2x32xf32>,
    %c0_584 = arith.constant 0 : index
    %c0_585 = arith.constant 0 : index
    %877 = vector.load %arg32[%c0_584, %c0_585] : memref<2x32xf32, #tpu.memory_space<vmem>>, vector<2x32xf32>
    tpu.vector_store %arg32[%c0_584, %c0_585], %875 {strides = array<i32>} : memref<2x32xf32, #tpu.memory_space<vmem>>, vector<2x32xf32>,
    %c0_586 = arith.constant 0 : index
    %c0_587 = arith.constant 0 : index
    %878 = vector.load %arg33[%c0_586, %c0_587] : memref<2x32xf32, #tpu.memory_space<vmem>>, vector<2x32xf32>
    tpu.vector_store %arg33[%c0_586, %c0_587], %852 {strides = array<i32>} : memref<2x32xf32, #tpu.memory_space<vmem>>, vector<2x32xf32>,
    %879 = arith.index_cast %c5_i32 : i32 to index
    %c0_588 = arith.constant 0 : index
    %c0_589 = arith.constant 0 : index
    %880 = vector.load %arg12[%879, %c0_588, %c0_589] : memref<8x2x32xf32, #tpu.memory_space<vmem>>, vector<1x2x32xf32>
    %881 = vector.shape_cast %880 : vector<1x2x32xf32> to vector<2x32xf32>
    %882 = vector.shape_cast %875 : vector<2x32xf32> to vector<1x2x32xf32>
    tpu.vector_store %arg12[%879, %c0_588, %c0_589], %882 {strides = array<i32>} : memref<8x2x32xf32, #tpu.memory_space<vmem>>, vector<1x2x32xf32>,
    %883 = arith.index_cast %c5_i32 : i32 to index
    %c0_590 = arith.constant 0 : index
    %c0_591 = arith.constant 0 : index
    %884 = vector.load %arg13[%883, %c0_590, %c0_591] : memref<8x2x32xf32, #tpu.memory_space<vmem>>, vector<1x2x32xf32>
    %885 = vector.shape_cast %884 : vector<1x2x32xf32> to vector<2x32xf32>
    %886 = vector.shape_cast %868 : vector<2x32xf32> to vector<1x2x32xf32>
    tpu.vector_store %arg13[%883, %c0_590, %c0_591], %886 {strides = array<i32>} : memref<8x2x32xf32, #tpu.memory_space<vmem>>, vector<1x2x32xf32>,
    %887 = arith.index_cast %c5_i32 : i32 to index
    %c0_592 = arith.constant 0 : index
    %c0_593 = arith.constant 0 : index
    %888 = vector.load %arg14[%887, %c0_592, %c0_593] : memref<8x2x32xf32, #tpu.memory_space<vmem>>, vector<1x2x32xf32>
    %889 = vector.shape_cast %888 : vector<1x2x32xf32> to vector<2x32xf32>
    %890 = vector.shape_cast %856 : vector<2x32xf32> to vector<1x2x32xf32>
    tpu.vector_store %arg14[%887, %c0_592, %c0_593], %890 {strides = array<i32>} : memref<8x2x32xf32, #tpu.memory_space<vmem>>, vector<1x2x32xf32>,
    %c6_i32 = arith.constant 6 : i32
    %891 = arith.index_cast %c6_i32 : i32 to index
    %c0_594 = arith.constant 0 : index
    %c0_595 = arith.constant 0 : index
    %892 = vector.load %arg2[%891, %c0_594, %c0_595] : memref<8x1x32xf32, #tpu.memory_space<vmem>>, vector<1x1x32xf32>
    %893 = vector.shape_cast %892 : vector<1x1x32xf32> to vector<1x32xf32>
    %894 = arith.index_cast %c6_i32 : i32 to index
    %c0_596 = arith.constant 0 : index
    %c0_597 = arith.constant 0 : index
    %895 = vector.load %arg3[%894, %c0_596, %c0_597] : memref<8x1x32xf32, #tpu.memory_space<vmem>>, vector<1x1x32xf32>
    %896 = vector.shape_cast %895 : vector<1x1x32xf32> to vector<1x32xf32>
    %897 = arith.index_cast %c6_i32 : i32 to index
    %c0_598 = arith.constant 0 : index
    %c0_599 = arith.constant 0 : index
    %898 = vector.load %arg4[%897, %c0_598, %c0_599] : memref<8x1x32xf32, #tpu.memory_space<vmem>>, vector<1x1x32xf32>
    %899 = vector.shape_cast %898 : vector<1x1x32xf32> to vector<1x32xf32>
    %900 = arith.index_cast %c6_i32 : i32 to index
    %c0_600 = arith.constant 0 : index
    %c0_601 = arith.constant 0 : index
    %901 = vector.load %arg1[%900, %c0_600, %c0_601] : memref<8x2x32xf32, #tpu.memory_space<vmem>>, vector<1x2x32xf32>
    %902 = vector.shape_cast %901 : vector<1x2x32xf32> to vector<2x32xf32>
    %c0_602 = arith.constant 0 : index
    %c0_603 = arith.constant 0 : index
    %903 = vector.load %arg26[%c0_602, %c0_603] : memref<2x32xf32, #tpu.memory_space<vmem>>, vector<2x32xf32>
    %c0_604 = arith.constant 0 : index
    %c0_605 = arith.constant 0 : index
    %904 = vector.load %arg5[%c0_604, %c0_605] : memref<32x32xf32, #tpu.memory_space<vmem>>, vector<32x32xf32>
    %cst_606 = arith.constant dense<0.000000e+00> : vector<2x32xf32>
    %905 = tpu.matmul %903, %904, %cst_606 {dimension_numbers = #tpu.dot_dimension_numbers<[1], [0], [0], [1], [0, 0, 1, 1], [], []>} : vector<2x32xf32>, vector<32x32xf32>, vector<2x32xf32> -> vector<2x32xf32>
    %906 = arith.addf %902, %905 : vector<2x32xf32>
    %c0_607 = arith.constant 0 : index
    %c0_608 = arith.constant 0 : index
    %907 = vector.load %arg25[%c0_607, %c0_608] : memref<2x32xf32, #tpu.memory_space<vmem>>, vector<2x32xf32>
    %c0_609 = arith.constant 0 : index
    %c0_610 = arith.constant 0 : index
    %908 = vector.load %arg26[%c0_609, %c0_610] : memref<2x32xf32, #tpu.memory_space<vmem>>, vector<2x32xf32>
    %c0_611 = arith.constant 0 : index
    %c0_612 = arith.constant 0 : index
    %909 = vector.load %arg27[%c0_611, %c0_612] : memref<2x32xf32, #tpu.memory_space<vmem>>, vector<2x32xf32>
    %cst_613 = arith.constant 0.998334705 : f32
    %910 = vector.broadcast %cst_613 : f32 to vector<2x32xf32>
    %911 = arith.mulf %910, %909 : vector<2x32xf32>
    %cst_614 = arith.constant 0.00166527857 : f32
    %912 = vector.broadcast %cst_614 : f32 to vector<2x32xf32>
    %913 = arith.mulf %912, %908 : vector<2x32xf32>
    %914 = arith.addf %911, %913 : vector<2x32xf32>
    %cst_615 = arith.constant 1.800000e+00 : f32
    %915 = vector.broadcast %cst_615 : f32 to vector<2x32xf32>
    %916 = arith.mulf %915, %914 : vector<2x32xf32>
    %cst_616 = arith.constant 0.00999999977 : f32
    %917 = vector.broadcast %cst_616 : f32 to vector<2x32xf32>
    %918 = arith.addf %917, %916 : vector<2x32xf32>
    %cst_617 = arith.constant 0.951229453 : f32
    %919 = vector.broadcast %cst_617 : f32 to vector<2x32xf32>
    %920 = arith.mulf %907, %919 : vector<2x32xf32>
    %921 = arith.addf %920, %906 : vector<2x32xf32>
    %922 = arith.mulf %918, %908 : vector<2x32xf32>
    %cst_618 = arith.constant 1.000000e+00 : f32
    %923 = vector.broadcast %cst_618 : f32 to vector<2x32xf32>
    %924 = arith.mulf %922, %923 : vector<2x32xf32>
    %925 = arith.subf %921, %924 : vector<2x32xf32>
    %cst_619 = arith.constant 0.000000e+00 : f32
    %926 = vector.broadcast %cst_619 : f32 to vector<1x32xf32>
    %927 = arith.cmpf oeq, %893, %926 : vector<1x32xf32>
    %928 = vector.shape_cast %927 : vector<1x32xi1> to vector<1x32xi1>
    %929 = vector.broadcast %928 : vector<1x32xi1> to vector<2x32xi1>
    %930 = arith.select %929, %907, %925 : vector<2x32xi1>, vector<2x32xf32>
    %931 = arith.subf %930, %918 : vector<2x32xf32>
    %cst_620 = arith.constant 0.000000e+00 : f32
    %932 = vector.broadcast %cst_620 : f32 to vector<2x32xf32>
    %933 = arith.cmpf ogt, %931, %932 : vector<2x32xf32>
    %934 = arith.extui %933 : vector<2x32xi1> to vector<2x32xi32>
    %935 = arith.sitofp %934 : vector<2x32xi32> to vector<2x32xf32>
    %936 = vector.broadcast %893 : vector<1x32xf32> to vector<2x32xf32>
    %937 = arith.mulf %935, %936 : vector<2x32xf32>
    %c0_621 = arith.constant 0 : index
    %c0_622 = arith.constant 0 : index
    %938 = vector.load %arg25[%c0_621, %c0_622] : memref<2x32xf32, #tpu.memory_space<vmem>>, vector<2x32xf32>
    tpu.vector_store %arg25[%c0_621, %c0_622], %930 {strides = array<i32>} : memref<2x32xf32, #tpu.memory_space<vmem>>, vector<2x32xf32>,
    %c0_623 = arith.constant 0 : index
    %c0_624 = arith.constant 0 : index
    %939 = vector.load %arg26[%c0_623, %c0_624] : memref<2x32xf32, #tpu.memory_space<vmem>>, vector<2x32xf32>
    tpu.vector_store %arg26[%c0_623, %c0_624], %937 {strides = array<i32>} : memref<2x32xf32, #tpu.memory_space<vmem>>, vector<2x32xf32>,
    %c0_625 = arith.constant 0 : index
    %c0_626 = arith.constant 0 : index
    %940 = vector.load %arg27[%c0_625, %c0_626] : memref<2x32xf32, #tpu.memory_space<vmem>>, vector<2x32xf32>
    tpu.vector_store %arg27[%c0_625, %c0_626], %914 {strides = array<i32>} : memref<2x32xf32, #tpu.memory_space<vmem>>, vector<2x32xf32>,
    %c0_627 = arith.constant 0 : index
    %c0_628 = arith.constant 0 : index
    %941 = vector.load %arg6[%c0_627, %c0_628] : memref<32x32xf32, #tpu.memory_space<vmem>>, vector<32x32xf32>
    %cst_629 = arith.constant dense<0.000000e+00> : vector<2x32xf32>
    %942 = tpu.matmul %937, %941, %cst_629 {dimension_numbers = #tpu.dot_dimension_numbers<[1], [0], [0], [1], [0, 0, 1, 1], [], []>} : vector<2x32xf32>, vector<32x32xf32>, vector<2x32xf32> -> vector<2x32xf32>
    %c0_630 = arith.constant 0 : index
    %c0_631 = arith.constant 0 : index
    %943 = vector.load %arg29[%c0_630, %c0_631] : memref<2x32xf32, #tpu.memory_space<vmem>>, vector<2x32xf32>
    %c0_632 = arith.constant 0 : index
    %c0_633 = arith.constant 0 : index
    %944 = vector.load %arg7[%c0_632, %c0_633] : memref<32x32xf32, #tpu.memory_space<vmem>>, vector<32x32xf32>
    %cst_634 = arith.constant dense<0.000000e+00> : vector<2x32xf32>
    %945 = tpu.matmul %943, %944, %cst_634 {dimension_numbers = #tpu.dot_dimension_numbers<[1], [0], [0], [1], [0, 0, 1, 1], [], []>} : vector<2x32xf32>, vector<32x32xf32>, vector<2x32xf32> -> vector<2x32xf32>
    %946 = arith.addf %942, %945 : vector<2x32xf32>
    %c0_635 = arith.constant 0 : index
    %c0_636 = arith.constant 0 : index
    %947 = vector.load %arg8[%c0_635, %c0_636] : memref<1x32xf32, #tpu.memory_space<vmem>>, vector<1x32xf32>
    %948 = vector.broadcast %947 : vector<1x32xf32> to vector<2x32xf32>
    %949 = arith.addf %946, %948 : vector<2x32xf32>
    %c0_637 = arith.constant 0 : index
    %c0_638 = arith.constant 0 : index
    %950 = vector.load %arg28[%c0_637, %c0_638] : memref<2x32xf32, #tpu.memory_space<vmem>>, vector<2x32xf32>
    %c0_639 = arith.constant 0 : index
    %c0_640 = arith.constant 0 : index
    %951 = vector.load %arg29[%c0_639, %c0_640] : memref<2x32xf32, #tpu.memory_space<vmem>>, vector<2x32xf32>
    %c0_641 = arith.constant 0 : index
    %c0_642 = arith.constant 0 : index
    %952 = vector.load %arg30[%c0_641, %c0_642] : memref<2x32xf32, #tpu.memory_space<vmem>>, vector<2x32xf32>
    %cst_643 = arith.constant 0.998334705 : f32
    %953 = vector.broadcast %cst_643 : f32 to vector<2x32xf32>
    %954 = arith.mulf %953, %952 : vector<2x32xf32>
    %cst_644 = arith.constant 0.00166527857 : f32
    %955 = vector.broadcast %cst_644 : f32 to vector<2x32xf32>
    %956 = arith.mulf %955, %951 : vector<2x32xf32>
    %957 = arith.addf %954, %956 : vector<2x32xf32>
    %cst_645 = arith.constant 1.800000e+00 : f32
    %958 = vector.broadcast %cst_645 : f32 to vector<2x32xf32>
    %959 = arith.mulf %958, %957 : vector<2x32xf32>
    %cst_646 = arith.constant 0.00999999977 : f32
    %960 = vector.broadcast %cst_646 : f32 to vector<2x32xf32>
    %961 = arith.addf %960, %959 : vector<2x32xf32>
    %cst_647 = arith.constant 0.951229453 : f32
    %962 = vector.broadcast %cst_647 : f32 to vector<2x32xf32>
    %963 = arith.mulf %950, %962 : vector<2x32xf32>
    %964 = arith.addf %963, %949 : vector<2x32xf32>
    %965 = arith.mulf %961, %951 : vector<2x32xf32>
    %cst_648 = arith.constant 1.000000e+00 : f32
    %966 = vector.broadcast %cst_648 : f32 to vector<2x32xf32>
    %967 = arith.mulf %965, %966 : vector<2x32xf32>
    %968 = arith.subf %964, %967 : vector<2x32xf32>
    %cst_649 = arith.constant 0.000000e+00 : f32
    %969 = vector.broadcast %cst_649 : f32 to vector<1x32xf32>
    %970 = arith.cmpf oeq, %896, %969 : vector<1x32xf32>
    %971 = vector.shape_cast %970 : vector<1x32xi1> to vector<1x32xi1>
    %972 = vector.broadcast %971 : vector<1x32xi1> to vector<2x32xi1>
    %973 = arith.select %972, %950, %968 : vector<2x32xi1>, vector<2x32xf32>
    %974 = arith.subf %973, %961 : vector<2x32xf32>
    %cst_650 = arith.constant 0.000000e+00 : f32
    %975 = vector.broadcast %cst_650 : f32 to vector<2x32xf32>
    %976 = arith.cmpf ogt, %974, %975 : vector<2x32xf32>
    %977 = arith.extui %976 : vector<2x32xi1> to vector<2x32xi32>
    %978 = arith.sitofp %977 : vector<2x32xi32> to vector<2x32xf32>
    %979 = vector.broadcast %896 : vector<1x32xf32> to vector<2x32xf32>
    %980 = arith.mulf %978, %979 : vector<2x32xf32>
    %c0_651 = arith.constant 0 : index
    %c0_652 = arith.constant 0 : index
    %981 = vector.load %arg28[%c0_651, %c0_652] : memref<2x32xf32, #tpu.memory_space<vmem>>, vector<2x32xf32>
    tpu.vector_store %arg28[%c0_651, %c0_652], %973 {strides = array<i32>} : memref<2x32xf32, #tpu.memory_space<vmem>>, vector<2x32xf32>,
    %c0_653 = arith.constant 0 : index
    %c0_654 = arith.constant 0 : index
    %982 = vector.load %arg29[%c0_653, %c0_654] : memref<2x32xf32, #tpu.memory_space<vmem>>, vector<2x32xf32>
    tpu.vector_store %arg29[%c0_653, %c0_654], %980 {strides = array<i32>} : memref<2x32xf32, #tpu.memory_space<vmem>>, vector<2x32xf32>,
    %c0_655 = arith.constant 0 : index
    %c0_656 = arith.constant 0 : index
    %983 = vector.load %arg30[%c0_655, %c0_656] : memref<2x32xf32, #tpu.memory_space<vmem>>, vector<2x32xf32>
    tpu.vector_store %arg30[%c0_655, %c0_656], %957 {strides = array<i32>} : memref<2x32xf32, #tpu.memory_space<vmem>>, vector<2x32xf32>,
    %c0_657 = arith.constant 0 : index
    %c0_658 = arith.constant 0 : index
    %984 = vector.load %arg9[%c0_657, %c0_658] : memref<32x32xf32, #tpu.memory_space<vmem>>, vector<32x32xf32>
    %cst_659 = arith.constant dense<0.000000e+00> : vector<2x32xf32>
    %985 = tpu.matmul %980, %984, %cst_659 {dimension_numbers = #tpu.dot_dimension_numbers<[1], [0], [0], [1], [0, 0, 1, 1], [], []>} : vector<2x32xf32>, vector<32x32xf32>, vector<2x32xf32> -> vector<2x32xf32>
    %c0_660 = arith.constant 0 : index
    %c0_661 = arith.constant 0 : index
    %986 = vector.load %arg32[%c0_660, %c0_661] : memref<2x32xf32, #tpu.memory_space<vmem>>, vector<2x32xf32>
    %c0_662 = arith.constant 0 : index
    %c0_663 = arith.constant 0 : index
    %987 = vector.load %arg10[%c0_662, %c0_663] : memref<32x32xf32, #tpu.memory_space<vmem>>, vector<32x32xf32>
    %cst_664 = arith.constant dense<0.000000e+00> : vector<2x32xf32>
    %988 = tpu.matmul %986, %987, %cst_664 {dimension_numbers = #tpu.dot_dimension_numbers<[1], [0], [0], [1], [0, 0, 1, 1], [], []>} : vector<2x32xf32>, vector<32x32xf32>, vector<2x32xf32> -> vector<2x32xf32>
    %989 = arith.addf %985, %988 : vector<2x32xf32>
    %c0_665 = arith.constant 0 : index
    %c0_666 = arith.constant 0 : index
    %990 = vector.load %arg11[%c0_665, %c0_666] : memref<1x32xf32, #tpu.memory_space<vmem>>, vector<1x32xf32>
    %991 = vector.broadcast %990 : vector<1x32xf32> to vector<2x32xf32>
    %992 = arith.addf %989, %991 : vector<2x32xf32>
    %c0_667 = arith.constant 0 : index
    %c0_668 = arith.constant 0 : index
    %993 = vector.load %arg31[%c0_667, %c0_668] : memref<2x32xf32, #tpu.memory_space<vmem>>, vector<2x32xf32>
    %c0_669 = arith.constant 0 : index
    %c0_670 = arith.constant 0 : index
    %994 = vector.load %arg32[%c0_669, %c0_670] : memref<2x32xf32, #tpu.memory_space<vmem>>, vector<2x32xf32>
    %c0_671 = arith.constant 0 : index
    %c0_672 = arith.constant 0 : index
    %995 = vector.load %arg33[%c0_671, %c0_672] : memref<2x32xf32, #tpu.memory_space<vmem>>, vector<2x32xf32>
    %cst_673 = arith.constant 0.998334705 : f32
    %996 = vector.broadcast %cst_673 : f32 to vector<2x32xf32>
    %997 = arith.mulf %996, %995 : vector<2x32xf32>
    %cst_674 = arith.constant 0.00166527857 : f32
    %998 = vector.broadcast %cst_674 : f32 to vector<2x32xf32>
    %999 = arith.mulf %998, %994 : vector<2x32xf32>
    %1000 = arith.addf %997, %999 : vector<2x32xf32>
    %cst_675 = arith.constant 1.800000e+00 : f32
    %1001 = vector.broadcast %cst_675 : f32 to vector<2x32xf32>
    %1002 = arith.mulf %1001, %1000 : vector<2x32xf32>
    %cst_676 = arith.constant 0.00999999977 : f32
    %1003 = vector.broadcast %cst_676 : f32 to vector<2x32xf32>
    %1004 = arith.addf %1003, %1002 : vector<2x32xf32>
    %cst_677 = arith.constant 0.951229453 : f32
    %1005 = vector.broadcast %cst_677 : f32 to vector<2x32xf32>
    %1006 = arith.mulf %993, %1005 : vector<2x32xf32>
    %1007 = arith.addf %1006, %992 : vector<2x32xf32>
    %1008 = arith.mulf %1004, %994 : vector<2x32xf32>
    %cst_678 = arith.constant 1.000000e+00 : f32
    %1009 = vector.broadcast %cst_678 : f32 to vector<2x32xf32>
    %1010 = arith.mulf %1008, %1009 : vector<2x32xf32>
    %1011 = arith.subf %1007, %1010 : vector<2x32xf32>
    %cst_679 = arith.constant 0.000000e+00 : f32
    %1012 = vector.broadcast %cst_679 : f32 to vector<1x32xf32>
    %1013 = arith.cmpf oeq, %899, %1012 : vector<1x32xf32>
    %1014 = vector.shape_cast %1013 : vector<1x32xi1> to vector<1x32xi1>
    %1015 = vector.broadcast %1014 : vector<1x32xi1> to vector<2x32xi1>
    %1016 = arith.select %1015, %993, %1011 : vector<2x32xi1>, vector<2x32xf32>
    %1017 = arith.subf %1016, %1004 : vector<2x32xf32>
    %cst_680 = arith.constant 0.000000e+00 : f32
    %1018 = vector.broadcast %cst_680 : f32 to vector<2x32xf32>
    %1019 = arith.cmpf ogt, %1017, %1018 : vector<2x32xf32>
    %1020 = arith.extui %1019 : vector<2x32xi1> to vector<2x32xi32>
    %1021 = arith.sitofp %1020 : vector<2x32xi32> to vector<2x32xf32>
    %1022 = vector.broadcast %899 : vector<1x32xf32> to vector<2x32xf32>
    %1023 = arith.mulf %1021, %1022 : vector<2x32xf32>
    %c0_681 = arith.constant 0 : index
    %c0_682 = arith.constant 0 : index
    %1024 = vector.load %arg31[%c0_681, %c0_682] : memref<2x32xf32, #tpu.memory_space<vmem>>, vector<2x32xf32>
    tpu.vector_store %arg31[%c0_681, %c0_682], %1016 {strides = array<i32>} : memref<2x32xf32, #tpu.memory_space<vmem>>, vector<2x32xf32>,
    %c0_683 = arith.constant 0 : index
    %c0_684 = arith.constant 0 : index
    %1025 = vector.load %arg32[%c0_683, %c0_684] : memref<2x32xf32, #tpu.memory_space<vmem>>, vector<2x32xf32>
    tpu.vector_store %arg32[%c0_683, %c0_684], %1023 {strides = array<i32>} : memref<2x32xf32, #tpu.memory_space<vmem>>, vector<2x32xf32>,
    %c0_685 = arith.constant 0 : index
    %c0_686 = arith.constant 0 : index
    %1026 = vector.load %arg33[%c0_685, %c0_686] : memref<2x32xf32, #tpu.memory_space<vmem>>, vector<2x32xf32>
    tpu.vector_store %arg33[%c0_685, %c0_686], %1000 {strides = array<i32>} : memref<2x32xf32, #tpu.memory_space<vmem>>, vector<2x32xf32>,
    %1027 = arith.index_cast %c6_i32 : i32 to index
    %c0_687 = arith.constant 0 : index
    %c0_688 = arith.constant 0 : index
    %1028 = vector.load %arg12[%1027, %c0_687, %c0_688] : memref<8x2x32xf32, #tpu.memory_space<vmem>>, vector<1x2x32xf32>
    %1029 = vector.shape_cast %1028 : vector<1x2x32xf32> to vector<2x32xf32>
    %1030 = vector.shape_cast %1023 : vector<2x32xf32> to vector<1x2x32xf32>
    tpu.vector_store %arg12[%1027, %c0_687, %c0_688], %1030 {strides = array<i32>} : memref<8x2x32xf32, #tpu.memory_space<vmem>>, vector<1x2x32xf32>,
    %1031 = arith.index_cast %c6_i32 : i32 to index
    %c0_689 = arith.constant 0 : index
    %c0_690 = arith.constant 0 : index
    %1032 = vector.load %arg13[%1031, %c0_689, %c0_690] : memref<8x2x32xf32, #tpu.memory_space<vmem>>, vector<1x2x32xf32>
    %1033 = vector.shape_cast %1032 : vector<1x2x32xf32> to vector<2x32xf32>
    %1034 = vector.shape_cast %1016 : vector<2x32xf32> to vector<1x2x32xf32>
    tpu.vector_store %arg13[%1031, %c0_689, %c0_690], %1034 {strides = array<i32>} : memref<8x2x32xf32, #tpu.memory_space<vmem>>, vector<1x2x32xf32>,
    %1035 = arith.index_cast %c6_i32 : i32 to index
    %c0_691 = arith.constant 0 : index
    %c0_692 = arith.constant 0 : index
    %1036 = vector.load %arg14[%1035, %c0_691, %c0_692] : memref<8x2x32xf32, #tpu.memory_space<vmem>>, vector<1x2x32xf32>
    %1037 = vector.shape_cast %1036 : vector<1x2x32xf32> to vector<2x32xf32>
    %1038 = vector.shape_cast %1004 : vector<2x32xf32> to vector<1x2x32xf32>
    tpu.vector_store %arg14[%1035, %c0_691, %c0_692], %1038 {strides = array<i32>} : memref<8x2x32xf32, #tpu.memory_space<vmem>>, vector<1x2x32xf32>,
    %c7_i32 = arith.constant 7 : i32
    %1039 = arith.index_cast %c7_i32 : i32 to index
    %c0_693 = arith.constant 0 : index
    %c0_694 = arith.constant 0 : index
    %1040 = vector.load %arg2[%1039, %c0_693, %c0_694] : memref<8x1x32xf32, #tpu.memory_space<vmem>>, vector<1x1x32xf32>
    %1041 = vector.shape_cast %1040 : vector<1x1x32xf32> to vector<1x32xf32>
    %1042 = arith.index_cast %c7_i32 : i32 to index
    %c0_695 = arith.constant 0 : index
    %c0_696 = arith.constant 0 : index
    %1043 = vector.load %arg3[%1042, %c0_695, %c0_696] : memref<8x1x32xf32, #tpu.memory_space<vmem>>, vector<1x1x32xf32>
    %1044 = vector.shape_cast %1043 : vector<1x1x32xf32> to vector<1x32xf32>
    %1045 = arith.index_cast %c7_i32 : i32 to index
    %c0_697 = arith.constant 0 : index
    %c0_698 = arith.constant 0 : index
    %1046 = vector.load %arg4[%1045, %c0_697, %c0_698] : memref<8x1x32xf32, #tpu.memory_space<vmem>>, vector<1x1x32xf32>
    %1047 = vector.shape_cast %1046 : vector<1x1x32xf32> to vector<1x32xf32>
    %1048 = arith.index_cast %c7_i32 : i32 to index
    %c0_699 = arith.constant 0 : index
    %c0_700 = arith.constant 0 : index
    %1049 = vector.load %arg1[%1048, %c0_699, %c0_700] : memref<8x2x32xf32, #tpu.memory_space<vmem>>, vector<1x2x32xf32>
    %1050 = vector.shape_cast %1049 : vector<1x2x32xf32> to vector<2x32xf32>
    %c0_701 = arith.constant 0 : index
    %c0_702 = arith.constant 0 : index
    %1051 = vector.load %arg26[%c0_701, %c0_702] : memref<2x32xf32, #tpu.memory_space<vmem>>, vector<2x32xf32>
    %c0_703 = arith.constant 0 : index
    %c0_704 = arith.constant 0 : index
    %1052 = vector.load %arg5[%c0_703, %c0_704] : memref<32x32xf32, #tpu.memory_space<vmem>>, vector<32x32xf32>
    %cst_705 = arith.constant dense<0.000000e+00> : vector<2x32xf32>
    %1053 = tpu.matmul %1051, %1052, %cst_705 {dimension_numbers = #tpu.dot_dimension_numbers<[1], [0], [0], [1], [0, 0, 1, 1], [], []>} : vector<2x32xf32>, vector<32x32xf32>, vector<2x32xf32> -> vector<2x32xf32>
    %1054 = arith.addf %1050, %1053 : vector<2x32xf32>
    %c0_706 = arith.constant 0 : index
    %c0_707 = arith.constant 0 : index
    %1055 = vector.load %arg25[%c0_706, %c0_707] : memref<2x32xf32, #tpu.memory_space<vmem>>, vector<2x32xf32>
    %c0_708 = arith.constant 0 : index
    %c0_709 = arith.constant 0 : index
    %1056 = vector.load %arg26[%c0_708, %c0_709] : memref<2x32xf32, #tpu.memory_space<vmem>>, vector<2x32xf32>
    %c0_710 = arith.constant 0 : index
    %c0_711 = arith.constant 0 : index
    %1057 = vector.load %arg27[%c0_710, %c0_711] : memref<2x32xf32, #tpu.memory_space<vmem>>, vector<2x32xf32>
    %cst_712 = arith.constant 0.998334705 : f32
    %1058 = vector.broadcast %cst_712 : f32 to vector<2x32xf32>
    %1059 = arith.mulf %1058, %1057 : vector<2x32xf32>
    %cst_713 = arith.constant 0.00166527857 : f32
    %1060 = vector.broadcast %cst_713 : f32 to vector<2x32xf32>
    %1061 = arith.mulf %1060, %1056 : vector<2x32xf32>
    %1062 = arith.addf %1059, %1061 : vector<2x32xf32>
    %cst_714 = arith.constant 1.800000e+00 : f32
    %1063 = vector.broadcast %cst_714 : f32 to vector<2x32xf32>
    %1064 = arith.mulf %1063, %1062 : vector<2x32xf32>
    %cst_715 = arith.constant 0.00999999977 : f32
    %1065 = vector.broadcast %cst_715 : f32 to vector<2x32xf32>
    %1066 = arith.addf %1065, %1064 : vector<2x32xf32>
    %cst_716 = arith.constant 0.951229453 : f32
    %1067 = vector.broadcast %cst_716 : f32 to vector<2x32xf32>
    %1068 = arith.mulf %1055, %1067 : vector<2x32xf32>
    %1069 = arith.addf %1068, %1054 : vector<2x32xf32>
    %1070 = arith.mulf %1066, %1056 : vector<2x32xf32>
    %cst_717 = arith.constant 1.000000e+00 : f32
    %1071 = vector.broadcast %cst_717 : f32 to vector<2x32xf32>
    %1072 = arith.mulf %1070, %1071 : vector<2x32xf32>
    %1073 = arith.subf %1069, %1072 : vector<2x32xf32>
    %cst_718 = arith.constant 0.000000e+00 : f32
    %1074 = vector.broadcast %cst_718 : f32 to vector<1x32xf32>
    %1075 = arith.cmpf oeq, %1041, %1074 : vector<1x32xf32>
    %1076 = vector.shape_cast %1075 : vector<1x32xi1> to vector<1x32xi1>
    %1077 = vector.broadcast %1076 : vector<1x32xi1> to vector<2x32xi1>
    %1078 = arith.select %1077, %1055, %1073 : vector<2x32xi1>, vector<2x32xf32>
    %1079 = arith.subf %1078, %1066 : vector<2x32xf32>
    %cst_719 = arith.constant 0.000000e+00 : f32
    %1080 = vector.broadcast %cst_719 : f32 to vector<2x32xf32>
    %1081 = arith.cmpf ogt, %1079, %1080 : vector<2x32xf32>
    %1082 = arith.extui %1081 : vector<2x32xi1> to vector<2x32xi32>
    %1083 = arith.sitofp %1082 : vector<2x32xi32> to vector<2x32xf32>
    %1084 = vector.broadcast %1041 : vector<1x32xf32> to vector<2x32xf32>
    %1085 = arith.mulf %1083, %1084 : vector<2x32xf32>
    %c0_720 = arith.constant 0 : index
    %c0_721 = arith.constant 0 : index
    %1086 = vector.load %arg25[%c0_720, %c0_721] : memref<2x32xf32, #tpu.memory_space<vmem>>, vector<2x32xf32>
    tpu.vector_store %arg25[%c0_720, %c0_721], %1078 {strides = array<i32>} : memref<2x32xf32, #tpu.memory_space<vmem>>, vector<2x32xf32>,
    %c0_722 = arith.constant 0 : index
    %c0_723 = arith.constant 0 : index
    %1087 = vector.load %arg26[%c0_722, %c0_723] : memref<2x32xf32, #tpu.memory_space<vmem>>, vector<2x32xf32>
    tpu.vector_store %arg26[%c0_722, %c0_723], %1085 {strides = array<i32>} : memref<2x32xf32, #tpu.memory_space<vmem>>, vector<2x32xf32>,
    %c0_724 = arith.constant 0 : index
    %c0_725 = arith.constant 0 : index
    %1088 = vector.load %arg27[%c0_724, %c0_725] : memref<2x32xf32, #tpu.memory_space<vmem>>, vector<2x32xf32>
    tpu.vector_store %arg27[%c0_724, %c0_725], %1062 {strides = array<i32>} : memref<2x32xf32, #tpu.memory_space<vmem>>, vector<2x32xf32>,
    %c0_726 = arith.constant 0 : index
    %c0_727 = arith.constant 0 : index
    %1089 = vector.load %arg6[%c0_726, %c0_727] : memref<32x32xf32, #tpu.memory_space<vmem>>, vector<32x32xf32>
    %cst_728 = arith.constant dense<0.000000e+00> : vector<2x32xf32>
    %1090 = tpu.matmul %1085, %1089, %cst_728 {dimension_numbers = #tpu.dot_dimension_numbers<[1], [0], [0], [1], [0, 0, 1, 1], [], []>} : vector<2x32xf32>, vector<32x32xf32>, vector<2x32xf32> -> vector<2x32xf32>
    %c0_729 = arith.constant 0 : index
    %c0_730 = arith.constant 0 : index
    %1091 = vector.load %arg29[%c0_729, %c0_730] : memref<2x32xf32, #tpu.memory_space<vmem>>, vector<2x32xf32>
    %c0_731 = arith.constant 0 : index
    %c0_732 = arith.constant 0 : index
    %1092 = vector.load %arg7[%c0_731, %c0_732] : memref<32x32xf32, #tpu.memory_space<vmem>>, vector<32x32xf32>
    %cst_733 = arith.constant dense<0.000000e+00> : vector<2x32xf32>
    %1093 = tpu.matmul %1091, %1092, %cst_733 {dimension_numbers = #tpu.dot_dimension_numbers<[1], [0], [0], [1], [0, 0, 1, 1], [], []>} : vector<2x32xf32>, vector<32x32xf32>, vector<2x32xf32> -> vector<2x32xf32>
    %1094 = arith.addf %1090, %1093 : vector<2x32xf32>
    %c0_734 = arith.constant 0 : index
    %c0_735 = arith.constant 0 : index
    %1095 = vector.load %arg8[%c0_734, %c0_735] : memref<1x32xf32, #tpu.memory_space<vmem>>, vector<1x32xf32>
    %1096 = vector.broadcast %1095 : vector<1x32xf32> to vector<2x32xf32>
    %1097 = arith.addf %1094, %1096 : vector<2x32xf32>
    %c0_736 = arith.constant 0 : index
    %c0_737 = arith.constant 0 : index
    %1098 = vector.load %arg28[%c0_736, %c0_737] : memref<2x32xf32, #tpu.memory_space<vmem>>, vector<2x32xf32>
    %c0_738 = arith.constant 0 : index
    %c0_739 = arith.constant 0 : index
    %1099 = vector.load %arg29[%c0_738, %c0_739] : memref<2x32xf32, #tpu.memory_space<vmem>>, vector<2x32xf32>
    %c0_740 = arith.constant 0 : index
    %c0_741 = arith.constant 0 : index
    %1100 = vector.load %arg30[%c0_740, %c0_741] : memref<2x32xf32, #tpu.memory_space<vmem>>, vector<2x32xf32>
    %cst_742 = arith.constant 0.998334705 : f32
    %1101 = vector.broadcast %cst_742 : f32 to vector<2x32xf32>
    %1102 = arith.mulf %1101, %1100 : vector<2x32xf32>
    %cst_743 = arith.constant 0.00166527857 : f32
    %1103 = vector.broadcast %cst_743 : f32 to vector<2x32xf32>
    %1104 = arith.mulf %1103, %1099 : vector<2x32xf32>
    %1105 = arith.addf %1102, %1104 : vector<2x32xf32>
    %cst_744 = arith.constant 1.800000e+00 : f32
    %1106 = vector.broadcast %cst_744 : f32 to vector<2x32xf32>
    %1107 = arith.mulf %1106, %1105 : vector<2x32xf32>
    %cst_745 = arith.constant 0.00999999977 : f32
    %1108 = vector.broadcast %cst_745 : f32 to vector<2x32xf32>
    %1109 = arith.addf %1108, %1107 : vector<2x32xf32>
    %cst_746 = arith.constant 0.951229453 : f32
    %1110 = vector.broadcast %cst_746 : f32 to vector<2x32xf32>
    %1111 = arith.mulf %1098, %1110 : vector<2x32xf32>
    %1112 = arith.addf %1111, %1097 : vector<2x32xf32>
    %1113 = arith.mulf %1109, %1099 : vector<2x32xf32>
    %cst_747 = arith.constant 1.000000e+00 : f32
    %1114 = vector.broadcast %cst_747 : f32 to vector<2x32xf32>
    %1115 = arith.mulf %1113, %1114 : vector<2x32xf32>
    %1116 = arith.subf %1112, %1115 : vector<2x32xf32>
    %cst_748 = arith.constant 0.000000e+00 : f32
    %1117 = vector.broadcast %cst_748 : f32 to vector<1x32xf32>
    %1118 = arith.cmpf oeq, %1044, %1117 : vector<1x32xf32>
    %1119 = vector.shape_cast %1118 : vector<1x32xi1> to vector<1x32xi1>
    %1120 = vector.broadcast %1119 : vector<1x32xi1> to vector<2x32xi1>
    %1121 = arith.select %1120, %1098, %1116 : vector<2x32xi1>, vector<2x32xf32>
    %1122 = arith.subf %1121, %1109 : vector<2x32xf32>
    %cst_749 = arith.constant 0.000000e+00 : f32
    %1123 = vector.broadcast %cst_749 : f32 to vector<2x32xf32>
    %1124 = arith.cmpf ogt, %1122, %1123 : vector<2x32xf32>
    %1125 = arith.extui %1124 : vector<2x32xi1> to vector<2x32xi32>
    %1126 = arith.sitofp %1125 : vector<2x32xi32> to vector<2x32xf32>
    %1127 = vector.broadcast %1044 : vector<1x32xf32> to vector<2x32xf32>
    %1128 = arith.mulf %1126, %1127 : vector<2x32xf32>
    %c0_750 = arith.constant 0 : index
    %c0_751 = arith.constant 0 : index
    %1129 = vector.load %arg28[%c0_750, %c0_751] : memref<2x32xf32, #tpu.memory_space<vmem>>, vector<2x32xf32>
    tpu.vector_store %arg28[%c0_750, %c0_751], %1121 {strides = array<i32>} : memref<2x32xf32, #tpu.memory_space<vmem>>, vector<2x32xf32>,
    %c0_752 = arith.constant 0 : index
    %c0_753 = arith.constant 0 : index
    %1130 = vector.load %arg29[%c0_752, %c0_753] : memref<2x32xf32, #tpu.memory_space<vmem>>, vector<2x32xf32>
    tpu.vector_store %arg29[%c0_752, %c0_753], %1128 {strides = array<i32>} : memref<2x32xf32, #tpu.memory_space<vmem>>, vector<2x32xf32>,
    %c0_754 = arith.constant 0 : index
    %c0_755 = arith.constant 0 : index
    %1131 = vector.load %arg30[%c0_754, %c0_755] : memref<2x32xf32, #tpu.memory_space<vmem>>, vector<2x32xf32>
    tpu.vector_store %arg30[%c0_754, %c0_755], %1105 {strides = array<i32>} : memref<2x32xf32, #tpu.memory_space<vmem>>, vector<2x32xf32>,
    %c0_756 = arith.constant 0 : index
    %c0_757 = arith.constant 0 : index
    %1132 = vector.load %arg9[%c0_756, %c0_757] : memref<32x32xf32, #tpu.memory_space<vmem>>, vector<32x32xf32>
    %cst_758 = arith.constant dense<0.000000e+00> : vector<2x32xf32>
    %1133 = tpu.matmul %1128, %1132, %cst_758 {dimension_numbers = #tpu.dot_dimension_numbers<[1], [0], [0], [1], [0, 0, 1, 1], [], []>} : vector<2x32xf32>, vector<32x32xf32>, vector<2x32xf32> -> vector<2x32xf32>
    %c0_759 = arith.constant 0 : index
    %c0_760 = arith.constant 0 : index
    %1134 = vector.load %arg32[%c0_759, %c0_760] : memref<2x32xf32, #tpu.memory_space<vmem>>, vector<2x32xf32>
    %c0_761 = arith.constant 0 : index
    %c0_762 = arith.constant 0 : index
    %1135 = vector.load %arg10[%c0_761, %c0_762] : memref<32x32xf32, #tpu.memory_space<vmem>>, vector<32x32xf32>
    %cst_763 = arith.constant dense<0.000000e+00> : vector<2x32xf32>
    %1136 = tpu.matmul %1134, %1135, %cst_763 {dimension_numbers = #tpu.dot_dimension_numbers<[1], [0], [0], [1], [0, 0, 1, 1], [], []>} : vector<2x32xf32>, vector<32x32xf32>, vector<2x32xf32> -> vector<2x32xf32>
    %1137 = arith.addf %1133, %1136 : vector<2x32xf32>
    %c0_764 = arith.constant 0 : index
    %c0_765 = arith.constant 0 : index
    %1138 = vector.load %arg11[%c0_764, %c0_765] : memref<1x32xf32, #tpu.memory_space<vmem>>, vector<1x32xf32>
    %1139 = vector.broadcast %1138 : vector<1x32xf32> to vector<2x32xf32>
    %1140 = arith.addf %1137, %1139 : vector<2x32xf32>
    %c0_766 = arith.constant 0 : index
    %c0_767 = arith.constant 0 : index
    %1141 = vector.load %arg31[%c0_766, %c0_767] : memref<2x32xf32, #tpu.memory_space<vmem>>, vector<2x32xf32>
    %c0_768 = arith.constant 0 : index
    %c0_769 = arith.constant 0 : index
    %1142 = vector.load %arg32[%c0_768, %c0_769] : memref<2x32xf32, #tpu.memory_space<vmem>>, vector<2x32xf32>
    %c0_770 = arith.constant 0 : index
    %c0_771 = arith.constant 0 : index
    %1143 = vector.load %arg33[%c0_770, %c0_771] : memref<2x32xf32, #tpu.memory_space<vmem>>, vector<2x32xf32>
    %cst_772 = arith.constant 0.998334705 : f32
    %1144 = vector.broadcast %cst_772 : f32 to vector<2x32xf32>
    %1145 = arith.mulf %1144, %1143 : vector<2x32xf32>
    %cst_773 = arith.constant 0.00166527857 : f32
    %1146 = vector.broadcast %cst_773 : f32 to vector<2x32xf32>
    %1147 = arith.mulf %1146, %1142 : vector<2x32xf32>
    %1148 = arith.addf %1145, %1147 : vector<2x32xf32>
    %cst_774 = arith.constant 1.800000e+00 : f32
    %1149 = vector.broadcast %cst_774 : f32 to vector<2x32xf32>
    %1150 = arith.mulf %1149, %1148 : vector<2x32xf32>
    %cst_775 = arith.constant 0.00999999977 : f32
    %1151 = vector.broadcast %cst_775 : f32 to vector<2x32xf32>
    %1152 = arith.addf %1151, %1150 : vector<2x32xf32>
    %cst_776 = arith.constant 0.951229453 : f32
    %1153 = vector.broadcast %cst_776 : f32 to vector<2x32xf32>
    %1154 = arith.mulf %1141, %1153 : vector<2x32xf32>
    %1155 = arith.addf %1154, %1140 : vector<2x32xf32>
    %1156 = arith.mulf %1152, %1142 : vector<2x32xf32>
    %cst_777 = arith.constant 1.000000e+00 : f32
    %1157 = vector.broadcast %cst_777 : f32 to vector<2x32xf32>
    %1158 = arith.mulf %1156, %1157 : vector<2x32xf32>
    %1159 = arith.subf %1155, %1158 : vector<2x32xf32>
    %cst_778 = arith.constant 0.000000e+00 : f32
    %1160 = vector.broadcast %cst_778 : f32 to vector<1x32xf32>
    %1161 = arith.cmpf oeq, %1047, %1160 : vector<1x32xf32>
    %1162 = vector.shape_cast %1161 : vector<1x32xi1> to vector<1x32xi1>
    %1163 = vector.broadcast %1162 : vector<1x32xi1> to vector<2x32xi1>
    %1164 = arith.select %1163, %1141, %1159 : vector<2x32xi1>, vector<2x32xf32>
    %1165 = arith.subf %1164, %1152 : vector<2x32xf32>
    %cst_779 = arith.constant 0.000000e+00 : f32
    %1166 = vector.broadcast %cst_779 : f32 to vector<2x32xf32>
    %1167 = arith.cmpf ogt, %1165, %1166 : vector<2x32xf32>
    %1168 = arith.extui %1167 : vector<2x32xi1> to vector<2x32xi32>
    %1169 = arith.sitofp %1168 : vector<2x32xi32> to vector<2x32xf32>
    %1170 = vector.broadcast %1047 : vector<1x32xf32> to vector<2x32xf32>
    %1171 = arith.mulf %1169, %1170 : vector<2x32xf32>
    %c0_780 = arith.constant 0 : index
    %c0_781 = arith.constant 0 : index
    %1172 = vector.load %arg31[%c0_780, %c0_781] : memref<2x32xf32, #tpu.memory_space<vmem>>, vector<2x32xf32>
    tpu.vector_store %arg31[%c0_780, %c0_781], %1164 {strides = array<i32>} : memref<2x32xf32, #tpu.memory_space<vmem>>, vector<2x32xf32>,
    %c0_782 = arith.constant 0 : index
    %c0_783 = arith.constant 0 : index
    %1173 = vector.load %arg32[%c0_782, %c0_783] : memref<2x32xf32, #tpu.memory_space<vmem>>, vector<2x32xf32>
    tpu.vector_store %arg32[%c0_782, %c0_783], %1171 {strides = array<i32>} : memref<2x32xf32, #tpu.memory_space<vmem>>, vector<2x32xf32>,
    %c0_784 = arith.constant 0 : index
    %c0_785 = arith.constant 0 : index
    %1174 = vector.load %arg33[%c0_784, %c0_785] : memref<2x32xf32, #tpu.memory_space<vmem>>, vector<2x32xf32>
    tpu.vector_store %arg33[%c0_784, %c0_785], %1148 {strides = array<i32>} : memref<2x32xf32, #tpu.memory_space<vmem>>, vector<2x32xf32>,
    %1175 = arith.index_cast %c7_i32 : i32 to index
    %c0_786 = arith.constant 0 : index
    %c0_787 = arith.constant 0 : index
    %1176 = vector.load %arg12[%1175, %c0_786, %c0_787] : memref<8x2x32xf32, #tpu.memory_space<vmem>>, vector<1x2x32xf32>
    %1177 = vector.shape_cast %1176 : vector<1x2x32xf32> to vector<2x32xf32>
    %1178 = vector.shape_cast %1171 : vector<2x32xf32> to vector<1x2x32xf32>
    tpu.vector_store %arg12[%1175, %c0_786, %c0_787], %1178 {strides = array<i32>} : memref<8x2x32xf32, #tpu.memory_space<vmem>>, vector<1x2x32xf32>,
    %1179 = arith.index_cast %c7_i32 : i32 to index
    %c0_788 = arith.constant 0 : index
    %c0_789 = arith.constant 0 : index
    %1180 = vector.load %arg13[%1179, %c0_788, %c0_789] : memref<8x2x32xf32, #tpu.memory_space<vmem>>, vector<1x2x32xf32>
    %1181 = vector.shape_cast %1180 : vector<1x2x32xf32> to vector<2x32xf32>
    %1182 = vector.shape_cast %1164 : vector<2x32xf32> to vector<1x2x32xf32>
    tpu.vector_store %arg13[%1179, %c0_788, %c0_789], %1182 {strides = array<i32>} : memref<8x2x32xf32, #tpu.memory_space<vmem>>, vector<1x2x32xf32>,
    %1183 = arith.index_cast %c7_i32 : i32 to index
    %c0_790 = arith.constant 0 : index
    %c0_791 = arith.constant 0 : index
    %1184 = vector.load %arg14[%1183, %c0_790, %c0_791] : memref<8x2x32xf32, #tpu.memory_space<vmem>>, vector<1x2x32xf32>
    %1185 = vector.shape_cast %1184 : vector<1x2x32xf32> to vector<2x32xf32>
    %1186 = vector.shape_cast %1152 : vector<2x32xf32> to vector<1x2x32xf32>
    tpu.vector_store %arg14[%1183, %c0_790, %c0_791], %1186 {strides = array<i32>} : memref<8x2x32xf32, #tpu.memory_space<vmem>>, vector<1x2x32xf32>,
    %c8_i32 = arith.constant 8 : i32
    %c1_i32_792 = arith.constant 1 : i32
    %1187 = arith.cmpi eq, %arg0, %c1_i32_792 : i32
    %1188 = arith.extui %1187 : i1 to i32
    %c0_i32_793 = arith.constant 0 : i32
    %1189 = arith.cmpi ne, %1188, %c0_i32_793 : i32
    scf.if %1189 {
      %c0_794 = arith.constant 0 : index
      %c0_795 = arith.constant 0 : index
      %1190 = vector.load %arg25[%c0_794, %c0_795] : memref<2x32xf32, #tpu.memory_space<vmem>>, vector<2x32xf32>
      %c0_796 = arith.constant 0 : index
      %c0_797 = arith.constant 0 : index
      %1191 = vector.load %arg15[%c0_796, %c0_797] : memref<2x32xf32, #tpu.memory_space<vmem>>, vector<2x32xf32>
      tpu.vector_store %arg15[%c0_796, %c0_797], %1190 {strides = array<i32>} : memref<2x32xf32, #tpu.memory_space<vmem>>, vector<2x32xf32>,
      %c0_798 = arith.constant 0 : index
      %c0_799 = arith.constant 0 : index
      %1192 = vector.load %arg26[%c0_798, %c0_799] : memref<2x32xf32, #tpu.memory_space<vmem>>, vector<2x32xf32>
      %c0_800 = arith.constant 0 : index
      %c0_801 = arith.constant 0 : index
      %1193 = vector.load %arg16[%c0_800, %c0_801] : memref<2x32xf32, #tpu.memory_space<vmem>>, vector<2x32xf32>
      tpu.vector_store %arg16[%c0_800, %c0_801], %1192 {strides = array<i32>} : memref<2x32xf32, #tpu.memory_space<vmem>>, vector<2x32xf32>,
      %c0_802 = arith.constant 0 : index
      %c0_803 = arith.constant 0 : index
      %1194 = vector.load %arg27[%c0_802, %c0_803] : memref<2x32xf32, #tpu.memory_space<vmem>>, vector<2x32xf32>
      %c0_804 = arith.constant 0 : index
      %c0_805 = arith.constant 0 : index
      %1195 = vector.load %arg17[%c0_804, %c0_805] : memref<2x32xf32, #tpu.memory_space<vmem>>, vector<2x32xf32>
      tpu.vector_store %arg17[%c0_804, %c0_805], %1194 {strides = array<i32>} : memref<2x32xf32, #tpu.memory_space<vmem>>, vector<2x32xf32>,
      %c0_806 = arith.constant 0 : index
      %c0_807 = arith.constant 0 : index
      %1196 = vector.load %arg28[%c0_806, %c0_807] : memref<2x32xf32, #tpu.memory_space<vmem>>, vector<2x32xf32>
      %c0_808 = arith.constant 0 : index
      %c0_809 = arith.constant 0 : index
      %1197 = vector.load %arg18[%c0_808, %c0_809] : memref<2x32xf32, #tpu.memory_space<vmem>>, vector<2x32xf32>
      tpu.vector_store %arg18[%c0_808, %c0_809], %1196 {strides = array<i32>} : memref<2x32xf32, #tpu.memory_space<vmem>>, vector<2x32xf32>,
      %c0_810 = arith.constant 0 : index
      %c0_811 = arith.constant 0 : index
      %1198 = vector.load %arg29[%c0_810, %c0_811] : memref<2x32xf32, #tpu.memory_space<vmem>>, vector<2x32xf32>
      %c0_812 = arith.constant 0 : index
      %c0_813 = arith.constant 0 : index
      %1199 = vector.load %arg19[%c0_812, %c0_813] : memref<2x32xf32, #tpu.memory_space<vmem>>, vector<2x32xf32>
      tpu.vector_store %arg19[%c0_812, %c0_813], %1198 {strides = array<i32>} : memref<2x32xf32, #tpu.memory_space<vmem>>, vector<2x32xf32>,
      %c0_814 = arith.constant 0 : index
      %c0_815 = arith.constant 0 : index
      %1200 = vector.load %arg30[%c0_814, %c0_815] : memref<2x32xf32, #tpu.memory_space<vmem>>, vector<2x32xf32>
      %c0_816 = arith.constant 0 : index
      %c0_817 = arith.constant 0 : index
      %1201 = vector.load %arg20[%c0_816, %c0_817] : memref<2x32xf32, #tpu.memory_space<vmem>>, vector<2x32xf32>
      tpu.vector_store %arg20[%c0_816, %c0_817], %1200 {strides = array<i32>} : memref<2x32xf32, #tpu.memory_space<vmem>>, vector<2x32xf32>,
      %c0_818 = arith.constant 0 : index
      %c0_819 = arith.constant 0 : index
      %1202 = vector.load %arg31[%c0_818, %c0_819] : memref<2x32xf32, #tpu.memory_space<vmem>>, vector<2x32xf32>
      %c0_820 = arith.constant 0 : index
      %c0_821 = arith.constant 0 : index
      %1203 = vector.load %arg21[%c0_820, %c0_821] : memref<2x32xf32, #tpu.memory_space<vmem>>, vector<2x32xf32>
      tpu.vector_store %arg21[%c0_820, %c0_821], %1202 {strides = array<i32>} : memref<2x32xf32, #tpu.memory_space<vmem>>, vector<2x32xf32>,
      %c0_822 = arith.constant 0 : index
      %c0_823 = arith.constant 0 : index
      %1204 = vector.load %arg32[%c0_822, %c0_823] : memref<2x32xf32, #tpu.memory_space<vmem>>, vector<2x32xf32>
      %c0_824 = arith.constant 0 : index
      %c0_825 = arith.constant 0 : index
      %1205 = vector.load %arg22[%c0_824, %c0_825] : memref<2x32xf32, #tpu.memory_space<vmem>>, vector<2x32xf32>
      tpu.vector_store %arg22[%c0_824, %c0_825], %1204 {strides = array<i32>} : memref<2x32xf32, #tpu.memory_space<vmem>>, vector<2x32xf32>,
      %c0_826 = arith.constant 0 : index
      %c0_827 = arith.constant 0 : index
      %1206 = vector.load %arg33[%c0_826, %c0_827] : memref<2x32xf32, #tpu.memory_space<vmem>>, vector<2x32xf32>
      %c0_828 = arith.constant 0 : index
      %c0_829 = arith.constant 0 : index
      %1207 = vector.load %arg23[%c0_828, %c0_829] : memref<2x32xf32, #tpu.memory_space<vmem>>, vector<2x32xf32>
      tpu.vector_store %arg23[%c0_828, %c0_829], %1206 {strides = array<i32>} : memref<2x32xf32, #tpu.memory_space<vmem>>, vector<2x32xf32>,
      %c0_830 = arith.constant 0 : index
      %c0_831 = arith.constant 0 : index
      %1208 = vector.load %arg26[%c0_830, %c0_831] : memref<2x32xf32, #tpu.memory_space<vmem>>, vector<2x32xf32>
      %1209 = vector.shape_cast %1208 : vector<2x32xf32> to vector<1x2x32xf32>
      %cst_832 = arith.constant dense<0.000000e+00> : vector<1xf32>
      %1210 = vector.multi_reduction <add>, %1209, %cst_832 [1, 2] : vector<1x2x32xf32> to vector<1xf32>
      %1211 = vector.shape_cast %1210 : vector<1xf32> to vector<1x1x1xf32>
      %1212 = vector.extract %1211[0, 0, 0] : f32 from vector<1x1x1xf32>
      %c0_833 = arith.constant 0 : index
      %c0_834 = arith.constant 0 : index
      %1213 = vector.load %arg29[%c0_833, %c0_834] : memref<2x32xf32, #tpu.memory_space<vmem>>, vector<2x32xf32>
      %1214 = vector.shape_cast %1213 : vector<2x32xf32> to vector<1x2x32xf32>
      %cst_835 = arith.constant dense<0.000000e+00> : vector<1xf32>
      %1215 = vector.multi_reduction <add>, %1214, %cst_835 [1, 2] : vector<1x2x32xf32> to vector<1xf32>
      %1216 = vector.shape_cast %1215 : vector<1xf32> to vector<1x1x1xf32>
      %1217 = vector.extract %1216[0, 0, 0] : f32 from vector<1x1x1xf32>
      %1218 = arith.addf %1212, %1217 : f32
      %c0_836 = arith.constant 0 : index
      %c0_837 = arith.constant 0 : index
      %1219 = vector.load %arg32[%c0_836, %c0_837] : memref<2x32xf32, #tpu.memory_space<vmem>>, vector<2x32xf32>
      %1220 = vector.shape_cast %1219 : vector<2x32xf32> to vector<1x2x32xf32>
      %cst_838 = arith.constant dense<0.000000e+00> : vector<1xf32>
      %1221 = vector.multi_reduction <add>, %1220, %cst_838 [1, 2] : vector<1x2x32xf32> to vector<1xf32>
      %1222 = vector.shape_cast %1221 : vector<1xf32> to vector<1x1x1xf32>
      %1223 = vector.extract %1222[0, 0, 0] : f32 from vector<1x1x1xf32>
      %1224 = arith.addf %1218, %1223 : f32
      %cst_839 = arith.constant 1.920000e+02 : f32
      %1225 = arith.divf %1224, %cst_839 : f32
      %1226 = vector.broadcast %1225 : f32 to vector<1x1xf32>
      %c0_840 = arith.constant 0 : index
      %c0_841 = arith.constant 0 : index
      %1227 = vector.load %arg24[%c0_840, %c0_841] : memref<1x1xf32, #tpu.memory_space<vmem>>, vector<1x1xf32>
      tpu.vector_store %arg24[%c0_840, %c0_841], %1226 {strides = array<i32>} : memref<1x1xf32, #tpu.memory_space<vmem>>, vector<1x1xf32>,
    } else {
    }
    return
  }
  func.func @transform_0(%arg0: i32) -> (i32, i32, i32) {
    %c0_i32 = arith.constant 0 : i32
    %c0_i32_0 = arith.constant 0 : i32
    %c0_i32_1 = arith.constant 0 : i32
    return %arg0, %c0_i32, %c0_i32_0 : i32, i32, i32
  }
  func.func @transform_1(%arg0: i32) -> (i32, i32, i32) {
    %c0_i32 = arith.constant 0 : i32
    %c0_i32_0 = arith.constant 0 : i32
    %c0_i32_1 = arith.constant 0 : i32
    return %arg0, %c0_i32, %c0_i32_0 : i32, i32, i32
  }
  func.func @transform_2(%arg0: i32) -> (i32, i32, i32) {
    %c0_i32 = arith.constant 0 : i32
    %c0_i32_0 = arith.constant 0 : i32
    %c0_i32_1 = arith.constant 0 : i32
    return %arg0, %c0_i32, %c0_i32_0 : i32, i32, i32
  }
  func.func @transform_3(%arg0: i32) -> (i32, i32, i32) {
    %c0_i32 = arith.constant 0 : i32
    %c0_i32_0 = arith.constant 0 : i32
    %c0_i32_1 = arith.constant 0 : i32
    return %arg0, %c0_i32, %c0_i32_0 : i32, i32, i32
  }
  func.func @transform_4(%arg0: i32) -> (i32, i32) {
    %c0_i32 = arith.constant 0 : i32
    %c0_i32_0 = arith.constant 0 : i32
    %c0_i32_1 = arith.constant 0 : i32
    return %c0_i32, %c0_i32_0 : i32, i32
  }
  func.func @transform_5(%arg0: i32) -> (i32, i32) {
    %c0_i32 = arith.constant 0 : i32
    %c0_i32_0 = arith.constant 0 : i32
    %c0_i32_1 = arith.constant 0 : i32
    return %c0_i32, %c0_i32_0 : i32, i32
  }
  func.func @transform_6(%arg0: i32) -> (i32, i32) {
    %c0_i32 = arith.constant 0 : i32
    %c0_i32_0 = arith.constant 0 : i32
    %c0_i32_1 = arith.constant 0 : i32
    return %c0_i32, %c0_i32_0 : i32, i32
  }
  func.func @transform_7(%arg0: i32) -> (i32, i32) {
    %c0_i32 = arith.constant 0 : i32
    %c0_i32_0 = arith.constant 0 : i32
    %c0_i32_1 = arith.constant 0 : i32
    return %c0_i32, %c0_i32_0 : i32, i32
  }
  func.func @transform_8(%arg0: i32) -> (i32, i32) {
    %c0_i32 = arith.constant 0 : i32
    %c0_i32_0 = arith.constant 0 : i32
    %c0_i32_1 = arith.constant 0 : i32
    return %c0_i32, %c0_i32_0 : i32, i32
  }
  func.func @transform_9(%arg0: i32) -> (i32, i32) {
    %c0_i32 = arith.constant 0 : i32
    %c0_i32_0 = arith.constant 0 : i32
    %c0_i32_1 = arith.constant 0 : i32
    return %c0_i32, %c0_i32_0 : i32, i32
  }
  func.func @transform_10(%arg0: i32) -> (i32, i32) {
    %c0_i32 = arith.constant 0 : i32
    %c0_i32_0 = arith.constant 0 : i32
    %c0_i32_1 = arith.constant 0 : i32
    return %c0_i32, %c0_i32_0 : i32, i32
  }
  func.func @transform_11(%arg0: i32) -> (i32, i32, i32) {
    %c0_i32 = arith.constant 0 : i32
    %c0_i32_0 = arith.constant 0 : i32
    %c0_i32_1 = arith.constant 0 : i32
    return %arg0, %c0_i32, %c0_i32_0 : i32, i32, i32
  }
  func.func @transform_12(%arg0: i32) -> (i32, i32, i32) {
    %c0_i32 = arith.constant 0 : i32
    %c0_i32_0 = arith.constant 0 : i32
    %c0_i32_1 = arith.constant 0 : i32
    return %arg0, %c0_i32, %c0_i32_0 : i32, i32, i32
  }
  func.func @transform_13(%arg0: i32) -> (i32, i32, i32) {
    %c0_i32 = arith.constant 0 : i32
    %c0_i32_0 = arith.constant 0 : i32
    %c0_i32_1 = arith.constant 0 : i32
    return %arg0, %c0_i32, %c0_i32_0 : i32, i32, i32
  }
  func.func @transform_14(%arg0: i32) -> (i32, i32) {
    %c0_i32 = arith.constant 0 : i32
    %c0_i32_0 = arith.constant 0 : i32
    %c0_i32_1 = arith.constant 0 : i32
    return %c0_i32, %c0_i32_0 : i32, i32
  }
  func.func @transform_15(%arg0: i32) -> (i32, i32) {
    %c0_i32 = arith.constant 0 : i32
    %c0_i32_0 = arith.constant 0 : i32
    %c0_i32_1 = arith.constant 0 : i32
    return %c0_i32, %c0_i32_0 : i32, i32
  }
  func.func @transform_16(%arg0: i32) -> (i32, i32) {
    %c0_i32 = arith.constant 0 : i32
    %c0_i32_0 = arith.constant 0 : i32
    %c0_i32_1 = arith.constant 0 : i32
    return %c0_i32, %c0_i32_0 : i32, i32
  }
  func.func @transform_17(%arg0: i32) -> (i32, i32) {
    %c0_i32 = arith.constant 0 : i32
    %c0_i32_0 = arith.constant 0 : i32
    %c0_i32_1 = arith.constant 0 : i32
    return %c0_i32, %c0_i32_0 : i32, i32
  }
  func.func @transform_18(%arg0: i32) -> (i32, i32) {
    %c0_i32 = arith.constant 0 : i32
    %c0_i32_0 = arith.constant 0 : i32
    %c0_i32_1 = arith.constant 0 : i32
    return %c0_i32, %c0_i32_0 : i32, i32
  }
  func.func @transform_19(%arg0: i32) -> (i32, i32) {
    %c0_i32 = arith.constant 0 : i32
    %c0_i32_0 = arith.constant 0 : i32
    %c0_i32_1 = arith.constant 0 : i32
    return %c0_i32, %c0_i32_0 : i32, i32
  }
  func.func @transform_20(%arg0: i32) -> (i32, i32) {
    %c0_i32 = arith.constant 0 : i32
    %c0_i32_0 = arith.constant 0 : i32
    %c0_i32_1 = arith.constant 0 : i32
    return %c0_i32, %c0_i32_0 : i32, i32
  }
  func.func @transform_21(%arg0: i32) -> (i32, i32) {
    %c0_i32 = arith.constant 0 : i32
    %c0_i32_0 = arith.constant 0 : i32
    %c0_i32_1 = arith.constant 0 : i32
    return %c0_i32, %c0_i32_0 : i32, i32
  }
  func.func @transform_22(%arg0: i32) -> (i32, i32) {
    %c0_i32 = arith.constant 0 : i32
    %c0_i32_0 = arith.constant 0 : i32
    %c0_i32_1 = arith.constant 0 : i32
    return %c0_i32, %c0_i32_0 : i32, i32
  }
  func.func @transform_23(%arg0: i32) -> (i32, i32) {
    %c0_i32 = arith.constant 0 : i32
    %c0_i32_0 = arith.constant 0 : i32
    %c0_i32_1 = arith.constant 0 : i32
    return %c0_i32, %c0_i32_0 : i32, i32
  }
}

</mosaic_0001>

<bundles_post_ra>
// kernel: tpu_custom_call.1
= control target key start
LH: loop header
LB: loop body
LE: loop exit
PB: predicated region body
PF: predicated region fallthrough
CT: control target
= control target key end

     0   :  { %s9244_s0 = inlined_call_operand.hbm [shape: f32[16,2,32], index: 0, kind: input, shape index: {}]   ;;  %s9245_s1 = inlined_call_operand.hbm [shape: f32[16,1,32], index: 1, kind: input, shape index: {}]   ;;  %s9246_s2 = inlined_call_operand.hbm [shape: f32[16,1,32], index: 2, kind: input, shape index: {}]   ;;  %s9247_s3 = inlined_call_operand.hbm [shape: f32[16,1,32], index: 3, kind: input, shape index: {}]   ;;  %s9248_s4 = inlined_call_operand.hbm [shape: f32[32,32], index: 4, kind: input, shape index: {}]   ;;  %s9249_s5 = inlined_call_operand.hbm [shape: f32[32,32], index: 5, kind: input, shape index: {}]   ;;  %s9250_s6 = inlined_call_operand.hbm [shape: f32[32,32], index: 6, kind: input, shape index: {}]   ;;  %s9251_s7 = inlined_call_operand.vmem [shape: f32[1,32], index: 7, kind: input, shape index: {}]   ;;  %s9252_s8 = inlined_call_operand.hbm [shape: f32[32,32], index: 8, kind: input, shape index: {}]   ;;  %s9253_s9 = inlined_call_operand.vmem [shape: f32[32,32], index: 9, kind: input, shape index: {}]   ;;  %s9254_s10 = inlined_call_operand.vmem [shape: f32[1,32], index: 10, kind: input, shape index: {}]   ;;  %s9255_s11 = inlined_call_operand.hbm [shape: f32[16,2,32], index: 11, kind: output, shape index: {0}]   ;;  %s9256_s12 = inlined_call_operand.hbm [shape: f32[16,2,32], index: 12, kind: output, shape index: {1}]   ;;  %s9257_s13 = inlined_call_operand.hbm [shape: f32[16,2,32], index: 13, kind: output, shape index: {2}]   ;;  %s9258_s14 = inlined_call_operand.hbm [shape: f32[2,32], index: 14, kind: output, shape index: {3}]   ;;  %s9259_s15 = inlined_call_operand.hbm [shape: f32[2,32], index: 15, kind: output, shape index: {4}]   ;;  %s9260_s16 = inlined_call_operand.hbm [shape: f32[2,32], index: 16, kind: output, shape index: {5}]   ;;  %s9261_s17 = inlined_call_operand.hbm [shape: f32[2,32], index: 17, kind: output, shape index: {6}]   ;;  %s9262_s18 = inlined_call_operand.hbm [shape: f32[2,32], index: 18, kind: output, shape index: {7}]   ;;  %s9263_s19 = inlined_call_operand.hbm [shape: f32[2,32], index: 19, kind: output, shape index: {8}]   ;;  %s9264_s20 = inlined_call_operand.hbm [shape: f32[2,32], index: 20, kind: output, shape index: {9}]   ;;  %s9265_s21 = inlined_call_operand.hbm [shape: f32[2,32], index: 21, kind: output, shape index: {10}]   ;;  %s9266_s22 = inlined_call_operand.hbm [shape: f32[2,32], index: 22, kind: output, shape index: {11}]   ;;  %s9267_s23 = inlined_call_operand.hbm [shape: f32[1,1], index: 23, kind: output, shape index: {12}]  }
   0x1   :  { %9327 = sst [smem:[#allocation63_spill]] %s9244_s0 }
   0x2   :  { %9328 = sst [smem:[#allocation64_spill]] %s9245_s1 }
   0x3   :  { %9329 = sst [smem:[#allocation65_spill]] %s9246_s2 }
   0x4   :  { %9330 = sst [smem:[#allocation66_spill]] %s9247_s3 }
   0x5   :  { %9331 = sst [smem:[#allocation67_spill]] %s9248_s4 }
   0x6   :  { %9332 = sst [smem:[#allocation68_spill]] %s9249_s5 }
   0x7   :  { %9333 = sst [smem:[#allocation69_spill]] %s9250_s6 }
   0x8   :  { %9334 = sst [smem:[#allocation70_spill]] %s9251_s7 }
   0x9   :  { %9335 = sst [smem:[#allocation71_spill]] %s9252_s8 }
   0xa   :  { %9336 = sst [smem:[#allocation72_spill]] %s9253_s9 }
   0xb   :  { %9337 = sst [smem:[#allocation73_spill]] %s9254_s10 }
   0xc   :  { %9338 = sst [smem:[#allocation74_spill]] %s9255_s11 }
   0xd   :  { %9339 = sst [smem:[#allocation75_spill]] %s9256_s12 }
   0xe   :  { %9340 = sst [smem:[#allocation76_spill]] %s9257_s13 }
   0xf   :  { %9341 = sst [smem:[#allocation77_spill]] %s9258_s14 }
  0x10   :  { %9342 = sst [smem:[#allocation78_spill]] %s9259_s15 }
  0x11   :  { %9343 = sst [smem:[#allocation79_spill]] %s9260_s16 }
  0x12   :  { %9344 = sst [smem:[#allocation80_spill]] %s9261_s17 }
  0x13   :  { %9345 = sst [smem:[#allocation81_spill]] %s9262_s18 }
  0x14   :  { %9346 = sst [smem:[#allocation82_spill]] %s9263_s19 }
  0x15   :  { %9347 = sst [smem:[#allocation83_spill]] %s9264_s20 }
  0x16   :  { %9348 = sst [smem:[#allocation84_spill]] %s9265_s21 }
  0x17   :  { %9349 = sst [smem:[#allocation85_spill]] %s9266_s22 }
  0x18   :  { %9350 = sst [smem:[#allocation86_spill]] %s9267_s23 }
  0x19   :  { %29 = vsyncpa [#allocation12], 0 }
  0x1a   :  { %31 = vsyncpa [#allocation12 + $0x1], 0 }
  0x1b   :  { %32 = vsyncpa [#allocation15], 0 }
  0x1c   :  { %34 = vsyncpa [#allocation15 + $0x1], 0 }
  0x1d   :  { %35 = vsyncpa [#allocation18], 0 }
  0x1e   :  { %37 = vsyncpa [#allocation18 + $0x1], 0 }
  0x1f   :  { %38 = vsyncpa [#allocation21], 0 }
  0x20   :  { %39 = vsyncpa [#allocation24], 0 }
  0x21   :  { %40 = vsyncpa [#allocation13], 0 }
  0x22   :  { %42 = vsyncpa [#allocation13 + $0x1], 0 }
  0x23   :  { %43 = vsyncpa [#allocation27], 0 }
  0x24   :  { %45 = vsyncpa [#allocation27 + $0x1], 0 }
  0x25   :  { %46 = vsyncpa [#allocation30], 0 }
  0x26   :  { %47 = vsyncpa [#allocation33], 0 }
  0x27   :  { %48 = vsyncpa [#allocation36], 0 }
  0x28   :  { %49 = vsyncpa [#allocation39], 0 }
  0x29   :  { %50 = vsyncpa [#allocation42], 0  ;;  %s7726_s4 = smov 0   ;;  %s7728_s30 = smov 0  }
  0x2a   :  { %s7730_s24 = smov 0   ;;  %s7732_s25 = smov 0  }
  0x2b LB: > { %9351 = sst [smem:[#allocation57_spill]] %s7557_s4  ;;  %s7747_s5 = sadd.s32 4294967295, %s7569_s25   ;;  %s7569_s25 = sphi %s7732_s25, %s9455_s25   ;;  %s7565_s24 = sphi %s7730_s24, %s9457_s24   ;;  %s7561_s30 = sphi %s7728_s30, %s9459_s30   ;;  %s7557_s4 = sphi %s7726_s4, %s9458_s4  }
  0x2c   : > { %9352 = sst [smem:[#allocation58_spill]] %s7565_s24  ;;  %s9276_s1 = sadd.s32 4294967294, %s7569_s25  }
  0x2d   : > { %p76_p0 = scmp.ne.s32.totalorder %s7561_s30, %s7557_s4  ;;  %p9282_p1 = scmp.eq.s32.totalorder %s7747_s5, 0 }
  0x2e   : > { %p331_p3 = scmp.eq.s32.totalorder %s9276_s1, 1  ;;  %p5630_p5 = scmp.ge.s32.totalorder %s7569_s25, 1 }
  0x2f   : > { %p7758_p4 = por %p9282_p1, %p76_p0  ;;  %p600_p7 = scmp.lt.s32.totalorder %s7569_s25, 3 }
  0x30   : > { %p7763_p6 = por %p331_p3, %p76_p0  ;;  %s7571_s27 = smov [#allocation19]  }
  0x31   : > { %s9353_s26 = scalar_select %p7758_p4, 1, 0 }
  0x32   : > { %s9354_s2 = scalar_select %p7763_p6, 1, 0 }
  0x33   : > { %p7769_p9 = pnand %p5630_p5, %p600_p7  ;;  %s612_s7 = sshll.u32 %s7571_s27, 4  ;;  %s7773_s7 = int_to_ptr.vmem [resolvable:$true] %s612_s7 }
  0x34   : > { %9355 = sst [smem:[#allocation59_spill]] %s9354_s2  ;;  %s7572_s29 = smov [#allocation20]  }
  0x35   : > { %s9356_s6 = scalar_select %p7769_p9, 1, 0 }
  0x36   : > { %p6785_p10 = pneg %p7769_p9  ;;  %s625_s3 = sshll.u32 %s7572_s29, 4  ;;  %s7784_s3 = int_to_ptr.vmem [resolvable:$true] %s625_s3 }
  0x37   : > { %s9358_s2 = sld [smem:[#allocation67_spill]] }
  0x38   : > { %p7780_p12 = pnand %p6785_p10, %p9282_p1 }
  0x3a   : > { %s9357_s28 = scalar_select %p7780_p12, 1, 0 }
  0x3b   : > { %p7794_p0 = pneg %p7780_p12 }
  0x3d   : > { %s6911_s4 = scalar_lea.hbm %s9358_s2, 512 }
  0x3e   : > { %p6912_p13 = scmp.ne.s32.totalorder %s9358_s2, %s6911_s4  ;;  %p6918_p7 = scmp.lt.u32.totalorder %s6911_s4, %s9358_s2 }
  0x3f   : > { %s9359_s21 = scalar_select %p7794_p0, 1, 0 }
  0x40   : > { %p6914_p3 = pnand %p7794_p0, %p6912_p13 }
  0x42   : > { %p6915_p5 = pneg %p6914_p3 }
  0x44   : > { %p6920_p10 = pnand %p6918_p7, %p6915_p5 }
  0x46   : > { %6923 = shalt.err (!%p6920_p10)
}
  0x47   : > { %s6924_s23 = scalar_lea.vmem %s7773_s7, 512  ;;  %p6932_p2 = scmp.lt.s32.totalorder %s7773_s7, %s7773_s7 }
  0x48   : > { %p6925_p11 = scmp.ne.s32.totalorder %s7773_s7, %s6924_s23  ;;  %p6933_p6 = scmp.lt.s32.totalorder %s6924_s23, %s6924_s23 }
  0x4a   : > { %p6927_p8 = pnand %p6925_p11, %p7794_p0  ;;  %p6934_p13 = por %p6933_p6, %p6932_p2 }
  0x4c   : > { %p6928_p1 = pneg %p6927_p8 }
  0x4e   : > { %p6935_p3 = pnand %p6934_p13, %p6928_p1 }
  0x50   : > { %6938 = shalt.err (!%p6935_p3)
}
  0x51   : > { %s9288_s1 = smov 128   ;;  %s9290_s19 = smov 8  }
  0x52   : > { %6788 = dma.hbm_to_vmem [thread:$0]  (!%p7780_p12), %s9358_s2, 512, %s7773_s7, [#allocation18], %s9288_s1, %s9288_s1, %s9290_s19  }
  0x53   : > { %s9360_s17 = sld [smem:[#allocation68_spill]] }
  0x59   : > { %s6939_s23 = scalar_lea.hbm %s9360_s17, 512 }
  0x5a   : > { %p6940_p1 = scmp.ne.s32.totalorder %s9360_s17, %s6939_s23  ;;  %p6946_p8 = scmp.lt.u32.totalorder %s6939_s23, %s9360_s17 }
  0x5c   : > { %p6942_p2 = pnand %p6940_p1, %p7794_p0 }
  0x5e   : > { %p6943_p6 = pneg %p6942_p2 }
  0x60   : > { %p6948_p11 = pnand %p6946_p8, %p6943_p6 }
  0x62   : > { %6951 = shalt.err (!%p6948_p11)
}
  0x63   : > { %s6952_s7 = scalar_lea.vmem %s7784_s3, 512  ;;  %p6960_p13 = scmp.lt.s32.totalorder %s7784_s3, %s7784_s3 }
  0x64   : > { %p6953_p5 = scmp.ne.s32.totalorder %s7784_s3, %s6952_s7  ;;  %p6961_p3 = scmp.lt.s32.totalorder %s6952_s7, %s6952_s7 }
  0x66   : > { %p6955_p7 = pnand %p6953_p5, %p7794_p0  ;;  %p6962_p1 = por %p6961_p3, %p6960_p13 }
  0x68   : > { %p6956_p10 = pneg %p6955_p7 }
  0x6a   : > { %p6963_p2 = pnand %p6962_p1, %p6956_p10 }
  0x6c   : > { %6966 = shalt.err (!%p6963_p2)
}
  0x6d   : > { %6791 = dma.hbm_to_vmem [thread:$0]  (!%p7780_p12), %s9360_s17, 512, %s7784_s3, [#allocation21], %s9288_s1, %s9288_s1, %s9290_s19  }
  0x6e   : > { %s7845_s15 = sadd.s32 1, %s7569_s25   ;;  %s63_s22 = sadd.s32 1, %s7565_s24 }
  0x6f   : > { %9361 = sst [smem:[#allocation60_spill]] %s7845_s15  ;;  %s60_s4 = ssub.s32 %s7569_s25, %s7845_s15 }
  0x70   : > { %p70_p6 = scmp.ne.s32.totalorder %s7565_s24, %s7561_s30  ;;  %p61_p8 = scmp.eq.s32.totalorder %s60_s4, 0 }
  0x71   : > { %p71_p11 = scmp.eq.s32.totalorder %s7569_s25, 0  ;;  %p9362_p5 = scmp.eq.s32.totalorder %s7747_s5, 1 }
  0x72   : > { %p6825_p10 = scmp.lt.s32.totalorder %s7569_s25, 2  ;;  %s7864_s29 = sand.u32 1, %s7565_s24  }
  0x73   : > { %p7855_p7 = por %p9362_p5, %p70_p6  ;;  %p72_p13 = por %p71_p11, %p70_p6 }
  0x74   : > { %s7861_s27 = scalar_select %p61_p8, %s7565_s24, %s63_s22  }
  0x75   : > { %s9363_s0 = scalar_select %p7855_p7, 1, 0 }
  0x76   : > { %9365 = sst [smem:[#allocation62_spill]] %s7861_s27  ;;  %s7868_s23 = sshll.u32 %s7864_s29, 3 }
  0x77   : > { %9364 = sst [smem:[#allocation61_spill]] %s9363_s0  ;;  %p7870_p3 = pnand %p6825_p10, %p72_p13 }
  0x78   : > { %s7875_s11 = sshll.u32 %s7569_s25, 7  ;;  %s9367_s22 = sld [smem:[#allocation64_spill]] }
  0x79   : > { %s9366_s7 = scalar_select %p7870_p3, 1, 0 }
  0x7a   : > { %s699_s19 = scalar_lea.vmem [#allocation14], %s7868_s23  ;;  %s9368_s2 = sand.u32 1, %s7569_s25  }
  0x7b   : > { %s706_s3 = sshll.u32 %s699_s19, 4  ;;  %s7888_s17 = scalar_lea.sflag [#allocation15], %s9368_s2  ;;  %s7884_s3 = int_to_ptr.vmem [resolvable:$true] %s706_s3 }
  0x7c   : > { %p7894_p2 = pneg %p7870_p3 }
  0x7e   : > { %s7881_s1 = scalar_lea.hbm %s9367_s22, %s7875_s11  ;;  %s6972_s19 = scalar_lea.hbm %s9367_s22, 256 }
  0x7f   : > { %s6967_s27 = scalar_lea.hbm %s7881_s1, 128  ;;  %p6973_p11 = scmp.lt.u32.totalorder %s7881_s1, %s9367_s22 }
  0x80   : > { %p6968_p1 = scmp.ne.s32.totalorder %s7881_s1, %s6967_s27  ;;  %p6974_p5 = scmp.lt.u32.totalorder %s6972_s19, %s6967_s27 }
  0x81   : > { %s9369_s24 = scalar_select %p7894_p2, 1, 0 }
  0x82   : > { %p6970_p6 = pnand %p7894_p2, %p6968_p1  ;;  %p6975_p10 = por %p6974_p5, %p6973_p11 }
  0x83   : > { %p6976_p13 = scmp.lt.u32.totalorder %s6967_s27, %s7881_s1 }
  0x84   : > { %p6971_p8 = pneg %p6970_p6 }
  0x85   : > { %p6977_p7 = por %p6976_p13, %p6975_p10 }
  0x87   : > { %p6978_p4 = pnand %p6977_p7, %p6971_p8 }
  0x89   : > { %6981 = shalt.err (!%p6978_p4)
}
  0x8a   : > { %s6982_s2 = scalar_lea.vmem %s7884_s3, 128  ;;  %s7575_s13 = smov [#allocation14]  }
  0x8b   : > { %p6983_p1 = scmp.ne.s32.totalorder %s7884_s3, %s6982_s2  ;;  %s6987_s4 = sshll.u32 %s7575_s13, 4  ;;  %s6988_s4 = int_to_ptr.vmem [resolvable:$false] %s6987_s4 }
  0x8c   : > { %s6989_s20 = scalar_lea.vmem %s6988_s4, 256  ;;  %p6990_p12 = scmp.lt.s32.totalorder %s7884_s3, %s6988_s4 }
  0x8d   : > { %p6985_p6 = pnand %p6983_p1, %p7894_p2  ;;  %p6991_p0 = scmp.lt.s32.totalorder %s6989_s20, %s6982_s2 }
  0x8f   : > { %p6986_p9 = pneg %p6985_p6  ;;  %p6992_p11 = por %p6991_p0, %p6990_p12 }
  0x91   : > { %p6993_p5 = pnand %p6992_p11, %p6986_p9 }
  0x93   : > { %6996 = shalt.err (!%p6993_p5)
}
  0x94   : > { %s9317_s15 = smov 16   ;;  %s7577_s27 = smov 1  }
  0x95   : > { %6804 = dma.hbm_to_vmem [thread:$0]  (!%p7870_p3), %s7881_s1, 128, %s7884_s3, %s7888_s17, %s9317_s15, %s9317_s15, %s7577_s27  }
  0x96   : > { %s7578_s19 = smov [#allocation22]   ;;  %s7579_s4 = smov [#allocation23]  }
  0x97   : > { %s638_s13 = sshll.u32 %s7578_s19, 4  ;;  %s654_s2 = sshll.u32 %s7579_s4, 4  ;;  %s639_s13 = int_to_ptr.vmem [resolvable:$true] %s638_s13  ;;  %s655_s2 = int_to_ptr.vmem [resolvable:$true] %s654_s2 }
  0x98   : > { %s9370_s18 = sld [smem:[#allocation69_spill]]  ;;  %p9371_p9 = scmp.ne.s32.totalorder %s9359_s21, 0 }
  0x9e   : > { %s6997_s16 = scalar_lea.hbm %s9370_s18, 512 }
  0x9f   : > { %p6998_p4 = scmp.ne.s32.totalorder %s9370_s18, %s6997_s16  ;;  %p7004_p7 = scmp.lt.u32.totalorder %s6997_s16, %s9370_s18 }
  0xa1   : > { %p7000_p12 = pnand %p6998_p4, %p9371_p9 }
  0xa3   : > { %p7001_p0 = pneg %p7000_p12 }
  0xa5   : > { %p7006_p8 = pnand %p7004_p7, %p7001_p0 }
  0xa7   : > { %7009 = shalt.err (!%p7006_p8)
}
  0xa8   : > { %s7010_s1 = scalar_lea.vmem %s639_s13, 512  ;;  %p7018_p6 = scmp.lt.s32.totalorder %s639_s13, %s639_s13 }
  0xa9   : > { %p7011_p10 = scmp.ne.s32.totalorder %s639_s13, %s7010_s1  ;;  %p7019_p11 = scmp.lt.s32.totalorder %s7010_s1, %s7010_s1 }
  0xab   : > { %p7013_p13 = pnand %p7011_p10, %p9371_p9  ;;  %p7020_p5 = por %p7019_p11, %p7018_p6 }
  0xad   : > { %p7014_p1 = pneg %p7013_p13 }
  0xaf   : > { %p7021_p3 = pnand %p7020_p5, %p7014_p1 }
  0xb1   : > { %7024 = shalt.err (!%p7021_p3)
}
  0xb2   : > { %p9372_p4 = scmp.ne.s32.totalorder %s9357_s28, 0  ;;  %s9373_s12 = smov 8  }
  0xb3   : > { %s9374_s14 = smov 128   ;;  %s9375_s8 = sld [smem:[#allocation71_spill]] }
  0xb4   : > { %6794 = dma.hbm_to_vmem [thread:$0]  (!%p9372_p4), %s9370_s18, 512, %s639_s13, [#allocation21], %s9374_s14, %s9374_s14, %s9373_s12  }
  0xb9   : > { %s7025_s22 = scalar_lea.hbm %s9375_s8, 512 }
  0xba   : > { %p7026_p12 = scmp.ne.s32.totalorder %s9375_s8, %s7025_s22  ;;  %p7032_p7 = scmp.lt.u32.totalorder %s7025_s22, %s9375_s8 }
  0xbc   : > { %p7028_p3 = pnand %p7026_p12, %p9371_p9 }
  0xbe   : > { %p7029_p0 = pneg %p7028_p3 }
  0xc0   : > { %p7034_p8 = pnand %p7032_p7, %p7029_p0 }
  0xc2   : > { %7037 = shalt.err (!%p7034_p8)
}
  0xc3   : > { %s7038_s10 = scalar_lea.vmem %s655_s2, 512  ;;  %p7046_p6 = scmp.lt.s32.totalorder %s655_s2, %s655_s2 }
  0xc4   : > { %p7039_p10 = scmp.ne.s32.totalorder %s655_s2, %s7038_s10  ;;  %p7047_p11 = scmp.lt.s32.totalorder %s7038_s10, %s7038_s10 }
  0xc6   : > { %p7041_p13 = pnand %p7039_p10, %p9371_p9  ;;  %p7048_p5 = por %p7047_p11, %p7046_p6 }
  0xc8   : > { %p7042_p1 = pneg %p7041_p13 }
  0xca   : > { %p7049_p2 = pnand %p7048_p5, %p7042_p1 }
  0xcc   : > { %7052 = shalt.err (!%p7049_p2)
}
  0xcd   : > { %6797 = dma.hbm_to_vmem [thread:$0]  (!%p9372_p4), %s9375_s8, 512, %s655_s2, [#allocation24], %s9374_s14, %s9374_s14, %s9373_s12  }
  0xce   : > { %s5636_s21 = sshll.u32 %s7864_s29, 4  ;;  %s5822_s0 = sshll.u32 %s7569_s25, 8 }
  0xcf   : > { %s9376_s19 = sld [smem:[#allocation63_spill]]  ;;  %s678_s28 = scalar_lea.vmem [#allocation11], %s5636_s21 }
  0xd0   : > { %s685_s20 = sshll.u32 %s678_s28, 4  ;;  %s675_s1 = scalar_lea.sflag [#allocation12], %s7864_s29  ;;  %s7970_s20 = int_to_ptr.vmem [resolvable:$true] %s685_s20 }
  0xd1   : > { %p9377_p9 = scmp.ne.s32.totalorder %s9369_s24, 0 }
  0xd5   : > { %s7968_s4 = scalar_lea.hbm %s9376_s19, %s5822_s0  ;;  %s7058_s14 = scalar_lea.hbm %s9376_s19, 512 }
  0xd6   : > { %s7053_s10 = scalar_lea.hbm %s7968_s4, 256  ;;  %p7059_p3 = scmp.lt.u32.totalorder %s7968_s4, %s9376_s19 }
  0xd7   : > { %p7054_p2 = scmp.ne.s32.totalorder %s7968_s4, %s7053_s10  ;;  %p7060_p0 = scmp.lt.u32.totalorder %s7058_s14, %s7053_s10 }
  0xd8   : > { %p7062_p8 = scmp.lt.u32.totalorder %s7053_s10, %s7968_s4 }
  0xd9   : > { %p7056_p4 = pnand %p7054_p2, %p9377_p9  ;;  %p7061_p7 = por %p7060_p0, %p7059_p3 }
  0xdb   : > { %p7057_p12 = pneg %p7056_p4  ;;  %p7063_p10 = por %p7062_p8, %p7061_p7 }
  0xdd   : > { %p7064_p13 = pnand %p7063_p10, %p7057_p12 }
  0xdf   : > { %7067 = shalt.err (!%p7064_p13)
}
  0xe0   : > { %s7068_s21 = scalar_lea.vmem %s7970_s20, 256  ;;  %s7580_s0 = smov [#allocation11]  }
  0xe1   : > { %p7069_p1 = scmp.ne.s32.totalorder %s7970_s20, %s7068_s21  ;;  %s7073_s3 = sshll.u32 %s7580_s0, 4  ;;  %s7074_s3 = int_to_ptr.vmem [resolvable:$false] %s7073_s3 }
  0xe2   : > { %s7075_s22 = scalar_lea.vmem %s7074_s3, 512  ;;  %p7076_p5 = scmp.lt.s32.totalorder %s7970_s20, %s7074_s3 }
  0xe3   : > { %p7071_p6 = pnand %p7069_p1, %p9377_p9  ;;  %p7077_p2 = scmp.lt.s32.totalorder %s7075_s22, %s7068_s21 }
  0xe5   : > { %p7072_p11 = pneg %p7071_p6  ;;  %p7078_p4 = por %p7077_p2, %p7076_p5 }
  0xe7   : > { %p7079_p3 = pnand %p7078_p4, %p7072_p11 }
  0xe9   : > { %7082 = shalt.err (!%p7079_p3)
}
  0xea   : > { %s7581_s28 = smov 32   ;;  %s7582_s10 = smov 2  }
  0xeb   : > { %p9378_p12 = scmp.ne.s32.totalorder %s9366_s7, 0  ;;  %s9379_s14 = sld [smem:[#allocation65_spill]] }
  0xec   : > { %s720_s16 = scalar_lea.vmem [#allocation16], %s7868_s23  ;;  %s9380_s22 = sld [smem:[#allocation66_spill]] }
  0xed   : > { %6801 = dma.hbm_to_vmem [thread:$0]  (!%p9378_p12), %s7968_s4, 256, %s7970_s20, %s675_s1, %s7581_s28, %s7581_s28, %s7582_s10  }
  0xee   : > { %s727_s21 = sshll.u32 %s720_s16, 4  ;;  %s8003_s21 = int_to_ptr.vmem [resolvable:$true] %s727_s21 }
  0xf1   : > { %s8000_s13 = scalar_lea.hbm %s9379_s14, %s7875_s11  ;;  %s7088_s1 = scalar_lea.hbm %s9379_s14, 256 }
  0xf2   : > { %s8009_s15 = scalar_lea.hbm %s9380_s22, %s7875_s11  ;;  %s7083_s29 = scalar_lea.hbm %s8000_s13, 128 }
  0xf3   : > { %p7084_p0 = scmp.ne.s32.totalorder %s8000_s13, %s7083_s29  ;;  %p7089_p10 = scmp.lt.u32.totalorder %s8000_s13, %s9379_s14 }
  0xf4   : > { %p7090_p13 = scmp.lt.u32.totalorder %s7088_s1, %s7083_s29  ;;  %p7092_p6 = scmp.lt.u32.totalorder %s7083_s29, %s8000_s13 }
  0xf5   : > { %p7086_p7 = pnand %p7084_p0, %p9377_p9 }
  0xf6   : > { %p7091_p1 = por %p7090_p13, %p7089_p10 }
  0xf7   : > { %p7087_p8 = pneg %p7086_p7 }
  0xf8   : > { %p7093_p11 = por %p7092_p6, %p7091_p1 }
  0xfa   : > { %p7094_p5 = pnand %p7093_p11, %p7087_p8 }
  0xfc   : > { %7097 = shalt.err (!%p7094_p5)
}
  0xfd   : > { %s7098_s11 = scalar_lea.vmem %s8003_s21, 128  ;;  %s7583_s2 = smov [#allocation16]  }
  0xfe   : > { %p7099_p2 = scmp.ne.s32.totalorder %s8003_s21, %s7098_s11  ;;  %s7103_s12 = sshll.u32 %s7583_s2, 4  ;;  %s7104_s12 = int_to_ptr.vmem [resolvable:$false] %s7103_s12 }
  0xff   : > { %s7105_s16 = scalar_lea.vmem %s7104_s12, 256  ;;  %p7106_p0 = scmp.lt.s32.totalorder %s8003_s21, %s7104_s12 }
 0x100   : > { %p7101_p4 = pnand %p7099_p2, %p9377_p9  ;;  %p7107_p7 = scmp.lt.s32.totalorder %s7105_s16, %s7098_s11 }
 0x102   : > { %p7102_p3 = pneg %p7101_p4  ;;  %p7108_p10 = por %p7107_p7, %p7106_p0 }
 0x104   : > { %p7109_p13 = pnand %p7108_p10, %p7102_p3 }
 0x106   : > { %7112 = shalt.err (!%p7109_p13)
}
 0x107   : > { %s9381_s0 = smov 16   ;;  %s741_s3 = scalar_lea.vmem [#allocation17], %s7868_s23 }
 0x108   : > { %6807 = dma.hbm_to_vmem [thread:$0]  (!%p9378_p12), %s8000_s13, 128, %s8003_s21, %s7888_s17, %s9381_s0, %s9381_s0, %s7577_s27  }
 0x109   : > { %s748_s29 = sshll.u32 %s741_s3, 4  ;;  %s9382_s4 = sand.u32 1, %s7569_s25   ;;  %s8037_s29 = int_to_ptr.vmem [resolvable:$true] %s748_s29 }
 0x10a   : > { %s8041_s20 = scalar_lea.sflag [#allocation18], %s9382_s4  ;;  %s7113_s1 = scalar_lea.hbm %s8009_s15, 128 }
 0x10b   : > { %p7114_p8 = scmp.ne.s32.totalorder %s8009_s15, %s7113_s1  ;;  %s7118_s11 = scalar_lea.hbm %s9380_s22, 256 }
 0x10c   : > { %p7119_p11 = scmp.lt.u32.totalorder %s8009_s15, %s9380_s22  ;;  %p7120_p5 = scmp.lt.u32.totalorder %s7118_s11, %s7113_s1 }
 0x10d   : > { %p7116_p1 = pnand %p7114_p8, %p9377_p9  ;;  %p7122_p4 = scmp.lt.u32.totalorder %s7113_s1, %s8009_s15 }
 0x10e   : > { %p7121_p2 = por %p7120_p5, %p7119_p11 }
 0x10f   : > { %p7117_p6 = pneg %p7116_p1 }
 0x110   : > { %p7123_p3 = por %p7122_p4, %p7121_p2 }
 0x112   : > { %p7124_p0 = pnand %p7123_p3, %p7117_p6 }
 0x114   : > { %7127 = shalt.err (!%p7124_p0)
}
 0x115   : > { %s7128_s17 = scalar_lea.vmem %s8037_s29, 128  ;;  %s7584_s23 = smov [#allocation17]  }
 0x116   : > { %p7129_p7 = scmp.ne.s32.totalorder %s8037_s29, %s7128_s17  ;;  %s7133_s13 = sshll.u32 %s7584_s23, 4  ;;  %s7134_s13 = int_to_ptr.vmem [resolvable:$false] %s7133_s13 }
 0x117   : > { %s7135_s21 = scalar_lea.vmem %s7134_s13, 256  ;;  %p7136_p8 = scmp.lt.s32.totalorder %s8037_s29, %s7134_s13 }
 0x118   : > { %p7131_p10 = pnand %p7129_p7, %p9377_p9  ;;  %p7137_p1 = scmp.lt.s32.totalorder %s7135_s21, %s7128_s17 }
 0x11a   : > { %p7132_p13 = pneg %p7131_p10  ;;  %p7138_p11 = por %p7137_p1, %p7136_p8 }
 0x11c   : > { %p7139_p5 = pnand %p7138_p11, %p7132_p13 }
 0x11e   : > { %7142 = shalt.err (!%p7139_p5)
}
 0x11f   : > { %6810 = dma.hbm_to_vmem [thread:$0]  (!%p9378_p12), %s8009_s15, 128, %s8037_s29, %s8041_s20, %s9381_s0, %s9381_s0, %s7577_s27  }
 0x120   : > { %p9383_p9 = scmp.ne.s32.totalorder %s9356_s6, 0 }
 0x121   : > { %s8071_s24 = sand.u32 (!%p9383_p9), 1, %s7561_s30   ;;  %p9384_p6 = scmp.ne.s32.totalorder (!%p9383_p9), %s9353_s26, 0 }
 0x122   : > { %760 = sbr.rel (%p9383_p9) target bundleno = 3931 (0xf5b), region = 64  ;;  %s5649_s16 = sshll.u32 (!%p9383_p9), %s8071_s24, 4 }
 0x123   : > { %s763_s3 = scalar_lea.sflag (!%p9383_p9), [#allocation12], %s8071_s24  ;;  %s8075_s4 = scalar_lea.vmem (!%p9383_p9), [#allocation11], %s5649_s16 }
 0x129   : > { %7504 = dma.done.wait (%p9384_p6), %s763_s3, 256  }
 0x12a   : > { %7506 = vsyncadd (%p9384_p6), %s763_s3, 4294967040  ;;  %s8082_s6 = sand.u32 1, %s7747_s5   ;;  %s5650_s7 = sshll.u32 %s8071_s24, 3 }
 0x12b   : > { %s772_s15 = scalar_lea.sflag [#allocation15], %s8082_s6  ;;  %s8086_s27 = scalar_lea.vmem [#allocation14], %s5650_s7 }
 0x12c   : > { %7508 = dma.done.wait (%p9384_p6), %s772_s15, 256  }
 0x12d   : > { %7510 = vsyncadd (%p9384_p6), %s772_s15, 4294967040  ;;  %s8092_s0 = scalar_lea.vmem [#allocation16], %s5650_s7  ;;  %s790_s29 = scalar_lea.sflag [#allocation18], %s8082_s6 }
 0x12e   : > { %s8095_s20 = scalar_lea.vmem [#allocation17], %s5650_s7 }
 0x12f   : > { %7512 = dma.done.wait (%p9384_p6), %s790_s29, 128  }
 0x130   : > { %7514 = vsyncadd (%p9384_p6), %s790_s29, 4294967168  ;;  %p9385_p12 = scmp.eq.s32.totalorder %s7747_s5, 0 }
 0x132   : > { %7516 = dma.done.wait (%p9385_p12), [#allocation18], 512   ;;  %p9386_p2 = pmov %p9385_p12 }
 0x134   : > { %7518 = vsyncadd (%p9386_p2), [#allocation18], 4294966784  ;;  %p9387_p4 = pmov %p9386_p2 }
 0x135   : > { %p9388_p3 = pmov %p9386_p2 }
 0x136   : > { %7520 = dma.done.wait (%p9387_p4), [#allocation21], 1024  }
 0x137   : > { %7522 = vsyncadd (%p9388_p3), [#allocation21], 4294966272  ;;  %p9389_p0 = pmov %p9386_p2 }
 0x139   : > { %7524 = dma.done.wait (%p9389_p0), [#allocation24], 512   ;;  %p9390_p7 = pmov %p9389_p0 }
 0x13a   : > { %s8113_s26 = scalar_lea.vmem [#allocation25], %s5649_s16  ;;  %s8115_s1 = scalar_lea.vmem [#allocation26], %s5649_s16 }
 0x13b   : > { %7526 = vsyncadd (%p9390_p7), [#allocation24], 4294966784  ;;  %s8117_s28 = scalar_lea.vmem [#allocation28], %s5649_s16  ;;  %p9391_p10 = scmp.ne.s32.totalorder %s7747_s5, 0 }
 0x13c   : > { %vm908_vm0 = vcmask (!%p9391_p10), 254976   ;;  %v7585_v0 = vmov (!%p9391_p10), 0.0   ;;  %v7586_v1 = vmov (!%p9391_p10), 0.01  }
 0x13d   : > { %907 = sbr.rel (%p9391_p10) target bundleno = 324 (0x144), region = 100  ;;  %909 = vst.msk [vmem:[#allocation2] sm:$0x3] (!%p9391_p10), %vm908_vm0, %v7585_v0  ;;  %910 = vst.msk [vmem:[#allocation3] sm:$0x3] (!%p9391_p10), %vm908_vm0, %v7585_v0 }
 0x13e   : > { %911 = vst.msk [vmem:[#allocation5] sm:$0x3] (!%p9391_p10), %vm908_vm0, %v7585_v0  ;;  %912 = vst.msk [vmem:[#allocation6] sm:$0x3] (!%p9391_p10), %vm908_vm0, %v7585_v0 }
 0x13f   : > { %913 = vst.msk [vmem:[#allocation8] sm:$0x3] (!%p9391_p10), %vm908_vm0, %v7585_v0  ;;  %914 = vst.msk [vmem:[#allocation9] sm:$0x3] (!%p9391_p10), %vm908_vm0, %v7585_v0 }
 0x140   : > { %915 = vst.msk [vmem:[#allocation4] sm:$0x3] (!%p9391_p10), %vm908_vm0, %v7586_v1  ;;  %916 = vst.msk [vmem:[#allocation7] sm:$0x3] (!%p9391_p10), %vm908_vm0, %v7586_v1 }
 0x141   : > { %917 = vst.msk [vmem:[#allocation10] sm:$0x3] (!%p9391_p10), %vm908_vm0, %v7586_v1 }
 0x144 PF: > { %v923_v2 = vld [vmem:[#allocation19] sm:$0xff]  ;;  %v924_v3 = vld [vmem:[#allocation19 + $0x8] sm:$0xff]  ;;  %v925_v4 = vld [vmem:[#allocation19 + $0x10] sm:$0xff]  ;;  %v7587_v5 = vmov 0.0|0.0   ;;  %vm7588_vm1 = vmmov 0   ;;  %v7589_v8 = vmov 0.0   ;;  %v1015_v35 = vlaneseq }
 0x145   : > { %6469 = vmatprep.subr.bf16.mxu0 %v7587_v5  ;;  %v8122_v6 = vpack.c.bf16 %v924_v3, %v923_v2  ;;  %v926_v7 = vld [vmem:[#allocation19 + $0x18] sm:$0xff]  ;;  %6037 = vmatprep.mubr.msk.f32.mxu0 %vm7588_vm1, %v7589_v8  ;;  %v1041_v9 = vld [vmem:[#allocation22] sm:$0xff]  ;;  %v1042_v10 = vld [vmem:[#allocation22 + $0x8] sm:$0xff]  ;;  %vm927_vm2 = vcmask 261120   ;;  %s9392_s9 = sld [smem:[#allocation72_spill]]  ;;  %vm1032_vm3 = vcmask 254976  }
 0x146   : > { %6475 = vmatprep.subr.bf16.mxu1 %v7587_v5  ;;  %6048 = vmatprep.mubr.msk.f32.mxu1 %vm7588_vm1, %v7589_v8  ;;  %v8130_v11 = vpack.c.bf16 %v926_v7, %v925_v4  ;;  %v8132_v12 = vpack.c.bf16 %v1042_v10, %v1041_v9  ;;  %v922_v13 = vld [vmem:[#allocation3] sm:$0x3]  ;;  %v1043_v15 = vld [vmem:[#allocation22 + $0x10] sm:$0xff]  ;;  %v1044_v16 = vld [vmem:[#allocation22 + $0x18] sm:$0xff]  ;;  %v1016_v37 = vshrl.u32 %v1015_v35, 7  ;;  %v7590_v42 = vmov 0  }
 0x147   : > { %6471 = vmatpush3.bf16.msra.mxu0 %v8122_v6  ;;  %v1003_v14 = vld [vmem:[#allocation4] sm:$0x3]  ;;  %v8142_v17 = vpack.c.bf16 %v1044_v16, %v1043_v15  ;;  %v1005_v19 = vmul.f32 0.0016652786, %v922_v13  ;;  %v1037_v21 = vld [vmem:[#allocation20 + $0x8] sm:$0xff]  ;;  %v1038_v28 = vld [vmem:[#allocation20 + $0x10] sm:$0xff] }
 0x148   : > { %6472 = vmatprep.subr.bf16.mxu0 %v7587_v5  ;;  %6477 = vmatpush3.bf16.msra.mxu1 %v8132_v12  ;;  %v1004_v18 = vmul.f32 0.9983347, %v1003_v14  ;;  %v1036_v20 = vld [vmem:[#allocation20] sm:$0xff]  ;;  %v1039_v29 = vld [vmem:[#allocation20 + $0x18] sm:$0xff]  ;;  %v8181_v34 = vld [vmem:[#allocation9] sm:$0x3] }
 0x149   : > { %6478 = vmatprep.subr.bf16.mxu1 %v7587_v5  ;;  %v8149_v23 = vpack.c.bf16 %v1037_v21, %v1036_v20  ;;  %v8154_v26 = vld [vmem:[#allocation6] sm:$0x3]  ;;  %v8168_v31 = vpack.c.bf16 %v1039_v29, %v1038_v28  ;;  %v918_v36 = vld [vmem:[%s8086_s27] sm:$0x1]  ;;  %v1002_v39 = vld [vmem:[#allocation2] sm:$0x3] }
 0x14a   : > { %v1006_v25 = vadd.f32 %v1005_v19, %v1004_v18  ;;  %vm1013_vm4 = vcmp.eq.f32.partialorder %v918_v36, 0.0  ;;  %v8192_v40 = vsub.s32 0, %v1016_v37  ;;  %v921_v44 = vld [vmem:[%s8075_s4] sm:$0x3]  ;;  %v1009_v45 = vmul.f32 0.95122945, %v1002_v39 }
 0x14b   : > { %6474 = vmatpush3.bf16.msra.mxu0 %v8130_v11  ;;  %v1237_v22 = vld [vmem:[%s9392_s9] sm:$0xff]  ;;  %v1238_v24 = vld [vmem:[%s9392_s9 + $0x8] sm:$0xff]  ;;  %v1239_v30 = vld [vmem:[%s9392_s9 + $0x10] sm:$0xff]  ;;  %v1014_v43 = vsel %vm1013_vm4, 1, %v7590_v42  ;;  %v1202_v3 = vmul.f32 0.0016652786, %v8154_v26 }
 0x14c   : > { %6481 = vmatprep.subr.bf16.mxu0 %v7587_v5  ;;  %6480 = vmatpush3.bf16.msra.mxu1 %v8142_v17  ;;  %v8156_v27 = vpack.c.bf16 %v1238_v24, %v1237_v22  ;;  %1035 = vst.msk [vmem:[#allocation4] sm:$0x3] %vm1032_vm3, %v1006_v25  ;;  %v1240_v32 = vld [vmem:[%s9392_s9 + $0x18] sm:$0xff]  ;;  %v1007_v38 = vmul.f32 1.8, %v1006_v25  ;;  %v1018_v47 = vrot.slane %v1014_v43, %v8192_v40  ;;  %v1232_v10 = vld [vmem:[#allocation23] sm:$0xff] }
 0x14d   : > { %6487 = vmatprep.subr.bf16.mxu1 %v7587_v5  ;;  %v8175_v33 = vpack.c.bf16 %v1240_v32, %v1239_v30  ;;  %v1029_v55 = vrot.slane %v918_v36, %v8192_v40  ;;  %v1200_v1 = vld [vmem:[#allocation7] sm:$0x3]  ;;  %v1234_v15 = vld [vmem:[#allocation23 + $0x10] sm:$0xff]  ;;  %v1235_v16 = vld [vmem:[#allocation23 + $0x18] sm:$0xff]  ;;  %s9393_s7 = sld [smem:[#allocation70_spill]]  ;;  %s9394_s10 = sld [smem:[#allocation73_spill]] }
 0x14e   : > { %6038 = vmatmul.mubr.msk.f32.vlgmr.msra.gmra.mrb[0].mxu0 %vm927_vm2, %v922_v13  ;;  %v1008_v41 = vadd.f32 0.01, %v1007_v38  ;;  %vm1019_vm5 = vcmp.eq.s32.totalorder %v1018_v47, 1  ;;  %v1201_v2 = vmul.f32 0.9983347, %v1200_v1  ;;  %v8224_v18 = vpack.c.bf16 %v1235_v16, %v1234_v15  ;;  %p5790_p13 = scmp.ne.s32.totalorder %s7747_s5, 1 }
 0x14f   : > { %6059 = vmatprep.mubr.msk.f32.mxu0 %vm7588_vm1, %v7589_v8  ;;  %6049 = vmatmul.mubr.msk.f32.vlgmr.msra.gmra.mrb[0].mxu1 %vm927_vm2, %v8154_v26  ;;  %v919_v19 = vld [vmem:[%s8092_s0] sm:$0x1]  ;;  %v1199_v21 = vld [vmem:[#allocation5] sm:$0x3]  ;;  %v5671_v25 = vld [vmem:[%s8086_s27 + $0x1] sm:$0x1] }
 0x150   : > { %6483 = vmatpush3.bf16.msra.mxu0 %v8149_v23  ;;  %6489 = vmatpush3.bf16.msra.mxu1 %v8156_v27  ;;  %v1011_v49 = vmul.f32 %v1008_v41, %v922_v13  ;;  %v1203_v4 = vadd.f32 %v1202_v3, %v1201_v2  ;;  %v1233_v13 = vld [vmem:[#allocation23 + $0x8] sm:$0xff]  ;;  %vm1210_vm7 = vcmp.eq.f32.partialorder %v919_v19, 0.0  ;;  %v1206_v32 = vmul.f32 0.95122945, %v1199_v21 }
 0x151   : > { %6484 = vmatprep.subr.bf16.mxu0 %v7587_v5  ;;  %6490 = vmatprep.subr.bf16.mxu1 %v7587_v5  ;;  %v8220_v14 = vpack.c.bf16 %v1233_v13, %v1232_v10  ;;  %v1211_v24 = vsel %vm1210_vm7, 1, %v7590_v42  ;;  %vm1529_vm8 = vcmp.eq.f32.partialorder %v5671_v25, 0.0 }
 0x152   : > { %6070 = vmatprep.mubr.msk.f32.mxu1 %vm7588_vm1, %v7589_v8  ;;  %1231 = vst.msk [vmem:[#allocation7] sm:$0x3] %vm1032_vm3, %v1203_v4  ;;  %v1204_v20 = vmul.f32 1.8, %v1203_v4  ;;  %v1215_v36 = vrot.slane %v1211_v24, %v8192_v40  ;;  %v1530_v43 = vsel %vm1529_vm8, 1, %v7590_v42 }
 0x153   : > { %v1519_v58 = vld [vmem:[#allocation4] sm:$0x3]  ;;  %v8234_v29 = vld [vmem:[%s9393_s7] ss:$0 sm:$0xff] }
 0x154   : > { %6486 = vmatpush3.bf16.msra.mxu0 %v8168_v31  ;;  %6492 = vmatpush3.bf16.msra.mxu1 %v8175_v33  ;;  %v1520_v59 = vmul.f32 0.9983347, %v1519_v58  ;;  %v1205_v22 = vadd.f32 0.01, %v1204_v20  ;;  %vm1216_vm9 = vcmp.eq.s32.totalorder %v1215_v36, 1 }
 0x155   : > { %6493 = vmatprep.subr.bf16.mxu0 %v7587_v5  ;;  %6499 = vmatprep.subr.bf16.mxu1 %v7587_v5  ;;  %v1396_v20 = vld [vmem:[#allocation10] sm:$0x3] }
 0x156   : > { %v1208_v38 = vmul.f32 %v1205_v22, %v8154_v26  ;;  %v1226_v26 = vrot.slane %v919_v19, %v8192_v40 }
 0x157   : > { %6071 = vmatmul.mubr.msk.f32.vlgmr.msra.gmra.mrb[2].mxu1 %vm927_vm2, %v8181_v34 }
 0x158   : > { %6501 = vmatpush3.bf16.msra.mxu1 %v8122_v6  ;;  %6092 = vmatprep.mubr.msk.f32.mxu1 %vm7588_vm1, %v7589_v8 }
 0x159   : > { %6502 = vmatprep.subr.bf16.mxu1 %v7587_v5 }
 0x15c   : > { %6504 = vmatpush3.bf16.msra.mxu1 %v8130_v11 }
 0x15d   : > { %6511 = vmatprep.subr.bf16.mxu1 %v7587_v5 }
 0x221   : > { %v997_v46 = vpop.f32.mrb[0].mxu0 }
 0x222   : > { %v1001_v48 = vadd.f32 %v997_v46, %v921_v44  ;;  %v6039_v50 = vpop.f32.mrb[1].mxu0  ;;  %v1114_v63 = vpop.f32.mrb[0].mxu1  ;;  %v5674_v44 = vld [vmem:[%s8075_s4 + $0x2] sm:$0x3] }
 0x223   : > { %v6050_v0 = vpop.f32.mrb[1].mxu1 }
 0x224   : > { %v1010_v51 = vadd.f32 %v1009_v45, %v1001_v48  ;;  %v1715_v0 = vld [vmem:[#allocation7] sm:$0x3] }
 0x225   : > { %v1716_v2 = vmul.f32 0.9983347, %v1715_v0 }
 0x226   : > { %v1012_v52 = vsub.f32 %v1010_v51, %v1011_v49  ;;  %v1534_v49 = vrot.slane %v1530_v43, %v8192_v40  ;;  %v5672_v43 = vld [vmem:[%s8092_s0 + $0x1] sm:$0x1] }
 0x227   : > { %vm1725_vm14 = vcmp.eq.f32.partialorder %v5672_v43, 0.0 }
 0x228   : > { %v1020_v53 = vsel %vm1019_vm5, %v1002_v39, %v1012_v52  ;;  %vm1535_vm11 = vcmp.eq.s32.totalorder %v1534_v49, 1 }
 0x229   : > { %v1021_v54 = vsub.f32 %v1020_v53, %v1008_v41  ;;  %1033 = vst.msk [vmem:[#allocation2] sm:$0x3] %vm1032_vm3, %v1020_v53 }
 0x22a   : > { %v8218_v7 = vpop.f32.mrb[2].mxu1 }
 0x22b   : > { %vm1022_vm6 = vcmp.gt.f32.partialorder %v1021_v54, 0.0  ;;  %v6072_v9 = vpop.f32.mrb[3].mxu1 }
 0x22c   : > { %v5662_v56 = vsel %vm1022_vm6, 1.0, %v7589_v8 }
 0x22d   : > { %v1031_v57 = vmul.f32 %v5662_v56, %v1029_v55 }
 0x22f   : > { %1034 = vst.msk [vmem:[#allocation3] sm:$0x3] %vm1032_vm3, %v1031_v57  ;;  %6060 = vmatmul.mubr.msk.f32.vlgmr.msra.gmra.mrb[2].mxu0 %vm927_vm2, %v1031_v57 }
 0x230   : > { %6081 = vmatprep.mubr.msk.f32.mxu0 %vm7588_vm1, %v7589_v8  ;;  %6495 = vmatpush3.bf16.msra.mxu0 %v8220_v14  ;;  %v1518_v45 = vld [vmem:[#allocation2] sm:$0x3] }
 0x231   : > { %6496 = vmatprep.subr.bf16.mxu0 %v7587_v5  ;;  %v1525_v52 = vmul.f32 0.95122945, %v1518_v45 }
 0x234   : > { %6498 = vmatpush3.bf16.msra.mxu0 %v8224_v18 }
 0x235   : > { %6505 = vmatprep.subr.bf16.mxu0 %v7587_v5 }
 0x236   : > { %v8204_v60 = vld [vmem:[#allocation3] sm:$0x3] }
 0x237   : > { %6093 = vmatmul.mubr.msk.f32.vlgmr.msra.gmra.mrb[4].mxu1 %vm927_vm2, %v8204_v60  ;;  %v1521_v61 = vmul.f32 0.0016652786, %v8204_v60 }
 0x238   : > { %6513 = vmatpush3.bf16.msra.mxu1 %v8149_v23  ;;  %6114 = vmatprep.mubr.msk.f32.mxu1 %vm7588_vm1, %v7589_v8 }
 0x239   : > { %v1522_v62 = vadd.f32 %v1521_v61, %v1520_v59  ;;  %6514 = vmatprep.subr.bf16.mxu1 %v7587_v5 }
 0x23b   : > { %1550 = vst.msk [vmem:[#allocation4] sm:$0x3] %vm1032_vm3, %v1522_v62  ;;  %v1523_v39 = vmul.f32 1.8, %v1522_v62 }
 0x23c   : > { %6516 = vmatpush3.bf16.msra.mxu1 %v8168_v31 }
 0x23d   : > { %6523 = vmatprep.subr.bf16.mxu1 %v7587_v5  ;;  %v1524_v47 = vadd.f32 0.01, %v1523_v39 }
 0x23f   : > { %v1527_v56 = vmul.f32 %v1524_v47, %v8204_v60 }
 0x242   : > { %v2037_v10 = vld [vmem:[#allocation4] sm:$0x3] }
 0x243   : > { %v2038_v15 = vmul.f32 0.9983347, %v2037_v10 }
 0x302   : > { %v1187_v28 = vpop.f32.mrb[2].mxu0 }
 0x303   : > { %v1188_v30 = vadd.f32 %v1187_v28, %v1114_v63  ;;  %v6061_v35 = vpop.f32.mrb[3].mxu0  ;;  %v1545_v63 = vrot.slane %v5671_v25, %v8192_v40 }
 0x305   : > { %v1198_v37 = vadd.f32 %v8234_v29, %v1188_v30  ;;  %v920_v30 = vld [vmem:[%s8095_s20] sm:$0x1] }
 0x306   : > { %vm1406_vm13 = vcmp.eq.f32.partialorder %v920_v30, 0.0 }
 0x307   : > { %v1207_v41 = vadd.f32 %v1206_v32, %v1198_v37  ;;  %v1395_v32 = vld [vmem:[#allocation8] sm:$0x3]  ;;  %v1407_v35 = vsel %vm1406_vm13, 1, %v7590_v42  ;;  %v8293_v37 = vld [vmem:[%s9394_s10] ss:$0 sm:$0xff] }
 0x308   : > { %v1402_v39 = vmul.f32 0.95122945, %v1395_v32 }
 0x309   : > { %v1209_v46 = vsub.f32 %v1207_v41, %v1208_v38 }
 0x30a   : > { %v1513_v48 = vpop.f32.mrb[4].mxu1 }
 0x30b   : > { %v1217_v50 = vsel %vm1216_vm9, %v1199_v21, %v1209_v46  ;;  %v1517_v51 = vadd.f32 %v5674_v44, %v1513_v48  ;;  %v6094_v53 = vpop.f32.mrb[5].mxu1  ;;  %v1397_v21 = vmul.f32 0.9983347, %v1396_v20  ;;  %v1411_v44 = vrot.slane %v1407_v35, %v8192_v40 }
 0x30c   : > { %v1218_v54 = vsub.f32 %v1217_v50, %v1205_v22  ;;  %1229 = vst.msk [vmem:[#allocation5] sm:$0x3] %vm1032_vm3, %v1217_v50  ;;  %v1398_v22 = vmul.f32 0.0016652786, %v8181_v34 }
 0x30d   : > { %v1526_v55 = vadd.f32 %v1525_v52, %v1517_v51  ;;  %vm1412_vm15 = vcmp.eq.s32.totalorder %v1411_v44, 1  ;;  %v1726_v52 = vsel %vm1725_vm14, 1, %v7590_v42 }
 0x30e   : > { %vm1219_vm10 = vcmp.gt.f32.partialorder %v1218_v54, 0.0  ;;  %v1399_v24 = vadd.f32 %v1398_v22, %v1397_v21 }
 0x30f   : > { %v1528_v57 = vsub.f32 %v1526_v55, %v1527_v56  ;;  %v5666_v58 = vsel %vm1219_vm10, 1.0, %v7589_v8 }
 0x310   : > { %v1228_v59 = vmul.f32 %v5666_v58, %v1226_v26  ;;  %v1400_v25 = vmul.f32 1.8, %v1399_v24  ;;  %1427 = vst.msk [vmem:[#allocation10] sm:$0x3] %vm1032_vm3, %v1399_v24  ;;  %v1730_v58 = vrot.slane %v1726_v52, %v8192_v40 }
 0x311   : > { %v1536_v61 = vsel %vm1535_vm11, %v1518_v45, %v1528_v57 }
 0x312   : > { %v1537_v62 = vsub.f32 %v1536_v61, %v1524_v47  ;;  %1548 = vst.msk [vmem:[#allocation2] sm:$0x3] %vm1032_vm3, %v1536_v61  ;;  %1230 = vst.msk [vmem:[#allocation6] sm:$0x3] %vm1032_vm3, %v1228_v59  ;;  %6082 = vmatmul.mubr.msk.f32.vlgmr.msra.gmra.mrb[4].mxu0 %vm927_vm2, %v1228_v59  ;;  %v1401_v28 = vadd.f32 0.01, %v1400_v25 }
 0x313   : > { %6507 = vmatpush3.bf16.msra.mxu0 %v8132_v12  ;;  %6103 = vmatprep.mubr.msk.f32.mxu0 %vm7588_vm1, %v7589_v8  ;;  %v1714_v53 = vld [vmem:[#allocation5] sm:$0x3]  ;;  %vm1731_vm4 = vcmp.eq.s32.totalorder %v1730_v58, 1 }
 0x314   : > { %vm1538_vm12 = vcmp.gt.f32.partialorder %v1537_v62, 0.0  ;;  %6508 = vmatprep.subr.bf16.mxu0 %v7587_v5  ;;  %1430 = vst.msk [vmem:[%s8117_s28] sm:$0x3] %vm1032_vm3, %v1401_v28  ;;  %v1404_v46 = vmul.f32 %v1401_v28, %v8181_v34  ;;  %v1422_v34 = vrot.slane %v920_v30, %v8192_v40  ;;  %v1721_v61 = vmul.f32 0.95122945, %v1714_v53 }
 0x315   : > { %v5676_v60 = vsel %vm1538_vm12, 1.0, %v7589_v8 }
 0x316   : > { %v1547_v1 = vmul.f32 %v5676_v60, %v1545_v63 }
 0x317   : > { %6510 = vmatpush3.bf16.msra.mxu0 %v8142_v17  ;;  %v1911_v10 = vld [vmem:[#allocation10] sm:$0x3] }
 0x318   : > { %1549 = vst.msk [vmem:[#allocation3] sm:$0x3] %vm1032_vm3, %v1547_v1  ;;  %6115 = vmatmul.mubr.msk.f32.vlgmr.msra.gmra.mrb[6].mxu1 %vm927_vm2, %v1547_v1  ;;  %6517 = vmatprep.subr.bf16.mxu0 %v7587_v5  ;;  %v1912_v20 = vmul.f32 0.9983347, %v1911_v10 }
 0x319   : > { %v8259_v3 = vld [vmem:[#allocation6] sm:$0x3]  ;;  %6525 = vmatpush3.bf16.msra.mxu1 %v8220_v14  ;;  %6136 = vmatprep.mubr.msk.f32.mxu1 %vm7588_vm1, %v7589_v8 }
 0x31a   : > { %6104 = vmatmul.mubr.msk.f32.vlgmr.msra.gmra.mrb[6].mxu0 %vm927_vm2, %v8259_v3  ;;  %v1717_v4 = vmul.f32 0.0016652786, %v8259_v3  ;;  %6526 = vmatprep.subr.bf16.mxu1 %v7587_v5 }
 0x31b   : > { %6519 = vmatpush3.bf16.msra.mxu0 %v8156_v27  ;;  %6125 = vmatprep.mubr.msk.f32.mxu0 %vm7588_vm1, %v7589_v8 }
 0x31c   : > { %v1718_v9 = vadd.f32 %v1717_v4, %v1716_v2  ;;  %6520 = vmatprep.subr.bf16.mxu0 %v7587_v5 }
 0x31d   : > { %6528 = vmatpush3.bf16.msra.mxu1 %v8224_v18 }
 0x31e   : > { %1746 = vst.msk [vmem:[#allocation7] sm:$0x3] %vm1032_vm3, %v1718_v9  ;;  %6535 = vmatprep.subr.bf16.mxu1 %v7587_v5  ;;  %v1719_v48 = vmul.f32 1.8, %v1718_v9  ;;  %v1741_v9 = vrot.slane %v5672_v43, %v8192_v40 }
 0x31f   : > { %6522 = vmatpush3.bf16.msra.mxu0 %v8175_v33  ;;  %v8276_v13 = vld [vmem:[#allocation3] sm:$0x3] }
 0x320   : > { %6529 = vmatprep.subr.bf16.mxu0 %v7587_v5  ;;  %v2039_v16 = vmul.f32 0.0016652786, %v8276_v13  ;;  %v1720_v55 = vadd.f32 0.01, %v1719_v48 }
 0x322   : > { %v8280_v19 = vadd.f32 %v2039_v16, %v2038_v15  ;;  %v1723_v60 = vmul.f32 %v1720_v55, %v8259_v3 }
 0x324   : > { %2068 = vst.msk [vmem:[#allocation4] sm:$0x3] %vm1032_vm3, %v8280_v19 }
 0x325   : > { %v2233_v25 = vld [vmem:[#allocation7] sm:$0x3] }
 0x3e5   : > { %v1383_v36 = vpop.f32.mrb[4].mxu0 }
 0x3e6   : > { %v1384_v38 = vadd.f32 %v1383_v36, %v8218_v7  ;;  %v6083_v41 = vpop.f32.mrb[5].mxu0 }
 0x3e8   : > { %v1394_v45 = vadd.f32 %v8293_v37, %v1384_v38 }
 0x3ea   : > { %v1403_v47 = vadd.f32 %v1402_v39, %v1394_v45  ;;  %v5688_v39 = vld [vmem:[%s8086_s27 + $0x2] sm:$0x1] }
 0x3eb   : > { %v1702_v49 = vpop.f32.mrb[6].mxu1  ;;  %vm2047_vm7 = vcmp.eq.f32.partialorder %v5688_v39, 0.0 }
 0x3ec   : > { %v1405_v50 = vsub.f32 %v1403_v47, %v1404_v46  ;;  %v6116_v51 = vpop.f32.mrb[7].mxu1 }
 0x3ed   : > { %v1629_v7 = vpop.f32.mrb[6].mxu0 }
 0x3ee   : > { %v1413_v54 = vsel %vm1412_vm15, %v1395_v32, %v1405_v50  ;;  %v1703_v26 = vadd.f32 %v1702_v49, %v1629_v7  ;;  %v6105_v56 = vpop.f32.mrb[7].mxu0  ;;  %v2234_v32 = vmul.f32 0.9983347, %v2233_v25  ;;  %v2041_v50 = vmul.f32 1.8, %v8280_v19 }
 0x3ef   : > { %v1414_v57 = vsub.f32 %v1413_v54, %v1401_v28  ;;  %1425 = vst.msk [vmem:[#allocation8] sm:$0x3] %vm1032_vm3, %v1413_v54  ;;  %1429 = vst.msk [vmem:[%s8115_s1] sm:$0x3] %vm1032_vm3, %v1413_v54  ;;  %v2048_v7 = vsel %vm2047_vm7, 1, %v7590_v42 }
 0x3f0   : > { %v1713_v59 = vadd.f32 %v8234_v29, %v1703_v26  ;;  %v2036_v54 = vld [vmem:[#allocation2] sm:$0x3] }
 0x3f1   : > { %vm1415_vm0 = vcmp.gt.f32.partialorder %v1414_v57, 0.0  ;;  %v2052_v57 = vrot.slane %v2048_v7, %v8192_v40 }
 0x3f2   : > { %v5670_v62 = vsel %vm1415_vm0, 1.0, %v7589_v8  ;;  %v1722_v63 = vadd.f32 %v1721_v61, %v1713_v59  ;;  %v2043_v61 = vmul.f32 0.95122945, %v2036_v54 }
 0x3f3   : > { %v1424_v0 = vmul.f32 %v5670_v62, %v1422_v34  ;;  %vm2053_vm10 = vcmp.eq.s32.totalorder %v2052_v57, 1 }
 0x3f4   : > { %v1724_v1 = vsub.f32 %v1722_v63, %v1723_v60 }
 0x3f5   : > { %1426 = vst.msk [vmem:[#allocation9] sm:$0x3] %vm1032_vm3, %v1424_v0  ;;  %1428 = vst.msk [vmem:[%s8113_s26] sm:$0x3] %vm1032_vm3, %v1424_v0 }
 0x3f6   : > { %v1732_v2 = vsel %vm1731_vm4, %v1714_v53, %v1724_v1  ;;  %v1910_v44 = vld [vmem:[#allocation8] sm:$0x3]  ;;  %v5691_v53 = vld [vmem:[%s8075_s4 + $0x4] sm:$0x3] }
 0x3f7   : > { %v1733_v4 = vsub.f32 %v1732_v2, %v1720_v55  ;;  %1744 = vst.msk [vmem:[#allocation5] sm:$0x3] %vm1032_vm3, %v1732_v2  ;;  %v1917_v49 = vmul.f32 0.95122945, %v1910_v44  ;;  %v2042_v55 = vadd.f32 0.01, %v2041_v50 }
 0x3f9   : > { %vm1734_vm5 = vcmp.gt.f32.partialorder %v1733_v4, 0.0  ;;  %v2045_v1 = vmul.f32 %v2042_v55, %v8276_v13 }
 0x3fa   : > { %v5680_v15 = vsel %vm1734_vm5, 1.0, %v7589_v8 }
 0x3fb   : > { %v1743_v16 = vmul.f32 %v5680_v15, %v1741_v9 }
 0x3fc   : > { %v1751_v3 = vld [vmem:[#allocation9] sm:$0x3] }
 0x3fd   : > { %6126 = vmatmul.mubr.msk.f32.vlgmr.msra.gmra.mrb[8].mxu0 %vm927_vm2, %v1751_v3  ;;  %1745 = vst.msk [vmem:[#allocation6] sm:$0x3] %vm1032_vm3, %v1743_v16  ;;  %6137 = vmatmul.mubr.msk.f32.vlgmr.msra.gmra.mrb[8].mxu1 %vm927_vm2, %v1743_v16  ;;  %v1913_v21 = vmul.f32 0.0016652786, %v1751_v3  ;;  %v2063_v16 = vrot.slane %v5688_v39, %v8192_v40 }
 0x3fe   : > { %6531 = vmatpush3.bf16.msra.mxu0 %v8122_v6  ;;  %6537 = vmatpush3.bf16.msra.mxu1 %v8132_v12 }
 0x3ff   : > { %6532 = vmatprep.subr.bf16.mxu0 %v7587_v5  ;;  %6538 = vmatprep.subr.bf16.mxu1 %v7587_v5  ;;  %v1914_v22 = vadd.f32 %v1913_v21, %v1912_v20 }
 0x400   : > { %6147 = vmatprep.mubr.msk.f32.mxu0 %vm7588_vm1, %v7589_v8  ;;  %6158 = vmatprep.mubr.msk.f32.mxu1 %vm7588_vm1, %v7589_v8 }
 0x401   : > { %v1915_v24 = vmul.f32 1.8, %v1914_v22  ;;  %1942 = vst.msk [vmem:[#allocation10] sm:$0x3] %vm1032_vm3, %v1914_v22 }
 0x402   : > { %6534 = vmatpush3.bf16.msra.mxu0 %v8130_v11  ;;  %6540 = vmatpush3.bf16.msra.mxu1 %v8142_v17 }
 0x403   : > { %v1916_v28 = vadd.f32 0.01, %v1915_v24  ;;  %6541 = vmatprep.subr.bf16.mxu0 %v7587_v5  ;;  %6547 = vmatprep.subr.bf16.mxu1 %v7587_v5 }
 0x404   : > { %v8331_v30 = vld [vmem:[#allocation6] sm:$0x3] }
 0x405   : > { %6148 = vmatmul.mubr.msk.f32.vlgmr.msra.gmra.mrb[10].mxu0 %vm927_vm2, %v8276_v13  ;;  %6159 = vmatmul.mubr.msk.f32.vlgmr.msra.gmra.mrb[10].mxu1 %vm927_vm2, %v8331_v30  ;;  %5687 = vst.msk [vmem:[%s8117_s28 + $0x2] sm:$0x3] %vm1032_vm3, %v1916_v28  ;;  %v2235_v35 = vmul.f32 0.0016652786, %v8331_v30  ;;  %v1919_v52 = vmul.f32 %v1916_v28, %v1751_v3 }
 0x406   : > { %6543 = vmatpush3.bf16.msra.mxu0 %v8149_v23  ;;  %6549 = vmatpush3.bf16.msra.mxu1 %v8156_v27  ;;  %v5673_v27 = vld [vmem:[%s8095_s20 + $0x1] sm:$0x1] }
 0x407   : > { %6544 = vmatprep.subr.bf16.mxu0 %v7587_v5  ;;  %6550 = vmatprep.subr.bf16.mxu1 %v7587_v5  ;;  %v8344_v36 = vadd.f32 %v2235_v35, %v2234_v32  ;;  %vm1921_vm6 = vcmp.eq.f32.partialorder %v5673_v27, 0.0  ;;  %v1937_v60 = vrot.slane %v5673_v27, %v8192_v40 }
 0x408   : > { %6169 = vmatprep.mubr.msk.f32.mxu0 %vm7588_vm1, %v7589_v8  ;;  %6180 = vmatprep.mubr.msk.f32.mxu1 %vm7588_vm1, %v7589_v8  ;;  %v1922_v38 = vsel %vm1921_vm6, 1, %v7590_v42  ;;  %v2429_v3 = vld [vmem:[#allocation10] sm:$0x3] }
 0x409   : > { %2264 = vst.msk [vmem:[#allocation7] sm:$0x3] %vm1032_vm3, %v8344_v36  ;;  %v1926_v48 = vrot.slane %v1922_v38, %v8192_v40  ;;  %v2430_v22 = vmul.f32 0.9983347, %v2429_v3 }
 0x40a   : > { %6546 = vmatpush3.bf16.msra.mxu0 %v8168_v31  ;;  %6552 = vmatpush3.bf16.msra.mxu1 %v8175_v33 }
 0x40b   : > { %6559 = vmatprep.subr.bf16.mxu1 %v7587_v5  ;;  %6553 = vmatprep.subr.bf16.mxu0 %v7587_v5  ;;  %vm1927_vm8 = vcmp.eq.s32.totalorder %v1926_v48, 1  ;;  %v5705_v48 = vld [vmem:[%s8086_s27 + $0x3] sm:$0x1] }
 0x40c   : > { %vm2565_vm13 = vcmp.eq.f32.partialorder %v5705_v48, 0.0 }
 0x4d0   : > { %v1825_v41 = vpop.f32.mrb[8].mxu0  ;;  %v1898_v43 = vpop.f32.mrb[8].mxu1 }
 0x4d1   : > { %v1899_v45 = vadd.f32 %v1898_v43, %v1825_v41  ;;  %v6127_v46 = vpop.f32.mrb[9].mxu0  ;;  %v6138_v47 = vpop.f32.mrb[9].mxu1  ;;  %v2237_v41 = vmul.f32 1.8, %v8344_v36 }
 0x4d3   : > { %v1909_v33 = vadd.f32 %v8293_v37, %v1899_v45  ;;  %v2232_v45 = vld [vmem:[#allocation5] sm:$0x3]  ;;  %v2238_v46 = vadd.f32 0.01, %v2237_v41 }
 0x4d4   : > { %v2239_v50 = vmul.f32 0.95122945, %v2232_v45 }
 0x4d5   : > { %v1918_v51 = vadd.f32 %v1917_v49, %v1909_v33 }
 0x4d7   : > { %v1920_v26 = vsub.f32 %v1918_v51, %v1919_v52  ;;  %v2241_v52 = vmul.f32 %v2238_v46, %v8331_v30 }
 0x4d8   : > { %v2031_v56 = vpop.f32.mrb[10].mxu0  ;;  %v8365_v34 = vpop.f32.mrb[10].mxu1 }
 0x4d9   : > { %v1928_v58 = vsel %vm1927_vm8, %v1910_v44, %v1920_v26  ;;  %v2035_v59 = vadd.f32 %v5691_v53, %v2031_v56  ;;  %v6149_v19 = vpop.f32.mrb[11].mxu0  ;;  %v6160_v62 = vpop.f32.mrb[11].mxu1  ;;  %v5708_v26 = vld [vmem:[%s8075_s4 + $0x6] sm:$0x3] }
 0x4da   : > { %v1929_v63 = vsub.f32 %v1928_v58, %v1916_v28  ;;  %1940 = vst.msk [vmem:[#allocation8] sm:$0x3] %vm1032_vm3, %v1928_v58  ;;  %5686 = vst.msk [vmem:[%s8115_s1 + $0x2] sm:$0x3] %vm1032_vm3, %v1928_v58  ;;  %v2555_v28 = vld [vmem:[#allocation4] sm:$0x3] }
 0x4db   : > { %v2044_v0 = vadd.f32 %v2043_v61, %v2035_v59 }
 0x4dc   : > { %vm1930_vm9 = vcmp.gt.f32.partialorder %v1929_v63, 0.0 }
 0x4dd   : > { %v5684_v2 = vsel %vm1930_vm9, 1.0, %v7589_v8  ;;  %v2046_v4 = vsub.f32 %v2044_v0, %v2045_v1 }
 0x4de   : > { %v1939_v9 = vmul.f32 %v5684_v2, %v1937_v60 }
 0x4df   : > { %v2054_v10 = vsel %vm2053_vm10, %v2036_v54, %v2046_v4  ;;  %v2566_v54 = vsel %vm2565_vm13, 1, %v7590_v42 }
 0x4e0   : > { %1941 = vst.msk [vmem:[#allocation9] sm:$0x3] %vm1032_vm3, %v1939_v9  ;;  %5685 = vst.msk [vmem:[%s8113_s26 + $0x2] sm:$0x3] %vm1032_vm3, %v1939_v9  ;;  %v2055_v15 = vsub.f32 %v2054_v10, %v2042_v55  ;;  %v2570_v59 = vrot.slane %v2566_v54, %v8192_v40 }
 0x4e1   : > { %2066 = vst.msk [vmem:[#allocation2] sm:$0x3] %vm1032_vm3, %v2054_v10  ;;  %v2581_v10 = vrot.slane %v5705_v48, %v8192_v40 }
 0x4e2   : > { %vm2056_vm11 = vcmp.gt.f32.partialorder %v2055_v15, 0.0  ;;  %vm2571_vm0 = vcmp.eq.s32.totalorder %v2570_v59, 1 }
 0x4e3   : > { %v5693_v20 = vsel %vm2056_vm11, 1.0, %v7589_v8 }
 0x4e4   : > { %v2065_v13 = vmul.f32 %v5693_v20, %v2063_v16  ;;  %v2751_v16 = vld [vmem:[#allocation7] sm:$0x3] }
 0x4e6   : > { %2067 = vst.msk [vmem:[#allocation3] sm:$0x3] %vm1032_vm3, %v2065_v13  ;;  %6170 = vmatmul.mubr.msk.f32.vlgmr.msra.gmra.mrb[12].mxu0 %vm927_vm2, %v2065_v13  ;;  %v2752_v13 = vmul.f32 0.9983347, %v2751_v16 }
 0x4e7   : > { %v8381_v21 = vld [vmem:[#allocation9] sm:$0x3]  ;;  %6555 = vmatpush3.bf16.msra.mxu0 %v8220_v14  ;;  %6191 = vmatprep.mubr.msk.f32.mxu0 %vm7588_vm1, %v7589_v8 }
 0x4e8   : > { %6181 = vmatmul.mubr.msk.f32.vlgmr.msra.gmra.mrb[12].mxu1 %vm927_vm2, %v8381_v21  ;;  %6556 = vmatprep.subr.bf16.mxu0 %v7587_v5  ;;  %v2431_v24 = vmul.f32 0.0016652786, %v8381_v21  ;;  %v2554_v55 = vld [vmem:[#allocation2] sm:$0x3] }
 0x4e9   : > { %6561 = vmatpush3.bf16.msra.mxu1 %v8122_v6  ;;  %6202 = vmatprep.mubr.msk.f32.mxu1 %vm7588_vm1, %v7589_v8  ;;  %v2556_v6 = vmul.f32 0.9983347, %v2555_v28  ;;  %v2561_v62 = vmul.f32 0.95122945, %v2554_v55 }
 0x4ea   : > { %6562 = vmatprep.subr.bf16.mxu1 %v7587_v5  ;;  %v2432_v25 = vadd.f32 %v2431_v24, %v2430_v22 }
 0x4eb   : > { %6558 = vmatpush3.bf16.msra.mxu0 %v8224_v18 }
 0x4ec   : > { %6565 = vmatprep.subr.bf16.mxu0 %v7587_v5  ;;  %v2433_v32 = vmul.f32 1.8, %v2432_v25  ;;  %2460 = vst.msk [vmem:[#allocation10] sm:$0x3] %vm1032_vm3, %v2432_v25 }
 0x4ed   : > { %6564 = vmatpush3.bf16.msra.mxu1 %v8130_v11  ;;  %v2475_v35 = vld [vmem:[#allocation3] sm:$0x3]  ;;  %v5689_v11 = vld [vmem:[%s8092_s0 + $0x2] sm:$0x1] }
 0x4ee   : > { %v2557_v27 = vmul.f32 0.0016652786, %v2475_v35  ;;  %6571 = vmatprep.subr.bf16.mxu1 %v7587_v5  ;;  %v8399_v38 = vadd.f32 0.01, %v2433_v32  ;;  %vm2243_vm12 = vcmp.eq.f32.partialorder %v5689_v11, 0.0  ;;  %v2259_v61 = vrot.slane %v5689_v11, %v8192_v40  ;;  %v2788_v32 = vld [vmem:[%s9392_s9] sm:$0xff] }
 0x4ef   : > { %v2244_v43 = vsel %vm2243_vm12, 1, %v7590_v42  ;;  %v5690_v11 = vld [vmem:[%s8095_s20 + $0x2] sm:$0x1] }
 0x4f0   : > { %6203 = vmatmul.mubr.msk.f32.vlgmr.msra.gmra.mrb[14].mxu1 %vm927_vm2, %v2475_v35  ;;  %v2558_v39 = vadd.f32 %v2557_v27, %v2556_v6  ;;  %5704 = vst.msk [vmem:[%s8117_s28 + $0x4] sm:$0x3] %vm1032_vm3, %v8399_v38  ;;  %v2248_v33 = vrot.slane %v2244_v43, %v8192_v40  ;;  %v2790_v6 = vld [vmem:[%s9392_s9 + $0x10] sm:$0xff]  ;;  %v2791_v27 = vld [vmem:[%s9392_s9 + $0x18] sm:$0xff]  ;;  %vm2439_vm5 = vcmp.eq.f32.partialorder %v5690_v11, 0.0 }
 0x4f1   : > { %6573 = vmatpush3.bf16.msra.mxu1 %v8149_v23  ;;  %6224 = vmatprep.mubr.msk.f32.mxu1 %vm7588_vm1, %v7589_v8  ;;  %v2440_v41 = vsel %vm2439_vm5, 1, %v7590_v42 }
 0x4f2   : > { %2586 = vst.msk [vmem:[#allocation4] sm:$0x3] %vm1032_vm3, %v2558_v39  ;;  %6574 = vmatprep.subr.bf16.mxu1 %v7587_v5  ;;  %v2559_v7 = vmul.f32 1.8, %v2558_v39  ;;  %vm2249_vm14 = vcmp.eq.s32.totalorder %v2248_v33, 1  ;;  %v8478_v39 = vpack.c.bf16 %v2791_v27, %v2790_v6 }
 0x4f4   : > { %v2560_v57 = vadd.f32 0.01, %v2559_v7 }
 0x4f5   : > { %6576 = vmatpush3.bf16.msra.mxu1 %v8168_v31 }
 0x4f6   : > { %6583 = vmatprep.subr.bf16.mxu1 %v7587_v5  ;;  %v2563_v60 = vmul.f32 %v2560_v57, %v2475_v35 }
 0x4f9   : > { %v3073_v22 = vld [vmem:[#allocation4] sm:$0x3] }
 0x5b9   : > { %v2220_v44 = vpop.f32.mrb[12].mxu0 }
 0x5ba   : > { %v2221_v23 = vadd.f32 %v2220_v44, %v8365_v34  ;;  %v6171_v47 = vpop.f32.mrb[13].mxu0  ;;  %v2428_v44 = vld [vmem:[#allocation8] sm:$0x3] }
 0x5bb   : > { %v8418_v49 = vpop.f32.mrb[12].mxu1  ;;  %v2444_v47 = vrot.slane %v2440_v41, %v8192_v40  ;;  %v2435_v33 = vmul.f32 0.95122945, %v2428_v44 }
 0x5bc   : > { %v2231_v31 = vadd.f32 %v8234_v29, %v2221_v23  ;;  %v6182_v51 = vpop.f32.mrb[13].mxu1 }
 0x5bd   : > { %vm2445_vm7 = vcmp.eq.s32.totalorder %v2444_v47, 1  ;;  %v3105_v47 = vld [vmem:[#allocation20] sm:$0xff] }
 0x5be   : > { %v2240_v36 = vadd.f32 %v2239_v50, %v2231_v31  ;;  %v2437_v50 = vmul.f32 %v8399_v38, %v8381_v21 }
 0x5c0   : > { %v2242_v53 = vsub.f32 %v2240_v36, %v2241_v52 }
 0x5c2   : > { %v2250_v56 = vsel %vm2249_vm14, %v2232_v45, %v2242_v53 }
 0x5c3   : > { %v2251_v34 = vsub.f32 %v2250_v56, %v2238_v46  ;;  %2262 = vst.msk [vmem:[#allocation5] sm:$0x3] %vm1032_vm3, %v2250_v56  ;;  %v2549_v58 = vpop.f32.mrb[14].mxu1  ;;  %v5706_v46 = vld [vmem:[%s8092_s0 + $0x3] sm:$0x1] }
 0x5c4   : > { %v2553_v19 = vadd.f32 %v5708_v26, %v2549_v58  ;;  %v6204_v30 = vpop.f32.mrb[15].mxu1  ;;  %vm2761_vm6 = vcmp.eq.f32.partialorder %v5706_v46, 0.0  ;;  %v2455_v58 = vrot.slane %v5690_v11, %v8192_v40 }
 0x5c5   : > { %vm2252_vm15 = vcmp.gt.f32.partialorder %v2251_v34, 0.0  ;;  %v2762_v52 = vsel %vm2761_vm6, 1, %v7590_v42 }
 0x5c6   : > { %v2562_v63 = vadd.f32 %v2561_v62, %v2553_v19  ;;  %v5697_v0 = vsel %vm2252_vm15, 1.0, %v7589_v8  ;;  %v2766_v21 = vrot.slane %v2762_v52, %v8192_v40 }
 0x5c7   : > { %v2261_v1 = vmul.f32 %v5697_v0, %v2259_v61  ;;  %v2994_v0 = vld [vmem:[#allocation19] sm:$0xff] }
 0x5c8   : > { %v2564_v2 = vsub.f32 %v2562_v63, %v2563_v60  ;;  %vm2767_vm9 = vcmp.eq.s32.totalorder %v2766_v21, 1 }
 0x5c9   : > { %2263 = vst.msk [vmem:[#allocation6] sm:$0x3] %vm1032_vm3, %v2261_v1  ;;  %6192 = vmatmul.mubr.msk.f32.vlgmr.msra.gmra.mrb[14].mxu0 %vm927_vm2, %v2261_v1 }
 0x5ca   : > { %v2572_v4 = vsel %vm2571_vm0, %v2554_v55, %v2564_v2  ;;  %6567 = vmatpush3.bf16.msra.mxu0 %v8132_v12  ;;  %6213 = vmatprep.mubr.msk.f32.mxu0 %vm7588_vm1, %v7589_v8  ;;  %v2750_v53 = vld [vmem:[#allocation5] sm:$0x3]  ;;  %v2995_v2 = vld [vmem:[#allocation19 + $0x8] sm:$0xff] }
 0x5cb   : > { %v2573_v9 = vsub.f32 %v2572_v4, %v2560_v57  ;;  %2584 = vst.msk [vmem:[#allocation2] sm:$0x3] %vm1032_vm3, %v2572_v4  ;;  %6568 = vmatprep.subr.bf16.mxu0 %v7587_v5  ;;  %v2757_v61 = vmul.f32 0.95122945, %v2750_v53  ;;  %v3110_v4 = vld [vmem:[#allocation22] sm:$0xff] }
 0x5cd   : > { %vm2574_vm4 = vcmp.gt.f32.partialorder %v2573_v9, 0.0  ;;  %v3111_v9 = vld [vmem:[#allocation22 + $0x8] sm:$0xff] }
 0x5ce   : > { %v5710_v15 = vsel %vm2574_vm4, 1.0, %v7589_v8  ;;  %6570 = vmatpush3.bf16.msra.mxu0 %v8142_v17  ;;  %v8508_v16 = vpack.c.bf16 %v3111_v9, %v3110_v4 }
 0x5cf   : > { %v2583_v20 = vmul.f32 %v5710_v15, %v2581_v10  ;;  %6577 = vmatprep.subr.bf16.mxu0 %v7587_v5  ;;  %v8506_v15 = vpack.c.bf16 %v2995_v2, %v2994_v0 }
 0x5d0   : > { %v8439_v12 = vld [vmem:[#allocation6] sm:$0x3] }
 0x5d1   : > { %6214 = vmatmul.mubr.msk.f32.vlgmr.msra.gmra.mrb[16].mxu0 %vm927_vm2, %v8439_v12  ;;  %2585 = vst.msk [vmem:[#allocation3] sm:$0x3] %vm1032_vm3, %v2583_v20  ;;  %6225 = vmatmul.mubr.msk.f32.vlgmr.msra.gmra.mrb[16].mxu1 %vm927_vm2, %v2583_v20  ;;  %v2753_v3 = vmul.f32 0.0016652786, %v8439_v12  ;;  %v2996_v20 = vld [vmem:[#allocation19 + $0x10] sm:$0xff] }
 0x5d2   : > { %6585 = vmatpush3.bf16.msra.mxu1 %v8220_v14  ;;  %6235 = vmatprep.mubr.msk.f32.mxu0 %vm7588_vm1, %v7589_v8  ;;  %v3074_v14 = vmul.f32 0.9983347, %v3073_v22  ;;  %v3113_v22 = vld [vmem:[#allocation22 + $0x18] sm:$0xff] }
 0x5d3   : > { %v2754_v17 = vadd.f32 %v2753_v3, %v2752_v13  ;;  %6586 = vmatprep.subr.bf16.mxu1 %v7587_v5  ;;  %6246 = vmatprep.mubr.msk.f32.mxu1 %vm7588_vm1, %v7589_v8  ;;  %v2997_v3 = vld [vmem:[#allocation19 + $0x18] sm:$0xff] }
 0x5d5   : > { %2782 = vst.msk [vmem:[#allocation7] sm:$0x3] %vm1032_vm3, %v2754_v17  ;;  %v2755_v51 = vmul.f32 1.8, %v2754_v17  ;;  %v3112_v17 = vld [vmem:[#allocation22 + $0x10] sm:$0xff] }
 0x5d6   : > { %6588 = vmatpush3.bf16.msra.mxu1 %v8224_v18  ;;  %v2789_v18 = vld [vmem:[%s9392_s9 + $0x8] sm:$0xff]  ;;  %v8521_v6 = vpack.c.bf16 %v3113_v22, %v3112_v17 }
 0x5d7   : > { %6595 = vmatprep.subr.bf16.mxu1 %v7587_v5  ;;  %v8468_v35 = vpack.c.bf16 %v2789_v18, %v2788_v32  ;;  %v2756_v55 = vadd.f32 0.01, %v2755_v51  ;;  %v8519_v18 = vpack.c.bf16 %v2997_v3, %v2996_v20 }
 0x5d8   : > { %v8455_v24 = vld [vmem:[#allocation3] sm:$0x3] }
 0x5d9   : > { %v3075_v25 = vmul.f32 0.0016652786, %v8455_v24  ;;  %6579 = vmatpush3.bf16.msra.mxu0 %v8468_v35  ;;  %v2759_v30 = vmul.f32 %v2756_v55, %v8439_v12  ;;  %v2947_v12 = vld [vmem:[#allocation10] sm:$0x3] }
 0x5da   : > { %6580 = vmatprep.subr.bf16.mxu0 %v7587_v5 }
 0x5db   : > { %v8458_v28 = vadd.f32 %v3075_v25, %v3074_v14  ;;  %v2948_v25 = vmul.f32 0.9983347, %v2947_v12 }
 0x5dc   : > { %v3269_v41 = vld [vmem:[#allocation7] sm:$0x3] }
 0x5dd   : > { %3104 = vst.msk [vmem:[#allocation4] sm:$0x3] %vm1032_vm3, %v8458_v28  ;;  %6582 = vmatpush3.bf16.msra.mxu0 %v8478_v39  ;;  %v3077_v21 = vmul.f32 1.8, %v8458_v28 }
 0x5de   : > { %6589 = vmatprep.subr.bf16.mxu0 %v7587_v5 }
 0x69c   : > { %v2416_v43 = vpop.f32.mrb[14].mxu0 }
 0x69d   : > { %v2417_v45 = vadd.f32 %v2416_v43, %v8418_v49  ;;  %v6193_v23 = vpop.f32.mrb[15].mxu0 }
 0x69f   : > { %v2427_v48 = vadd.f32 %v8293_v37, %v2417_v45  ;;  %v3270_v45 = vmul.f32 0.9983347, %v3269_v41 }
 0x6a1   : > { %v2436_v31 = vadd.f32 %v2435_v33, %v2427_v48  ;;  %v3106_v48 = vld [vmem:[#allocation20 + $0x8] sm:$0xff] }
 0x6a2   : > { %v8558_v33 = vpack.c.bf16 %v3106_v48, %v3105_v47 }
 0x6a3   : > { %v2438_v36 = vsub.f32 %v2436_v31, %v2437_v50  ;;  %v3107_v31 = vld [vmem:[#allocation20 + $0x10] sm:$0xff]  ;;  %v3108_v50 = vld [vmem:[#allocation20 + $0x18] sm:$0xff] }
 0x6a4   : > { %v2665_v7 = vpop.f32.mrb[16].mxu0  ;;  %v2738_v49 = vpop.f32.mrb[16].mxu1  ;;  %v8562_v51 = vpack.c.bf16 %v3108_v50, %v3107_v31 }
 0x6a5   : > { %v2446_v54 = vsel %vm2445_vm7, %v2428_v44, %v2438_v36  ;;  %v2739_v26 = vadd.f32 %v2738_v49, %v2665_v7  ;;  %v6215_v56 = vpop.f32.mrb[17].mxu0  ;;  %v6226_v57 = vpop.f32.mrb[17].mxu1  ;;  %v5707_v36 = vld [vmem:[%s8095_s20 + $0x3] sm:$0x1]  ;;  %v5722_v7 = vld [vmem:[%s8086_s27 + $0x4] sm:$0x1] }
 0x6a6   : > { %v2447_v34 = vsub.f32 %v2446_v54, %v8399_v38  ;;  %2458 = vst.msk [vmem:[#allocation8] sm:$0x3] %vm1032_vm3, %v2446_v54  ;;  %5703 = vst.msk [vmem:[%s8115_s1 + $0x4] sm:$0x3] %vm1032_vm3, %v2446_v54  ;;  %vm2957_vm11 = vcmp.eq.f32.partialorder %v5707_v36, 0.0  ;;  %vm3083_vm12 = vcmp.eq.f32.partialorder %v5722_v7, 0.0 }
 0x6a7   : > { %v2749_v59 = vadd.f32 %v8234_v29, %v2739_v26  ;;  %v2777_v29 = vrot.slane %v5706_v46, %v8192_v40  ;;  %v2958_v52 = vsel %vm2957_vm11, 1, %v7590_v42 }
 0x6a8   : > { %vm2448_vm8 = vcmp.gt.f32.partialorder %v2447_v34, 0.0  ;;  %v2962_v57 = vrot.slane %v2958_v52, %v8192_v40 }
 0x6a9   : > { %v5701_v19 = vsel %vm2448_vm8, 1.0, %v7589_v8  ;;  %v2758_v62 = vadd.f32 %v2757_v61, %v2749_v59 }
 0x6aa   : > { %v2457_v63 = vmul.f32 %v5701_v19, %v2455_v58  ;;  %v3084_v19 = vsel %vm3083_vm12, 1, %v7590_v42  ;;  %vm2963_vm13 = vcmp.eq.s32.totalorder %v2962_v57, 1 }
 0x6ab   : > { %v2760_v38 = vsub.f32 %v2758_v62, %v2759_v30  ;;  %v5725_v62 = vld [vmem:[%s8075_s4 + $0x8] sm:$0x3]  ;;  %v3072_v30 = vld [vmem:[#allocation2] sm:$0x3]  ;;  %v3088_v0 = vrot.slane %v3084_v19, %v8192_v40 }
 0x6ac   : > { %2459 = vst.msk [vmem:[#allocation9] sm:$0x3] %vm1032_vm3, %v2457_v63  ;;  %5702 = vst.msk [vmem:[%s8113_s26 + $0x4] sm:$0x3] %vm1032_vm3, %v2457_v63  ;;  %v3079_v28 = vmul.f32 0.95122945, %v3072_v30 }
 0x6ad   : > { %v2768_v60 = vsel %vm2767_vm9, %v2750_v53, %v2760_v38  ;;  %v2946_v54 = vld [vmem:[#allocation8] sm:$0x3]  ;;  %v3078_v38 = vadd.f32 0.01, %v3077_v21  ;;  %vm3089_vm15 = vcmp.eq.s32.totalorder %v3088_v0, 1 }
 0x6ae   : > { %v2769_v1 = vsub.f32 %v2768_v60, %v2756_v55  ;;  %2780 = vst.msk [vmem:[#allocation5] sm:$0x3] %vm1032_vm3, %v2768_v60  ;;  %v2953_v58 = vmul.f32 0.95122945, %v2946_v54  ;;  %v8635_v21 = vld [vmem:[%s9393_s7] ss:$0 sm:$0xff] }
 0x6af   : > { %v3081_v12 = vmul.f32 %v3078_v38, %v8455_v24 }
 0x6b0   : > { %vm2770_vm10 = vcmp.gt.f32.partialorder %v2769_v1, 0.0 }
 0x6b1   : > { %v5714_v10 = vsel %vm2770_vm10, 1.0, %v7589_v8 }
 0x6b2   : > { %v2779_v13 = vmul.f32 %v5714_v10, %v2777_v29  ;;  %v2973_v10 = vrot.slane %v5707_v36, %v8192_v40 }
 0x6b3   : > { %v8510_v14 = vld [vmem:[#allocation9] sm:$0x3] }
 0x6b4   : > { %6236 = vmatmul.mubr.msk.f32.vlgmr.msra.gmra.mrb[18].mxu0 %vm927_vm2, %v8510_v14  ;;  %2781 = vst.msk [vmem:[#allocation6] sm:$0x3] %vm1032_vm3, %v2779_v13  ;;  %6247 = vmatmul.mubr.msk.f32.vlgmr.msra.gmra.mrb[18].mxu1 %vm927_vm2, %v2779_v13  ;;  %v2949_v32 = vmul.f32 0.0016652786, %v8510_v14 }
 0x6b5   : > { %6591 = vmatpush3.bf16.msra.mxu0 %v8506_v15  ;;  %6597 = vmatpush3.bf16.msra.mxu1 %v8508_v16 }
 0x6b6   : > { %6592 = vmatprep.subr.bf16.mxu0 %v7587_v5  ;;  %6598 = vmatprep.subr.bf16.mxu1 %v7587_v5  ;;  %v2950_v27 = vadd.f32 %v2949_v32, %v2948_v25  ;;  %v3099_v25 = vrot.slane %v5722_v7, %v8192_v40  ;;  %v3301_v7 = vld [vmem:[#allocation23] sm:$0xff] }
 0x6b7   : > { %6257 = vmatprep.mubr.msk.f32.mxu0 %vm7588_vm1, %v7589_v8  ;;  %6268 = vmatprep.mubr.msk.f32.mxu1 %vm7588_vm1, %v7589_v8 }
 0x6b8   : > { %v2951_v11 = vmul.f32 1.8, %v2950_v27  ;;  %2978 = vst.msk [vmem:[#allocation10] sm:$0x3] %vm1032_vm3, %v2950_v27 }
 0x6b9   : > { %6594 = vmatpush3.bf16.msra.mxu0 %v8519_v18  ;;  %6600 = vmatpush3.bf16.msra.mxu1 %v8521_v6 }
 0x6ba   : > { %v8532_v43 = vadd.f32 0.01, %v2951_v11  ;;  %6601 = vmatprep.subr.bf16.mxu0 %v7587_v5  ;;  %6607 = vmatprep.subr.bf16.mxu1 %v7587_v5 }
 0x6bb   : > { %v8536_v44 = vld [vmem:[#allocation6] sm:$0x3] }
 0x6bc   : > { %6258 = vmatmul.mubr.msk.f32.vlgmr.msra.gmra.mrb[20].mxu0 %vm927_vm2, %v8455_v24  ;;  %6269 = vmatmul.mubr.msk.f32.vlgmr.msra.gmra.mrb[20].mxu1 %vm927_vm2, %v8536_v44  ;;  %5721 = vst.msk [vmem:[%s8117_s28 + $0x6] sm:$0x3] %vm1032_vm3, %v8532_v43  ;;  %v3271_v23 = vmul.f32 0.0016652786, %v8536_v44  ;;  %v2955_v61 = vmul.f32 %v8532_v43, %v8510_v14 }
 0x6bd   : > { %6609 = vmatpush3.bf16.msra.mxu1 %v8468_v35  ;;  %6279 = vmatprep.mubr.msk.f32.mxu0 %vm7588_vm1, %v7589_v8 }
 0x6be   : > { %6610 = vmatprep.subr.bf16.mxu1 %v7587_v5  ;;  %6290 = vmatprep.mubr.msk.f32.mxu1 %vm7588_vm1, %v7589_v8  ;;  %v8552_v46 = vadd.f32 %v3271_v23, %v3270_v45  ;;  %v3591_v23 = vld [vmem:[#allocation4] sm:$0x3] }
 0x6bf   : > { %6603 = vmatpush3.bf16.msra.mxu0 %v8558_v33  ;;  %v3465_v27 = vld [vmem:[#allocation10] sm:$0x3]  ;;  %v3592_v31 = vmul.f32 0.9983347, %v3591_v23 }
 0x6c0   : > { %3300 = vst.msk [vmem:[#allocation7] sm:$0x3] %vm1032_vm3, %v8552_v46  ;;  %6604 = vmatprep.subr.bf16.mxu0 %v7587_v5  ;;  %v3466_v41 = vmul.f32 0.9983347, %v3465_v27  ;;  %v3273_v57 = vmul.f32 1.8, %v8552_v46 }
 0x6c1   : > { %6612 = vmatpush3.bf16.msra.mxu1 %v8478_v39 }
 0x6c2   : > { %6619 = vmatprep.subr.bf16.mxu1 %v7587_v5  ;;  %v3274_v19 = vadd.f32 0.01, %v3273_v57 }
 0x6c3   : > { %6606 = vmatpush3.bf16.msra.mxu0 %v8562_v51 }
 0x6c4   : > { %6613 = vmatprep.subr.bf16.mxu0 %v7587_v5 }
 0x787   : > { %v2861_v49 = vpop.f32.mrb[18].mxu0  ;;  %v2934_v53 = vpop.f32.mrb[18].mxu1 }
 0x788   : > { %v2935_v26 = vadd.f32 %v2934_v53, %v2861_v49  ;;  %v6237_v55 = vpop.f32.mrb[19].mxu0  ;;  %v6248_v56 = vpop.f32.mrb[19].mxu1  ;;  %v3302_v49 = vld [vmem:[#allocation23 + $0x8] sm:$0xff] }
 0x789   : > { %v8621_v53 = vpack.c.bf16 %v3302_v49, %v3301_v7  ;;  %v5723_v56 = vld [vmem:[%s8092_s0 + $0x4] sm:$0x1] }
 0x78a   : > { %v2945_v34 = vadd.f32 %v8293_v37, %v2935_v26  ;;  %v3304_v26 = vld [vmem:[#allocation23 + $0x18] sm:$0xff]  ;;  %vm3279_vm4 = vcmp.eq.f32.partialorder %v5723_v56, 0.0 }
 0x78c   : > { %v2954_v59 = vadd.f32 %v2953_v58, %v2945_v34  ;;  %v3280_v34 = vsel %vm3279_vm4, 1, %v7590_v42 }
 0x78e   : > { %v2956_v63 = vsub.f32 %v2954_v59, %v2955_v61  ;;  %v3268_v59 = vld [vmem:[#allocation5] sm:$0x3] }
 0x78f   : > { %v3067_v60 = vpop.f32.mrb[20].mxu0  ;;  %v8577_v1 = vpop.f32.mrb[20].mxu1 }
 0x790   : > { %v2964_v37 = vsel %vm2963_vm13, %v2946_v54, %v2956_v63  ;;  %v3071_v29 = vadd.f32 %v5725_v62, %v3067_v60  ;;  %v6259_v2 = vpop.f32.mrb[21].mxu0  ;;  %v6270_v4 = vpop.f32.mrb[21].mxu1  ;;  %v3303_v54 = vld [vmem:[#allocation23 + $0x10] sm:$0xff]  ;;  %v3284_v63 = vrot.slane %v3280_v34, %v8192_v40  ;;  %v3275_v60 = vmul.f32 0.95122945, %v3268_v59 }
 0x791   : > { %v2965_v9 = vsub.f32 %v2964_v37, %v8532_v43  ;;  %2976 = vst.msk [vmem:[#allocation8] sm:$0x3] %vm1032_vm3, %v2964_v37  ;;  %5720 = vst.msk [vmem:[%s8115_s1 + $0x6] sm:$0x3] %vm1032_vm3, %v2964_v37  ;;  %v8625_v55 = vpack.c.bf16 %v3304_v26, %v3303_v54  ;;  %v5742_v4 = vld [vmem:[%s8075_s4 + $0xa] sm:$0x3] }
 0x792   : > { %v3080_v20 = vadd.f32 %v3079_v28, %v3071_v29  ;;  %v3277_v29 = vmul.f32 %v3274_v19, %v8536_v44  ;;  %vm3285_vm6 = vcmp.eq.s32.totalorder %v3284_v63, 1 }
 0x793   : > { %vm2966_vm14 = vcmp.gt.f32.partialorder %v2965_v9, 0.0 }
 0x794   : > { %v5718_v13 = vsel %vm2966_vm14, 1.0, %v7589_v8  ;;  %v3082_v3 = vsub.f32 %v3080_v20, %v3081_v12 }
 0x795   : > { %v2975_v17 = vmul.f32 %v5718_v13, %v2973_v10 }
 0x796   : > { %v3090_v22 = vsel %vm3089_vm15, %v3072_v30, %v3082_v3  ;;  %v5739_v30 = vld [vmem:[%s8086_s27 + $0x5] sm:$0x1] }
 0x797   : > { %2977 = vst.msk [vmem:[#allocation9] sm:$0x3] %vm1032_vm3, %v2975_v17  ;;  %5719 = vst.msk [vmem:[%s8113_s26 + $0x6] sm:$0x3] %vm1032_vm3, %v2975_v17  ;;  %v3091_v14 = vsub.f32 %v3090_v22, %v3078_v38  ;;  %vm3601_vm5 = vcmp.eq.f32.partialorder %v5739_v30, 0.0  ;;  %v3295_v17 = vrot.slane %v5723_v56, %v8192_v40  ;;  %v3617_v23 = vrot.slane %v5739_v30, %v8192_v40 }
 0x798   : > { %3102 = vst.msk [vmem:[#allocation2] sm:$0x3] %vm1032_vm3, %v3090_v22 }
 0x799   : > { %vm3092_vm0 = vcmp.gt.f32.partialorder %v3091_v14, 0.0 }
 0x79a   : > { %v5727_v32 = vsel %vm3092_vm0, 1.0, %v7589_v8 }
 0x79b   : > { %v3101_v24 = vmul.f32 %v5727_v32, %v3099_v25 }
 0x79d   : > { %6280 = vmatmul.mubr.msk.f32.vlgmr.msra.gmra.mrb[22].mxu0 %vm927_vm2, %v3101_v24  ;;  %3103 = vst.msk [vmem:[#allocation3] sm:$0x3] %vm1032_vm3, %v3101_v24 }
 0x79e   : > { %v8594_v11 = vld [vmem:[#allocation9] sm:$0x3]  ;;  %6301 = vmatprep.mubr.msk.f32.mxu0 %vm7588_vm1, %v7589_v8  ;;  %6615 = vmatpush3.bf16.msra.mxu0 %v8621_v53 }
 0x79f   : > { %6291 = vmatmul.mubr.msk.f32.vlgmr.msra.gmra.mrb[22].mxu1 %vm927_vm2, %v8594_v11  ;;  %v3467_v43 = vmul.f32 0.0016652786, %v8594_v11  ;;  %6616 = vmatprep.subr.bf16.mxu0 %v7587_v5  ;;  %v3590_v9 = vld [vmem:[#allocation2] sm:$0x3] }
 0x7a0   : > { %6621 = vmatpush3.bf16.msra.mxu1 %v8506_v15  ;;  %6312 = vmatprep.mubr.msk.f32.mxu1 %vm7588_vm1, %v7589_v8  ;;  %v3597_v14 = vmul.f32 0.95122945, %v3590_v9 }
 0x7a1   : > { %6622 = vmatprep.subr.bf16.mxu1 %v7587_v5  ;;  %v3468_v45 = vadd.f32 %v3467_v43, %v3466_v41 }
 0x7a2   : > { %6618 = vmatpush3.bf16.msra.mxu0 %v8625_v55 }
 0x7a3   : > { %v3469_v47 = vmul.f32 1.8, %v3468_v45  ;;  %3496 = vst.msk [vmem:[#allocation10] sm:$0x3] %vm1032_vm3, %v3468_v45  ;;  %6625 = vmatprep.subr.bf16.mxu0 %v7587_v5 }
 0x7a4   : > { %6624 = vmatpush3.bf16.msra.mxu1 %v8519_v18  ;;  %v3511_v48 = vld [vmem:[#allocation3] sm:$0x3] }
 0x7a5   : > { %v3593_v50 = vmul.f32 0.0016652786, %v3511_v48  ;;  %6631 = vmatprep.subr.bf16.mxu1 %v7587_v5  ;;  %v8608_v36 = vadd.f32 0.01, %v3469_v47 }
 0x7a7   : > { %6313 = vmatmul.mubr.msk.f32.vlgmr.msra.gmra.mrb[24].mxu1 %vm927_vm2, %v3511_v48  ;;  %v3594_v52 = vadd.f32 %v3593_v50, %v3592_v31  ;;  %5738 = vst.msk [vmem:[%s8117_s28 + $0x8] sm:$0x3] %vm1032_vm3, %v8608_v36 }
 0x7a8   : > { %6633 = vmatpush3.bf16.msra.mxu1 %v8558_v33  ;;  %6334 = vmatprep.mubr.msk.f32.mxu1 %vm7588_vm1, %v7589_v8 }
 0x7a9   : > { %3622 = vst.msk [vmem:[#allocation4] sm:$0x3] %vm1032_vm3, %v3594_v52  ;;  %6634 = vmatprep.subr.bf16.mxu1 %v7587_v5  ;;  %v3595_v28 = vmul.f32 1.8, %v3594_v52 }
 0x7ab   : > { %v3596_v20 = vadd.f32 0.01, %v3595_v28  ;;  %v3473_v28 = vmul.f32 %v8608_v36, %v8594_v11 }
 0x7ac   : > { %6636 = vmatpush3.bf16.msra.mxu1 %v8562_v51 }
 0x7ad   : > { %6643 = vmatprep.subr.bf16.mxu1 %v7587_v5  ;;  %v3599_v32 = vmul.f32 %v3596_v20, %v3511_v48  ;;  %v3787_v48 = vld [vmem:[#allocation7] sm:$0x3] }
 0x7ae   : > { %v3788_v52 = vmul.f32 0.9983347, %v3787_v48  ;;  %v3983_v48 = vld [vmem:[#allocation10] sm:$0x3] }
 0x7b0   : > { %v4109_v54 = vld [vmem:[#allocation4] sm:$0x3] }
 0x7b1   : > { %v4110_v57 = vmul.f32 0.9983347, %v4109_v54 }
 0x870   : > { %v3256_v58 = vpop.f32.mrb[22].mxu0 }
 0x871   : > { %v3257_v61 = vadd.f32 %v3256_v58, %v8577_v1  ;;  %v6281_v62 = vpop.f32.mrb[23].mxu0  ;;  %v3602_v1 = vsel %vm3601_vm5, 1, %v7590_v42  ;;  %v5724_v58 = vld [vmem:[%s8095_s20 + $0x4] sm:$0x1] }
 0x872   : > { %v8640_v38 = vpop.f32.mrb[22].mxu1  ;;  %v3606_v3 = vrot.slane %v3602_v1, %v8192_v40  ;;  %vm3475_vm10 = vcmp.eq.f32.partialorder %v5724_v58, 0.0  ;;  %v3464_v62 = vld [vmem:[#allocation8] sm:$0x3] }
 0x873   : > { %v3267_v46 = vadd.f32 %v8635_v21, %v3257_v61  ;;  %v6292_v0 = vpop.f32.mrb[23].mxu1 }
 0x874   : > { %vm3607_vm8 = vcmp.eq.s32.totalorder %v3606_v3, 1 }
 0x875   : > { %v3276_v37 = vadd.f32 %v3275_v60, %v3267_v46  ;;  %v5740_v46 = vld [vmem:[%s8092_s0 + $0x5] sm:$0x1] }
 0x876   : > { %vm3797_vm11 = vcmp.eq.f32.partialorder %v5740_v46, 0.0 }
 0x877   : > { %v3278_v2 = vsub.f32 %v3276_v37, %v3277_v29  ;;  %v3471_v37 = vmul.f32 0.95122945, %v3464_v62 }
 0x879   : > { %v3286_v10 = vsel %vm3285_vm6, %v3268_v59, %v3278_v2  ;;  %v3476_v59 = vsel %vm3475_vm10, 1, %v7590_v42 }
 0x87a   : > { %v3287_v12 = vsub.f32 %v3286_v10, %v3274_v19  ;;  %3298 = vst.msk [vmem:[#allocation5] sm:$0x3] %vm1032_vm3, %v3286_v10  ;;  %v3585_v13 = vpop.f32.mrb[24].mxu1  ;;  %v8689_v19 = vld [vmem:[%s9394_s10] ss:$0 sm:$0xff]  ;;  %v3480_v60 = vrot.slane %v3476_v59, %v8192_v40 }
 0x87b   : > { %v3589_v22 = vadd.f32 %v5742_v4, %v3585_v13  ;;  %v6314_v44 = vpop.f32.mrb[25].mxu1  ;;  %v3798_v4 = vsel %vm3797_vm11, 1, %v7590_v42 }
 0x87c   : > { %vm3288_vm7 = vcmp.gt.f32.partialorder %v3287_v12, 0.0  ;;  %vm3481_vm12 = vcmp.eq.s32.totalorder %v3480_v60, 1  ;;  %v3802_v11 = vrot.slane %v3798_v4, %v8192_v40 }
 0x87d   : > { %v3598_v25 = vadd.f32 %v3597_v14, %v3589_v22  ;;  %v5731_v24 = vsel %vm3288_vm7, 1.0, %v7589_v8  ;;  %v3491_v14 = vrot.slane %v5724_v58, %v8192_v40 }
 0x87e   : > { %v3297_v27 = vmul.f32 %v5731_v24, %v3295_v17  ;;  %vm3803_vm14 = vcmp.eq.s32.totalorder %v3802_v11, 1 }
 0x87f   : > { %v3600_v41 = vsub.f32 %v3598_v25, %v3599_v32 }
 0x880   : > { %6302 = vmatmul.mubr.msk.f32.vlgmr.msra.gmra.mrb[24].mxu0 %vm927_vm2, %v3297_v27  ;;  %3299 = vst.msk [vmem:[#allocation6] sm:$0x3] %vm1032_vm3, %v3297_v27 }
 0x881   : > { %v3608_v43 = vsel %vm3607_vm8, %v3590_v9, %v3600_v41  ;;  %6627 = vmatpush3.bf16.msra.mxu0 %v8508_v16  ;;  %6323 = vmatprep.mubr.msk.f32.mxu0 %vm7588_vm1, %v7589_v8  ;;  %v3786_v10 = vld [vmem:[#allocation5] sm:$0x3] }
 0x882   : > { %v3609_v45 = vsub.f32 %v3608_v43, %v3596_v20  ;;  %3620 = vst.msk [vmem:[#allocation2] sm:$0x3] %vm1032_vm3, %v3608_v43  ;;  %6628 = vmatprep.subr.bf16.mxu0 %v7587_v5  ;;  %v3793_v25 = vmul.f32 0.95122945, %v3786_v10 }
 0x884   : > { %vm3610_vm9 = vcmp.gt.f32.partialorder %v3609_v45, 0.0 }
 0x885   : > { %v5744_v47 = vsel %vm3610_vm9, 1.0, %v7589_v8  ;;  %6630 = vmatpush3.bf16.msra.mxu0 %v8521_v6 }
 0x886   : > { %v3619_v31 = vmul.f32 %v5744_v47, %v3617_v23  ;;  %6637 = vmatprep.subr.bf16.mxu0 %v7587_v5  ;;  %v3813_v23 = vrot.slane %v5740_v46, %v8192_v40 }
 0x887   : > { %v3627_v50 = vld [vmem:[#allocation6] sm:$0x3] }
 0x888   : > { %6324 = vmatmul.mubr.msk.f32.vlgmr.msra.gmra.mrb[26].mxu0 %vm927_vm2, %v3627_v50  ;;  %6335 = vmatmul.mubr.msk.f32.vlgmr.msra.gmra.mrb[26].mxu1 %vm927_vm2, %v3619_v31  ;;  %3621 = vst.msk [vmem:[#allocation3] sm:$0x3] %vm1032_vm3, %v3619_v31  ;;  %v3789_v7 = vmul.f32 0.0016652786, %v3627_v50 }
 0x889   : > { %6639 = vmatpush3.bf16.msra.mxu0 %v8468_v35  ;;  %6645 = vmatpush3.bf16.msra.mxu1 %v8621_v53 }
 0x88a   : > { %v3790_v49 = vadd.f32 %v3789_v7, %v3788_v52  ;;  %6640 = vmatprep.subr.bf16.mxu0 %v7587_v5  ;;  %6646 = vmatprep.subr.bf16.mxu1 %v7587_v5 }
 0x88b   : > { %6345 = vmatprep.mubr.msk.f32.mxu0 %vm7588_vm1, %v7589_v8  ;;  %6356 = vmatprep.mubr.msk.f32.mxu1 %vm7588_vm1, %v7589_v8 }
 0x88c   : > { %3818 = vst.msk [vmem:[#allocation7] sm:$0x3] %vm1032_vm3, %v3790_v49  ;;  %v3791_v2 = vmul.f32 1.8, %v3790_v49 }
 0x88d   : > { %6642 = vmatpush3.bf16.msra.mxu0 %v8478_v39  ;;  %6648 = vmatpush3.bf16.msra.mxu1 %v8625_v55 }
 0x88e   : > { %6649 = vmatprep.subr.bf16.mxu0 %v7587_v5  ;;  %6655 = vmatprep.subr.bf16.mxu1 %v7587_v5  ;;  %v3792_v13 = vadd.f32 0.01, %v3791_v2 }
 0x88f   : > { %v8677_v26 = vld [vmem:[#allocation3] sm:$0x3] }
 0x890   : > { %v4111_v56 = vmul.f32 0.0016652786, %v8677_v26  ;;  %v3795_v27 = vmul.f32 %v3792_v13, %v3627_v50  ;;  %v3984_v50 = vmul.f32 0.9983347, %v3983_v48 }
 0x892   : > { %v8680_v34 = vadd.f32 %v4111_v56, %v4110_v57 }
 0x894   : > { %4140 = vst.msk [vmem:[#allocation4] sm:$0x3] %vm1032_vm3, %v8680_v34  ;;  %v4113_v2 = vmul.f32 1.8, %v8680_v34 }
 0x953   : > { %v3452_v61 = vpop.f32.mrb[24].mxu0 }
 0x954   : > { %v3453_v30 = vadd.f32 %v3452_v61, %v8640_v38  ;;  %v6303_v63 = vpop.f32.mrb[25].mxu0 }
 0x956   : > { %v3463_v0 = vadd.f32 %v8689_v19, %v3453_v30 }
 0x958   : > { %v3472_v29 = vadd.f32 %v3471_v37, %v3463_v0 }
 0x95a   : > { %v3474_v1 = vsub.f32 %v3472_v29, %v3473_v28 }
 0x95b   : > { %v3701_v9 = vpop.f32.mrb[26].mxu0  ;;  %v3774_v38 = vpop.f32.mrb[26].mxu1 }
 0x95c   : > { %v3482_v20 = vsel %vm3481_vm12, %v3464_v62, %v3474_v1  ;;  %v3775_v12 = vadd.f32 %v3774_v38, %v3701_v9  ;;  %v6325_v3 = vpop.f32.mrb[27].mxu0  ;;  %v6336_v17 = vpop.f32.mrb[27].mxu1  ;;  %v5756_v62 = vld [vmem:[%s8086_s27 + $0x6] sm:$0x1]  ;;  %v5759_v38 = vld [vmem:[%s8075_s4 + $0xc] sm:$0x3] }
 0x95d   : > { %v3483_v22 = vsub.f32 %v3482_v20, %v8608_v36  ;;  %3494 = vst.msk [vmem:[#allocation8] sm:$0x3] %vm1032_vm3, %v3482_v20  ;;  %5737 = vst.msk [vmem:[%s8115_s1 + $0x8] sm:$0x3] %vm1032_vm3, %v3482_v20  ;;  %vm4119_vm4 = vcmp.eq.f32.partialorder %v5756_v62, 0.0 }
 0x95e   : > { %v3785_v44 = vadd.f32 %v8635_v21, %v3775_v12  ;;  %v4120_v9 = vsel %vm4119_vm4, 1, %v7590_v42  ;;  %v4114_v12 = vadd.f32 0.01, %v4113_v2 }
 0x95f   : > { %vm3484_vm13 = vcmp.gt.f32.partialorder %v3483_v22, 0.0  ;;  %v4124_v3 = vrot.slane %v4120_v9, %v8192_v40 }
 0x960   : > { %v5735_v32 = vsel %vm3484_vm13, 1.0, %v7589_v8  ;;  %v3794_v24 = vadd.f32 %v3793_v25, %v3785_v44 }
 0x961   : > { %v3493_v41 = vmul.f32 %v5735_v32, %v3491_v14  ;;  %vm4125_vm7 = vcmp.eq.s32.totalorder %v4124_v3, 1 }
 0x962   : > { %v3796_v43 = vsub.f32 %v3794_v24, %v3795_v27  ;;  %v4117_v27 = vmul.f32 %v4114_v12, %v8677_v26 }
 0x963   : > { %5736 = vst.msk [vmem:[%s8113_s26 + $0x8] sm:$0x3] %vm1032_vm3, %v3493_v41  ;;  %3495 = vst.msk [vmem:[#allocation9] sm:$0x3] %vm1032_vm3, %v3493_v41 }
 0x964   : > { %v3804_v36 = vsel %vm3803_vm14, %v3786_v10, %v3796_v43  ;;  %v3982_v46 = vld [vmem:[#allocation8] sm:$0x3]  ;;  %v4108_v10 = vld [vmem:[#allocation2] sm:$0x3] }
 0x965   : > { %v3805_v45 = vsub.f32 %v3804_v36, %v3792_v13  ;;  %3816 = vst.msk [vmem:[#allocation5] sm:$0x3] %vm1032_vm3, %v3804_v36  ;;  %v3989_v28 = vmul.f32 0.95122945, %v3982_v46  ;;  %v4115_v11 = vmul.f32 0.95122945, %v4108_v10 }
 0x967   : > { %vm3806_vm15 = vcmp.gt.f32.partialorder %v3805_v45, 0.0 }
 0x968   : > { %v5748_v47 = vsel %vm3806_vm15, 1.0, %v7589_v8 }
 0x969   : > { %v3815_v31 = vmul.f32 %v5748_v47, %v3813_v23  ;;  %v4135_v47 = vrot.slane %v5756_v62, %v8192_v40 }
 0x96a   : > { %v3823_v52 = vld [vmem:[#allocation9] sm:$0x3] }
 0x96b   : > { %6346 = vmatmul.mubr.msk.f32.vlgmr.msra.gmra.mrb[28].mxu0 %vm927_vm2, %v3823_v52  ;;  %6357 = vmatmul.mubr.msk.f32.vlgmr.msra.gmra.mrb[28].mxu1 %vm927_vm2, %v3815_v31  ;;  %3817 = vst.msk [vmem:[#allocation6] sm:$0x3] %vm1032_vm3, %v3815_v31  ;;  %v3985_v7 = vmul.f32 0.0016652786, %v3823_v52 }
 0x96c   : > { %6651 = vmatpush3.bf16.msra.mxu0 %v8506_v15  ;;  %6657 = vmatpush3.bf16.msra.mxu1 %v8508_v16  ;;  %v4305_v16 = vld [vmem:[#allocation7] sm:$0x3] }
 0x96d   : > { %6652 = vmatprep.subr.bf16.mxu0 %v7587_v5  ;;  %6658 = vmatprep.subr.bf16.mxu1 %v7587_v5  ;;  %v3986_v49 = vadd.f32 %v3985_v7, %v3984_v50 }
 0x96e   : > { %6367 = vmatprep.mubr.msk.f32.mxu0 %vm7588_vm1, %v7589_v8  ;;  %6378 = vmatprep.mubr.msk.f32.mxu1 %vm7588_vm1, %v7589_v8 }
 0x96f   : > { %v3987_v54 = vmul.f32 1.8, %v3986_v49  ;;  %4014 = vst.msk [vmem:[#allocation10] sm:$0x3] %vm1032_vm3, %v3986_v49 }
 0x970   : > { %6654 = vmatpush3.bf16.msra.mxu0 %v8519_v18  ;;  %6660 = vmatpush3.bf16.msra.mxu1 %v8521_v6  ;;  %v4306_v6 = vmul.f32 0.9983347, %v4305_v16 }
 0x971   : > { %v3988_v56 = vadd.f32 0.01, %v3987_v54  ;;  %6661 = vmatprep.subr.bf16.mxu0 %v7587_v5  ;;  %6667 = vmatprep.subr.bf16.mxu1 %v7587_v5  ;;  %v4627_v54 = vld [vmem:[#allocation4] sm:$0x3] }
 0x972   : > { %v8728_v57 = vld [vmem:[#allocation6] sm:$0x3] }
 0x973   : > { %6368 = vmatmul.mubr.msk.f32.vlgmr.msra.gmra.mrb[30].mxu0 %vm927_vm2, %v8677_v26  ;;  %6379 = vmatmul.mubr.msk.f32.vlgmr.msra.gmra.mrb[30].mxu1 %vm927_vm2, %v8728_v57  ;;  %v4307_v58 = vmul.f32 0.0016652786, %v8728_v57  ;;  %5755 = vst.msk [vmem:[%s8117_s28 + $0xa] sm:$0x3] %vm1032_vm3, %v3988_v56  ;;  %v3991_v4 = vmul.f32 %v3988_v56, %v3823_v52 }
 0x974   : > { %6663 = vmatpush3.bf16.msra.mxu0 %v8558_v33  ;;  %6669 = vmatpush3.bf16.msra.mxu1 %v8468_v35  ;;  %v5741_v35 = vld [vmem:[%s8095_s20 + $0x5] sm:$0x1] }
 0x975   : > { %6664 = vmatprep.subr.bf16.mxu0 %v7587_v5  ;;  %6670 = vmatprep.subr.bf16.mxu1 %v7587_v5  ;;  %v8741_v59 = vadd.f32 %v4307_v58, %v4306_v6  ;;  %vm3993_vm0 = vcmp.eq.f32.partialorder %v5741_v35, 0.0  ;;  %v4009_v32 = vrot.slane %v5741_v35, %v8192_v40  ;;  %v4628_v58 = vmul.f32 0.9983347, %v4627_v54 }
 0x976   : > { %6389 = vmatprep.mubr.msk.f32.mxu0 %vm7588_vm1, %v7589_v8  ;;  %6400 = vmatprep.mubr.msk.f32.mxu1 %vm7588_vm1, %v7589_v8  ;;  %v3994_v61 = vsel %vm3993_vm0, 1, %v7590_v42  ;;  %v4501_v31 = vld [vmem:[#allocation10] sm:$0x3] }
 0x977   : > { %4336 = vst.msk [vmem:[#allocation7] sm:$0x3] %vm1032_vm3, %v8741_v59  ;;  %v3998_v29 = vrot.slane %v3994_v61, %v8192_v40  ;;  %v4502_v50 = vmul.f32 0.9983347, %v4501_v31  ;;  %v4309_v61 = vmul.f32 1.8, %v8741_v59 }
 0x978   : > { %6666 = vmatpush3.bf16.msra.mxu0 %v8562_v51  ;;  %6672 = vmatpush3.bf16.msra.mxu1 %v8478_v39 }
 0x979   : > { %6679 = vmatprep.subr.bf16.mxu1 %v7587_v5  ;;  %6673 = vmatprep.subr.bf16.mxu0 %v7587_v5  ;;  %vm3999_vm5 = vcmp.eq.s32.totalorder %v3998_v29, 1 }
 0xa3e   : > { %v3897_v30 = vpop.f32.mrb[28].mxu0  ;;  %v3970_v63 = vpop.f32.mrb[28].mxu1 }
 0xa3f   : > { %v3971_v60 = vadd.f32 %v3970_v63, %v3897_v30  ;;  %v6347_v0 = vpop.f32.mrb[29].mxu0  ;;  %v6358_v37 = vpop.f32.mrb[29].mxu1  ;;  %v4304_v63 = vld [vmem:[#allocation5] sm:$0x3] }
 0xa40   : > { %v5773_v0 = vld [vmem:[%s8086_s27 + $0x7] sm:$0x1] }
 0xa41   : > { %v3981_v39 = vadd.f32 %v8689_v19, %v3971_v60  ;;  %vm4637_vm10 = vcmp.eq.f32.partialorder %v5773_v0, 0.0 }
 0xa42   : > { %v4638_v9 = vsel %vm4637_vm10, 1, %v7590_v42 }
 0xa43   : > { %v3990_v1 = vadd.f32 %v3989_v28, %v3981_v39  ;;  %v4311_v39 = vmul.f32 0.95122945, %v4304_v63 }
 0xa45   : > { %v3992_v20 = vsub.f32 %v3990_v1, %v3991_v4 }
 0xa46   : > { %v4103_v13 = vpop.f32.mrb[30].mxu0  ;;  %v8762_v17 = vpop.f32.mrb[30].mxu1 }
 0xa47   : > { %v4000_v22 = vsel %vm3999_vm5, %v3982_v46, %v3992_v20  ;;  %v4107_v14 = vadd.f32 %v5759_v38, %v4103_v13  ;;  %v6369_v34 = vpop.f32.mrb[31].mxu0  ;;  %v6380_v44 = vpop.f32.mrb[31].mxu1  ;;  %v4310_v46 = vadd.f32 0.01, %v4309_v61  ;;  %v5776_v38 = vld [vmem:[%s8075_s4 + $0xe] sm:$0x3] }
 0xa48   : > { %v4001_v25 = vsub.f32 %v4000_v22, %v3988_v56  ;;  %4012 = vst.msk [vmem:[#allocation8] sm:$0x3] %vm1032_vm3, %v4000_v22  ;;  %5754 = vst.msk [vmem:[%s8115_s1 + $0xa] sm:$0x3] %vm1032_vm3, %v4000_v22  ;;  %v5758_v61 = vld [vmem:[%s8095_s20 + $0x6] sm:$0x1] }
 0xa49   : > { %v4116_v24 = vadd.f32 %v4115_v11, %v4107_v14  ;;  %v4313_v2 = vmul.f32 %v4310_v46, %v8728_v57  ;;  %v4664_v14 = vld [vmem:[#allocation22] sm:$0xff]  ;;  %v4665_v11 = vld [vmem:[#allocation22 + $0x8] sm:$0xff] }
 0xa4a   : > { %vm4002_vm6 = vcmp.gt.f32.partialorder %v4001_v25, 0.0 }
 0xa4b   : > { %v5752_v41 = vsel %vm4002_vm6, 1.0, %v7589_v8  ;;  %v4118_v43 = vsub.f32 %v4116_v24, %v4117_v27  ;;  %v6686_v27 = vpack.c.bf16 %v4665_v11, %v4664_v14 }
 0xa4c   : > { %v4011_v36 = vmul.f32 %v5752_v41, %v4009_v32 }
 0xa4d   : > { %v4126_v45 = vsel %vm4125_vm7, %v4108_v10, %v4118_v43  ;;  %v4666_v43 = vld [vmem:[#allocation22 + $0x10] sm:$0xff] }
 0xa4e   : > { %5753 = vst.msk [vmem:[%s8113_s26 + $0xa] sm:$0x3] %vm1032_vm3, %v4011_v36  ;;  %4013 = vst.msk [vmem:[#allocation9] sm:$0x3] %vm1032_vm3, %v4011_v36  ;;  %v4127_v23 = vsub.f32 %v4126_v45, %v4114_v12  ;;  %v4667_v36 = vld [vmem:[#allocation22 + $0x18] sm:$0xff] }
 0xa4f   : > { %4138 = vst.msk [vmem:[#allocation2] sm:$0x3] %vm1032_vm3, %v4126_v45 }
 0xa50   : > { %vm4128_vm8 = vcmp.gt.f32.partialorder %v4127_v23, 0.0 }
 0xa51   : > { %v5761_v48 = vsel %vm4128_vm8, 1.0, %v7589_v8 }
 0xa52   : > { %v4137_v26 = vmul.f32 %v5761_v48, %v4135_v47  ;;  %v6689_v47 = vpack.c.bf16 %v4667_v36, %v4666_v43 }
 0xa54   : > { %6390 = vmatmul.mubr.msk.f32.vlgmr.msra.gmra.mrb[32].mxu0 %vm927_vm2, %v4137_v26  ;;  %4139 = vst.msk [vmem:[#allocation3] sm:$0x3] %vm1032_vm3, %v4137_v26  ;;  %v4653_v26 = vrot.slane %v5773_v0, %v8192_v40 }
 0xa55   : > { %v8778_v52 = vld [vmem:[#allocation9] sm:$0x3]  ;;  %6675 = vmatpush3.bf16.msra.mxu0 %v8621_v53  ;;  %6411 = vmatprep.mubr.msk.f32.mxu0 %vm7588_vm1, %v7589_v8 }
 0xa56   : > { %6401 = vmatmul.mubr.msk.f32.vlgmr.msra.gmra.mrb[32].mxu1 %vm927_vm2, %v8778_v52  ;;  %v4503_v7 = vmul.f32 0.0016652786, %v8778_v52  ;;  %6676 = vmatprep.subr.bf16.mxu0 %v7587_v5  ;;  %v4626_v10 = vld [vmem:[#allocation2] sm:$0x3] }
 0xa57   : > { %6681 = vmatpush3.bf16.msra.mxu1 %v8506_v15  ;;  %6422 = vmatprep.mubr.msk.f32.mxu1 %vm7588_vm1, %v7589_v8  ;;  %v4633_v34 = vmul.f32 0.95122945, %v4626_v10 }
 0xa58   : > { %v4504_v49 = vadd.f32 %v4503_v7, %v4502_v50  ;;  %6682 = vmatprep.subr.bf16.mxu1 %v7587_v5  ;;  %v4823_v50 = vld [vmem:[#allocation7] sm:$0x3] }
 0xa59   : > { %6678 = vmatpush3.bf16.msra.mxu0 %v8625_v55  ;;  %v4824_v54 = vmul.f32 0.9983347, %v4823_v50 }
 0xa5a   : > { %4532 = vst.msk [vmem:[#allocation10] sm:$0x3] %vm1032_vm3, %v4504_v49  ;;  %6685 = vmatprep.subr.bf16.mxu0 %v7587_v5  ;;  %v4505_v16 = vmul.f32 1.8, %v4504_v49 }
 0xa5b   : > { %6684 = vmatpush3.bf16.msra.mxu1 %v8519_v18  ;;  %v4547_v56 = vld [vmem:[#allocation3] sm:$0x3]  ;;  %v5757_v18 = vld [vmem:[%s8092_s0 + $0x6] sm:$0x1] }
 0xa5c   : > { %v4629_v15 = vmul.f32 0.0016652786, %v4547_v56  ;;  %6691 = vmatprep.subr.bf16.mxu1 %v7587_v5  ;;  %v8796_v6 = vadd.f32 0.01, %v4505_v16  ;;  %vm4315_vm9 = vcmp.eq.f32.partialorder %v5757_v18, 0.0  ;;  %v4331_v22 = vrot.slane %v5757_v18, %v8192_v40 }
 0xa5d   : > { %v4316_v62 = vsel %vm4315_vm9, 1, %v7590_v42 }
 0xa5e   : > { %6423 = vmatmul.mubr.msk.f32.vlgmr.msra.gmra.mrb[34].mxu1 %vm927_vm2, %v4547_v56  ;;  %v4630_v35 = vadd.f32 %v4629_v15, %v4628_v58  ;;  %5772 = vst.msk [vmem:[%s8117_s28 + $0xc] sm:$0x3] %vm1032_vm3, %v8796_v6  ;;  %v4320_v37 = vrot.slane %v4316_v62, %v8192_v40  ;;  %v4860_v15 = vld [vmem:[%s9392_s9] sm:$0xff] }
 0xa5f   : > { %6693 = vmatpush3.bf16.msra.mxu1 %v8558_v33  ;;  %6444 = vmatprep.mubr.msk.f32.mxu1 %vm7588_vm1, %v7589_v8 }
 0xa60   : > { %4658 = vst.msk [vmem:[#allocation4] sm:$0x3] %vm1032_vm3, %v4630_v35  ;;  %6694 = vmatprep.subr.bf16.mxu1 %v7587_v5  ;;  %v4631_v1 = vmul.f32 1.8, %v4630_v35  ;;  %vm4321_vm11 = vcmp.eq.s32.totalorder %v4320_v37, 1  ;;  %v4862_v35 = vld [vmem:[%s9392_s9 + $0x10] sm:$0xff] }
 0xa62   : > { %v4632_v12 = vadd.f32 0.01, %v4631_v1 }
 0xa63   : > { %6696 = vmatpush3.bf16.msra.mxu1 %v8562_v51 }
 0xa64   : > { %6703 = vmatprep.subr.bf16.mxu1 %v7587_v5  ;;  %v4635_v32 = vmul.f32 %v4632_v12, %v4547_v56 }
 0xb27   : > { %v4292_v30 = vpop.f32.mrb[32].mxu0 }
 0xb28   : > { %v4293_v33 = vadd.f32 %v4292_v30, %v8762_v17  ;;  %v6391_v60 = vpop.f32.mrb[33].mxu0  ;;  %v4642_v17 = vrot.slane %v4638_v9, %v8192_v40 }
 0xb29   : > { %v8815_v29 = vpop.f32.mrb[32].mxu1 }
 0xb2a   : > { %v4303_v51 = vadd.f32 %v8635_v21, %v4293_v33  ;;  %v6402_v28 = vpop.f32.mrb[33].mxu1  ;;  %vm4643_vm13 = vcmp.eq.s32.totalorder %v4642_v17, 1 }
 0xb2c   : > { %v4312_v59 = vadd.f32 %v4311_v39, %v4303_v51  ;;  %v4509_v39 = vmul.f32 %v8796_v6, %v8778_v52 }
 0xb2e   : > { %v4314_v4 = vsub.f32 %v4312_v59, %v4313_v2 }
 0xb30   : > { %v4322_v20 = vsel %vm4321_vm11, %v4304_v63, %v4314_v4  ;;  %v4500_v63 = vld [vmem:[#allocation8] sm:$0x3] }
 0xb31   : > { %v4323_v13 = vsub.f32 %v4322_v20, %v4310_v46  ;;  %4334 = vst.msk [vmem:[#allocation5] sm:$0x3] %vm1032_vm3, %v4322_v20  ;;  %v4621_v3 = vpop.f32.mrb[34].mxu1  ;;  %v4507_v37 = vmul.f32 0.95122945, %v4500_v63 }
 0xb32   : > { %v4625_v57 = vadd.f32 %v5776_v38, %v4621_v3  ;;  %v6424_v44 = vpop.f32.mrb[35].mxu1  ;;  %v4527_v3 = vrot.slane %v5758_v61, %v8192_v40 }
 0xb33   : > { %vm4324_vm12 = vcmp.gt.f32.partialorder %v4323_v13, 0.0 }
 0xb34   : > { %v4634_v25 = vadd.f32 %v4633_v34, %v4625_v57  ;;  %v5765_v24 = vsel %vm4324_vm12, 1.0, %v7589_v8 }
 0xb35   : > { %v4333_v41 = vmul.f32 %v5765_v24, %v4331_v22 }
 0xb36   : > { %v4636_v45 = vsub.f32 %v4634_v25, %v4635_v32  ;;  %v5019_v32 = vld [vmem:[#allocation10] sm:$0x3] }
 0xb37   : > { %6412 = vmatmul.mubr.msk.f32.vlgmr.msra.gmra.mrb[34].mxu0 %vm927_vm2, %v4333_v41  ;;  %4335 = vst.msk [vmem:[#allocation6] sm:$0x3] %vm1032_vm3, %v4333_v41  ;;  %v5020_v43 = vmul.f32 0.9983347, %v5019_v32 }
 0xb38   : > { %v4644_v23 = vsel %vm4643_vm13, %v4626_v10, %v4636_v45  ;;  %6687 = vmatpush3.bf16.msra.mxu0 %v6686_v27  ;;  %6433 = vmatprep.mubr.msk.f32.mxu0 %vm7588_vm1, %v7589_v8  ;;  %v4822_v4 = vld [vmem:[#allocation5] sm:$0x3] }
 0xb39   : > { %v4645_v48 = vsub.f32 %v4644_v23, %v4632_v12  ;;  %4656 = vst.msk [vmem:[#allocation2] sm:$0x3] %vm1032_vm3, %v4644_v23  ;;  %6688 = vmatprep.subr.bf16.mxu0 %v7587_v5  ;;  %v4829_v22 = vmul.f32 0.95122945, %v4822_v4 }
 0xb3b   : > { %vm4646_vm14 = vcmp.gt.f32.partialorder %v4645_v48, 0.0  ;;  %v5775_v48 = vld [vmem:[%s8095_s20 + $0x7] sm:$0x1] }
 0xb3c   : > { %v5778_v31 = vsel %vm4646_vm14, 1.0, %v7589_v8  ;;  %6690 = vmatpush3.bf16.msra.mxu0 %v6689_v47  ;;  %vm5029_vm7 = vcmp.eq.f32.partialorder %v5775_v48, 0.0 }
 0xb3d   : > { %v4655_v7 = vmul.f32 %v5778_v31, %v4653_v26  ;;  %6697 = vmatprep.subr.bf16.mxu0 %v7587_v5  ;;  %v5030_v26 = vsel %vm5029_vm7, 1, %v7590_v42 }
 0xb3e   : > { %v4663_v49 = vld [vmem:[#allocation6] sm:$0x3] }
 0xb3f   : > { %6434 = vmatmul.mubr.msk.f32.vlgmr.msra.gmra.mrb[36].mxu0 %vm927_vm2, %v4663_v49  ;;  %v4825_v16 = vmul.f32 0.0016652786, %v4663_v49  ;;  %4657 = vst.msk [vmem:[#allocation3] sm:$0x3] %vm1032_vm3, %v4655_v7  ;;  %6445 = vmatmul.mubr.msk.f32.vlgmr.msra.gmra.mrb[36].mxu1 %vm927_vm2, %v4655_v7 }
 0xb40   : > { %6705 = vmatpush3.bf16.msra.mxu1 %v8621_v53  ;;  %6455 = vmatprep.mubr.msk.f32.mxu0 %vm7588_vm1, %v7589_v8  ;;  %v4861_v53 = vld [vmem:[%s9392_s9 + $0x8] sm:$0xff] }
 0xb41   : > { %v4826_v56 = vadd.f32 %v4825_v16, %v4824_v54  ;;  %6706 = vmatprep.subr.bf16.mxu1 %v7587_v5  ;;  %6466 = vmatprep.mubr.msk.f32.mxu1 %vm7588_vm1, %v7589_v8  ;;  %v6698_v58 = vpack.c.bf16 %v4861_v53, %v4860_v15  ;;  %vm4511_vm1 = vcmp.eq.f32.partialorder %v5758_v61, 0.0 }
 0xb42   : > { %v4512_v62 = vsel %vm4511_vm1, 1, %v7590_v42 }
 0xb43   : > { %4854 = vst.msk [vmem:[#allocation7] sm:$0x3] %vm1032_vm3, %v4826_v56  ;;  %6699 = vmatpush3.bf16.msra.mxu0 %v6698_v58  ;;  %v4516_v60 = vrot.slane %v4512_v62, %v8192_v40  ;;  %v4827_v28 = vmul.f32 1.8, %v4826_v56  ;;  %v5034_v56 = vrot.slane %v5030_v26, %v8192_v40 }
 0xb44   : > { %6708 = vmatpush3.bf16.msra.mxu1 %v8625_v55  ;;  %6700 = vmatprep.subr.bf16.mxu0 %v7587_v5  ;;  %v4863_v55 = vld [vmem:[%s9392_s9 + $0x18] sm:$0xff]  ;;  %v5774_v5 = vld [vmem:[%s8092_s0 + $0x7] sm:$0x1] }
 0xb45   : > { %v6701_v18 = vpack.c.bf16 %v4863_v55, %v4862_v35  ;;  %vm4833_vm15 = vcmp.eq.f32.partialorder %v5774_v5, 0.0  ;;  %vm4517_vm0 = vcmp.eq.s32.totalorder %v4516_v60, 1  ;;  %v4828_v10 = vadd.f32 0.01, %v4827_v28 }
 0xb46   : > { %v4834_v2 = vsel %vm4833_vm15, 1, %v7590_v42  ;;  %v5045_v42 = vrot.slane %v5775_v48, %v8192_v40  ;;  %v5063_v60 = vld [vmem:[#allocation3] sm:$0x3] (!%p5790_p13) }
 0xb47   : > { %6702 = vmatpush3.bf16.msra.mxu0 %v6701_v18  ;;  %v4838_v52 = vrot.slane %v4834_v2, %v8192_v40  ;;  %v4831_v57 = vmul.f32 %v4828_v10, %v4663_v49  ;;  %5064 = vst.msk [vmem:[#allocation31] sm:$0x3] (!%p5790_p13), %vm1032_vm3, %v5063_v60 }
 0xb49   : > { %vm4839_vm5 = vcmp.eq.s32.totalorder %v4838_v52, 1 }
 0xc0a   : > { %v4488_v30 = vpop.f32.mrb[34].mxu0 }
 0xc0b   : > { %v4489_v33 = vadd.f32 %v4488_v30, %v8815_v29  ;;  %v6413_v46 = vpop.f32.mrb[35].mxu0 }
 0xc0d   : > { %v4499_v0 = vadd.f32 %v8689_v19, %v4489_v33 }
 0xc0f   : > { %v4508_v51 = vadd.f32 %v4507_v37, %v4499_v0  ;;  %v5065_v0 = vld [vmem:[#allocation4] sm:$0x3] (!%p5790_p13) }
 0xc10   : > { %5066 = vst.msk [vmem:[#allocation32] sm:$0x3] (!%p5790_p13), %vm1032_vm3, %v5065_v0 }
 0xc11   : > { %v4510_v59 = vsub.f32 %v4508_v51, %v4509_v39  ;;  %v5071_v39 = vld [vmem:[#allocation7] sm:$0x3] (!%p5790_p13) }
 0xc12   : > { %v4737_v1 = vpop.f32.mrb[36].mxu0  ;;  %v4810_v29 = vpop.f32.mrb[36].mxu1  ;;  %5072 = vst.msk [vmem:[#allocation37] sm:$0x3] (!%p5790_p13), %vm1032_vm3, %v5071_v39 }
 0xc13   : > { %v4518_v9 = vsel %vm4517_vm0, %v4500_v63, %v4510_v59  ;;  %v4811_v38 = vadd.f32 %v4810_v29, %v4737_v1  ;;  %v6435_v20 = vpop.f32.mrb[37].mxu0  ;;  %v6446_v12 = vpop.f32.mrb[37].mxu1  ;;  %v5079_v63 = vld [vmem:[#allocation3] sm:$0x3] (!%p5790_p13) }
 0xc14   : > { %v4519_v13 = vsub.f32 %v4518_v9, %v8796_v6  ;;  %4530 = vst.msk [vmem:[#allocation8] sm:$0x3] %vm1032_vm3, %v4518_v9  ;;  %5771 = vst.msk [vmem:[%s8115_s1 + $0xc] sm:$0x3] %vm1032_vm3, %v4518_v9  ;;  %v5080_v46 = vsel (!%p5790_p13), %vm1032_vm3, %v5079_v63, 0.0 }
 0xc15   : > { %v4821_v17 = vadd.f32 %v8635_v21, %v4811_v38  ;;  %v4849_v21 = vrot.slane %v5774_v5, %v8192_v40  ;;  %5081 = vadd.xlane.f32.xlu0 (!%p5790_p13), %v5080_v46 }
 0xc16   : > { %vm4520_vm4 = vcmp.gt.f32.partialorder %v4519_v13, 0.0 }
 0xc17   : > { %v5769_v14 = vsel %vm4520_vm4, 1.0, %v7589_v8  ;;  %v4830_v11 = vadd.f32 %v4829_v22, %v4821_v17 }
 0xc18   : > { %v4529_v34 = vmul.f32 %v5769_v14, %v4527_v3 }
 0xc19   : > { %v4832_v44 = vsub.f32 %v4830_v11, %v4831_v57 }
 0xc1a   : > { %5770 = vst.msk [vmem:[%s8113_s26 + $0xc] sm:$0x3] %vm1032_vm3, %v4529_v34  ;;  %4531 = vst.msk [vmem:[#allocation9] sm:$0x3] %vm1032_vm3, %v4529_v34 }
 0xc1b   : > { %v4840_v6 = vsel %vm4839_vm5, %v4822_v4, %v4832_v44  ;;  %v5018_v7 = vld [vmem:[#allocation8] sm:$0x3] }
 0xc1c   : > { %v4841_v25 = vsub.f32 %v4840_v6, %v4828_v10  ;;  %4852 = vst.msk [vmem:[#allocation5] sm:$0x3] %vm1032_vm3, %v4840_v6  ;;  %v5025_v53 = vmul.f32 0.95122945, %v5018_v7 }
 0xc1e   : > { %vm4842_vm6 = vcmp.gt.f32.partialorder %v4841_v25, 0.0 }
 0xc1f   : > { %v5782_v24 = vsel %vm4842_vm6, 1.0, %v7589_v8 }
 0xc20   : > { %v4851_v27 = vmul.f32 %v5782_v24, %v4849_v21 }
 0xc21   : > { %v4859_v41 = vld [vmem:[#allocation9] sm:$0x3] }
 0xc22   : > { %6456 = vmatmul.mubr.msk.f32.vlgmr.msra.gmra.mrb[38].mxu0 %vm927_vm2, %v4859_v41  ;;  %v5021_v36 = vmul.f32 0.0016652786, %v4859_v41  ;;  %4853 = vst.msk [vmem:[#allocation6] sm:$0x3] %vm1032_vm3, %v4851_v27  ;;  %6467 = vmatmul.mubr.msk.f32.vlgmr.msra.gmra.mrb[38].mxu1 %vm927_vm2, %v4851_v27  ;;  %vm5035_vm2 = vcmp.eq.s32.totalorder %v5034_v56, 1 }
 0xc23   : > { %v5067_v37 = vld [vmem:[#allocation5] sm:$0x3] (!%p5790_p13) }
 0xc24   : > { %v5022_v45 = vadd.f32 %v5021_v36, %v5020_v43  ;;  %5068 = vst.msk [vmem:[#allocation34] sm:$0x3] (!%p5790_p13), %vm1032_vm3, %v5067_v37 }
 0xc26   : > { %5050 = vst.msk [vmem:[#allocation10] sm:$0x3] %vm1032_vm3, %v5022_v45  ;;  %v5023_v23 = vmul.f32 1.8, %v5022_v45 }
 0xc28   : > { %v5024_v47 = vadd.f32 0.01, %v5023_v23 }
 0xc29   : > { %v5090_v33 = vld [vmem:[#allocation6] sm:$0x3] (!%p5790_p13) }
 0xc2a   : > { %5789 = vst.msk [vmem:[%s8117_s28 + $0xe] sm:$0x3] %vm1032_vm3, %v5024_v47  ;;  %v5027_v35 = vmul.f32 %v5024_v47, %v4859_v41  ;;  %v5091_v5 = vsel (!%p5790_p13), %vm1032_vm3, %v5090_v33, 0.0  ;;  %v5069_v51 = vld [vmem:[#allocation6] sm:$0x3] (!%p5790_p13) }
 0xc2b   : > { %5092 = vadd.xlane.f32.xlu0 (!%p5790_p13), %v5091_v5  ;;  %5070 = vst.msk [vmem:[#allocation35] sm:$0x3] (!%p5790_p13), %vm1032_vm3, %v5069_v51 }
 0xc2d   : > { %v5077_v2 = vld [vmem:[#allocation10] sm:$0x3] (!%p5790_p13) }
 0xc2e   : > { %5078 = vst.msk [vmem:[#allocation41] sm:$0x3] (!%p5790_p13), %vm1032_vm3, %v5077_v2 }
 0xca2   : > { %v5082_v29 = vpop.xlane.xlu0 (!%p5790_p13), %5081 }
 0xca3   : > { %v5083_v9 = vrot.slane (!%p5790_p13), %v5082_v29, 4 }
 0xca5   : > { %v5084_v10 = vadd.f32 (!%p5790_p13), %v5083_v9, %v5082_v29 }
 0xca7   : > { %v5085_v13 = vrot.slane (!%p5790_p13), %v5084_v10, 2 }
 0xca9   : > { %v5086_v17 = vadd.f32 (!%p5790_p13), %v5085_v13, %v5084_v10 }
 0xcab   : > { %v5087_v11 = vrot.slane (!%p5790_p13), %v5086_v17, 1 }
 0xcad   : > { %v5088_v34 = vadd.f32 (!%p5790_p13), %v5087_v11, %v5086_v17 }
 0xcaf   : > { %6709 = vpush (!%p5790_p13), %v5088_v34 }
 0xcb8   : > { %v5093_v20 = vpop.xlane.xlu0 (!%p5790_p13), %5092 }
 0xcb9   : > { %v5094_v3 = vrot.slane (!%p5790_p13), %v5093_v20, 4 }
 0xcbb   : > { %v5095_v52 = vadd.f32 (!%p5790_p13), %v5094_v3, %v5093_v20 }
 0xcbd   : > { %v5096_v14 = vrot.slane (!%p5790_p13), %v5095_v52, 2 }
 0xcbf   : > { %v5097_v57 = vadd.f32 (!%p5790_p13), %v5096_v14, %v5095_v52 }
 0xcc1   : > { %v5098_v6 = vrot.slane (!%p5790_p13), %v5097_v57, 1 }
 0xcc3   : > { %v5099_v25 = vadd.f32 (!%p5790_p13), %v5098_v6, %v5097_v57 }
 0xcc5   : > { %6711 = vpush (!%p5790_p13), %v5099_v25 }
 0xce0   : > { %s6710_s0 = spop (!%p5790_p13), %6709 }
 0xcf5   : > { %v4933_v31 = vpop.f32.mrb[38].mxu0  ;;  %v5006_v50 = vpop.f32.mrb[38].mxu1 }
 0xcf6   : > { %v5007_v49 = vadd.f32 %v5006_v50, %v4933_v31  ;;  %v6457_v54 = vpop.f32.mrb[39].mxu0  ;;  %v6468_v16 = vpop.f32.mrb[39].mxu1  ;;  %s6712_s20 = spop (!%p5790_p13), %6711 }
 0xcf7   : > { %s5101_s16 = sadd.f32 (!%p5790_p13), %s6712_s20, %s6710_s0 }
 0xcf8   : > { %v5017_v15 = vadd.f32 %v8689_v19, %v5007_v49 }
 0xcfa   : > { %v5026_v58 = vadd.f32 %v5025_v53, %v5017_v15 }
 0xcfc   : > { %v5028_v55 = vsub.f32 %v5026_v58, %v5027_v35 }
 0xcfe   : > { %v5036_v18 = vsel %vm5035_vm2, %v5018_v7, %v5028_v55 }
 0xcff   : > { %v5037_v61 = vsub.f32 %v5036_v18, %v5024_v47  ;;  %5048 = vst.msk [vmem:[#allocation8] sm:$0x3] %vm1032_vm3, %v5036_v18  ;;  %5788 = vst.msk [vmem:[%s8115_s1 + $0xe] sm:$0x3] %vm1032_vm3, %v5036_v18  ;;  %5060 = sbr.rel (%p5790_p13) target bundleno = 3552 (0xde0), region = 104 }
 0xd01   : > { %vm5038_vm8 = vcmp.gt.f32.partialorder %v5037_v61, 0.0 }
 0xd02   : > { %v5786_v62 = vsel %vm5038_vm8, 1.0, %v7589_v8  ;;  %v5061_v8 = vld [vmem:[#allocation2] sm:$0x3] (!%p5790_p13) }
 0xd03   : > { %v5047_v30 = vmul.f32 %v5786_v62, %v5045_v42  ;;  %5062 = vst.msk [vmem:[#allocation29] sm:$0x3] (!%p5790_p13), %vm1032_vm3, %v5061_v8 }
 0xd05   : > { %5049 = vst.msk [vmem:[#allocation9] sm:$0x3] %vm1032_vm3, %v5047_v30  ;;  %5787 = vst.msk [vmem:[%s8113_s26 + $0xe] sm:$0x3] %vm1032_vm3, %v5047_v30 }
 0xd06   : > { %v5073_v28 = vld [vmem:[#allocation8] sm:$0x3] }
 0xd07   : > { %5074 = vst.msk [vmem:[#allocation38] sm:$0x3] %vm1032_vm3, %v5073_v28 }
 0xd0c   : > { %v5102_v19 = vld [vmem:[#allocation9] sm:$0x3] }
 0xd0d   : > { %v5103_v40 = vsel %vm1032_vm3, %v5102_v19, 0.0  ;;  %v5075_v59 = vld [vmem:[#allocation9] sm:$0x3] }
 0xd0e   : > { %5104 = vadd.xlane.f32.xlu1 %v5103_v40  ;;  %5076 = vst.msk [vmem:[#allocation40] sm:$0x3] %vm1032_vm3, %v5075_v59  ;;  %vm5118_vm3 = vcmask 0  }
 0xd9b   : > { %v5105_v1 = vpop.xlane.xlu1 %5104 }
 0xd9c   : > { %v5106_v4 = vrot.slane %v5105_v1, 4 }
 0xd9e   : > { %v5107_v38 = vadd.f32 %v5106_v4, %v5105_v1 }
 0xda0   : > { %v5108_v12 = vrot.slane %v5107_v38, 2 }
 0xda2   : > { %v5109_v22 = vadd.f32 %v5108_v12, %v5107_v38 }
 0xda4   : > { %v5110_v44 = vrot.slane %v5109_v22, 1 }
 0xda6   : > { %v5111_v21 = vadd.f32 %v5110_v44, %v5109_v22 }
 0xda8   : > { %6713 = vpush %v5111_v21 }
 0xdd9   : > { %s6714_s3 = spop %6713 }
 0xdda   : > { %s5113_s15 = sadd.f32 %s6714_s3, %s5101_s16 }
 0xddc   : > { %s5116_s29 = smul.f32 0.0052083335, %s5113_s15 }
 0xdde   : > { %v5117_v32 = vstv %s5116_s29 }
 0xddf   : > { %5119 = vst.msk [vmem:[#allocation43] sm:$0x1] %vm5118_vm3, %v5117_v32 }
 0xde0 PF: > { %s9395_s11 = sld [smem:[#allocation61_spill]]  ;;  %s8913_s4 = sshll.u32 %s7747_s5, 8 }
 0xde1   : > { %s9396_s12 = sld [smem:[#allocation75_spill]]  ;;  %s5160_s23 = sshll.u32 %s8115_s1, 4  ;;  %s8922_s23 = int_to_ptr.vmem [resolvable:$true] %s5160_s23 }
 0xde2   : > { %s9319_s13 = scalar_lea.sflag [#allocation27], %s8082_s6  ;;  %s7143_s21 = scalar_lea.vmem %s8922_s23, 256 }
 0xde3   : > { %p7144_p8 = scmp.ne.s32.totalorder %s8922_s23, %s7143_s21  ;;  %s7591_s0 = smov [#allocation26]  }
 0xde4   : > { %s7147_s20 = sshll.u32 %s7591_s0, 4  ;;  %s7148_s20 = int_to_ptr.vmem [resolvable:$false] %s7147_s20 }
 0xde5   : > { %s7149_s16 = scalar_lea.vmem %s7148_s20, 512  ;;  %p7150_p9 = scmp.lt.s32.totalorder %s8922_s23, %s7148_s20 }
 0xde6   : > { %p9397_p1 = scmp.ne.s32.totalorder %s9395_s11, 0  ;;  %p7151_p6 = scmp.lt.s32.totalorder %s7149_s16, %s7143_s21 }
 0xde7   : > { %s8919_s17 = scalar_lea.hbm %s9396_s12, %s8913_s4 }
 0xde8   : > { %p7145_p11 = pnand %p7144_p8, %p9397_p1  ;;  %p7152_p12 = por %p7151_p6, %p7150_p9 }
 0xdea   : > { %p7146_p5 = pneg %p7145_p11 }
 0xdec   : > { %p7153_p2 = pnand %p7152_p12, %p7146_p5 }
 0xdee   : > { %7156 = shalt.err (!%p7153_p2)
}
 0xdef   : > { %s7157_s1 = scalar_lea.hbm %s8919_s17, 256  ;;  %s7161_s29 = scalar_lea.hbm %s9396_s12, 512 }
 0xdf0   : > { %p7158_p4 = scmp.ne.s32.totalorder %s8919_s17, %s7157_s1  ;;  %p7162_p7 = scmp.lt.u32.totalorder %s8919_s17, %s9396_s12 }
 0xdf1   : > { %p7163_p10 = scmp.lt.u32.totalorder %s7161_s29, %s7157_s1  ;;  %p7165_p8 = scmp.lt.u32.totalorder %s7157_s1, %s8919_s17 }
 0xdf2   : > { %p7159_p3 = pnand %p7158_p4, %p9397_p1 }
 0xdf3   : > { %p7164_p13 = por %p7163_p10, %p7162_p7 }
 0xdf4   : > { %p7160_p0 = pneg %p7159_p3 }
 0xdf5   : > { %p7166_p11 = por %p7165_p8, %p7164_p13 }
 0xdf7   : > { %p7167_p5 = pnand %p7166_p11, %p7160_p0 }
 0xdf9   : > { %7170 = shalt.err (!%p7167_p5)
}
 0xdfa   : > { %s9320_s21 = smov 32   ;;  %s9322_s0 = smov 2  }
 0xdfb   : > { %6740 = dma.vmem_to_hbm [thread:$0]  (%p9397_p1), %s8922_s23, 256, %s8919_s17, %s9319_s13, %s9320_s21, %s9320_s21, %s9322_s0  }
 0xdfc   : > { %s7594_s20 = smov [#allocation29]   ;;  %s7595_s1 = smov [#allocation32]  }
 0xdfd   : > { %s5190_s16 = sshll.u32 %s7594_s20, 4  ;;  %s5212_s3 = sshll.u32 %s7595_s1, 4  ;;  %s5191_s16 = int_to_ptr.vmem [resolvable:$true] %s5190_s16  ;;  %s5213_s3 = int_to_ptr.vmem [resolvable:$true] %s5212_s3 }
 0xdfe   : > { %s7171_s15 = scalar_lea.vmem %s5191_s16, 32  ;;  %p9398_p6 = scmp.eq.s32.totalorder %s7747_s5, 1 }
 0xdff   : > { %p7172_p9 = scmp.ne.s32.totalorder %s5191_s16, %s7171_s15  ;;  %p7178_p4 = scmp.lt.s32.totalorder %s5191_s16, %s5191_s16 }
 0xe00   : > { %p7179_p3 = scmp.lt.s32.totalorder %s7171_s15, %s7171_s15 }
 0xe01   : > { %p7173_p12 = pnand %p7172_p9, %p9398_p6 }
 0xe02   : > { %p7180_p0 = por %p7179_p3, %p7178_p4 }
 0xe03   : > { %p7174_p2 = pneg %p7173_p12 }
 0xe05   : > { %p7181_p7 = pnand %p7180_p0, %p7174_p2 }
 0xe07   : > { %7184 = shalt.err (!%p7181_p7)
}
 0xe08   : > { %s9399_s2 = sld [smem:[#allocation77_spill]]  ;;  %p9400_p13 = pmov %p9398_p6 }
 0xe0e   : > { %s7185_s17 = scalar_lea.hbm %s9399_s2, 32 }
 0xe0f   : > { %p7186_p10 = scmp.ne.s32.totalorder %s9399_s2, %s7185_s17  ;;  %p7191_p5 = scmp.lt.u32.totalorder %s7185_s17, %s9399_s2 }
 0xe11   : > { %p7187_p8 = pnand %p7186_p10, %p9400_p13 }
 0xe13   : > { %p7188_p11 = pneg %p7187_p8 }
 0xe15   : > { %p7193_p9 = pnand %p7191_p5, %p7188_p11 }
 0xe17   : > { %7196 = shalt.err (!%p7193_p9)
}
 0xe18   : > { %6743 = dma.vmem_to_hbm [thread:$0]  (%p9398_p6), %s5191_s16, 32, %s9399_s2, [#allocation30]  }
 0xe19   : > { %s7197_s29 = scalar_lea.vmem %s5213_s3, 32  ;;  %p9401_p2 = pmov %p9398_p6 }
 0xe1a   : > { %p7198_p12 = scmp.ne.s32.totalorder %s5213_s3, %s7197_s29  ;;  %p7204_p0 = scmp.lt.s32.totalorder %s5213_s3, %s5213_s3 }
 0xe1b   : > { %p7205_p7 = scmp.lt.s32.totalorder %s7197_s29, %s7197_s29 }
 0xe1c   : > { %p7199_p4 = pnand %p7198_p12, %p9401_p2 }
 0xe1d   : > { %p7206_p10 = por %p7205_p7, %p7204_p0 }
 0xe1e   : > { %p7200_p3 = pneg %p7199_p4 }
 0xe20   : > { %p7207_p13 = pnand %p7206_p10, %p7200_p3 }
 0xe22   : > { %7210 = shalt.err (!%p7207_p13)
}
 0xe23   : > { %s9402_s17 = sld [smem:[#allocation79_spill]]  ;;  %p9403_p11 = pmov %p9401_p2 }
 0xe29   : > { %s7211_s23 = scalar_lea.hbm %s9402_s17, 32 }
 0xe2a   : > { %p7212_p8 = scmp.ne.s32.totalorder %s9402_s17, %s7211_s23  ;;  %p7217_p6 = scmp.lt.u32.totalorder %s7211_s23, %s9402_s17 }
 0xe2c   : > { %p7213_p5 = pnand %p7212_p8, %p9403_p11 }
 0xe2e   : > { %p7214_p9 = pneg %p7213_p5 }
 0xe30   : > { %p7219_p12 = pnand %p7217_p6, %p7214_p9 }
 0xe32   : > { %7222 = shalt.err (!%p7219_p12)
}
 0xe33   : > { %6747 = dma.vmem_to_hbm [thread:$0]  (%p9401_p2), %s5213_s3, 32, %s9402_s17, [#allocation33]  }
 0xe34   : > { %s7596_s13 = smov [#allocation35]   ;;  %s7597_s20 = smov [#allocation38]  }
 0xe35   : > { %s5234_s27 = sshll.u32 %s7596_s13, 4  ;;  %s5256_s21 = sshll.u32 %s7597_s20, 4  ;;  %s5235_s27 = int_to_ptr.vmem [resolvable:$true] %s5234_s27  ;;  %s5257_s21 = int_to_ptr.vmem [resolvable:$true] %s5256_s21 }
 0xe36   : > { %s7223_s0 = scalar_lea.vmem %s5235_s27, 32  ;;  %p9404_p3 = pmov %p9401_p2 }
 0xe37   : > { %p7224_p4 = scmp.ne.s32.totalorder %s5235_s27, %s7223_s0  ;;  %p7230_p10 = scmp.lt.s32.totalorder %s5235_s27, %s5235_s27 }
 0xe38   : > { %p7231_p13 = scmp.lt.s32.totalorder %s7223_s0, %s7223_s0 }
 0xe39   : > { %p7225_p0 = pnand %p7224_p4, %p9404_p3 }
 0xe3a   : > { %p7232_p8 = por %p7231_p13, %p7230_p10 }
 0xe3b   : > { %p7226_p7 = pneg %p7225_p0 }
 0xe3d   : > { %p7233_p11 = pnand %p7232_p8, %p7226_p7 }
 0xe3f   : > { %7236 = shalt.err (!%p7233_p11)
}
 0xe40   : > { %s9405_s1 = sld [smem:[#allocation81_spill]]  ;;  %p9406_p9 = pmov %p9401_p2 }
 0xe46   : > { %s7237_s3 = scalar_lea.hbm %s9405_s1, 32 }
 0xe47   : > { %p7238_p5 = scmp.ne.s32.totalorder %s9405_s1, %s7237_s3  ;;  %p7243_p2 = scmp.lt.u32.totalorder %s7237_s3, %s9405_s1 }
 0xe49   : > { %p7239_p6 = pnand %p7238_p5, %p9406_p9 }
 0xe4b   : > { %p7240_p12 = pneg %p7239_p6 }
 0xe4d   : > { %p7245_p4 = pnand %p7243_p2, %p7240_p12 }
 0xe4f   : > { %7248 = shalt.err (!%p7245_p4)
}
 0xe50   : > { %6751 = dma.vmem_to_hbm [thread:$0]  (%p9404_p3), %s5235_s27, 32, %s9405_s1, [#allocation36]  }
 0xe51   : > { %s7249_s23 = scalar_lea.vmem %s5257_s21, 32  ;;  %p9407_p7 = pmov %p9404_p3 }
 0xe52   : > { %p7250_p0 = scmp.ne.s32.totalorder %s5257_s21, %s7249_s23  ;;  %p7256_p8 = scmp.lt.s32.totalorder %s5257_s21, %s5257_s21 }
 0xe53   : > { %p7257_p11 = scmp.lt.s32.totalorder %s7249_s23, %s7249_s23 }
 0xe54   : > { %p7251_p10 = pnand %p7250_p0, %p9407_p7 }
 0xe55   : > { %p7258_p5 = por %p7257_p11, %p7256_p8 }
 0xe56   : > { %p7252_p13 = pneg %p7251_p10 }
 0xe58   : > { %p7259_p9 = pnand %p7258_p5, %p7252_p13 }
 0xe5a   : > { %7262 = shalt.err (!%p7259_p9)
}
 0xe5b   : > { %s9408_s15 = sld [smem:[#allocation83_spill]]  ;;  %p9409_p12 = pmov %p9404_p3 }
 0xe61   : > { %s7263_s29 = scalar_lea.hbm %s9408_s15, 32 }
 0xe62   : > { %p7264_p6 = scmp.ne.s32.totalorder %s9408_s15, %s7263_s29  ;;  %p7269_p3 = scmp.lt.u32.totalorder %s7263_s29, %s9408_s15 }
 0xe64   : > { %p7265_p2 = pnand %p7264_p6, %p9409_p12 }
 0xe66   : > { %p7266_p4 = pneg %p7265_p2 }
 0xe68   : > { %p7271_p0 = pnand %p7269_p3, %p7266_p4 }
 0xe6a   : > { %7274 = shalt.err (!%p7271_p0)
}
 0xe6b   : > { %6755 = dma.vmem_to_hbm [thread:$0]  (%p9407_p7), %s5257_s21, 32, %s9408_s15, [#allocation39]  }
 0xe6c   : > { %s7598_s16 = smov [#allocation41]   ;;  %s9410_s1 = sld [smem:[#allocation74_spill]] }
 0xe6d   : > { %s5278_s3 = sshll.u32 %s7598_s16, 4  ;;  %p9411_p13 = pmov %p9407_p7  ;;  %s5279_s3 = int_to_ptr.vmem [resolvable:$true] %s5278_s3 }
 0xe6e   : > { %s7275_s27 = scalar_lea.vmem %s5279_s3, 32  ;;  %p7282_p5 = scmp.lt.s32.totalorder %s5279_s3, %s5279_s3 }
 0xe6f   : > { %p7276_p10 = scmp.ne.s32.totalorder %s5279_s3, %s7275_s27  ;;  %p7283_p9 = scmp.lt.s32.totalorder %s7275_s27, %s7275_s27 }
 0xe71   : > { %p7277_p8 = pnand %p7276_p10, %p9411_p13  ;;  %p7284_p6 = por %p7283_p9, %p7282_p5 }
 0xe72   : > { %s9027_s7 = scalar_lea.hbm %s9410_s1, %s8913_s4 }
 0xe73   : > { %p7278_p11 = pneg %p7277_p8 }
 0xe75   : > { %p7285_p12 = pnand %p7284_p6, %p7278_p11 }
 0xe77   : > { %7288 = shalt.err (!%p7285_p12)
}
 0xe78   : > { %s9412_s20 = sld [smem:[#allocation85_spill]]  ;;  %p9413_p4 = pmov %p9407_p7 }
 0xe7e   : > { %s7289_s0 = scalar_lea.hbm %s9412_s20, 32 }
 0xe7f   : > { %p7290_p2 = scmp.ne.s32.totalorder %s9412_s20, %s7289_s0  ;;  %p7295_p7 = scmp.lt.u32.totalorder %s7289_s0, %s9412_s20 }
 0xe81   : > { %p7291_p3 = pnand %p7290_p2, %p9413_p4 }
 0xe83   : > { %p7292_p0 = pneg %p7291_p3 }
 0xe85   : > { %p7297_p10 = pnand %p7295_p7, %p7292_p0 }
 0xe87   : > { %7300 = shalt.err (!%p7297_p10)
}
 0xe88   : > { %p9414_p13 = pmov %p9413_p4  ;;  %s5144_s29 = sshll.u32 %s8113_s26, 4  ;;  %s9054_s29 = int_to_ptr.vmem [resolvable:$true] %s5144_s29 }
 0xe89   : > { %s9415_s16 = sld [smem:[#allocation76_spill]]  ;;  %s5176_s0 = sshll.u32 %s8117_s28, 4  ;;  %s9086_s0 = int_to_ptr.vmem [resolvable:$true] %s5176_s0 }
 0xe8a   : > { %6759 = dma.vmem_to_hbm [thread:$0]  (%p9414_p13), %s5279_s3, 32, %s9412_s20, [#allocation42]  }
 0xe8b   : > { %s5121_s13 = scalar_lea.sflag [#allocation13], %s8071_s24  ;;  %s7301_s8 = scalar_lea.vmem %s9054_s29, 256 }
 0xe8c   : > { %p7302_p8 = scmp.ne.s32.totalorder %s9054_s29, %s7301_s8  ;;  %s7599_s2 = smov [#allocation25]  }
 0xe8d   : > { %s7305_s3 = sshll.u32 %s7599_s2, 4  ;;  %s7306_s3 = int_to_ptr.vmem [resolvable:$false] %s7305_s3 }
 0xe8e   : > { %p7303_p11 = pnand %p7302_p8, %p9397_p1  ;;  %s7307_s26 = scalar_lea.vmem %s7306_s3, 512 }
 0xe8f   : > { %s9052_s9 = scalar_lea.hbm %s9415_s16, %s8913_s4  ;;  %p7308_p9 = scmp.lt.s32.totalorder %s9054_s29, %s7306_s3 }
 0xe90   : > { %p7304_p5 = pneg %p7303_p11  ;;  %p7309_p6 = scmp.lt.s32.totalorder %s7307_s26, %s7301_s8 }
 0xe92   : > { %p7310_p12 = por %p7309_p6, %p7308_p9 }
 0xe94   : > { %p7311_p2 = pnand %p7310_p12, %p7304_p5 }
 0xe96   : > { %7314 = shalt.err (!%p7311_p2)
}
 0xe97   : > { %s7315_s4 = scalar_lea.hbm %s9027_s7, 256  ;;  %s7319_s23 = scalar_lea.hbm %s9410_s1, 512 }
 0xe98   : > { %p7316_p4 = scmp.ne.s32.totalorder %s9027_s7, %s7315_s4  ;;  %p7320_p7 = scmp.lt.u32.totalorder %s9027_s7, %s9410_s1 }
 0xe99   : > { %p7321_p10 = scmp.lt.u32.totalorder %s7319_s23, %s7315_s4  ;;  %p7323_p8 = scmp.lt.u32.totalorder %s7315_s4, %s9027_s7 }
 0xe9a   : > { %p7317_p3 = pnand %p7316_p4, %p9397_p1 }
 0xe9b   : > { %p7322_p13 = por %p7321_p10, %p7320_p7 }
 0xe9c   : > { %p7318_p0 = pneg %p7317_p3 }
 0xe9d   : > { %p7324_p11 = por %p7323_p8, %p7322_p13 }
 0xe9f   : > { %p7325_p5 = pnand %p7324_p11, %p7318_p0 }
 0xea1   : > { %7328 = shalt.err (!%p7325_p5)
}
 0xea2   : > { %s9416_s8 = smov 2   ;;  %s9417_s26 = smov 32  }
 0xea3   : > { %6739 = dma.vmem_to_hbm [thread:$0]  (%p9397_p1), %s9054_s29, 256, %s9027_s7, %s5121_s13, %s9417_s26, %s9417_s26, %s9416_s8  }
 0xea4   : > { %s7329_s4 = scalar_lea.vmem %s9086_s0, 256  ;;  %s7600_s27 = smov [#allocation28]  }
 0xea5   : > { %p7330_p9 = scmp.ne.s32.totalorder %s9086_s0, %s7329_s4  ;;  %s7333_s21 = sshll.u32 %s7600_s27, 4  ;;  %s7334_s21 = int_to_ptr.vmem [resolvable:$false] %s7333_s21 }
 0xea6   : > { %s7335_s24 = scalar_lea.vmem %s7334_s21, 512  ;;  %p7336_p2 = scmp.lt.s32.totalorder %s9086_s0, %s7334_s21 }
 0xea7   : > { %p7331_p6 = pnand %p7330_p9, %p9397_p1  ;;  %p7337_p4 = scmp.lt.s32.totalorder %s7335_s24, %s7329_s4 }
 0xea9   : > { %p7332_p12 = pneg %p7331_p6  ;;  %p7338_p3 = por %p7337_p4, %p7336_p2 }
 0xeab   : > { %p7339_p0 = pnand %p7338_p3, %p7332_p12 }
 0xead   : > { %7342 = shalt.err (!%p7339_p0)
}
 0xeae   : > { %s7343_s28 = scalar_lea.hbm %s9052_s9, 256  ;;  %s7347_s13 = scalar_lea.hbm %s9415_s16, 512 }
 0xeaf   : > { %p7344_p7 = scmp.ne.s32.totalorder %s9052_s9, %s7343_s28  ;;  %p7348_p8 = scmp.lt.u32.totalorder %s9052_s9, %s9415_s16 }
 0xeb0   : > { %p7349_p11 = scmp.lt.u32.totalorder %s7347_s13, %s7343_s28  ;;  %p7351_p9 = scmp.lt.u32.totalorder %s7343_s28, %s9052_s9 }
 0xeb1   : > { %p7345_p10 = pnand %p7344_p7, %p9397_p1 }
 0xeb2   : > { %p7350_p5 = por %p7349_p11, %p7348_p8 }
 0xeb3   : > { %p7346_p13 = pneg %p7345_p10 }
 0xeb4   : > { %p7352_p6 = por %p7351_p9, %p7350_p5 }
 0xeb6   : > { %p7353_p12 = pnand %p7352_p6, %p7346_p13 }
 0xeb8   : > { %7356 = shalt.err (!%p7353_p12)
}
 0xeb9   : > { %s9418_s3 = scalar_lea.sflag [#allocation27], %s8082_s6  ;;  %s7601_s4 = smov [#allocation31]  }
 0xeba   : > { %6741 = dma.vmem_to_hbm [thread:$0]  (%p9397_p1), %s9086_s0, 256, %s9052_s9, %s9418_s3, %s9417_s26, %s9417_s26, %s9416_s8  }
 0xebb   : > { %s5201_s27 = sshll.u32 %s7601_s4, 4  ;;  %s7602_s21 = smov [#allocation34]   ;;  %s5202_s27 = int_to_ptr.vmem [resolvable:$true] %s5201_s27 }
 0xebc   : > { %s5223_s24 = sshll.u32 %s7602_s21, 4  ;;  %s7357_s28 = scalar_lea.vmem %s5202_s27, 32  ;;  %s5224_s24 = int_to_ptr.vmem [resolvable:$true] %s5223_s24 }
 0xebd   : > { %p7358_p2 = scmp.ne.s32.totalorder %s5202_s27, %s7357_s28  ;;  %p9419_p4 = scmp.eq.s32.totalorder %s7747_s5, 1 }
 0xebe   : > { %p7364_p7 = scmp.lt.s32.totalorder %s5202_s27, %s5202_s27  ;;  %p7365_p10 = scmp.lt.s32.totalorder %s7357_s28, %s7357_s28 }
 0xebf   : > { %p7359_p3 = pnand %p7358_p2, %p9419_p4 }
 0xec0   : > { %p7366_p13 = por %p7365_p10, %p7364_p7 }
 0xec1   : > { %p7360_p0 = pneg %p7359_p3 }
 0xec3   : > { %p7367_p8 = pnand %p7366_p13, %p7360_p0 }
 0xec5   : > { %7370 = shalt.err (!%p7367_p8)
}
 0xec6   : > { %s9420_s7 = sld [smem:[#allocation78_spill]]  ;;  %p9421_p11 = pmov %p9419_p4 }
 0xecc   : > { %s7371_s9 = scalar_lea.hbm %s9420_s7, 32 }
 0xecd   : > { %p7372_p1 = scmp.ne.s32.totalorder %s9420_s7, %s7371_s9  ;;  %p7377_p6 = scmp.lt.u32.totalorder %s7371_s9, %s9420_s7 }
 0xecf   : > { %p7373_p5 = pnand %p7372_p1, %p9421_p11 }
 0xed1   : > { %p7374_p9 = pneg %p7373_p5 }
 0xed3   : > { %p7379_p12 = pnand %p7377_p6, %p7374_p9 }
 0xed5   : > { %7382 = shalt.err (!%p7379_p12)
}
 0xed6   : > { %p9422_p2 = pmov %p9419_p4  ;;  %s7383_s2 = scalar_lea.vmem %s5224_s24, 32 }
 0xed7   : > { %p7384_p4 = scmp.ne.s32.totalorder %s5224_s24, %s7383_s2  ;;  %p7390_p10 = scmp.lt.s32.totalorder %s5224_s24, %s5224_s24 }
 0xed8   : > { %6745 = dma.vmem_to_hbm [thread:$0]  (%p9422_p2), %s5202_s27, 32, %s9420_s7, [#allocation30]  }
 0xed9   : > { %p9423_p3 = pmov %p9422_p2  ;;  %p7391_p13 = scmp.lt.s32.totalorder %s7383_s2, %s7383_s2 }
 0xedb   : > { %p7385_p0 = pnand %p7384_p4, %p9423_p3  ;;  %p7392_p8 = por %p7391_p13, %p7390_p10 }
 0xedd   : > { %p7386_p7 = pneg %p7385_p0 }
 0xedf   : > { %p7393_p1 = pnand %p7392_p8, %p7386_p7 }
 0xee1   : > { %7396 = shalt.err (!%p7393_p1)
}
 0xee2   : > { %s9424_s21 = sld [smem:[#allocation80_spill]]  ;;  %p9425_p5 = pmov %p9422_p2 }
 0xee8   : > { %s7397_s28 = scalar_lea.hbm %s9424_s21, 32 }
 0xee9   : > { %p7398_p11 = scmp.ne.s32.totalorder %s9424_s21, %s7397_s28  ;;  %p7403_p12 = scmp.lt.u32.totalorder %s7397_s28, %s9424_s21 }
 0xeeb   : > { %p7399_p9 = pnand %p7398_p11, %p9425_p5 }
 0xeed   : > { %p7400_p6 = pneg %p7399_p9 }
 0xeef   : > { %p7405_p2 = pnand %p7403_p12, %p7400_p6 }
 0xef1   : > { %7408 = shalt.err (!%p7405_p2)
}
 0xef2   : > { %p9426_p4 = pmov %p9423_p3  ;;  %s7603_s26 = smov [#allocation37]  }
 0xef3   : > { %s5245_s29 = sshll.u32 %s7603_s26, 4  ;;  %s7604_s13 = smov [#allocation40]   ;;  %s5246_s29 = int_to_ptr.vmem [resolvable:$true] %s5245_s29 }
 0xef4   : > { %6749 = dma.vmem_to_hbm [thread:$0]  (%p9426_p4), %s5224_s24, 32, %s9424_s21, [#allocation33]  }
 0xef5   : > { %s5267_s23 = sshll.u32 %s7604_s13, 4  ;;  %s7409_s2 = scalar_lea.vmem %s5246_s29, 32  ;;  %s5268_s23 = int_to_ptr.vmem [resolvable:$true] %s5267_s23 }
 0xef6   : > { %p7410_p3 = scmp.ne.s32.totalorder %s5246_s29, %s7409_s2  ;;  %p9427_p0 = pmov %p9426_p4 }
 0xef7   : > { %p7416_p13 = scmp.lt.s32.totalorder %s5246_s29, %s5246_s29  ;;  %p7417_p8 = scmp.lt.s32.totalorder %s7409_s2, %s7409_s2 }
 0xef8   : > { %p7411_p7 = pnand %p7410_p3, %p9427_p0 }
 0xef9   : > { %p7418_p1 = por %p7417_p8, %p7416_p13 }
 0xefa   : > { %p7412_p10 = pneg %p7411_p7 }
 0xefc   : > { %p7419_p11 = pnand %p7418_p1, %p7412_p10 }
 0xefe   : > { %7422 = shalt.err (!%p7419_p11)
}
 0xeff   : > { %s9428_s28 = sld [smem:[#allocation82_spill]]  ;;  %p9429_p9 = pmov %p9427_p0 }
 0xf05   : > { %s7423_s24 = scalar_lea.hbm %s9428_s28, 32 }
 0xf06   : > { %p7424_p5 = scmp.ne.s32.totalorder %s9428_s28, %s7423_s24  ;;  %p7429_p2 = scmp.lt.u32.totalorder %s7423_s24, %s9428_s28 }
 0xf08   : > { %p7425_p6 = pnand %p7424_p5, %p9429_p9 }
 0xf0a   : > { %p7426_p12 = pneg %p7425_p6 }
 0xf0c   : > { %p7431_p4 = pnand %p7429_p2, %p7426_p12 }
 0xf0e   : > { %7434 = shalt.err (!%p7431_p4)
}
 0xf0f   : > { %p9430_p3 = pmov %p9427_p0  ;;  %s7435_s26 = scalar_lea.vmem %s5268_s23, 32 }
 0xf10   : > { %p7436_p0 = scmp.ne.s32.totalorder %s5268_s23, %s7435_s26  ;;  %p7442_p8 = scmp.lt.s32.totalorder %s5268_s23, %s5268_s23 }
 0xf11   : > { %6753 = dma.vmem_to_hbm [thread:$0]  (%p9430_p3), %s5246_s29, 32, %s9428_s28, [#allocation36]  }
 0xf12   : > { %p9431_p7 = pmov %p9430_p3  ;;  %p7443_p1 = scmp.lt.s32.totalorder %s7435_s26, %s7435_s26 }
 0xf14   : > { %p7437_p10 = pnand %p7436_p0, %p9431_p7  ;;  %p7444_p11 = por %p7443_p1, %p7442_p8 }
 0xf16   : > { %p7438_p13 = pneg %p7437_p10 }
 0xf18   : > { %p7445_p5 = pnand %p7444_p11, %p7438_p13 }
 0xf1a   : > { %7448 = shalt.err (!%p7445_p5)
}
 0xf1b   : > { %s9432_s3 = sld [smem:[#allocation84_spill]]  ;;  %p9433_p6 = pmov %p9430_p3 }
 0xf21   : > { %s7449_s4 = scalar_lea.hbm %s9432_s3, 32 }
 0xf22   : > { %p7450_p9 = scmp.ne.s32.totalorder %s9432_s3, %s7449_s4  ;;  %p7455_p4 = scmp.lt.u32.totalorder %s7449_s4, %s9432_s3 }
 0xf24   : > { %p7451_p12 = pnand %p7450_p9, %p9433_p6 }
 0xf26   : > { %p7452_p2 = pneg %p7451_p12 }
 0xf28   : > { %p7457_p3 = pnand %p7455_p4, %p7452_p2 }
 0xf2a   : > { %7460 = shalt.err (!%p7457_p3)
}
 0xf2b   : > { %p9434_p0 = pmov %p9433_p6  ;;  %s7605_s0 = smov [#allocation43]  }
 0xf2c   : > { %s5289_s8 = sshll.u32 %s7605_s0, 4  ;;  %s5290_s8 = int_to_ptr.vmem [resolvable:$true] %s5289_s8 }
 0xf2d   : > { %6757 = dma.vmem_to_hbm [thread:$0]  (%p9434_p0), %s5268_s23, 32, %s9432_s3, [#allocation39]  }
 0xf2e   : > { %s7461_s26 = scalar_lea.vmem %s5290_s8, 16  ;;  %p9435_p10 = pmov %p9434_p0 }
 0xf2f   : > { %p7462_p7 = scmp.ne.s32.totalorder %s5290_s8, %s7461_s26  ;;  %s7467_s13 = scalar_lea.vmem %s5290_s8, 32 }
 0xf30   : > { %p7468_p1 = scmp.lt.s32.totalorder %s5290_s8, %s5290_s8  ;;  %p7469_p11 = scmp.lt.s32.totalorder %s7467_s13, %s7461_s26 }
 0xf31   : > { %p7463_p13 = pnand %p7462_p7, %p9435_p10 }
 0xf32   : > { %p7470_p5 = por %p7469_p11, %p7468_p1 }
 0xf33   : > { %p7464_p8 = pneg %p7463_p13 }
 0xf35   : > { %p7471_p9 = pnand %p7470_p5, %p7464_p8 }
 0xf37   : > { %7474 = shalt.err (!%p7471_p9)
}
 0xf38   : > { %s9436_s24 = sld [smem:[#allocation86_spill]]  ;;  %p9438_p12 = pmov %p9434_p0 }
 0xf3e   : > { %s9437_s6 = smov %s9436_s24  ;;  %s7475_s29 = scalar_lea.hbm %s9436_s24, 16 }
 0xf3f   : > { %p7476_p6 = scmp.ne.s32.totalorder %s9437_s6, %s7475_s29  ;;  %p7481_p3 = scmp.lt.u32.totalorder %s7475_s29, %s9437_s6 }
 0xf41   : > { %p7477_p2 = pnand %p7476_p6, %p9438_p12 }
 0xf43   : > { %p7478_p4 = pneg %p7477_p2 }
 0xf45   : > { %p7483_p0 = pnand %p7481_p3, %p7478_p4 }
 0xf47   : > { %7486 = shalt.err (!%p7483_p0)
}
 0xf48   : > { %p9439_p7 = pmov %p9435_p10 }
 0xf4a   : > { %6761 = dma.vmem_to_hbm [thread:$0]  (%p9439_p7), %s5290_s8, 16, %s9437_s6, [#allocation42]  }
 0xf4b   : > { %p9440_p10 = pmov %p9439_p7 }
 0xf4c   : > { %p9441_p13 = pmov %p9439_p7 }
 0xf4d   : > { %7528 = dma.done.wait (%p9440_p10), [#allocation30], 64  }
 0xf4e   : > { %7530 = vsyncadd (%p9441_p13), [#allocation30], 4294967232  ;;  %p9442_p8 = pmov %p9439_p7 }
 0xf4f   : > { %p9443_p1 = pmov %p9439_p7 }
 0xf50   : > { %7532 = dma.done.wait (%p9442_p8), [#allocation33], 64  }
 0xf51   : > { %7534 = vsyncadd (%p9443_p1), [#allocation33], 4294967232  ;;  %p9444_p11 = pmov %p9443_p1 }
 0xf52   : > { %p9445_p5 = pmov %p9443_p1 }
 0xf53   : > { %7536 = dma.done.wait (%p9444_p11), [#allocation36], 64  }
 0xf54   : > { %7538 = vsyncadd (%p9445_p5), [#allocation36], 4294967232  ;;  %p9446_p9 = pmov %p9443_p1 }
 0xf55   : > { %p9447_p6 = pmov %p9443_p1 }
 0xf56   : > { %7540 = dma.done.wait (%p9446_p9), [#allocation39], 64  }
 0xf57   : > { %7542 = vsyncadd (%p9447_p6), [#allocation39], 4294967232  ;;  %p9448_p12 = pmov %p9443_p1 }
 0xf58   : > { %p9449_p2 = pmov %p9443_p1 }
 0xf59   : > { %7544 = dma.done.wait (%p9448_p12), [#allocation42], 48  }
 0xf5a   : > { %7546 = vsyncadd (%p9449_p2), [#allocation42], 4294967248 }
 0xf5b PF: > { %s9450_s8 = sld [smem:[#allocation57_spill]]  ;;  %s9451_s13 = sld [smem:[#allocation59_spill]] }
 0xf5c   : > { %p9453_p3 = scmp.ge.s32.totalorder %s7569_s25, 2 }
 0xf61   : > { %s5341_s2 = sand.u32 1, %s9450_s8   ;;  %p9452_p4 = scmp.ne.s32.totalorder %s9451_s13, 0 }
 0xf62   : > { %s5342_s4 = scalar_lea.sflag [#allocation13], %s5341_s2 }
 0xf63   : > { %p6812_p0 = pnand %p9453_p3, %p9452_p4 }
 0xf65   : > { %7548 = dma.done.wait (!%p6812_p0), %s5342_s4, 256  }
 0xf66   : > { %7550 = vsyncadd (!%p6812_p0), %s5342_s4, 4294967040  ;;  %s9454_s24 = sadd.s32 4294967294, %s7569_s25  }
 0xf67   : > { %s5350_s29 = sand.u32 1, %s9454_s24  }
 0xf68   : > { %s5351_s23 = scalar_lea.sflag [#allocation27], %s5350_s29 }
 0xf69   : > { %7552 = dma.done.wait (!%p6812_p0), %s5351_s23, 512  }
 0xf6a   : > { %7554 = vsyncadd (!%p6812_p0), %s5351_s23, 4294966784  ;;  %s9455_s25 = sld [smem:[#allocation60_spill]]  ;;  %s9456_s5 = sld [smem:[#allocation58_spill]] }
 0xf6b   : > { %s9457_s24 = sld [smem:[#allocation62_spill]]  ;;  %s9458_s4 = smov %s7561_s30 }
 0xf70   : > { %p53_p7 = scmp.ge.s32.totalorder %s9455_s25, 4   ;;  %s9459_s30 = smov %s9456_s5 }
 0xf72   :  { %55 = sbr.rel (!%p53_p7) target bundleno = 43 (0x2b), region = 331 }
 0xf79   :  { %5365 = vsyncpa [#allocation12], 1 }
 0xf7a   :  { %5367 = vsyncpa [#allocation12 + $0x1], 1 }
 0xf7b   :  { %5368 = vsyncpa [#allocation15], 1 }
 0xf7c   :  { %5370 = vsyncpa [#allocation15 + $0x1], 1 }
 0xf7d   :  { %5371 = vsyncpa [#allocation18], 1 }
 0xf7e   :  { %5373 = vsyncpa [#allocation18 + $0x1], 1 }
 0xf7f   :  { %5374 = vsyncpa [#allocation21], 1 }
 0xf80   :  { %5375 = vsyncpa [#allocation24], 1 }
 0xf81   :  { %5376 = vsyncpa [#allocation13], 1 }
 0xf82   :  { %5378 = vsyncpa [#allocation13 + $0x1], 1 }
 0xf83   :  { %5379 = vsyncpa [#allocation27], 1 }
 0xf84   :  { %5381 = vsyncpa [#allocation27 + $0x1], 1 }
 0xf85   :  { %5382 = vsyncpa [#allocation30], 1 }
 0xf86   :  { %5383 = vsyncpa [#allocation33], 1 }
 0xf87   :  { %5384 = vsyncpa [#allocation36], 1 }
 0xf88   :  { %5385 = vsyncpa [#allocation39], 1 }
 0xf89   :  { %5386 = vsyncpa [#allocation42], 1 }

</bundles_post_ra>
